<compile_context>
chip_gen: v7x
topology: tpu7x:2x2x1
jax: 0.10.0
libtpu: 0.0.40
codegen_flags: <defaults>
</compile_context>

<pallas_src>
import functools

import jax
import jax.numpy as jnp
from jax.experimental import pallas as pl
from jax.experimental.pallas import tpu as pltpu


# --------------------------------------------------------------------------
# helpers
# --------------------------------------------------------------------------
def _round_up(x, m):
    return (x + m - 1) // m * m


def _silu(v):
    # exp -> EUP, approx reciprocal -> EUP; keeps VALU slots free.
    return v * pl.reciprocal(1.0 + jnp.exp(-v), approx=True)


# --------------------------------------------------------------------------
# Pallas kernels
# --------------------------------------------------------------------------
def _mm_kernel(*refs, n_k, fuse_silu, has_add):
    """Tiled matmul: o = a @ b + bias [+ add] [then SiLU], f32 accumulate."""
    if has_add:
        a_ref, b_ref, bias_ref, add_ref, o_ref, acc_ref = refs
    else:
        a_ref, b_ref, bias_ref, o_ref, acc_ref = refs
        add_ref = None

    k = pl.program_id(2)

    @pl.when(k == 0)
    def _init():
        acc_ref[...] = jnp.zeros_like(acc_ref)

    acc_ref[...] += jnp.dot(a_ref[...], b_ref[...],
                            preferred_element_type=jnp.float32)

    @pl.when(k == n_k - 1)
    def _finalize():
        y = acc_ref[...] + bias_ref[...]
        if has_add:
            y = y + add_ref[...]
        if fuse_silu:
            y = _silu(y)
        o_ref[...] = y


def matmul_bias(a, b, bias, add=None, fuse_silu=False):
    """(M,K) @ (K,N) + bias[N] (+ add[M,N]) (+ SiLU). bf16 MXU inputs, f32 out.

    Tiles are capped at 256 (fits comfortably inside v7x's 64 MiB VMEM with
    double-buffering; 256 also matches the v6e/v7x 256-wide MXU)."""
    M, K = a.shape
    Kb, N = b.shape
    assert K == Kb

    tm = 256 if M >= 256 else _round_up(M, 16)
    tn = 256 if N >= 256 else _round_up(N, 128)
    tk = 256 if K >= 256 else _round_up(K, 128)
    Mp, Np, Kp = _round_up(M, tm), _round_up(N, tn), _round_up(K, tk)
    n_k = Kp // tk

    a_p = jnp.pad(a.astype(jnp.bfloat16), ((0, Mp - M), (0, Kp - K)))
    b_p = jnp.pad(b.astype(jnp.bfloat16), ((0, Kp - K), (0, Np - N)))
    bias_p = jnp.pad(bias.astype(jnp.float32), (0, Np - N)).reshape(1, Np)

    inputs = [a_p, b_p, bias_p]
    in_specs = [
        pl.BlockSpec((tm, tk), lambda i, j, k: (i, k)),
        pl.BlockSpec((tk, tn), lambda i, j, k: (k, j)),
        pl.BlockSpec((1, tn), lambda i, j, k: (0, j)),
    ]
    if add is not None:
        add_p = jnp.pad(add.astype(jnp.float32), ((0, Mp - M), (0, Np - N)))
        inputs.append(add_p)
        in_specs.append(pl.BlockSpec((tm, tn), lambda i, j, k: (i, j)))

    out = pl.pallas_call(
        functools.partial(_mm_kernel, n_k=n_k, fuse_silu=fuse_silu,
                          has_add=add is not None),
        out_shape=jax.ShapeDtypeStruct((Mp, Np), jnp.float32),
        grid=(Mp // tm, Np // tn, n_k),
        in_specs=in_specs,
        out_specs=pl.BlockSpec((tm, tn), lambda i, j, k: (i, j)),
        scratch_shapes=[pltpu.VMEM((tm, tn), jnp.float32)],
        compiler_params=pltpu.CompilerParams(
            dimension_semantics=("parallel", "parallel", "arbitrary"),
            vmem_limit_bytes=32 * 1024 * 1024),
    )(*inputs)
    return out[:M, :N]


def _ln_silu_kernel(x_ref, w_ref, b_ref, o_ref, *, d_real):
    # LayerNorm over the last dim (padded cols are zero -> sums are exact with
    # the 1/d_real scaling; no mask needed), then SiLU.
    x = x_ref[...]
    inv_d = 1.0 / d_real
    mean = jnp.sum(x, axis=-1, keepdims=True) * inv_d
    ex2 = jnp.sum(x * x, axis=-1, keepdims=True) * inv_d
    var = ex2 - mean * mean
    inv = jax.lax.rsqrt(var + 1e-5)
    y = (x - mean) * inv * w_ref[...] + b_ref[...]
    o_ref[...] = _silu(y)


def layernorm_silu(x2d, w, b):
    """x2d: (M, D). LayerNorm over D with affine (w, b) then SiLU (f32)."""
    # TODO(synk): D is kept as one block (fine at these sizes); very large
    # feature maps would need a tiled two-pass reduction over D.
    M, D = x2d.shape
    Mp, Dp = _round_up(M, 8), _round_up(D, 128)
    x_p = jnp.pad(x2d.astype(jnp.float32), ((0, Mp - M), (0, Dp - D)))
    w_p = jnp.pad(w.astype(jnp.float32), (0, Dp - D)).reshape(1, Dp)
    b_p = jnp.pad(b.astype(jnp.float32), (0, Dp - D)).reshape(1, Dp)
    out = pl.pallas_call(
        functools.partial(_ln_silu_kernel, d_real=float(D)),
        out_shape=jax.ShapeDtypeStruct((Mp, Dp), jnp.float32),
        grid=(Mp // 8,),
        in_specs=[pl.BlockSpec((8, Dp), lambda i: (i, 0)),
                  pl.BlockSpec((1, Dp), lambda i: (0, 0)),
                  pl.BlockSpec((1, Dp), lambda i: (0, 0))],
        out_specs=pl.BlockSpec((8, Dp), lambda i: (i, 0)),
        compiler_params=pltpu.CompilerParams(
            dimension_semantics=("parallel",)),
    )(x_p, w_p, b_p)
    return out[:M, :D]


# --------------------------------------------------------------------------
# conv ops (NHWC im2col glue in XLA, matmul+epilogue in Pallas)
# --------------------------------------------------------------------------
def _im2col_nhwc(x, kh, kw, stride, pad):
    """x: (N,H,W,C) -> cols (N*Ho*Wo, kh*kw*C) in bf16 (channels lane-dense)."""
    x = x.astype(jnp.bfloat16)
    N, H, W, C = x.shape
    if pad > 0:
        x = jnp.pad(x, ((0, 0), (pad, pad), (pad, pad), (0, 0)))
    Ho = (H + 2 * pad - kh) // stride + 1
    Wo = (W + 2 * pad - kw) // stride + 1
    patches = [x[:, i:i + stride * Ho:stride, j:j + stride * Wo:stride, :]
               for i in range(kh) for j in range(kw)]
    cols = jnp.stack(patches, axis=3)            # (N, Ho, Wo, kh*kw, C)
    return cols.reshape(N * Ho * Wo, kh * kw * C), Ho, Wo


def conv2d(x, p, kh, kw, stride=1, pad=0, add=None, fuse_silu=False):
    """x: (N,H,W,C) NHWC; p['w']: pre-packed (kh*kw*C, O) bf16; p['b']: (O,)."""
    N, H, W, C = x.shape
    if kh == 1 and kw == 1 and stride == 1 and pad == 0:
        cols, Ho, Wo = x.reshape(N * H * W, C), H, W
    else:
        cols, Ho, Wo = _im2col_nhwc(x, kh, kw, stride, pad)
    out = matmul_bias(cols, p["w"], p["b"], add=add, fuse_silu=fuse_silu)
    return out.reshape(N, Ho, Wo, p["w"].shape[1])


def conv_transpose2d_2x2(x, p):
    """ConvTranspose2d k=2 s=2. x: (N,H,W,Ci); p['w']: (Ci, 4*Co) packed."""
    N, H, W, Ci = x.shape
    Co = p["w"].shape[1] // 4
    out = matmul_bias(x.reshape(N * H * W, Ci), p["w"], p["b"])   # (N*H*W, 4*Co)
    out = out.reshape(N, H, W, 2, 2, Co).transpose(0, 1, 3, 2, 4, 5)
    return out.reshape(N, 2 * H, 2 * W, Co)


# --------------------------------------------------------------------------
# parameter init (deterministic synthetic weights, pre-packed for the MXU)
# --------------------------------------------------------------------------
class KeyGen:
    def __init__(self, seed=0):
        self.key = jax.random.PRNGKey(seed)

    def __call__(self):
        self.key, sub = jax.random.split(self.key)
        return sub


def init_conv(kg, out_c, in_c, kh, kw):
    fan_in = in_c * kh * kw
    w = jax.random.normal(kg(), (out_c, in_c, kh, kw), jnp.float32) / jnp.sqrt(fan_in)
    b = jax.random.normal(kg(), (out_c,), jnp.float32) * 0.02
    # pack to (kh*kw*C, O) bf16, matching NHWC im2col column order (i, j, c).
    wm = jnp.transpose(w, (2, 3, 1, 0)).reshape(kh * kw * in_c, out_c)
    return {"w": wm.astype(jnp.bfloat16), "b": b}


def init_conv_t(kg, in_c, out_c, kh, kw):
    w = jax.random.normal(kg(), (in_c, out_c, kh, kw), jnp.float32) / jnp.sqrt(in_c * kh * kw)
    b = jax.random.normal(kg(), (out_c,), jnp.float32) * 0.02
    # pack to (Ci, kh*kw*Co) bf16; bias tiled per (i, j) tap.
    wm = jnp.transpose(w, (0, 2, 3, 1)).reshape(in_c, kh * kw * out_c)
    return {"w": wm.astype(jnp.bfloat16), "b": jnp.tile(b, kh * kw)}


def init_linear(kg, in_f, out_f):
    w = jax.random.normal(kg(), (out_f, in_f), jnp.float32) / jnp.sqrt(in_f)
    b = jax.random.normal(kg(), (out_f,), jnp.float32) * 0.02
    return {"w": w.T.astype(jnp.bfloat16), "b": b}   # pre-transposed (in, out)


def init_ln_flat(c, h, w):
    # PyTorch LayerNorm((C,H,W)) default init (weight=1, bias=0), stored already
    # permuted/flattened to the NHWC order (H,W,C).
    d = h * w * c
    return {"w": jnp.ones((d,), jnp.float32), "b": jnp.zeros((d,), jnp.float32)}


def make_pe_table(max_seq_len, d_model):
    assert d_model % 2 == 0
    i_seq = jnp.arange(max_seq_len, dtype=jnp.float32)
    j_seq = jnp.arange(0, d_model, 2, dtype=jnp.float32)
    arg = i_seq[:, None] / (10000.0 ** (j_seq[None, :] / d_model))
    pe = jnp.stack((jnp.sin(arg), jnp.cos(arg)), axis=2).reshape(max_seq_len, d_model)
    return pe


def init_res_block(kg, shape, in_c, out_c, time_c):
    C, H, W = shape
    p = {
        "ln1": init_ln_flat(C, H, W),
        "ln2": init_ln_flat(out_c, H, W),
        "conv1": init_conv(kg, out_c, in_c, 3, 3),
        "conv2": init_conv(kg, out_c, out_c, 3, 3),
        "time": init_linear(kg, time_c, out_c),
    }
    if in_c != out_c:
        p["res"] = init_conv(kg, out_c, in_c, 1, 1)
    return p


def init_unet(kg, n_steps, img_shape, channels, pe_dim):
    assert len(channels) >= 2
    C, H, W = img_shape
    layers = len(channels)
    Hs, Ws = [H], [W]
    cH, cW = H, W
    for _ in range(layers - 1):
        cH //= 2
        cW //= 2
        Hs.append(cH)
        Ws.append(cW)
    time_c = 4 * channels[0]

    params = {
        "pe_table": make_pe_table(n_steps, pe_dim),
        "pe_lin1": init_linear(kg, pe_dim, time_c),
        "pe_lin2": init_linear(kg, time_c, time_c),
        "encoders": [],
        "downs": [],
        "ups": [],
        "decoders": [],
    }

    prev = channels[0]
    for ch, eH, eW in zip(channels[:-1], Hs[:-1], Ws[:-1]):
        layer = []
        for idx in range(2):  # NUM_RES_BLOCK
            if idx == 0:
                layer.append(init_res_block(kg, (prev, eH, eW), prev, ch, time_c))
            else:
                layer.append(init_res_block(kg, (ch, eH, eW), ch, ch, time_c))
        params["encoders"].append(layer)
        params["downs"].append(init_conv(kg, ch, ch, 2, 2))
        prev = ch

    mH, mW = Hs[-1], Ws[-1]
    mch = channels[-1]
    params["mid"] = [
        init_res_block(kg, (prev, mH, mW), prev, mch, time_c),
        init_res_block(kg, (mch, mH, mW), mch, mch, time_c),
    ]
    prev = mch

    for ch, dH, dW in zip(channels[-2::-1], Hs[-2::-1], Ws[-2::-1]):
        params["ups"].append(init_conv_t(kg, prev, ch, 2, 2))
        layer = [init_res_block(kg, (2 * ch, dH, dW), 2 * ch, ch, time_c)
                 for _ in range(2)]
        params["decoders"].append(layer)
        prev = ch

    params["conv_in"] = init_conv(kg, channels[0], C, 3, 3)
    params["conv_out"] = init_conv(kg, C, prev, 3, 3)
    return params


# --------------------------------------------------------------------------
# forward pass (NHWC internally, NCHW at the module boundary)
# --------------------------------------------------------------------------
def res_block_forward(p, x, pe_act, final_silu=False):
    N, H, W, C = x.shape
    Co = p["conv1"]["w"].shape[1]

    # norm1 + SiLU over the whole (H,W,C) slab per sample (LayerNorm((C,H,W))).
    h = layernorm_silu(x.reshape(N, H * W * C),
                       p["ln1"]["w"], p["ln1"]["b"]).reshape(N, H, W, C)

    # time embedding: silu(pe) is hoisted into pe_act; project, broadcast over HW,
    # and fuse the add into conv1's epilogue.
    t_proj = matmul_bias(pe_act, p["time"]["w"], p["time"]["b"])     # (N, Co)
    t_add = jnp.repeat(t_proj, H * W, axis=0)                        # (N*H*W, Co)
    out = conv2d(h, p["conv1"], 3, 3, stride=1, pad=1, add=t_add)    # (N,H,W,Co)

    # norm2 + SiLU
    out = layernorm_silu(out.reshape(N, H * W * Co),
                         p["ln2"]["w"], p["ln2"]["b"]).reshape(N, H, W, Co)

    # residual branch, fused as an epilogue add of conv2 (+ optional final SiLU).
    if "res" in p:
        res = matmul_bias(x.reshape(N * H * W, C), p["res"]["w"], p["res"]["b"])
    else:
        res = x.reshape(N * H * W, C)
    out = conv2d(out, p["conv2"], 3, 3, stride=1, pad=1,
                 add=res.reshape(N, H, W, Co).reshape(N * H * W, Co) if False else res,
                 fuse_silu=final_silu)
    return out


def unet_forward(params, x_nchw, t):
    x = jnp.transpose(x_nchw, (0, 2, 3, 1))                          # NCHW -> NHWC

    # positional encoding MLP; SiLU activations fused into the matmul epilogues.
    pe_emb = params["pe_table"][t]                                   # (N, pe_dim)
    h = matmul_bias(pe_emb, params["pe_lin1"]["w"], params["pe_lin1"]["b"],
                    fuse_silu=True)
    # pe_act == silu(pe_linears(pe)); every ResBlock consumes silu(pe), so the
    # activation is hoisted here (identical semantics).
    pe_act = matmul_bias(h, params["pe_lin2"]["w"], params["pe_lin2"]["b"],
                         fuse_silu=True)

    x = conv2d(x, params["conv_in"], 3, 3, stride=1, pad=1)

    encoder_outs = []
    for enc_layer, down in zip(params["encoders"], params["downs"]):
        tmp = []
        for rb in enc_layer:
            x = res_block_forward(rb, x, pe_act)
            tmp.append(x)
        encoder_outs.append(list(reversed(tmp)))
        x = conv2d(x, down, 2, 2, stride=2, pad=0)

    # mid (with_attn=False -> attention block is Identity, so two ResBlocks)
    x = res_block_forward(params["mid"][0], x, pe_act)
    x = res_block_forward(params["mid"][1], x, pe_act)

    n_dec = len(params["decoders"])
    for li, (dec_layer, up, enc_out) in enumerate(
            zip(params["decoders"], params["ups"], encoder_outs[::-1])):
        x = conv_transpose2d_2x2(x, up)
        pad_x = enc_out[0].shape[1] - x.shape[1]     # torch dim 2 (H)
        pad_y = enc_out[0].shape[2] - x.shape[2]     # torch dim 3 (W)
        # F.pad(x, (pad_x//2, ..., pad_y//2, ...)): first pair pads W, second H.
        x = jnp.pad(x, ((0, 0),
                        (pad_y // 2, pad_y - pad_y // 2),
                        (pad_x // 2, pad_x - pad_x // 2),
                        (0, 0)))
        for bi, rb in enumerate(dec_layer):
            x = jnp.concatenate((enc_out[bi], x), axis=-1)
            is_last = (li == n_dec - 1) and (bi == len(dec_layer) - 1)
            # the final SiLU before conv_out is fused into the last block's conv2.
            x = res_block_forward(rb, x, pe_act, final_silu=is_last)

    x = conv2d(x, params["conv_out"], 3, 3, stride=1, pad=1)
    return jnp.transpose(x, (0, 3, 1, 2))                            # NHWC -> NCHW


# --------------------------------------------------------------------------
# main
# --------------------------------------------------------------------------
if __name__ == "__main__":
    n_steps = 32
    img_shape = (3, 16, 16)     # (C, H, W); H,W divisible by 2^(levels-1)
    channels = [8, 16, 32]      # 3 UNet levels
    pe_dim = 8                  # must be even
    batch = 2

    kg = KeyGen(seed=0)
    params = init_unet(kg, n_steps, img_shape, channels, pe_dim)

    key = jax.random.PRNGKey(0)
    kx, kt = jax.random.split(key)
    x = jax.random.normal(kx, (batch,) + img_shape, jnp.float32)
    t = jax.random.randint(kt, (batch,), 0, n_steps)

    fwd = jax.jit(unet_forward)
    out = fwd(params, x, t)
    out = jax.block_until_ready(out)
    assert out.shape == (batch,) + img_shape, out.shape
    assert bool(jnp.all(jnp.isfinite(out)))
    # TODO(synk): SelfAttentionBlock is not exercised (default with_attns=False -> nn.Identity).
    print("KERNEL_OK")
</pallas_src>

<mosaic_0001>
module attributes {stable_mosaic.version = 11 : i64} {
  func.func @_mm_kernel(%arg0: i32, %arg1: i32, %arg2: i32, %arg3: memref<256x128xbf16, #tpu.memory_space<vmem>>, %arg4: memref<128x128xbf16, #tpu.memory_space<vmem>>, %arg5: memref<1x128xf32, #tpu.memory_space<vmem>>, %arg6: memref<256x128xf32, #tpu.memory_space<vmem>>, %arg7: memref<256x128xf32, #tpu.memory_space<vmem>>) attributes {dimension_semantics = [#tpu.dimension_semantics<parallel>, #tpu.dimension_semantics<parallel>, #tpu.dimension_semantics<arbitrary>], iteration_bounds = array<i64: 2, 1, 1>, scalar_prefetch = 0 : i64, scratch_operands = 1 : i64, tpu.core_type = #tpu.core_type<tc>, window_params = [{transform_indices = @transform_0, window_bounds = array<i64: 256, 128>}, {transform_indices = @transform_1, window_bounds = array<i64: 128, 128>}, {transform_indices = @transform_2, window_bounds = array<i64: 1, 128>}, {transform_indices = @transform_3, window_bounds = array<i64: 256, 128>}]} {
    %c0_i32 = arith.constant 0 : i32
    %0 = arith.cmpi eq, %arg2, %c0_i32 : i32
    %1 = arith.extui %0 : i1 to i32
    %c0_i32_0 = arith.constant 0 : i32
    %2 = arith.cmpi ne, %1, %c0_i32_0 : i32
    scf.if %2 {
      %cst_10 = arith.constant 0.000000e+00 : f32
      %12 = vector.broadcast %cst_10 : f32 to vector<256x128xf32>
      %c0_11 = arith.constant 0 : index
      %c0_12 = arith.constant 0 : index
      %13 = vector.load %arg7[%c0_11, %c0_12] : memref<256x128xf32, #tpu.memory_space<vmem>>, vector<256x128xf32>
      tpu.vector_store %arg7[%c0_11, %c0_12], %12 {strides = array<i32>} : memref<256x128xf32, #tpu.memory_space<vmem>>, vector<256x128xf32>,
    } else {
    }
    %c0 = arith.constant 0 : index
    %c0_1 = arith.constant 0 : index
    %3 = vector.load %arg7[%c0, %c0_1] : memref<256x128xf32, #tpu.memory_space<vmem>>, vector<256x128xf32>
    %c0_2 = arith.constant 0 : index
    %c0_3 = arith.constant 0 : index
    %4 = vector.load %arg3[%c0_2, %c0_3] : memref<256x128xbf16, #tpu.memory_space<vmem>>, vector<256x128xbf16>
    %c0_4 = arith.constant 0 : index
    %c0_5 = arith.constant 0 : index
    %5 = vector.load %arg4[%c0_4, %c0_5] : memref<128x128xbf16, #tpu.memory_space<vmem>>, vector<128x128xbf16>
    %cst = arith.constant dense<0.000000e+00> : vector<256x128xf32>
    %6 = tpu.matmul %4, %5, %cst {dimension_numbers = #tpu.dot_dimension_numbers<[1], [0], [0], [1], [0, 0, 1, 1], [], []>} : vector<256x128xbf16>, vector<128x128xbf16>, vector<256x128xf32> -> vector<256x128xf32>
    %7 = arith.addf %3, %6 : vector<256x128xf32>
    %c0_6 = arith.constant 0 : index
    %c0_7 = arith.constant 0 : index
    %8 = vector.load %arg7[%c0_6, %c0_7] : memref<256x128xf32, #tpu.memory_space<vmem>>, vector<256x128xf32>
    tpu.vector_store %arg7[%c0_6, %c0_7], %7 {strides = array<i32>} : memref<256x128xf32, #tpu.memory_space<vmem>>, vector<256x128xf32>,
    %c0_i32_8 = arith.constant 0 : i32
    %9 = arith.cmpi eq, %arg2, %c0_i32_8 : i32
    %10 = arith.extui %9 : i1 to i32
    %c0_i32_9 = arith.constant 0 : i32
    %11 = arith.cmpi ne, %10, %c0_i32_9 : i32
    scf.if %11 {
      %c0_10 = arith.constant 0 : index
      %c0_11 = arith.constant 0 : index
      %12 = vector.load %arg7[%c0_10, %c0_11] : memref<256x128xf32, #tpu.memory_space<vmem>>, vector<256x128xf32>
      %c0_12 = arith.constant 0 : index
      %c0_13 = arith.constant 0 : index
      %13 = vector.load %arg5[%c0_12, %c0_13] : memref<1x128xf32, #tpu.memory_space<vmem>>, vector<1x128xf32>
      %14 = vector.broadcast %13 : vector<1x128xf32> to vector<256x128xf32>
      %15 = arith.addf %12, %14 : vector<256x128xf32>
      %c0_14 = arith.constant 0 : index
      %c0_15 = arith.constant 0 : index
      %16 = vector.load %arg6[%c0_14, %c0_15] : memref<256x128xf32, #tpu.memory_space<vmem>>, vector<256x128xf32>
      tpu.vector_store %arg6[%c0_14, %c0_15], %15 {strides = array<i32>} : memref<256x128xf32, #tpu.memory_space<vmem>>, vector<256x128xf32>,
    } else {
    }
    return
  }
  func.func @transform_0(%arg0: i32, %arg1: i32, %arg2: i32) -> (i32, i32) {
    %c0_i32 = arith.constant 0 : i32
    return %arg0, %arg2 : i32, i32
  }
  func.func @transform_1(%arg0: i32, %arg1: i32, %arg2: i32) -> (i32, i32) {
    %c0_i32 = arith.constant 0 : i32
    return %arg2, %arg1 : i32, i32
  }
  func.func @transform_2(%arg0: i32, %arg1: i32, %arg2: i32) -> (i32, i32) {
    %c0_i32 = arith.constant 0 : i32
    %c0_i32_0 = arith.constant 0 : i32
    return %c0_i32, %arg1 : i32, i32
  }
  func.func @transform_3(%arg0: i32, %arg1: i32, %arg2: i32) -> (i32, i32) {
    %c0_i32 = arith.constant 0 : i32
    return %arg0, %arg1 : i32, i32
  }
}

module attributes {stable_mosaic.version = 11 : i64} {
  func.func @_ln_silu_kernel(%arg0: i32, %arg1: memref<8x2048xf32, #tpu.memory_space<vmem>>, %arg2: memref<1x2048xf32, #tpu.memory_space<vmem>>, %arg3: memref<1x2048xf32, #tpu.memory_space<vmem>>, %arg4: memref<8x2048xf32, #tpu.memory_space<vmem>>) attributes {dimension_semantics = [#tpu.dimension_semantics<parallel>], iteration_bounds = array<i64: 1>, scalar_prefetch = 0 : i64, scratch_operands = 0 : i64, tpu.core_type = #tpu.core_type<tc>, window_params = [{transform_indices = @transform_0, window_bounds = array<i64: 8, 2048>}, {pipeline_mode = #tpu.pipeline_mode<synchronous>, transform_indices = @transform_1, window_bounds = array<i64: 1, 2048>}, {pipeline_mode = #tpu.pipeline_mode<synchronous>, transform_indices = @transform_2, window_bounds = array<i64: 1, 2048>}, {transform_indices = @transform_3, window_bounds = array<i64: 8, 2048>}]} {
    %c0 = arith.constant 0 : index
    %c0_0 = arith.constant 0 : index
    %0 = vector.load %arg1[%c0, %c0_0] : memref<8x2048xf32, #tpu.memory_space<vmem>>, vector<8x2048xf32>
    %cst = arith.constant dense<0.000000e+00> : vector<8xf32>
    %1 = vector.multi_reduction <add>, %0, %cst [1] : vector<8x2048xf32> to vector<8xf32>
    %2 = vector.shape_cast %1 : vector<8xf32> to vector<8x1xf32>
    %cst_1 = arith.constant 4.8828125E-4 : f32
    %3 = vector.broadcast %cst_1 : f32 to vector<8x1xf32>
    %4 = arith.mulf %2, %3 : vector<8x1xf32>
    %5 = arith.mulf %0, %0 : vector<8x2048xf32>
    %cst_2 = arith.constant dense<0.000000e+00> : vector<8xf32>
    %6 = vector.multi_reduction <add>, %5, %cst_2 [1] : vector<8x2048xf32> to vector<8xf32>
    %7 = vector.shape_cast %6 : vector<8xf32> to vector<8x1xf32>
    %cst_3 = arith.constant 4.8828125E-4 : f32
    %8 = vector.broadcast %cst_3 : f32 to vector<8x1xf32>
    %9 = arith.mulf %7, %8 : vector<8x1xf32>
    %10 = arith.mulf %4, %4 : vector<8x1xf32>
    %11 = arith.subf %9, %10 : vector<8x1xf32>
    %cst_4 = arith.constant 9.99999974E-6 : f32
    %12 = vector.broadcast %cst_4 : f32 to vector<8x1xf32>
    %13 = arith.addf %11, %12 : vector<8x1xf32>
    %14 = math.rsqrt %13 : vector<8x1xf32>
    %15 = vector.broadcast %4 : vector<8x1xf32> to vector<8x2048xf32>
    %16 = arith.subf %0, %15 : vector<8x2048xf32>
    %17 = vector.broadcast %14 : vector<8x1xf32> to vector<8x2048xf32>
    %18 = arith.mulf %16, %17 : vector<8x2048xf32>
    %c0_5 = arith.constant 0 : index
    %c0_6 = arith.constant 0 : index
    %19 = vector.load %arg2[%c0_5, %c0_6] : memref<1x2048xf32, #tpu.memory_space<vmem>>, vector<1x2048xf32>
    %20 = vector.broadcast %19 : vector<1x2048xf32> to vector<8x2048xf32>
    %21 = arith.mulf %18, %20 : vector<8x2048xf32>
    %c0_7 = arith.constant 0 : index
    %c0_8 = arith.constant 0 : index
    %22 = vector.load %arg3[%c0_7, %c0_8] : memref<1x2048xf32, #tpu.memory_space<vmem>>, vector<1x2048xf32>
    %23 = vector.broadcast %22 : vector<1x2048xf32> to vector<8x2048xf32>
    %24 = arith.addf %21, %23 : vector<8x2048xf32>
    %cst_9 = arith.constant 0.000000e+00 : f32
    %25 = vector.broadcast %cst_9 : f32 to vector<8x2048xf32>
    %26 = arith.subf %25, %24 : vector<8x2048xf32>
    %27 = math.exp %26 : vector<8x2048xf32>
    %cst_10 = arith.constant 1.000000e+00 : f32
    %28 = vector.broadcast %cst_10 : f32 to vector<8x2048xf32>
    %29 = arith.addf %28, %27 : vector<8x2048xf32>
    %30 = tpu.reciprocal %29 {approx = true} : vector<8x2048xf32> -> vector<8x2048xf32>
    %31 = arith.mulf %24, %30 : vector<8x2048xf32>
    %c0_11 = arith.constant 0 : index
    %c0_12 = arith.constant 0 : index
    %32 = vector.load %arg4[%c0_11, %c0_12] : memref<8x2048xf32, #tpu.memory_space<vmem>>, vector<8x2048xf32>
    tpu.vector_store %arg4[%c0_11, %c0_12], %31 {strides = array<i32>} : memref<8x2048xf32, #tpu.memory_space<vmem>>, vector<8x2048xf32>,
    return
  }
  func.func @transform_0(%arg0: i32) -> (i32, i32) {
    %c0_i32 = arith.constant 0 : i32
    %c0_i32_0 = arith.constant 0 : i32
    return %arg0, %c0_i32 : i32, i32
  }
  func.func @transform_1(%arg0: i32) -> (i32, i32) {
    %c0_i32 = arith.constant 0 : i32
    %c0_i32_0 = arith.constant 0 : i32
    %c0_i32_1 = arith.constant 0 : i32
    return %c0_i32, %c0_i32_0 : i32, i32
  }
  func.func @transform_2(%arg0: i32) -> (i32, i32) {
    %c0_i32 = arith.constant 0 : i32
    %c0_i32_0 = arith.constant 0 : i32
    %c0_i32_1 = arith.constant 0 : i32
    return %c0_i32, %c0_i32_0 : i32, i32
  }
  func.func @transform_3(%arg0: i32) -> (i32, i32) {
    %c0_i32 = arith.constant 0 : i32
    %c0_i32_0 = arith.constant 0 : i32
    return %arg0, %c0_i32 : i32, i32
  }
}

module attributes {stable_mosaic.version = 11 : i64} {
  func.func @_mm_kernel(%arg0: i32, %arg1: i32, %arg2: i32, %arg3: memref<16x128xbf16, #tpu.memory_space<vmem>>, %arg4: memref<128x128xbf16, #tpu.memory_space<vmem>>, %arg5: memref<1x128xf32, #tpu.memory_space<vmem>>, %arg6: memref<16x128xf32, #tpu.memory_space<vmem>>, %arg7: memref<16x128xf32, #tpu.memory_space<vmem>>) attributes {dimension_semantics = [#tpu.dimension_semantics<parallel>, #tpu.dimension_semantics<parallel>, #tpu.dimension_semantics<arbitrary>], iteration_bounds = array<i64: 1, 1, 1>, scalar_prefetch = 0 : i64, scratch_operands = 1 : i64, tpu.core_type = #tpu.core_type<tc>, window_params = [{transform_indices = @transform_0, window_bounds = array<i64: 16, 128>}, {transform_indices = @transform_1, window_bounds = array<i64: 128, 128>}, {transform_indices = @transform_2, window_bounds = array<i64: 1, 128>}, {transform_indices = @transform_3, window_bounds = array<i64: 16, 128>}]} {
    %c0_i32 = arith.constant 0 : i32
    %0 = arith.cmpi eq, %arg2, %c0_i32 : i32
    %1 = arith.extui %0 : i1 to i32
    %c0_i32_0 = arith.constant 0 : i32
    %2 = arith.cmpi ne, %1, %c0_i32_0 : i32
    scf.if %2 {
      %cst_10 = arith.constant 0.000000e+00 : f32
      %12 = vector.broadcast %cst_10 : f32 to vector<16x128xf32>
      %c0_11 = arith.constant 0 : index
      %c0_12 = arith.constant 0 : index
      %13 = vector.load %arg7[%c0_11, %c0_12] : memref<16x128xf32, #tpu.memory_space<vmem>>, vector<16x128xf32>
      tpu.vector_store %arg7[%c0_11, %c0_12], %12 {strides = array<i32>} : memref<16x128xf32, #tpu.memory_space<vmem>>, vector<16x128xf32>,
    } else {
    }
    %c0 = arith.constant 0 : index
    %c0_1 = arith.constant 0 : index
    %3 = vector.load %arg7[%c0, %c0_1] : memref<16x128xf32, #tpu.memory_space<vmem>>, vector<16x128xf32>
    %c0_2 = arith.constant 0 : index
    %c0_3 = arith.constant 0 : index
    %4 = vector.load %arg3[%c0_2, %c0_3] : memref<16x128xbf16, #tpu.memory_space<vmem>>, vector<16x128xbf16>
    %c0_4 = arith.constant 0 : index
    %c0_5 = arith.constant 0 : index
    %5 = vector.load %arg4[%c0_4, %c0_5] : memref<128x128xbf16, #tpu.memory_space<vmem>>, vector<128x128xbf16>
    %cst = arith.constant dense<0.000000e+00> : vector<16x128xf32>
    %6 = tpu.matmul %4, %5, %cst {dimension_numbers = #tpu.dot_dimension_numbers<[1], [0], [0], [1], [0, 0, 1, 1], [], []>} : vector<16x128xbf16>, vector<128x128xbf16>, vector<16x128xf32> -> vector<16x128xf32>
    %7 = arith.addf %3, %6 : vector<16x128xf32>
    %c0_6 = arith.constant 0 : index
    %c0_7 = arith.constant 0 : index
    %8 = vector.load %arg7[%c0_6, %c0_7] : memref<16x128xf32, #tpu.memory_space<vmem>>, vector<16x128xf32>
    tpu.vector_store %arg7[%c0_6, %c0_7], %7 {strides = array<i32>} : memref<16x128xf32, #tpu.memory_space<vmem>>, vector<16x128xf32>,
    %c0_i32_8 = arith.constant 0 : i32
    %9 = arith.cmpi eq, %arg2, %c0_i32_8 : i32
    %10 = arith.extui %9 : i1 to i32
    %c0_i32_9 = arith.constant 0 : i32
    %11 = arith.cmpi ne, %10, %c0_i32_9 : i32
    scf.if %11 {
      %c0_10 = arith.constant 0 : index
      %c0_11 = arith.constant 0 : index
      %12 = vector.load %arg7[%c0_10, %c0_11] : memref<16x128xf32, #tpu.memory_space<vmem>>, vector<16x128xf32>
      %c0_12 = arith.constant 0 : index
      %c0_13 = arith.constant 0 : index
      %13 = vector.load %arg5[%c0_12, %c0_13] : memref<1x128xf32, #tpu.memory_space<vmem>>, vector<1x128xf32>
      %14 = vector.broadcast %13 : vector<1x128xf32> to vector<16x128xf32>
      %15 = arith.addf %12, %14 : vector<16x128xf32>
      %cst_14 = arith.constant 0.000000e+00 : f32
      %16 = vector.broadcast %cst_14 : f32 to vector<16x128xf32>
      %17 = arith.subf %16, %15 : vector<16x128xf32>
      %18 = math.exp %17 : vector<16x128xf32>
      %cst_15 = arith.constant 1.000000e+00 : f32
      %19 = vector.broadcast %cst_15 : f32 to vector<16x128xf32>
      %20 = arith.addf %19, %18 : vector<16x128xf32>
      %21 = tpu.reciprocal %20 {approx = true} : vector<16x128xf32> -> vector<16x128xf32>
      %22 = arith.mulf %15, %21 : vector<16x128xf32>
      %c0_16 = arith.constant 0 : index
      %c0_17 = arith.constant 0 : index
      %23 = vector.load %arg6[%c0_16, %c0_17] : memref<16x128xf32, #tpu.memory_space<vmem>>, vector<16x128xf32>
      tpu.vector_store %arg6[%c0_16, %c0_17], %22 {strides = array<i32>} : memref<16x128xf32, #tpu.memory_space<vmem>>, vector<16x128xf32>,
    } else {
    }
    return
  }
  func.func @transform_0(%arg0: i32, %arg1: i32, %arg2: i32) -> (i32, i32) {
    %c0_i32 = arith.constant 0 : i32
    return %arg0, %arg2 : i32, i32
  }
  func.func @transform_1(%arg0: i32, %arg1: i32, %arg2: i32) -> (i32, i32) {
    %c0_i32 = arith.constant 0 : i32
    return %arg2, %arg1 : i32, i32
  }
  func.func @transform_2(%arg0: i32, %arg1: i32, %arg2: i32) -> (i32, i32) {
    %c0_i32 = arith.constant 0 : i32
    %c0_i32_0 = arith.constant 0 : i32
    return %c0_i32, %arg1 : i32, i32
  }
  func.func @transform_3(%arg0: i32, %arg1: i32, %arg2: i32) -> (i32, i32) {
    %c0_i32 = arith.constant 0 : i32
    return %arg0, %arg1 : i32, i32
  }
}

module attributes {stable_mosaic.version = 11 : i64} {
  func.func @_mm_kernel(%arg0: i32, %arg1: i32, %arg2: i32, %arg3: memref<16x128xbf16, #tpu.memory_space<vmem>>, %arg4: memref<128x128xbf16, #tpu.memory_space<vmem>>, %arg5: memref<1x128xf32, #tpu.memory_space<vmem>>, %arg6: memref<16x128xf32, #tpu.memory_space<vmem>>, %arg7: memref<16x128xf32, #tpu.memory_space<vmem>>) attributes {dimension_semantics = [#tpu.dimension_semantics<parallel>, #tpu.dimension_semantics<parallel>, #tpu.dimension_semantics<arbitrary>], iteration_bounds = array<i64: 1, 1, 1>, scalar_prefetch = 0 : i64, scratch_operands = 1 : i64, tpu.core_type = #tpu.core_type<tc>, window_params = [{transform_indices = @transform_0, window_bounds = array<i64: 16, 128>}, {transform_indices = @transform_1, window_bounds = array<i64: 128, 128>}, {transform_indices = @transform_2, window_bounds = array<i64: 1, 128>}, {transform_indices = @transform_3, window_bounds = array<i64: 16, 128>}]} {
    %c0_i32 = arith.constant 0 : i32
    %0 = arith.cmpi eq, %arg2, %c0_i32 : i32
    %1 = arith.extui %0 : i1 to i32
    %c0_i32_0 = arith.constant 0 : i32
    %2 = arith.cmpi ne, %1, %c0_i32_0 : i32
    scf.if %2 {
      %cst_10 = arith.constant 0.000000e+00 : f32
      %12 = vector.broadcast %cst_10 : f32 to vector<16x128xf32>
      %c0_11 = arith.constant 0 : index
      %c0_12 = arith.constant 0 : index
      %13 = vector.load %arg7[%c0_11, %c0_12] : memref<16x128xf32, #tpu.memory_space<vmem>>, vector<16x128xf32>
      tpu.vector_store %arg7[%c0_11, %c0_12], %12 {strides = array<i32>} : memref<16x128xf32, #tpu.memory_space<vmem>>, vector<16x128xf32>,
    } else {
    }
    %c0 = arith.constant 0 : index
    %c0_1 = arith.constant 0 : index
    %3 = vector.load %arg7[%c0, %c0_1] : memref<16x128xf32, #tpu.memory_space<vmem>>, vector<16x128xf32>
    %c0_2 = arith.constant 0 : index
    %c0_3 = arith.constant 0 : index
    %4 = vector.load %arg3[%c0_2, %c0_3] : memref<16x128xbf16, #tpu.memory_space<vmem>>, vector<16x128xbf16>
    %c0_4 = arith.constant 0 : index
    %c0_5 = arith.constant 0 : index
    %5 = vector.load %arg4[%c0_4, %c0_5] : memref<128x128xbf16, #tpu.memory_space<vmem>>, vector<128x128xbf16>
    %cst = arith.constant dense<0.000000e+00> : vector<16x128xf32>
    %6 = tpu.matmul %4, %5, %cst {dimension_numbers = #tpu.dot_dimension_numbers<[1], [0], [0], [1], [0, 0, 1, 1], [], []>} : vector<16x128xbf16>, vector<128x128xbf16>, vector<16x128xf32> -> vector<16x128xf32>
    %7 = arith.addf %3, %6 : vector<16x128xf32>
    %c0_6 = arith.constant 0 : index
    %c0_7 = arith.constant 0 : index
    %8 = vector.load %arg7[%c0_6, %c0_7] : memref<16x128xf32, #tpu.memory_space<vmem>>, vector<16x128xf32>
    tpu.vector_store %arg7[%c0_6, %c0_7], %7 {strides = array<i32>} : memref<16x128xf32, #tpu.memory_space<vmem>>, vector<16x128xf32>,
    %c0_i32_8 = arith.constant 0 : i32
    %9 = arith.cmpi eq, %arg2, %c0_i32_8 : i32
    %10 = arith.extui %9 : i1 to i32
    %c0_i32_9 = arith.constant 0 : i32
    %11 = arith.cmpi ne, %10, %c0_i32_9 : i32
    scf.if %11 {
      %c0_10 = arith.constant 0 : index
      %c0_11 = arith.constant 0 : index
      %12 = vector.load %arg7[%c0_10, %c0_11] : memref<16x128xf32, #tpu.memory_space<vmem>>, vector<16x128xf32>
      %c0_12 = arith.constant 0 : index
      %c0_13 = arith.constant 0 : index
      %13 = vector.load %arg5[%c0_12, %c0_13] : memref<1x128xf32, #tpu.memory_space<vmem>>, vector<1x128xf32>
      %14 = vector.broadcast %13 : vector<1x128xf32> to vector<16x128xf32>
      %15 = arith.addf %12, %14 : vector<16x128xf32>
      %c0_14 = arith.constant 0 : index
      %c0_15 = arith.constant 0 : index
      %16 = vector.load %arg6[%c0_14, %c0_15] : memref<16x128xf32, #tpu.memory_space<vmem>>, vector<16x128xf32>
      tpu.vector_store %arg6[%c0_14, %c0_15], %15 {strides = array<i32>} : memref<16x128xf32, #tpu.memory_space<vmem>>, vector<16x128xf32>,
    } else {
    }
    return
  }
  func.func @transform_0(%arg0: i32, %arg1: i32, %arg2: i32) -> (i32, i32) {
    %c0_i32 = arith.constant 0 : i32
    return %arg0, %arg2 : i32, i32
  }
  func.func @transform_1(%arg0: i32, %arg1: i32, %arg2: i32) -> (i32, i32) {
    %c0_i32 = arith.constant 0 : i32
    return %arg2, %arg1 : i32, i32
  }
  func.func @transform_2(%arg0: i32, %arg1: i32, %arg2: i32) -> (i32, i32) {
    %c0_i32 = arith.constant 0 : i32
    %c0_i32_0 = arith.constant 0 : i32
    return %c0_i32, %arg1 : i32, i32
  }
  func.func @transform_3(%arg0: i32, %arg1: i32, %arg2: i32) -> (i32, i32) {
    %c0_i32 = arith.constant 0 : i32
    return %arg0, %arg1 : i32, i32
  }
}

module attributes {stable_mosaic.version = 11 : i64} {
  func.func @_mm_kernel(%arg0: i32, %arg1: i32, %arg2: i32, %arg3: memref<256x128xbf16, #tpu.memory_space<vmem>>, %arg4: memref<128x128xbf16, #tpu.memory_space<vmem>>, %arg5: memref<1x128xf32, #tpu.memory_space<vmem>>, %arg6: memref<256x128xf32, #tpu.memory_space<vmem>>, %arg7: memref<256x128xf32, #tpu.memory_space<vmem>>, %arg8: memref<256x128xf32, #tpu.memory_space<vmem>>) attributes {dimension_semantics = [#tpu.dimension_semantics<parallel>, #tpu.dimension_semantics<parallel>, #tpu.dimension_semantics<arbitrary>], iteration_bounds = array<i64: 2, 1, 1>, scalar_prefetch = 0 : i64, scratch_operands = 1 : i64, tpu.core_type = #tpu.core_type<tc>, window_params = [{transform_indices = @transform_0, window_bounds = array<i64: 256, 128>}, {transform_indices = @transform_1, window_bounds = array<i64: 128, 128>}, {transform_indices = @transform_2, window_bounds = array<i64: 1, 128>}, {transform_indices = @transform_3, window_bounds = array<i64: 256, 128>}, {transform_indices = @transform_4, window_bounds = array<i64: 256, 128>}]} {
    %c0_i32 = arith.constant 0 : i32
    %0 = arith.cmpi eq, %arg2, %c0_i32 : i32
    %1 = arith.extui %0 : i1 to i32
    %c0_i32_0 = arith.constant 0 : i32
    %2 = arith.cmpi ne, %1, %c0_i32_0 : i32
    scf.if %2 {
      %cst_10 = arith.constant 0.000000e+00 : f32
      %12 = vector.broadcast %cst_10 : f32 to vector<256x128xf32>
      %c0_11 = arith.constant 0 : index
      %c0_12 = arith.constant 0 : index
      %13 = vector.load %arg8[%c0_11, %c0_12] : memref<256x128xf32, #tpu.memory_space<vmem>>, vector<256x128xf32>
      tpu.vector_store %arg8[%c0_11, %c0_12], %12 {strides = array<i32>} : memref<256x128xf32, #tpu.memory_space<vmem>>, vector<256x128xf32>,
    } else {
    }
    %c0 = arith.constant 0 : index
    %c0_1 = arith.constant 0 : index
    %3 = vector.load %arg8[%c0, %c0_1] : memref<256x128xf32, #tpu.memory_space<vmem>>, vector<256x128xf32>
    %c0_2 = arith.constant 0 : index
    %c0_3 = arith.constant 0 : index
    %4 = vector.load %arg3[%c0_2, %c0_3] : memref<256x128xbf16, #tpu.memory_space<vmem>>, vector<256x128xbf16>
    %c0_4 = arith.constant 0 : index
    %c0_5 = arith.constant 0 : index
    %5 = vector.load %arg4[%c0_4, %c0_5] : memref<128x128xbf16, #tpu.memory_space<vmem>>, vector<128x128xbf16>
    %cst = arith.constant dense<0.000000e+00> : vector<256x128xf32>
    %6 = tpu.matmul %4, %5, %cst {dimension_numbers = #tpu.dot_dimension_numbers<[1], [0], [0], [1], [0, 0, 1, 1], [], []>} : vector<256x128xbf16>, vector<128x128xbf16>, vector<256x128xf32> -> vector<256x128xf32>
    %7 = arith.addf %3, %6 : vector<256x128xf32>
    %c0_6 = arith.constant 0 : index
    %c0_7 = arith.constant 0 : index
    %8 = vector.load %arg8[%c0_6, %c0_7] : memref<256x128xf32, #tpu.memory_space<vmem>>, vector<256x128xf32>
    tpu.vector_store %arg8[%c0_6, %c0_7], %7 {strides = array<i32>} : memref<256x128xf32, #tpu.memory_space<vmem>>, vector<256x128xf32>,
    %c0_i32_8 = arith.constant 0 : i32
    %9 = arith.cmpi eq, %arg2, %c0_i32_8 : i32
    %10 = arith.extui %9 : i1 to i32
    %c0_i32_9 = arith.constant 0 : i32
    %11 = arith.cmpi ne, %10, %c0_i32_9 : i32
    scf.if %11 {
      %c0_10 = arith.constant 0 : index
      %c0_11 = arith.constant 0 : index
      %12 = vector.load %arg8[%c0_10, %c0_11] : memref<256x128xf32, #tpu.memory_space<vmem>>, vector<256x128xf32>
      %c0_12 = arith.constant 0 : index
      %c0_13 = arith.constant 0 : index
      %13 = vector.load %arg5[%c0_12, %c0_13] : memref<1x128xf32, #tpu.memory_space<vmem>>, vector<1x128xf32>
      %14 = vector.broadcast %13 : vector<1x128xf32> to vector<256x128xf32>
      %15 = arith.addf %12, %14 : vector<256x128xf32>
      %c0_14 = arith.constant 0 : index
      %c0_15 = arith.constant 0 : index
      %16 = vector.load %arg6[%c0_14, %c0_15] : memref<256x128xf32, #tpu.memory_space<vmem>>, vector<256x128xf32>
      %17 = arith.addf %15, %16 : vector<256x128xf32>
      %c0_16 = arith.constant 0 : index
      %c0_17 = arith.constant 0 : index
      %18 = vector.load %arg7[%c0_16, %c0_17] : memref<256x128xf32, #tpu.memory_space<vmem>>, vector<256x128xf32>
      tpu.vector_store %arg7[%c0_16, %c0_17], %17 {strides = array<i32>} : memref<256x128xf32, #tpu.memory_space<vmem>>, vector<256x128xf32>,
    } else {
    }
    return
  }
  func.func @transform_0(%arg0: i32, %arg1: i32, %arg2: i32) -> (i32, i32) {
    %c0_i32 = arith.constant 0 : i32
    return %arg0, %arg2 : i32, i32
  }
  func.func @transform_1(%arg0: i32, %arg1: i32, %arg2: i32) -> (i32, i32) {
    %c0_i32 = arith.constant 0 : i32
    return %arg2, %arg1 : i32, i32
  }
  func.func @transform_2(%arg0: i32, %arg1: i32, %arg2: i32) -> (i32, i32) {
    %c0_i32 = arith.constant 0 : i32
    %c0_i32_0 = arith.constant 0 : i32
    return %c0_i32, %arg1 : i32, i32
  }
  func.func @transform_3(%arg0: i32, %arg1: i32, %arg2: i32) -> (i32, i32) {
    %c0_i32 = arith.constant 0 : i32
    return %arg0, %arg1 : i32, i32
  }
  func.func @transform_4(%arg0: i32, %arg1: i32, %arg2: i32) -> (i32, i32) {
    %c0_i32 = arith.constant 0 : i32
    return %arg0, %arg1 : i32, i32
  }
}

module attributes {stable_mosaic.version = 11 : i64} {
  func.func @_mm_kernel(%arg0: i32, %arg1: i32, %arg2: i32, %arg3: memref<128x128xbf16, #tpu.memory_space<vmem>>, %arg4: memref<128x128xbf16, #tpu.memory_space<vmem>>, %arg5: memref<1x128xf32, #tpu.memory_space<vmem>>, %arg6: memref<128x128xf32, #tpu.memory_space<vmem>>, %arg7: memref<128x128xf32, #tpu.memory_space<vmem>>) attributes {dimension_semantics = [#tpu.dimension_semantics<parallel>, #tpu.dimension_semantics<parallel>, #tpu.dimension_semantics<arbitrary>], iteration_bounds = array<i64: 1, 1, 1>, scalar_prefetch = 0 : i64, scratch_operands = 1 : i64, tpu.core_type = #tpu.core_type<tc>, window_params = [{transform_indices = @transform_0, window_bounds = array<i64: 128, 128>}, {transform_indices = @transform_1, window_bounds = array<i64: 128, 128>}, {transform_indices = @transform_2, window_bounds = array<i64: 1, 128>}, {transform_indices = @transform_3, window_bounds = array<i64: 128, 128>}]} {
    %c0_i32 = arith.constant 0 : i32
    %0 = arith.cmpi eq, %arg2, %c0_i32 : i32
    %1 = arith.extui %0 : i1 to i32
    %c0_i32_0 = arith.constant 0 : i32
    %2 = arith.cmpi ne, %1, %c0_i32_0 : i32
    scf.if %2 {
      %cst_10 = arith.constant 0.000000e+00 : f32
      %12 = vector.broadcast %cst_10 : f32 to vector<128x128xf32>
      %c0_11 = arith.constant 0 : index
      %c0_12 = arith.constant 0 : index
      %13 = vector.load %arg7[%c0_11, %c0_12] : memref<128x128xf32, #tpu.memory_space<vmem>>, vector<128x128xf32>
      tpu.vector_store %arg7[%c0_11, %c0_12], %12 {strides = array<i32>} : memref<128x128xf32, #tpu.memory_space<vmem>>, vector<128x128xf32>,
    } else {
    }
    %c0 = arith.constant 0 : index
    %c0_1 = arith.constant 0 : index
    %3 = vector.load %arg7[%c0, %c0_1] : memref<128x128xf32, #tpu.memory_space<vmem>>, vector<128x128xf32>
    %c0_2 = arith.constant 0 : index
    %c0_3 = arith.constant 0 : index
    %4 = vector.load %arg3[%c0_2, %c0_3] : memref<128x128xbf16, #tpu.memory_space<vmem>>, vector<128x128xbf16>
    %c0_4 = arith.constant 0 : index
    %c0_5 = arith.constant 0 : index
    %5 = vector.load %arg4[%c0_4, %c0_5] : memref<128x128xbf16, #tpu.memory_space<vmem>>, vector<128x128xbf16>
    %cst = arith.constant dense<0.000000e+00> : vector<128x128xf32>
    %6 = tpu.matmul %4, %5, %cst {dimension_numbers = #tpu.dot_dimension_numbers<[1], [0], [0], [1], [0, 0, 1, 1], [], []>} : vector<128x128xbf16>, vector<128x128xbf16>, vector<128x128xf32> -> vector<128x128xf32>
    %7 = arith.addf %3, %6 : vector<128x128xf32>
    %c0_6 = arith.constant 0 : index
    %c0_7 = arith.constant 0 : index
    %8 = vector.load %arg7[%c0_6, %c0_7] : memref<128x128xf32, #tpu.memory_space<vmem>>, vector<128x128xf32>
    tpu.vector_store %arg7[%c0_6, %c0_7], %7 {strides = array<i32>} : memref<128x128xf32, #tpu.memory_space<vmem>>, vector<128x128xf32>,
    %c0_i32_8 = arith.constant 0 : i32
    %9 = arith.cmpi eq, %arg2, %c0_i32_8 : i32
    %10 = arith.extui %9 : i1 to i32
    %c0_i32_9 = arith.constant 0 : i32
    %11 = arith.cmpi ne, %10, %c0_i32_9 : i32
    scf.if %11 {
      %c0_10 = arith.constant 0 : index
      %c0_11 = arith.constant 0 : index
      %12 = vector.load %arg7[%c0_10, %c0_11] : memref<128x128xf32, #tpu.memory_space<vmem>>, vector<128x128xf32>
      %c0_12 = arith.constant 0 : index
      %c0_13 = arith.constant 0 : index
      %13 = vector.load %arg5[%c0_12, %c0_13] : memref<1x128xf32, #tpu.memory_space<vmem>>, vector<1x128xf32>
      %14 = vector.broadcast %13 : vector<1x128xf32> to vector<128x128xf32>
      %15 = arith.addf %12, %14 : vector<128x128xf32>
      %c0_14 = arith.constant 0 : index
      %c0_15 = arith.constant 0 : index
      %16 = vector.load %arg6[%c0_14, %c0_15] : memref<128x128xf32, #tpu.memory_space<vmem>>, vector<128x128xf32>
      tpu.vector_store %arg6[%c0_14, %c0_15], %15 {strides = array<i32>} : memref<128x128xf32, #tpu.memory_space<vmem>>, vector<128x128xf32>,
    } else {
    }
    return
  }
  func.func @transform_0(%arg0: i32, %arg1: i32, %arg2: i32) -> (i32, i32) {
    %c0_i32 = arith.constant 0 : i32
    return %arg0, %arg2 : i32, i32
  }
  func.func @transform_1(%arg0: i32, %arg1: i32, %arg2: i32) -> (i32, i32) {
    %c0_i32 = arith.constant 0 : i32
    return %arg2, %arg1 : i32, i32
  }
  func.func @transform_2(%arg0: i32, %arg1: i32, %arg2: i32) -> (i32, i32) {
    %c0_i32 = arith.constant 0 : i32
    %c0_i32_0 = arith.constant 0 : i32
    return %c0_i32, %arg1 : i32, i32
  }
  func.func @transform_3(%arg0: i32, %arg1: i32, %arg2: i32) -> (i32, i32) {
    %c0_i32 = arith.constant 0 : i32
    return %arg0, %arg1 : i32, i32
  }
}

module attributes {stable_mosaic.version = 11 : i64} {
  func.func @_ln_silu_kernel(%arg0: i32, %arg1: memref<8x512xf32, #tpu.memory_space<vmem>>, %arg2: memref<1x512xf32, #tpu.memory_space<vmem>>, %arg3: memref<1x512xf32, #tpu.memory_space<vmem>>, %arg4: memref<8x512xf32, #tpu.memory_space<vmem>>) attributes {dimension_semantics = [#tpu.dimension_semantics<parallel>], iteration_bounds = array<i64: 1>, scalar_prefetch = 0 : i64, scratch_operands = 0 : i64, tpu.core_type = #tpu.core_type<tc>, window_params = [{transform_indices = @transform_0, window_bounds = array<i64: 8, 512>}, {pipeline_mode = #tpu.pipeline_mode<synchronous>, transform_indices = @transform_1, window_bounds = array<i64: 1, 512>}, {pipeline_mode = #tpu.pipeline_mode<synchronous>, transform_indices = @transform_2, window_bounds = array<i64: 1, 512>}, {transform_indices = @transform_3, window_bounds = array<i64: 8, 512>}]} {
    %c0 = arith.constant 0 : index
    %c0_0 = arith.constant 0 : index
    %0 = vector.load %arg1[%c0, %c0_0] : memref<8x512xf32, #tpu.memory_space<vmem>>, vector<8x512xf32>
    %cst = arith.constant dense<0.000000e+00> : vector<8xf32>
    %1 = vector.multi_reduction <add>, %0, %cst [1] : vector<8x512xf32> to vector<8xf32>
    %2 = vector.shape_cast %1 : vector<8xf32> to vector<8x1xf32>
    %cst_1 = arith.constant 0.001953125 : f32
    %3 = vector.broadcast %cst_1 : f32 to vector<8x1xf32>
    %4 = arith.mulf %2, %3 : vector<8x1xf32>
    %5 = arith.mulf %0, %0 : vector<8x512xf32>
    %cst_2 = arith.constant dense<0.000000e+00> : vector<8xf32>
    %6 = vector.multi_reduction <add>, %5, %cst_2 [1] : vector<8x512xf32> to vector<8xf32>
    %7 = vector.shape_cast %6 : vector<8xf32> to vector<8x1xf32>
    %cst_3 = arith.constant 0.001953125 : f32
    %8 = vector.broadcast %cst_3 : f32 to vector<8x1xf32>
    %9 = arith.mulf %7, %8 : vector<8x1xf32>
    %10 = arith.mulf %4, %4 : vector<8x1xf32>
    %11 = arith.subf %9, %10 : vector<8x1xf32>
    %cst_4 = arith.constant 9.99999974E-6 : f32
    %12 = vector.broadcast %cst_4 : f32 to vector<8x1xf32>
    %13 = arith.addf %11, %12 : vector<8x1xf32>
    %14 = math.rsqrt %13 : vector<8x1xf32>
    %15 = vector.broadcast %4 : vector<8x1xf32> to vector<8x512xf32>
    %16 = arith.subf %0, %15 : vector<8x512xf32>
    %17 = vector.broadcast %14 : vector<8x1xf32> to vector<8x512xf32>
    %18 = arith.mulf %16, %17 : vector<8x512xf32>
    %c0_5 = arith.constant 0 : index
    %c0_6 = arith.constant 0 : index
    %19 = vector.load %arg2[%c0_5, %c0_6] : memref<1x512xf32, #tpu.memory_space<vmem>>, vector<1x512xf32>
    %20 = vector.broadcast %19 : vector<1x512xf32> to vector<8x512xf32>
    %21 = arith.mulf %18, %20 : vector<8x512xf32>
    %c0_7 = arith.constant 0 : index
    %c0_8 = arith.constant 0 : index
    %22 = vector.load %arg3[%c0_7, %c0_8] : memref<1x512xf32, #tpu.memory_space<vmem>>, vector<1x512xf32>
    %23 = vector.broadcast %22 : vector<1x512xf32> to vector<8x512xf32>
    %24 = arith.addf %21, %23 : vector<8x512xf32>
    %cst_9 = arith.constant 0.000000e+00 : f32
    %25 = vector.broadcast %cst_9 : f32 to vector<8x512xf32>
    %26 = arith.subf %25, %24 : vector<8x512xf32>
    %27 = math.exp %26 : vector<8x512xf32>
    %cst_10 = arith.constant 1.000000e+00 : f32
    %28 = vector.broadcast %cst_10 : f32 to vector<8x512xf32>
    %29 = arith.addf %28, %27 : vector<8x512xf32>
    %30 = tpu.reciprocal %29 {approx = true} : vector<8x512xf32> -> vector<8x512xf32>
    %31 = arith.mulf %24, %30 : vector<8x512xf32>
    %c0_11 = arith.constant 0 : index
    %c0_12 = arith.constant 0 : index
    %32 = vector.load %arg4[%c0_11, %c0_12] : memref<8x512xf32, #tpu.memory_space<vmem>>, vector<8x512xf32>
    tpu.vector_store %arg4[%c0_11, %c0_12], %31 {strides = array<i32>} : memref<8x512xf32, #tpu.memory_space<vmem>>, vector<8x512xf32>,
    return
  }
  func.func @transform_0(%arg0: i32) -> (i32, i32) {
    %c0_i32 = arith.constant 0 : i32
    %c0_i32_0 = arith.constant 0 : i32
    return %arg0, %c0_i32 : i32, i32
  }
  func.func @transform_1(%arg0: i32) -> (i32, i32) {
    %c0_i32 = arith.constant 0 : i32
    %c0_i32_0 = arith.constant 0 : i32
    %c0_i32_1 = arith.constant 0 : i32
    return %c0_i32, %c0_i32_0 : i32, i32
  }
  func.func @transform_2(%arg0: i32) -> (i32, i32) {
    %c0_i32 = arith.constant 0 : i32
    %c0_i32_0 = arith.constant 0 : i32
    %c0_i32_1 = arith.constant 0 : i32
    return %c0_i32, %c0_i32_0 : i32, i32
  }
  func.func @transform_3(%arg0: i32) -> (i32, i32) {
    %c0_i32 = arith.constant 0 : i32
    %c0_i32_0 = arith.constant 0 : i32
    return %arg0, %c0_i32 : i32, i32
  }
}

module attributes {stable_mosaic.version = 11 : i64} {
  func.func @_mm_kernel(%arg0: i32, %arg1: i32, %arg2: i32, %arg3: memref<128x128xbf16, #tpu.memory_space<vmem>>, %arg4: memref<128x128xbf16, #tpu.memory_space<vmem>>, %arg5: memref<1x128xf32, #tpu.memory_space<vmem>>, %arg6: memref<128x128xf32, #tpu.memory_space<vmem>>, %arg7: memref<128x128xf32, #tpu.memory_space<vmem>>, %arg8: memref<128x128xf32, #tpu.memory_space<vmem>>) attributes {dimension_semantics = [#tpu.dimension_semantics<parallel>, #tpu.dimension_semantics<parallel>, #tpu.dimension_semantics<arbitrary>], iteration_bounds = array<i64: 1, 1, 1>, scalar_prefetch = 0 : i64, scratch_operands = 1 : i64, tpu.core_type = #tpu.core_type<tc>, window_params = [{transform_indices = @transform_0, window_bounds = array<i64: 128, 128>}, {transform_indices = @transform_1, window_bounds = array<i64: 128, 128>}, {transform_indices = @transform_2, window_bounds = array<i64: 1, 128>}, {transform_indices = @transform_3, window_bounds = array<i64: 128, 128>}, {transform_indices = @transform_4, window_bounds = array<i64: 128, 128>}]} {
    %c0_i32 = arith.constant 0 : i32
    %0 = arith.cmpi eq, %arg2, %c0_i32 : i32
    %1 = arith.extui %0 : i1 to i32
    %c0_i32_0 = arith.constant 0 : i32
    %2 = arith.cmpi ne, %1, %c0_i32_0 : i32
    scf.if %2 {
      %cst_10 = arith.constant 0.000000e+00 : f32
      %12 = vector.broadcast %cst_10 : f32 to vector<128x128xf32>
      %c0_11 = arith.constant 0 : index
      %c0_12 = arith.constant 0 : index
      %13 = vector.load %arg8[%c0_11, %c0_12] : memref<128x128xf32, #tpu.memory_space<vmem>>, vector<128x128xf32>
      tpu.vector_store %arg8[%c0_11, %c0_12], %12 {strides = array<i32>} : memref<128x128xf32, #tpu.memory_space<vmem>>, vector<128x128xf32>,
    } else {
    }
    %c0 = arith.constant 0 : index
    %c0_1 = arith.constant 0 : index
    %3 = vector.load %arg8[%c0, %c0_1] : memref<128x128xf32, #tpu.memory_space<vmem>>, vector<128x128xf32>
    %c0_2 = arith.constant 0 : index
    %c0_3 = arith.constant 0 : index
    %4 = vector.load %arg3[%c0_2, %c0_3] : memref<128x128xbf16, #tpu.memory_space<vmem>>, vector<128x128xbf16>
    %c0_4 = arith.constant 0 : index
    %c0_5 = arith.constant 0 : index
    %5 = vector.load %arg4[%c0_4, %c0_5] : memref<128x128xbf16, #tpu.memory_space<vmem>>, vector<128x128xbf16>
    %cst = arith.constant dense<0.000000e+00> : vector<128x128xf32>
    %6 = tpu.matmul %4, %5, %cst {dimension_numbers = #tpu.dot_dimension_numbers<[1], [0], [0], [1], [0, 0, 1, 1], [], []>} : vector<128x128xbf16>, vector<128x128xbf16>, vector<128x128xf32> -> vector<128x128xf32>
    %7 = arith.addf %3, %6 : vector<128x128xf32>
    %c0_6 = arith.constant 0 : index
    %c0_7 = arith.constant 0 : index
    %8 = vector.load %arg8[%c0_6, %c0_7] : memref<128x128xf32, #tpu.memory_space<vmem>>, vector<128x128xf32>
    tpu.vector_store %arg8[%c0_6, %c0_7], %7 {strides = array<i32>} : memref<128x128xf32, #tpu.memory_space<vmem>>, vector<128x128xf32>,
    %c0_i32_8 = arith.constant 0 : i32
    %9 = arith.cmpi eq, %arg2, %c0_i32_8 : i32
    %10 = arith.extui %9 : i1 to i32
    %c0_i32_9 = arith.constant 0 : i32
    %11 = arith.cmpi ne, %10, %c0_i32_9 : i32
    scf.if %11 {
      %c0_10 = arith.constant 0 : index
      %c0_11 = arith.constant 0 : index
      %12 = vector.load %arg8[%c0_10, %c0_11] : memref<128x128xf32, #tpu.memory_space<vmem>>, vector<128x128xf32>
      %c0_12 = arith.constant 0 : index
      %c0_13 = arith.constant 0 : index
      %13 = vector.load %arg5[%c0_12, %c0_13] : memref<1x128xf32, #tpu.memory_space<vmem>>, vector<1x128xf32>
      %14 = vector.broadcast %13 : vector<1x128xf32> to vector<128x128xf32>
      %15 = arith.addf %12, %14 : vector<128x128xf32>
      %c0_14 = arith.constant 0 : index
      %c0_15 = arith.constant 0 : index
      %16 = vector.load %arg6[%c0_14, %c0_15] : memref<128x128xf32, #tpu.memory_space<vmem>>, vector<128x128xf32>
      %17 = arith.addf %15, %16 : vector<128x128xf32>
      %c0_16 = arith.constant 0 : index
      %c0_17 = arith.constant 0 : index
      %18 = vector.load %arg7[%c0_16, %c0_17] : memref<128x128xf32, #tpu.memory_space<vmem>>, vector<128x128xf32>
      tpu.vector_store %arg7[%c0_16, %c0_17], %17 {strides = array<i32>} : memref<128x128xf32, #tpu.memory_space<vmem>>, vector<128x128xf32>,
    } else {
    }
    return
  }
  func.func @transform_0(%arg0: i32, %arg1: i32, %arg2: i32) -> (i32, i32) {
    %c0_i32 = arith.constant 0 : i32
    return %arg0, %arg2 : i32, i32
  }
  func.func @transform_1(%arg0: i32, %arg1: i32, %arg2: i32) -> (i32, i32) {
    %c0_i32 = arith.constant 0 : i32
    return %arg2, %arg1 : i32, i32
  }
  func.func @transform_2(%arg0: i32, %arg1: i32, %arg2: i32) -> (i32, i32) {
    %c0_i32 = arith.constant 0 : i32
    %c0_i32_0 = arith.constant 0 : i32
    return %c0_i32, %arg1 : i32, i32
  }
  func.func @transform_3(%arg0: i32, %arg1: i32, %arg2: i32) -> (i32, i32) {
    %c0_i32 = arith.constant 0 : i32
    return %arg0, %arg1 : i32, i32
  }
  func.func @transform_4(%arg0: i32, %arg1: i32, %arg2: i32) -> (i32, i32) {
    %c0_i32 = arith.constant 0 : i32
    return %arg0, %arg1 : i32, i32
  }
}

module attributes {stable_mosaic.version = 11 : i64} {
  func.func @_ln_silu_kernel(%arg0: i32, %arg1: memref<8x1024xf32, #tpu.memory_space<vmem>>, %arg2: memref<1x1024xf32, #tpu.memory_space<vmem>>, %arg3: memref<1x1024xf32, #tpu.memory_space<vmem>>, %arg4: memref<8x1024xf32, #tpu.memory_space<vmem>>) attributes {dimension_semantics = [#tpu.dimension_semantics<parallel>], iteration_bounds = array<i64: 1>, scalar_prefetch = 0 : i64, scratch_operands = 0 : i64, tpu.core_type = #tpu.core_type<tc>, window_params = [{transform_indices = @transform_0, window_bounds = array<i64: 8, 1024>}, {pipeline_mode = #tpu.pipeline_mode<synchronous>, transform_indices = @transform_1, window_bounds = array<i64: 1, 1024>}, {pipeline_mode = #tpu.pipeline_mode<synchronous>, transform_indices = @transform_2, window_bounds = array<i64: 1, 1024>}, {transform_indices = @transform_3, window_bounds = array<i64: 8, 1024>}]} {
    %c0 = arith.constant 0 : index
    %c0_0 = arith.constant 0 : index
    %0 = vector.load %arg1[%c0, %c0_0] : memref<8x1024xf32, #tpu.memory_space<vmem>>, vector<8x1024xf32>
    %cst = arith.constant dense<0.000000e+00> : vector<8xf32>
    %1 = vector.multi_reduction <add>, %0, %cst [1] : vector<8x1024xf32> to vector<8xf32>
    %2 = vector.shape_cast %1 : vector<8xf32> to vector<8x1xf32>
    %cst_1 = arith.constant 9.765625E-4 : f32
    %3 = vector.broadcast %cst_1 : f32 to vector<8x1xf32>
    %4 = arith.mulf %2, %3 : vector<8x1xf32>
    %5 = arith.mulf %0, %0 : vector<8x1024xf32>
    %cst_2 = arith.constant dense<0.000000e+00> : vector<8xf32>
    %6 = vector.multi_reduction <add>, %5, %cst_2 [1] : vector<8x1024xf32> to vector<8xf32>
    %7 = vector.shape_cast %6 : vector<8xf32> to vector<8x1xf32>
    %cst_3 = arith.constant 9.765625E-4 : f32
    %8 = vector.broadcast %cst_3 : f32 to vector<8x1xf32>
    %9 = arith.mulf %7, %8 : vector<8x1xf32>
    %10 = arith.mulf %4, %4 : vector<8x1xf32>
    %11 = arith.subf %9, %10 : vector<8x1xf32>
    %cst_4 = arith.constant 9.99999974E-6 : f32
    %12 = vector.broadcast %cst_4 : f32 to vector<8x1xf32>
    %13 = arith.addf %11, %12 : vector<8x1xf32>
    %14 = math.rsqrt %13 : vector<8x1xf32>
    %15 = vector.broadcast %4 : vector<8x1xf32> to vector<8x1024xf32>
    %16 = arith.subf %0, %15 : vector<8x1024xf32>
    %17 = vector.broadcast %14 : vector<8x1xf32> to vector<8x1024xf32>
    %18 = arith.mulf %16, %17 : vector<8x1024xf32>
    %c0_5 = arith.constant 0 : index
    %c0_6 = arith.constant 0 : index
    %19 = vector.load %arg2[%c0_5, %c0_6] : memref<1x1024xf32, #tpu.memory_space<vmem>>, vector<1x1024xf32>
    %20 = vector.broadcast %19 : vector<1x1024xf32> to vector<8x1024xf32>
    %21 = arith.mulf %18, %20 : vector<8x1024xf32>
    %c0_7 = arith.constant 0 : index
    %c0_8 = arith.constant 0 : index
    %22 = vector.load %arg3[%c0_7, %c0_8] : memref<1x1024xf32, #tpu.memory_space<vmem>>, vector<1x1024xf32>
    %23 = vector.broadcast %22 : vector<1x1024xf32> to vector<8x1024xf32>
    %24 = arith.addf %21, %23 : vector<8x1024xf32>
    %cst_9 = arith.constant 0.000000e+00 : f32
    %25 = vector.broadcast %cst_9 : f32 to vector<8x1024xf32>
    %26 = arith.subf %25, %24 : vector<8x1024xf32>
    %27 = math.exp %26 : vector<8x1024xf32>
    %cst_10 = arith.constant 1.000000e+00 : f32
    %28 = vector.broadcast %cst_10 : f32 to vector<8x1024xf32>
    %29 = arith.addf %28, %27 : vector<8x1024xf32>
    %30 = tpu.reciprocal %29 {approx = true} : vector<8x1024xf32> -> vector<8x1024xf32>
    %31 = arith.mulf %24, %30 : vector<8x1024xf32>
    %c0_11 = arith.constant 0 : index
    %c0_12 = arith.constant 0 : index
    %32 = vector.load %arg4[%c0_11, %c0_12] : memref<8x1024xf32, #tpu.memory_space<vmem>>, vector<8x1024xf32>
    tpu.vector_store %arg4[%c0_11, %c0_12], %31 {strides = array<i32>} : memref<8x1024xf32, #tpu.memory_space<vmem>>, vector<8x1024xf32>,
    return
  }
  func.func @transform_0(%arg0: i32) -> (i32, i32) {
    %c0_i32 = arith.constant 0 : i32
    %c0_i32_0 = arith.constant 0 : i32
    return %arg0, %c0_i32 : i32, i32
  }
  func.func @transform_1(%arg0: i32) -> (i32, i32) {
    %c0_i32 = arith.constant 0 : i32
    %c0_i32_0 = arith.constant 0 : i32
    %c0_i32_1 = arith.constant 0 : i32
    return %c0_i32, %c0_i32_0 : i32, i32
  }
  func.func @transform_2(%arg0: i32) -> (i32, i32) {
    %c0_i32 = arith.constant 0 : i32
    %c0_i32_0 = arith.constant 0 : i32
    %c0_i32_1 = arith.constant 0 : i32
    return %c0_i32, %c0_i32_0 : i32, i32
  }
  func.func @transform_3(%arg0: i32) -> (i32, i32) {
    %c0_i32 = arith.constant 0 : i32
    %c0_i32_0 = arith.constant 0 : i32
    return %arg0, %c0_i32 : i32, i32
  }
}

module attributes {stable_mosaic.version = 11 : i64} {
  func.func @_mm_kernel(%arg0: i32, %arg1: i32, %arg2: i32, %arg3: memref<128x256xbf16, #tpu.memory_space<vmem>>, %arg4: memref<256x128xbf16, #tpu.memory_space<vmem>>, %arg5: memref<1x128xf32, #tpu.memory_space<vmem>>, %arg6: memref<128x128xf32, #tpu.memory_space<vmem>>, %arg7: memref<128x128xf32, #tpu.memory_space<vmem>>, %arg8: memref<128x128xf32, #tpu.memory_space<vmem>>) attributes {dimension_semantics = [#tpu.dimension_semantics<parallel>, #tpu.dimension_semantics<parallel>, #tpu.dimension_semantics<arbitrary>], iteration_bounds = array<i64: 1, 1, 1>, scalar_prefetch = 0 : i64, scratch_operands = 1 : i64, tpu.core_type = #tpu.core_type<tc>, window_params = [{transform_indices = @transform_0, window_bounds = array<i64: 128, 256>}, {transform_indices = @transform_1, window_bounds = array<i64: 256, 128>}, {transform_indices = @transform_2, window_bounds = array<i64: 1, 128>}, {transform_indices = @transform_3, window_bounds = array<i64: 128, 128>}, {transform_indices = @transform_4, window_bounds = array<i64: 128, 128>}]} {
    %c0_i32 = arith.constant 0 : i32
    %0 = arith.cmpi eq, %arg2, %c0_i32 : i32
    %1 = arith.extui %0 : i1 to i32
    %c0_i32_0 = arith.constant 0 : i32
    %2 = arith.cmpi ne, %1, %c0_i32_0 : i32
    scf.if %2 {
      %cst_10 = arith.constant 0.000000e+00 : f32
      %12 = vector.broadcast %cst_10 : f32 to vector<128x128xf32>
      %c0_11 = arith.constant 0 : index
      %c0_12 = arith.constant 0 : index
      %13 = vector.load %arg8[%c0_11, %c0_12] : memref<128x128xf32, #tpu.memory_space<vmem>>, vector<128x128xf32>
      tpu.vector_store %arg8[%c0_11, %c0_12], %12 {strides = array<i32>} : memref<128x128xf32, #tpu.memory_space<vmem>>, vector<128x128xf32>,
    } else {
    }
    %c0 = arith.constant 0 : index
    %c0_1 = arith.constant 0 : index
    %3 = vector.load %arg8[%c0, %c0_1] : memref<128x128xf32, #tpu.memory_space<vmem>>, vector<128x128xf32>
    %c0_2 = arith.constant 0 : index
    %c0_3 = arith.constant 0 : index
    %4 = vector.load %arg3[%c0_2, %c0_3] : memref<128x256xbf16, #tpu.memory_space<vmem>>, vector<128x256xbf16>
    %c0_4 = arith.constant 0 : index
    %c0_5 = arith.constant 0 : index
    %5 = vector.load %arg4[%c0_4, %c0_5] : memref<256x128xbf16, #tpu.memory_space<vmem>>, vector<256x128xbf16>
    %cst = arith.constant dense<0.000000e+00> : vector<128x128xf32>
    %6 = tpu.matmul %4, %5, %cst {dimension_numbers = #tpu.dot_dimension_numbers<[1], [0], [0], [1], [0, 0, 1, 1], [], []>} : vector<128x256xbf16>, vector<256x128xbf16>, vector<128x128xf32> -> vector<128x128xf32>
    %7 = arith.addf %3, %6 : vector<128x128xf32>
    %c0_6 = arith.constant 0 : index
    %c0_7 = arith.constant 0 : index
    %8 = vector.load %arg8[%c0_6, %c0_7] : memref<128x128xf32, #tpu.memory_space<vmem>>, vector<128x128xf32>
    tpu.vector_store %arg8[%c0_6, %c0_7], %7 {strides = array<i32>} : memref<128x128xf32, #tpu.memory_space<vmem>>, vector<128x128xf32>,
    %c0_i32_8 = arith.constant 0 : i32
    %9 = arith.cmpi eq, %arg2, %c0_i32_8 : i32
    %10 = arith.extui %9 : i1 to i32
    %c0_i32_9 = arith.constant 0 : i32
    %11 = arith.cmpi ne, %10, %c0_i32_9 : i32
    scf.if %11 {
      %c0_10 = arith.constant 0 : index
      %c0_11 = arith.constant 0 : index
      %12 = vector.load %arg8[%c0_10, %c0_11] : memref<128x128xf32, #tpu.memory_space<vmem>>, vector<128x128xf32>
      %c0_12 = arith.constant 0 : index
      %c0_13 = arith.constant 0 : index
      %13 = vector.load %arg5[%c0_12, %c0_13] : memref<1x128xf32, #tpu.memory_space<vmem>>, vector<1x128xf32>
      %14 = vector.broadcast %13 : vector<1x128xf32> to vector<128x128xf32>
      %15 = arith.addf %12, %14 : vector<128x128xf32>
      %c0_14 = arith.constant 0 : index
      %c0_15 = arith.constant 0 : index
      %16 = vector.load %arg6[%c0_14, %c0_15] : memref<128x128xf32, #tpu.memory_space<vmem>>, vector<128x128xf32>
      %17 = arith.addf %15, %16 : vector<128x128xf32>
      %c0_16 = arith.constant 0 : index
      %c0_17 = arith.constant 0 : index
      %18 = vector.load %arg7[%c0_16, %c0_17] : memref<128x128xf32, #tpu.memory_space<vmem>>, vector<128x128xf32>
      tpu.vector_store %arg7[%c0_16, %c0_17], %17 {strides = array<i32>} : memref<128x128xf32, #tpu.memory_space<vmem>>, vector<128x128xf32>,
    } else {
    }
    return
  }
  func.func @transform_0(%arg0: i32, %arg1: i32, %arg2: i32) -> (i32, i32) {
    %c0_i32 = arith.constant 0 : i32
    return %arg0, %arg2 : i32, i32
  }
  func.func @transform_1(%arg0: i32, %arg1: i32, %arg2: i32) -> (i32, i32) {
    %c0_i32 = arith.constant 0 : i32
    return %arg2, %arg1 : i32, i32
  }
  func.func @transform_2(%arg0: i32, %arg1: i32, %arg2: i32) -> (i32, i32) {
    %c0_i32 = arith.constant 0 : i32
    %c0_i32_0 = arith.constant 0 : i32
    return %c0_i32, %arg1 : i32, i32
  }
  func.func @transform_3(%arg0: i32, %arg1: i32, %arg2: i32) -> (i32, i32) {
    %c0_i32 = arith.constant 0 : i32
    return %arg0, %arg1 : i32, i32
  }
  func.func @transform_4(%arg0: i32, %arg1: i32, %arg2: i32) -> (i32, i32) {
    %c0_i32 = arith.constant 0 : i32
    return %arg0, %arg1 : i32, i32
  }
}

module attributes {stable_mosaic.version = 11 : i64} {
  func.func @_mm_kernel(%arg0: i32, %arg1: i32, %arg2: i32, %arg3: memref<32x128xbf16, #tpu.memory_space<vmem>>, %arg4: memref<128x128xbf16, #tpu.memory_space<vmem>>, %arg5: memref<1x128xf32, #tpu.memory_space<vmem>>, %arg6: memref<32x128xf32, #tpu.memory_space<vmem>>, %arg7: memref<32x128xf32, #tpu.memory_space<vmem>>) attributes {dimension_semantics = [#tpu.dimension_semantics<parallel>, #tpu.dimension_semantics<parallel>, #tpu.dimension_semantics<arbitrary>], iteration_bounds = array<i64: 1, 1, 1>, scalar_prefetch = 0 : i64, scratch_operands = 1 : i64, tpu.core_type = #tpu.core_type<tc>, window_params = [{transform_indices = @transform_0, window_bounds = array<i64: 32, 128>}, {transform_indices = @transform_1, window_bounds = array<i64: 128, 128>}, {transform_indices = @transform_2, window_bounds = array<i64: 1, 128>}, {transform_indices = @transform_3, window_bounds = array<i64: 32, 128>}]} {
    %c0_i32 = arith.constant 0 : i32
    %0 = arith.cmpi eq, %arg2, %c0_i32 : i32
    %1 = arith.extui %0 : i1 to i32
    %c0_i32_0 = arith.constant 0 : i32
    %2 = arith.cmpi ne, %1, %c0_i32_0 : i32
    scf.if %2 {
      %cst_10 = arith.constant 0.000000e+00 : f32
      %12 = vector.broadcast %cst_10 : f32 to vector<32x128xf32>
      %c0_11 = arith.constant 0 : index
      %c0_12 = arith.constant 0 : index
      %13 = vector.load %arg7[%c0_11, %c0_12] : memref<32x128xf32, #tpu.memory_space<vmem>>, vector<32x128xf32>
      tpu.vector_store %arg7[%c0_11, %c0_12], %12 {strides = array<i32>} : memref<32x128xf32, #tpu.memory_space<vmem>>, vector<32x128xf32>,
    } else {
    }
    %c0 = arith.constant 0 : index
    %c0_1 = arith.constant 0 : index
    %3 = vector.load %arg7[%c0, %c0_1] : memref<32x128xf32, #tpu.memory_space<vmem>>, vector<32x128xf32>
    %c0_2 = arith.constant 0 : index
    %c0_3 = arith.constant 0 : index
    %4 = vector.load %arg3[%c0_2, %c0_3] : memref<32x128xbf16, #tpu.memory_space<vmem>>, vector<32x128xbf16>
    %c0_4 = arith.constant 0 : index
    %c0_5 = arith.constant 0 : index
    %5 = vector.load %arg4[%c0_4, %c0_5] : memref<128x128xbf16, #tpu.memory_space<vmem>>, vector<128x128xbf16>
    %cst = arith.constant dense<0.000000e+00> : vector<32x128xf32>
    %6 = tpu.matmul %4, %5, %cst {dimension_numbers = #tpu.dot_dimension_numbers<[1], [0], [0], [1], [0, 0, 1, 1], [], []>} : vector<32x128xbf16>, vector<128x128xbf16>, vector<32x128xf32> -> vector<32x128xf32>
    %7 = arith.addf %3, %6 : vector<32x128xf32>
    %c0_6 = arith.constant 0 : index
    %c0_7 = arith.constant 0 : index
    %8 = vector.load %arg7[%c0_6, %c0_7] : memref<32x128xf32, #tpu.memory_space<vmem>>, vector<32x128xf32>
    tpu.vector_store %arg7[%c0_6, %c0_7], %7 {strides = array<i32>} : memref<32x128xf32, #tpu.memory_space<vmem>>, vector<32x128xf32>,
    %c0_i32_8 = arith.constant 0 : i32
    %9 = arith.cmpi eq, %arg2, %c0_i32_8 : i32
    %10 = arith.extui %9 : i1 to i32
    %c0_i32_9 = arith.constant 0 : i32
    %11 = arith.cmpi ne, %10, %c0_i32_9 : i32
    scf.if %11 {
      %c0_10 = arith.constant 0 : index
      %c0_11 = arith.constant 0 : index
      %12 = vector.load %arg7[%c0_10, %c0_11] : memref<32x128xf32, #tpu.memory_space<vmem>>, vector<32x128xf32>
      %c0_12 = arith.constant 0 : index
      %c0_13 = arith.constant 0 : index
      %13 = vector.load %arg5[%c0_12, %c0_13] : memref<1x128xf32, #tpu.memory_space<vmem>>, vector<1x128xf32>
      %14 = vector.broadcast %13 : vector<1x128xf32> to vector<32x128xf32>
      %15 = arith.addf %12, %14 : vector<32x128xf32>
      %c0_14 = arith.constant 0 : index
      %c0_15 = arith.constant 0 : index
      %16 = vector.load %arg6[%c0_14, %c0_15] : memref<32x128xf32, #tpu.memory_space<vmem>>, vector<32x128xf32>
      tpu.vector_store %arg6[%c0_14, %c0_15], %15 {strides = array<i32>} : memref<32x128xf32, #tpu.memory_space<vmem>>, vector<32x128xf32>,
    } else {
    }
    return
  }
  func.func @transform_0(%arg0: i32, %arg1: i32, %arg2: i32) -> (i32, i32) {
    %c0_i32 = arith.constant 0 : i32
    return %arg0, %arg2 : i32, i32
  }
  func.func @transform_1(%arg0: i32, %arg1: i32, %arg2: i32) -> (i32, i32) {
    %c0_i32 = arith.constant 0 : i32
    return %arg2, %arg1 : i32, i32
  }
  func.func @transform_2(%arg0: i32, %arg1: i32, %arg2: i32) -> (i32, i32) {
    %c0_i32 = arith.constant 0 : i32
    %c0_i32_0 = arith.constant 0 : i32
    return %c0_i32, %arg1 : i32, i32
  }
  func.func @transform_3(%arg0: i32, %arg1: i32, %arg2: i32) -> (i32, i32) {
    %c0_i32 = arith.constant 0 : i32
    return %arg0, %arg1 : i32, i32
  }
}

module attributes {stable_mosaic.version = 11 : i64} {
  func.func @_ln_silu_kernel(%arg0: i32, %arg1: memref<8x256xf32, #tpu.memory_space<vmem>>, %arg2: memref<1x256xf32, #tpu.memory_space<vmem>>, %arg3: memref<1x256xf32, #tpu.memory_space<vmem>>, %arg4: memref<8x256xf32, #tpu.memory_space<vmem>>) attributes {dimension_semantics = [#tpu.dimension_semantics<parallel>], iteration_bounds = array<i64: 1>, scalar_prefetch = 0 : i64, scratch_operands = 0 : i64, tpu.core_type = #tpu.core_type<tc>, window_params = [{transform_indices = @transform_0, window_bounds = array<i64: 8, 256>}, {pipeline_mode = #tpu.pipeline_mode<synchronous>, transform_indices = @transform_1, window_bounds = array<i64: 1, 256>}, {pipeline_mode = #tpu.pipeline_mode<synchronous>, transform_indices = @transform_2, window_bounds = array<i64: 1, 256>}, {transform_indices = @transform_3, window_bounds = array<i64: 8, 256>}]} {
    %c0 = arith.constant 0 : index
    %c0_0 = arith.constant 0 : index
    %0 = vector.load %arg1[%c0, %c0_0] : memref<8x256xf32, #tpu.memory_space<vmem>>, vector<8x256xf32>
    %cst = arith.constant dense<0.000000e+00> : vector<8xf32>
    %1 = vector.multi_reduction <add>, %0, %cst [1] : vector<8x256xf32> to vector<8xf32>
    %2 = vector.shape_cast %1 : vector<8xf32> to vector<8x1xf32>
    %cst_1 = arith.constant 3.906250e-03 : f32
    %3 = vector.broadcast %cst_1 : f32 to vector<8x1xf32>
    %4 = arith.mulf %2, %3 : vector<8x1xf32>
    %5 = arith.mulf %0, %0 : vector<8x256xf32>
    %cst_2 = arith.constant dense<0.000000e+00> : vector<8xf32>
    %6 = vector.multi_reduction <add>, %5, %cst_2 [1] : vector<8x256xf32> to vector<8xf32>
    %7 = vector.shape_cast %6 : vector<8xf32> to vector<8x1xf32>
    %cst_3 = arith.constant 3.906250e-03 : f32
    %8 = vector.broadcast %cst_3 : f32 to vector<8x1xf32>
    %9 = arith.mulf %7, %8 : vector<8x1xf32>
    %10 = arith.mulf %4, %4 : vector<8x1xf32>
    %11 = arith.subf %9, %10 : vector<8x1xf32>
    %cst_4 = arith.constant 9.99999974E-6 : f32
    %12 = vector.broadcast %cst_4 : f32 to vector<8x1xf32>
    %13 = arith.addf %11, %12 : vector<8x1xf32>
    %14 = math.rsqrt %13 : vector<8x1xf32>
    %15 = vector.broadcast %4 : vector<8x1xf32> to vector<8x256xf32>
    %16 = arith.subf %0, %15 : vector<8x256xf32>
    %17 = vector.broadcast %14 : vector<8x1xf32> to vector<8x256xf32>
    %18 = arith.mulf %16, %17 : vector<8x256xf32>
    %c0_5 = arith.constant 0 : index
    %c0_6 = arith.constant 0 : index
    %19 = vector.load %arg2[%c0_5, %c0_6] : memref<1x256xf32, #tpu.memory_space<vmem>>, vector<1x256xf32>
    %20 = vector.broadcast %19 : vector<1x256xf32> to vector<8x256xf32>
    %21 = arith.mulf %18, %20 : vector<8x256xf32>
    %c0_7 = arith.constant 0 : index
    %c0_8 = arith.constant 0 : index
    %22 = vector.load %arg3[%c0_7, %c0_8] : memref<1x256xf32, #tpu.memory_space<vmem>>, vector<1x256xf32>
    %23 = vector.broadcast %22 : vector<1x256xf32> to vector<8x256xf32>
    %24 = arith.addf %21, %23 : vector<8x256xf32>
    %cst_9 = arith.constant 0.000000e+00 : f32
    %25 = vector.broadcast %cst_9 : f32 to vector<8x256xf32>
    %26 = arith.subf %25, %24 : vector<8x256xf32>
    %27 = math.exp %26 : vector<8x256xf32>
    %cst_10 = arith.constant 1.000000e+00 : f32
    %28 = vector.broadcast %cst_10 : f32 to vector<8x256xf32>
    %29 = arith.addf %28, %27 : vector<8x256xf32>
    %30 = tpu.reciprocal %29 {approx = true} : vector<8x256xf32> -> vector<8x256xf32>
    %31 = arith.mulf %24, %30 : vector<8x256xf32>
    %c0_11 = arith.constant 0 : index
    %c0_12 = arith.constant 0 : index
    %32 = vector.load %arg4[%c0_11, %c0_12] : memref<8x256xf32, #tpu.memory_space<vmem>>, vector<8x256xf32>
    tpu.vector_store %arg4[%c0_11, %c0_12], %31 {strides = array<i32>} : memref<8x256xf32, #tpu.memory_space<vmem>>, vector<8x256xf32>,
    return
  }
  func.func @transform_0(%arg0: i32) -> (i32, i32) {
    %c0_i32 = arith.constant 0 : i32
    %c0_i32_0 = arith.constant 0 : i32
    return %arg0, %c0_i32 : i32, i32
  }
  func.func @transform_1(%arg0: i32) -> (i32, i32) {
    %c0_i32 = arith.constant 0 : i32
    %c0_i32_0 = arith.constant 0 : i32
    %c0_i32_1 = arith.constant 0 : i32
    return %c0_i32, %c0_i32_0 : i32, i32
  }
  func.func @transform_2(%arg0: i32) -> (i32, i32) {
    %c0_i32 = arith.constant 0 : i32
    %c0_i32_0 = arith.constant 0 : i32
    %c0_i32_1 = arith.constant 0 : i32
    return %c0_i32, %c0_i32_0 : i32, i32
  }
  func.func @transform_3(%arg0: i32) -> (i32, i32) {
    %c0_i32 = arith.constant 0 : i32
    %c0_i32_0 = arith.constant 0 : i32
    return %arg0, %c0_i32 : i32, i32
  }
}

module attributes {stable_mosaic.version = 11 : i64} {
  func.func @_mm_kernel(%arg0: i32, %arg1: i32, %arg2: i32, %arg3: memref<32x256xbf16, #tpu.memory_space<vmem>>, %arg4: memref<256x128xbf16, #tpu.memory_space<vmem>>, %arg5: memref<1x128xf32, #tpu.memory_space<vmem>>, %arg6: memref<32x128xf32, #tpu.memory_space<vmem>>, %arg7: memref<32x128xf32, #tpu.memory_space<vmem>>, %arg8: memref<32x128xf32, #tpu.memory_space<vmem>>) attributes {dimension_semantics = [#tpu.dimension_semantics<parallel>, #tpu.dimension_semantics<parallel>, #tpu.dimension_semantics<arbitrary>], iteration_bounds = array<i64: 1, 1, 1>, scalar_prefetch = 0 : i64, scratch_operands = 1 : i64, tpu.core_type = #tpu.core_type<tc>, window_params = [{transform_indices = @transform_0, window_bounds = array<i64: 32, 256>}, {transform_indices = @transform_1, window_bounds = array<i64: 256, 128>}, {transform_indices = @transform_2, window_bounds = array<i64: 1, 128>}, {transform_indices = @transform_3, window_bounds = array<i64: 32, 128>}, {transform_indices = @transform_4, window_bounds = array<i64: 32, 128>}]} {
    %c0_i32 = arith.constant 0 : i32
    %0 = arith.cmpi eq, %arg2, %c0_i32 : i32
    %1 = arith.extui %0 : i1 to i32
    %c0_i32_0 = arith.constant 0 : i32
    %2 = arith.cmpi ne, %1, %c0_i32_0 : i32
    scf.if %2 {
      %cst_10 = arith.constant 0.000000e+00 : f32
      %12 = vector.broadcast %cst_10 : f32 to vector<32x128xf32>
      %c0_11 = arith.constant 0 : index
      %c0_12 = arith.constant 0 : index
      %13 = vector.load %arg8[%c0_11, %c0_12] : memref<32x128xf32, #tpu.memory_space<vmem>>, vector<32x128xf32>
      tpu.vector_store %arg8[%c0_11, %c0_12], %12 {strides = array<i32>} : memref<32x128xf32, #tpu.memory_space<vmem>>, vector<32x128xf32>,
    } else {
    }
    %c0 = arith.constant 0 : index
    %c0_1 = arith.constant 0 : index
    %3 = vector.load %arg8[%c0, %c0_1] : memref<32x128xf32, #tpu.memory_space<vmem>>, vector<32x128xf32>
    %c0_2 = arith.constant 0 : index
    %c0_3 = arith.constant 0 : index
    %4 = vector.load %arg3[%c0_2, %c0_3] : memref<32x256xbf16, #tpu.memory_space<vmem>>, vector<32x256xbf16>
    %c0_4 = arith.constant 0 : index
    %c0_5 = arith.constant 0 : index
    %5 = vector.load %arg4[%c0_4, %c0_5] : memref<256x128xbf16, #tpu.memory_space<vmem>>, vector<256x128xbf16>
    %cst = arith.constant dense<0.000000e+00> : vector<32x128xf32>
    %6 = tpu.matmul %4, %5, %cst {dimension_numbers = #tpu.dot_dimension_numbers<[1], [0], [0], [1], [0, 0, 1, 1], [], []>} : vector<32x256xbf16>, vector<256x128xbf16>, vector<32x128xf32> -> vector<32x128xf32>
    %7 = arith.addf %3, %6 : vector<32x128xf32>
    %c0_6 = arith.constant 0 : index
    %c0_7 = arith.constant 0 : index
    %8 = vector.load %arg8[%c0_6, %c0_7] : memref<32x128xf32, #tpu.memory_space<vmem>>, vector<32x128xf32>
    tpu.vector_store %arg8[%c0_6, %c0_7], %7 {strides = array<i32>} : memref<32x128xf32, #tpu.memory_space<vmem>>, vector<32x128xf32>,
    %c0_i32_8 = arith.constant 0 : i32
    %9 = arith.cmpi eq, %arg2, %c0_i32_8 : i32
    %10 = arith.extui %9 : i1 to i32
    %c0_i32_9 = arith.constant 0 : i32
    %11 = arith.cmpi ne, %10, %c0_i32_9 : i32
    scf.if %11 {
      %c0_10 = arith.constant 0 : index
      %c0_11 = arith.constant 0 : index
      %12 = vector.load %arg8[%c0_10, %c0_11] : memref<32x128xf32, #tpu.memory_space<vmem>>, vector<32x128xf32>
      %c0_12 = arith.constant 0 : index
      %c0_13 = arith.constant 0 : index
      %13 = vector.load %arg5[%c0_12, %c0_13] : memref<1x128xf32, #tpu.memory_space<vmem>>, vector<1x128xf32>
      %14 = vector.broadcast %13 : vector<1x128xf32> to vector<32x128xf32>
      %15 = arith.addf %12, %14 : vector<32x128xf32>
      %c0_14 = arith.constant 0 : index
      %c0_15 = arith.constant 0 : index
      %16 = vector.load %arg6[%c0_14, %c0_15] : memref<32x128xf32, #tpu.memory_space<vmem>>, vector<32x128xf32>
      %17 = arith.addf %15, %16 : vector<32x128xf32>
      %c0_16 = arith.constant 0 : index
      %c0_17 = arith.constant 0 : index
      %18 = vector.load %arg7[%c0_16, %c0_17] : memref<32x128xf32, #tpu.memory_space<vmem>>, vector<32x128xf32>
      tpu.vector_store %arg7[%c0_16, %c0_17], %17 {strides = array<i32>} : memref<32x128xf32, #tpu.memory_space<vmem>>, vector<32x128xf32>,
    } else {
    }
    return
  }
  func.func @transform_0(%arg0: i32, %arg1: i32, %arg2: i32) -> (i32, i32) {
    %c0_i32 = arith.constant 0 : i32
    return %arg0, %arg2 : i32, i32
  }
  func.func @transform_1(%arg0: i32, %arg1: i32, %arg2: i32) -> (i32, i32) {
    %c0_i32 = arith.constant 0 : i32
    return %arg2, %arg1 : i32, i32
  }
  func.func @transform_2(%arg0: i32, %arg1: i32, %arg2: i32) -> (i32, i32) {
    %c0_i32 = arith.constant 0 : i32
    %c0_i32_0 = arith.constant 0 : i32
    return %c0_i32, %arg1 : i32, i32
  }
  func.func @transform_3(%arg0: i32, %arg1: i32, %arg2: i32) -> (i32, i32) {
    %c0_i32 = arith.constant 0 : i32
    return %arg0, %arg1 : i32, i32
  }
  func.func @transform_4(%arg0: i32, %arg1: i32, %arg2: i32) -> (i32, i32) {
    %c0_i32 = arith.constant 0 : i32
    return %arg0, %arg1 : i32, i32
  }
}

module attributes {stable_mosaic.version = 11 : i64} {
  func.func @_mm_kernel(%arg0: i32, %arg1: i32, %arg2: i32, %arg3: memref<32x256xbf16, #tpu.memory_space<vmem>>, %arg4: memref<256x128xbf16, #tpu.memory_space<vmem>>, %arg5: memref<1x128xf32, #tpu.memory_space<vmem>>, %arg6: memref<32x128xf32, #tpu.memory_space<vmem>>, %arg7: memref<32x128xf32, #tpu.memory_space<vmem>>, %arg8: memref<32x128xf32, #tpu.memory_space<vmem>>) attributes {dimension_semantics = [#tpu.dimension_semantics<parallel>, #tpu.dimension_semantics<parallel>, #tpu.dimension_semantics<arbitrary>], iteration_bounds = array<i64: 1, 1, 2>, scalar_prefetch = 0 : i64, scratch_operands = 1 : i64, tpu.core_type = #tpu.core_type<tc>, window_params = [{transform_indices = @transform_0, window_bounds = array<i64: 32, 256>}, {transform_indices = @transform_1, window_bounds = array<i64: 256, 128>}, {transform_indices = @transform_2, window_bounds = array<i64: 1, 128>}, {transform_indices = @transform_3, window_bounds = array<i64: 32, 128>}, {transform_indices = @transform_4, window_bounds = array<i64: 32, 128>}]} {
    %c0_i32 = arith.constant 0 : i32
    %0 = arith.cmpi eq, %arg2, %c0_i32 : i32
    %1 = arith.extui %0 : i1 to i32
    %c0_i32_0 = arith.constant 0 : i32
    %2 = arith.cmpi ne, %1, %c0_i32_0 : i32
    scf.if %2 {
      %cst_9 = arith.constant 0.000000e+00 : f32
      %12 = vector.broadcast %cst_9 : f32 to vector<32x128xf32>
      %c0_10 = arith.constant 0 : index
      %c0_11 = arith.constant 0 : index
      %13 = vector.load %arg8[%c0_10, %c0_11] : memref<32x128xf32, #tpu.memory_space<vmem>>, vector<32x128xf32>
      tpu.vector_store %arg8[%c0_10, %c0_11], %12 {strides = array<i32>} : memref<32x128xf32, #tpu.memory_space<vmem>>, vector<32x128xf32>,
    } else {
    }
    %c0 = arith.constant 0 : index
    %c0_1 = arith.constant 0 : index
    %3 = vector.load %arg8[%c0, %c0_1] : memref<32x128xf32, #tpu.memory_space<vmem>>, vector<32x128xf32>
    %c0_2 = arith.constant 0 : index
    %c0_3 = arith.constant 0 : index
    %4 = vector.load %arg3[%c0_2, %c0_3] : memref<32x256xbf16, #tpu.memory_space<vmem>>, vector<32x256xbf16>
    %c0_4 = arith.constant 0 : index
    %c0_5 = arith.constant 0 : index
    %5 = vector.load %arg4[%c0_4, %c0_5] : memref<256x128xbf16, #tpu.memory_space<vmem>>, vector<256x128xbf16>
    %cst = arith.constant dense<0.000000e+00> : vector<32x128xf32>
    %6 = tpu.matmul %4, %5, %cst {dimension_numbers = #tpu.dot_dimension_numbers<[1], [0], [0], [1], [0, 0, 1, 1], [], []>} : vector<32x256xbf16>, vector<256x128xbf16>, vector<32x128xf32> -> vector<32x128xf32>
    %7 = arith.addf %3, %6 : vector<32x128xf32>
    %c0_6 = arith.constant 0 : index
    %c0_7 = arith.constant 0 : index
    %8 = vector.load %arg8[%c0_6, %c0_7] : memref<32x128xf32, #tpu.memory_space<vmem>>, vector<32x128xf32>
    tpu.vector_store %arg8[%c0_6, %c0_7], %7 {strides = array<i32>} : memref<32x128xf32, #tpu.memory_space<vmem>>, vector<32x128xf32>,
    %c1_i32 = arith.constant 1 : i32
    %9 = arith.cmpi eq, %arg2, %c1_i32 : i32
    %10 = arith.extui %9 : i1 to i32
    %c0_i32_8 = arith.constant 0 : i32
    %11 = arith.cmpi ne, %10, %c0_i32_8 : i32
    scf.if %11 {
      %c0_9 = arith.constant 0 : index
      %c0_10 = arith.constant 0 : index
      %12 = vector.load %arg8[%c0_9, %c0_10] : memref<32x128xf32, #tpu.memory_space<vmem>>, vector<32x128xf32>
      %c0_11 = arith.constant 0 : index
      %c0_12 = arith.constant 0 : index
      %13 = vector.load %arg5[%c0_11, %c0_12] : memref<1x128xf32, #tpu.memory_space<vmem>>, vector<1x128xf32>
      %14 = vector.broadcast %13 : vector<1x128xf32> to vector<32x128xf32>
      %15 = arith.addf %12, %14 : vector<32x128xf32>
      %c0_13 = arith.constant 0 : index
      %c0_14 = arith.constant 0 : index
      %16 = vector.load %arg6[%c0_13, %c0_14] : memref<32x128xf32, #tpu.memory_space<vmem>>, vector<32x128xf32>
      %17 = arith.addf %15, %16 : vector<32x128xf32>
      %c0_15 = arith.constant 0 : index
      %c0_16 = arith.constant 0 : index
      %18 = vector.load %arg7[%c0_15, %c0_16] : memref<32x128xf32, #tpu.memory_space<vmem>>, vector<32x128xf32>
      tpu.vector_store %arg7[%c0_15, %c0_16], %17 {strides = array<i32>} : memref<32x128xf32, #tpu.memory_space<vmem>>, vector<32x128xf32>,
    } else {
    }
    return
  }
  func.func @transform_0(%arg0: i32, %arg1: i32, %arg2: i32) -> (i32, i32) {
    %c0_i32 = arith.constant 0 : i32
    return %arg0, %arg2 : i32, i32
  }
  func.func @transform_1(%arg0: i32, %arg1: i32, %arg2: i32) -> (i32, i32) {
    %c0_i32 = arith.constant 0 : i32
    return %arg2, %arg1 : i32, i32
  }
  func.func @transform_2(%arg0: i32, %arg1: i32, %arg2: i32) -> (i32, i32) {
    %c0_i32 = arith.constant 0 : i32
    %c0_i32_0 = arith.constant 0 : i32
    return %c0_i32, %arg1 : i32, i32
  }
  func.func @transform_3(%arg0: i32, %arg1: i32, %arg2: i32) -> (i32, i32) {
    %c0_i32 = arith.constant 0 : i32
    return %arg0, %arg1 : i32, i32
  }
  func.func @transform_4(%arg0: i32, %arg1: i32, %arg2: i32) -> (i32, i32) {
    %c0_i32 = arith.constant 0 : i32
    return %arg0, %arg1 : i32, i32
  }
}

module attributes {stable_mosaic.version = 11 : i64} {
  func.func @_mm_kernel(%arg0: i32, %arg1: i32, %arg2: i32, %arg3: memref<128x256xbf16, #tpu.memory_space<vmem>>, %arg4: memref<256x128xbf16, #tpu.memory_space<vmem>>, %arg5: memref<1x128xf32, #tpu.memory_space<vmem>>, %arg6: memref<128x128xf32, #tpu.memory_space<vmem>>, %arg7: memref<128x128xf32, #tpu.memory_space<vmem>>, %arg8: memref<128x128xf32, #tpu.memory_space<vmem>>) attributes {dimension_semantics = [#tpu.dimension_semantics<parallel>, #tpu.dimension_semantics<parallel>, #tpu.dimension_semantics<arbitrary>], iteration_bounds = array<i64: 1, 1, 2>, scalar_prefetch = 0 : i64, scratch_operands = 1 : i64, tpu.core_type = #tpu.core_type<tc>, window_params = [{transform_indices = @transform_0, window_bounds = array<i64: 128, 256>}, {transform_indices = @transform_1, window_bounds = array<i64: 256, 128>}, {transform_indices = @transform_2, window_bounds = array<i64: 1, 128>}, {transform_indices = @transform_3, window_bounds = array<i64: 128, 128>}, {transform_indices = @transform_4, window_bounds = array<i64: 128, 128>}]} {
    %c0_i32 = arith.constant 0 : i32
    %0 = arith.cmpi eq, %arg2, %c0_i32 : i32
    %1 = arith.extui %0 : i1 to i32
    %c0_i32_0 = arith.constant 0 : i32
    %2 = arith.cmpi ne, %1, %c0_i32_0 : i32
    scf.if %2 {
      %cst_9 = arith.constant 0.000000e+00 : f32
      %12 = vector.broadcast %cst_9 : f32 to vector<128x128xf32>
      %c0_10 = arith.constant 0 : index
      %c0_11 = arith.constant 0 : index
      %13 = vector.load %arg8[%c0_10, %c0_11] : memref<128x128xf32, #tpu.memory_space<vmem>>, vector<128x128xf32>
      tpu.vector_store %arg8[%c0_10, %c0_11], %12 {strides = array<i32>} : memref<128x128xf32, #tpu.memory_space<vmem>>, vector<128x128xf32>,
    } else {
    }
    %c0 = arith.constant 0 : index
    %c0_1 = arith.constant 0 : index
    %3 = vector.load %arg8[%c0, %c0_1] : memref<128x128xf32, #tpu.memory_space<vmem>>, vector<128x128xf32>
    %c0_2 = arith.constant 0 : index
    %c0_3 = arith.constant 0 : index
    %4 = vector.load %arg3[%c0_2, %c0_3] : memref<128x256xbf16, #tpu.memory_space<vmem>>, vector<128x256xbf16>
    %c0_4 = arith.constant 0 : index
    %c0_5 = arith.constant 0 : index
    %5 = vector.load %arg4[%c0_4, %c0_5] : memref<256x128xbf16, #tpu.memory_space<vmem>>, vector<256x128xbf16>
    %cst = arith.constant dense<0.000000e+00> : vector<128x128xf32>
    %6 = tpu.matmul %4, %5, %cst {dimension_numbers = #tpu.dot_dimension_numbers<[1], [0], [0], [1], [0, 0, 1, 1], [], []>} : vector<128x256xbf16>, vector<256x128xbf16>, vector<128x128xf32> -> vector<128x128xf32>
    %7 = arith.addf %3, %6 : vector<128x128xf32>
    %c0_6 = arith.constant 0 : index
    %c0_7 = arith.constant 0 : index
    %8 = vector.load %arg8[%c0_6, %c0_7] : memref<128x128xf32, #tpu.memory_space<vmem>>, vector<128x128xf32>
    tpu.vector_store %arg8[%c0_6, %c0_7], %7 {strides = array<i32>} : memref<128x128xf32, #tpu.memory_space<vmem>>, vector<128x128xf32>,
    %c1_i32 = arith.constant 1 : i32
    %9 = arith.cmpi eq, %arg2, %c1_i32 : i32
    %10 = arith.extui %9 : i1 to i32
    %c0_i32_8 = arith.constant 0 : i32
    %11 = arith.cmpi ne, %10, %c0_i32_8 : i32
    scf.if %11 {
      %c0_9 = arith.constant 0 : index
      %c0_10 = arith.constant 0 : index
      %12 = vector.load %arg8[%c0_9, %c0_10] : memref<128x128xf32, #tpu.memory_space<vmem>>, vector<128x128xf32>
      %c0_11 = arith.constant 0 : index
      %c0_12 = arith.constant 0 : index
      %13 = vector.load %arg5[%c0_11, %c0_12] : memref<1x128xf32, #tpu.memory_space<vmem>>, vector<1x128xf32>
      %14 = vector.broadcast %13 : vector<1x128xf32> to vector<128x128xf32>
      %15 = arith.addf %12, %14 : vector<128x128xf32>
      %c0_13 = arith.constant 0 : index
      %c0_14 = arith.constant 0 : index
      %16 = vector.load %arg6[%c0_13, %c0_14] : memref<128x128xf32, #tpu.memory_space<vmem>>, vector<128x128xf32>
      %17 = arith.addf %15, %16 : vector<128x128xf32>
      %c0_15 = arith.constant 0 : index
      %c0_16 = arith.constant 0 : index
      %18 = vector.load %arg7[%c0_15, %c0_16] : memref<128x128xf32, #tpu.memory_space<vmem>>, vector<128x128xf32>
      tpu.vector_store %arg7[%c0_15, %c0_16], %17 {strides = array<i32>} : memref<128x128xf32, #tpu.memory_space<vmem>>, vector<128x128xf32>,
    } else {
    }
    return
  }
  func.func @transform_0(%arg0: i32, %arg1: i32, %arg2: i32) -> (i32, i32) {
    %c0_i32 = arith.constant 0 : i32
    return %arg0, %arg2 : i32, i32
  }
  func.func @transform_1(%arg0: i32, %arg1: i32, %arg2: i32) -> (i32, i32) {
    %c0_i32 = arith.constant 0 : i32
    return %arg2, %arg1 : i32, i32
  }
  func.func @transform_2(%arg0: i32, %arg1: i32, %arg2: i32) -> (i32, i32) {
    %c0_i32 = arith.constant 0 : i32
    %c0_i32_0 = arith.constant 0 : i32
    return %c0_i32, %arg1 : i32, i32
  }
  func.func @transform_3(%arg0: i32, %arg1: i32, %arg2: i32) -> (i32, i32) {
    %c0_i32 = arith.constant 0 : i32
    return %arg0, %arg1 : i32, i32
  }
  func.func @transform_4(%arg0: i32, %arg1: i32, %arg2: i32) -> (i32, i32) {
    %c0_i32 = arith.constant 0 : i32
    return %arg0, %arg1 : i32, i32
  }
}

module attributes {stable_mosaic.version = 11 : i64} {
  func.func @_ln_silu_kernel(%arg0: i32, %arg1: memref<8x4096xf32, #tpu.memory_space<vmem>>, %arg2: memref<1x4096xf32, #tpu.memory_space<vmem>>, %arg3: memref<1x4096xf32, #tpu.memory_space<vmem>>, %arg4: memref<8x4096xf32, #tpu.memory_space<vmem>>) attributes {dimension_semantics = [#tpu.dimension_semantics<parallel>], iteration_bounds = array<i64: 1>, scalar_prefetch = 0 : i64, scratch_operands = 0 : i64, tpu.core_type = #tpu.core_type<tc>, window_params = [{transform_indices = @transform_0, window_bounds = array<i64: 8, 4096>}, {pipeline_mode = #tpu.pipeline_mode<synchronous>, transform_indices = @transform_1, window_bounds = array<i64: 1, 4096>}, {pipeline_mode = #tpu.pipeline_mode<synchronous>, transform_indices = @transform_2, window_bounds = array<i64: 1, 4096>}, {transform_indices = @transform_3, window_bounds = array<i64: 8, 4096>}]} {
    %c0 = arith.constant 0 : index
    %c0_0 = arith.constant 0 : index
    %0 = vector.load %arg1[%c0, %c0_0] : memref<8x4096xf32, #tpu.memory_space<vmem>>, vector<8x4096xf32>
    %cst = arith.constant dense<0.000000e+00> : vector<8xf32>
    %1 = vector.multi_reduction <add>, %0, %cst [1] : vector<8x4096xf32> to vector<8xf32>
    %2 = vector.shape_cast %1 : vector<8xf32> to vector<8x1xf32>
    %cst_1 = arith.constant 2.44140625E-4 : f32
    %3 = vector.broadcast %cst_1 : f32 to vector<8x1xf32>
    %4 = arith.mulf %2, %3 : vector<8x1xf32>
    %5 = arith.mulf %0, %0 : vector<8x4096xf32>
    %cst_2 = arith.constant dense<0.000000e+00> : vector<8xf32>
    %6 = vector.multi_reduction <add>, %5, %cst_2 [1] : vector<8x4096xf32> to vector<8xf32>
    %7 = vector.shape_cast %6 : vector<8xf32> to vector<8x1xf32>
    %cst_3 = arith.constant 2.44140625E-4 : f32
    %8 = vector.broadcast %cst_3 : f32 to vector<8x1xf32>
    %9 = arith.mulf %7, %8 : vector<8x1xf32>
    %10 = arith.mulf %4, %4 : vector<8x1xf32>
    %11 = arith.subf %9, %10 : vector<8x1xf32>
    %cst_4 = arith.constant 9.99999974E-6 : f32
    %12 = vector.broadcast %cst_4 : f32 to vector<8x1xf32>
    %13 = arith.addf %11, %12 : vector<8x1xf32>
    %14 = math.rsqrt %13 : vector<8x1xf32>
    %15 = vector.broadcast %4 : vector<8x1xf32> to vector<8x4096xf32>
    %16 = arith.subf %0, %15 : vector<8x4096xf32>
    %17 = vector.broadcast %14 : vector<8x1xf32> to vector<8x4096xf32>
    %18 = arith.mulf %16, %17 : vector<8x4096xf32>
    %c0_5 = arith.constant 0 : index
    %c0_6 = arith.constant 0 : index
    %19 = vector.load %arg2[%c0_5, %c0_6] : memref<1x4096xf32, #tpu.memory_space<vmem>>, vector<1x4096xf32>
    %20 = vector.broadcast %19 : vector<1x4096xf32> to vector<8x4096xf32>
    %21 = arith.mulf %18, %20 : vector<8x4096xf32>
    %c0_7 = arith.constant 0 : index
    %c0_8 = arith.constant 0 : index
    %22 = vector.load %arg3[%c0_7, %c0_8] : memref<1x4096xf32, #tpu.memory_space<vmem>>, vector<1x4096xf32>
    %23 = vector.broadcast %22 : vector<1x4096xf32> to vector<8x4096xf32>
    %24 = arith.addf %21, %23 : vector<8x4096xf32>
    %cst_9 = arith.constant 0.000000e+00 : f32
    %25 = vector.broadcast %cst_9 : f32 to vector<8x4096xf32>
    %26 = arith.subf %25, %24 : vector<8x4096xf32>
    %27 = math.exp %26 : vector<8x4096xf32>
    %cst_10 = arith.constant 1.000000e+00 : f32
    %28 = vector.broadcast %cst_10 : f32 to vector<8x4096xf32>
    %29 = arith.addf %28, %27 : vector<8x4096xf32>
    %30 = tpu.reciprocal %29 {approx = true} : vector<8x4096xf32> -> vector<8x4096xf32>
    %31 = arith.mulf %24, %30 : vector<8x4096xf32>
    %c0_11 = arith.constant 0 : index
    %c0_12 = arith.constant 0 : index
    %32 = vector.load %arg4[%c0_11, %c0_12] : memref<8x4096xf32, #tpu.memory_space<vmem>>, vector<8x4096xf32>
    tpu.vector_store %arg4[%c0_11, %c0_12], %31 {strides = array<i32>} : memref<8x4096xf32, #tpu.memory_space<vmem>>, vector<8x4096xf32>,
    return
  }
  func.func @transform_0(%arg0: i32) -> (i32, i32) {
    %c0_i32 = arith.constant 0 : i32
    %c0_i32_0 = arith.constant 0 : i32
    return %arg0, %c0_i32 : i32, i32
  }
  func.func @transform_1(%arg0: i32) -> (i32, i32) {
    %c0_i32 = arith.constant 0 : i32
    %c0_i32_0 = arith.constant 0 : i32
    %c0_i32_1 = arith.constant 0 : i32
    return %c0_i32, %c0_i32_0 : i32, i32
  }
  func.func @transform_2(%arg0: i32) -> (i32, i32) {
    %c0_i32 = arith.constant 0 : i32
    %c0_i32_0 = arith.constant 0 : i32
    %c0_i32_1 = arith.constant 0 : i32
    return %c0_i32, %c0_i32_0 : i32, i32
  }
  func.func @transform_3(%arg0: i32) -> (i32, i32) {
    %c0_i32 = arith.constant 0 : i32
    %c0_i32_0 = arith.constant 0 : i32
    return %arg0, %c0_i32 : i32, i32
  }
}

module attributes {stable_mosaic.version = 11 : i64} {
  func.func @_mm_kernel(%arg0: i32, %arg1: i32, %arg2: i32, %arg3: memref<256x128xbf16, #tpu.memory_space<vmem>>, %arg4: memref<128x128xbf16, #tpu.memory_space<vmem>>, %arg5: memref<1x128xf32, #tpu.memory_space<vmem>>, %arg6: memref<256x128xf32, #tpu.memory_space<vmem>>, %arg7: memref<256x128xf32, #tpu.memory_space<vmem>>, %arg8: memref<256x128xf32, #tpu.memory_space<vmem>>) attributes {dimension_semantics = [#tpu.dimension_semantics<parallel>, #tpu.dimension_semantics<parallel>, #tpu.dimension_semantics<arbitrary>], iteration_bounds = array<i64: 2, 1, 1>, scalar_prefetch = 0 : i64, scratch_operands = 1 : i64, tpu.core_type = #tpu.core_type<tc>, window_params = [{transform_indices = @transform_0, window_bounds = array<i64: 256, 128>}, {transform_indices = @transform_1, window_bounds = array<i64: 128, 128>}, {transform_indices = @transform_2, window_bounds = array<i64: 1, 128>}, {transform_indices = @transform_3, window_bounds = array<i64: 256, 128>}, {transform_indices = @transform_4, window_bounds = array<i64: 256, 128>}]} {
    %c0_i32 = arith.constant 0 : i32
    %0 = arith.cmpi eq, %arg2, %c0_i32 : i32
    %1 = arith.extui %0 : i1 to i32
    %c0_i32_0 = arith.constant 0 : i32
    %2 = arith.cmpi ne, %1, %c0_i32_0 : i32
    scf.if %2 {
      %cst_10 = arith.constant 0.000000e+00 : f32
      %12 = vector.broadcast %cst_10 : f32 to vector<256x128xf32>
      %c0_11 = arith.constant 0 : index
      %c0_12 = arith.constant 0 : index
      %13 = vector.load %arg8[%c0_11, %c0_12] : memref<256x128xf32, #tpu.memory_space<vmem>>, vector<256x128xf32>
      tpu.vector_store %arg8[%c0_11, %c0_12], %12 {strides = array<i32>} : memref<256x128xf32, #tpu.memory_space<vmem>>, vector<256x128xf32>,
    } else {
    }
    %c0 = arith.constant 0 : index
    %c0_1 = arith.constant 0 : index
    %3 = vector.load %arg8[%c0, %c0_1] : memref<256x128xf32, #tpu.memory_space<vmem>>, vector<256x128xf32>
    %c0_2 = arith.constant 0 : index
    %c0_3 = arith.constant 0 : index
    %4 = vector.load %arg3[%c0_2, %c0_3] : memref<256x128xbf16, #tpu.memory_space<vmem>>, vector<256x128xbf16>
    %c0_4 = arith.constant 0 : index
    %c0_5 = arith.constant 0 : index
    %5 = vector.load %arg4[%c0_4, %c0_5] : memref<128x128xbf16, #tpu.memory_space<vmem>>, vector<128x128xbf16>
    %cst = arith.constant dense<0.000000e+00> : vector<256x128xf32>
    %6 = tpu.matmul %4, %5, %cst {dimension_numbers = #tpu.dot_dimension_numbers<[1], [0], [0], [1], [0, 0, 1, 1], [], []>} : vector<256x128xbf16>, vector<128x128xbf16>, vector<256x128xf32> -> vector<256x128xf32>
    %7 = arith.addf %3, %6 : vector<256x128xf32>
    %c0_6 = arith.constant 0 : index
    %c0_7 = arith.constant 0 : index
    %8 = vector.load %arg8[%c0_6, %c0_7] : memref<256x128xf32, #tpu.memory_space<vmem>>, vector<256x128xf32>
    tpu.vector_store %arg8[%c0_6, %c0_7], %7 {strides = array<i32>} : memref<256x128xf32, #tpu.memory_space<vmem>>, vector<256x128xf32>,
    %c0_i32_8 = arith.constant 0 : i32
    %9 = arith.cmpi eq, %arg2, %c0_i32_8 : i32
    %10 = arith.extui %9 : i1 to i32
    %c0_i32_9 = arith.constant 0 : i32
    %11 = arith.cmpi ne, %10, %c0_i32_9 : i32
    scf.if %11 {
      %c0_10 = arith.constant 0 : index
      %c0_11 = arith.constant 0 : index
      %12 = vector.load %arg8[%c0_10, %c0_11] : memref<256x128xf32, #tpu.memory_space<vmem>>, vector<256x128xf32>
      %c0_12 = arith.constant 0 : index
      %c0_13 = arith.constant 0 : index
      %13 = vector.load %arg5[%c0_12, %c0_13] : memref<1x128xf32, #tpu.memory_space<vmem>>, vector<1x128xf32>
      %14 = vector.broadcast %13 : vector<1x128xf32> to vector<256x128xf32>
      %15 = arith.addf %12, %14 : vector<256x128xf32>
      %c0_14 = arith.constant 0 : index
      %c0_15 = arith.constant 0 : index
      %16 = vector.load %arg6[%c0_14, %c0_15] : memref<256x128xf32, #tpu.memory_space<vmem>>, vector<256x128xf32>
      %17 = arith.addf %15, %16 : vector<256x128xf32>
      %cst_16 = arith.constant 0.000000e+00 : f32
      %18 = vector.broadcast %cst_16 : f32 to vector<256x128xf32>
      %19 = arith.subf %18, %17 : vector<256x128xf32>
      %20 = math.exp %19 : vector<256x128xf32>
      %cst_17 = arith.constant 1.000000e+00 : f32
      %21 = vector.broadcast %cst_17 : f32 to vector<256x128xf32>
      %22 = arith.addf %21, %20 : vector<256x128xf32>
      %23 = tpu.reciprocal %22 {approx = true} : vector<256x128xf32> -> vector<256x128xf32>
      %24 = arith.mulf %17, %23 : vector<256x128xf32>
      %c0_18 = arith.constant 0 : index
      %c0_19 = arith.constant 0 : index
      %25 = vector.load %arg7[%c0_18, %c0_19] : memref<256x128xf32, #tpu.memory_space<vmem>>, vector<256x128xf32>
      tpu.vector_store %arg7[%c0_18, %c0_19], %24 {strides = array<i32>} : memref<256x128xf32, #tpu.memory_space<vmem>>, vector<256x128xf32>,
    } else {
    }
    return
  }
  func.func @transform_0(%arg0: i32, %arg1: i32, %arg2: i32) -> (i32, i32) {
    %c0_i32 = arith.constant 0 : i32
    return %arg0, %arg2 : i32, i32
  }
  func.func @transform_1(%arg0: i32, %arg1: i32, %arg2: i32) -> (i32, i32) {
    %c0_i32 = arith.constant 0 : i32
    return %arg2, %arg1 : i32, i32
  }
  func.func @transform_2(%arg0: i32, %arg1: i32, %arg2: i32) -> (i32, i32) {
    %c0_i32 = arith.constant 0 : i32
    %c0_i32_0 = arith.constant 0 : i32
    return %c0_i32, %arg1 : i32, i32
  }
  func.func @transform_3(%arg0: i32, %arg1: i32, %arg2: i32) -> (i32, i32) {
    %c0_i32 = arith.constant 0 : i32
    return %arg0, %arg1 : i32, i32
  }
  func.func @transform_4(%arg0: i32, %arg1: i32, %arg2: i32) -> (i32, i32) {
    %c0_i32 = arith.constant 0 : i32
    return %arg0, %arg1 : i32, i32
  }
}

module attributes {stable_mosaic.version = 11 : i64} {
  func.func @_mm_kernel(%arg0: i32, %arg1: i32, %arg2: i32, %arg3: memref<256x256xbf16, #tpu.memory_space<vmem>>, %arg4: memref<256x128xbf16, #tpu.memory_space<vmem>>, %arg5: memref<1x128xf32, #tpu.memory_space<vmem>>, %arg6: memref<256x128xf32, #tpu.memory_space<vmem>>, %arg7: memref<256x128xf32, #tpu.memory_space<vmem>>, %arg8: memref<256x128xf32, #tpu.memory_space<vmem>>) attributes {dimension_semantics = [#tpu.dimension_semantics<parallel>, #tpu.dimension_semantics<parallel>, #tpu.dimension_semantics<arbitrary>], iteration_bounds = array<i64: 2, 1, 1>, scalar_prefetch = 0 : i64, scratch_operands = 1 : i64, tpu.core_type = #tpu.core_type<tc>, window_params = [{transform_indices = @transform_0, window_bounds = array<i64: 256, 256>}, {transform_indices = @transform_1, window_bounds = array<i64: 256, 128>}, {transform_indices = @transform_2, window_bounds = array<i64: 1, 128>}, {transform_indices = @transform_3, window_bounds = array<i64: 256, 128>}, {transform_indices = @transform_4, window_bounds = array<i64: 256, 128>}]} {
    %c0_i32 = arith.constant 0 : i32
    %0 = arith.cmpi eq, %arg2, %c0_i32 : i32
    %1 = arith.extui %0 : i1 to i32
    %c0_i32_0 = arith.constant 0 : i32
    %2 = arith.cmpi ne, %1, %c0_i32_0 : i32
    scf.if %2 {
      %cst_10 = arith.constant 0.000000e+00 : f32
      %12 = vector.broadcast %cst_10 : f32 to vector<256x128xf32>
      %c0_11 = arith.constant 0 : index
      %c0_12 = arith.constant 0 : index
      %13 = vector.load %arg8[%c0_11, %c0_12] : memref<256x128xf32, #tpu.memory_space<vmem>>, vector<256x128xf32>
      tpu.vector_store %arg8[%c0_11, %c0_12], %12 {strides = array<i32>} : memref<256x128xf32, #tpu.memory_space<vmem>>, vector<256x128xf32>,
    } else {
    }
    %c0 = arith.constant 0 : index
    %c0_1 = arith.constant 0 : index
    %3 = vector.load %arg8[%c0, %c0_1] : memref<256x128xf32, #tpu.memory_space<vmem>>, vector<256x128xf32>
    %c0_2 = arith.constant 0 : index
    %c0_3 = arith.constant 0 : index
    %4 = vector.load %arg3[%c0_2, %c0_3] : memref<256x256xbf16, #tpu.memory_space<vmem>>, vector<256x256xbf16>
    %c0_4 = arith.constant 0 : index
    %c0_5 = arith.constant 0 : index
    %5 = vector.load %arg4[%c0_4, %c0_5] : memref<256x128xbf16, #tpu.memory_space<vmem>>, vector<256x128xbf16>
    %cst = arith.constant dense<0.000000e+00> : vector<256x128xf32>
    %6 = tpu.matmul %4, %5, %cst {dimension_numbers = #tpu.dot_dimension_numbers<[1], [0], [0], [1], [0, 0, 1, 1], [], []>} : vector<256x256xbf16>, vector<256x128xbf16>, vector<256x128xf32> -> vector<256x128xf32>
    %7 = arith.addf %3, %6 : vector<256x128xf32>
    %c0_6 = arith.constant 0 : index
    %c0_7 = arith.constant 0 : index
    %8 = vector.load %arg8[%c0_6, %c0_7] : memref<256x128xf32, #tpu.memory_space<vmem>>, vector<256x128xf32>
    tpu.vector_store %arg8[%c0_6, %c0_7], %7 {strides = array<i32>} : memref<256x128xf32, #tpu.memory_space<vmem>>, vector<256x128xf32>,
    %c0_i32_8 = arith.constant 0 : i32
    %9 = arith.cmpi eq, %arg2, %c0_i32_8 : i32
    %10 = arith.extui %9 : i1 to i32
    %c0_i32_9 = arith.constant 0 : i32
    %11 = arith.cmpi ne, %10, %c0_i32_9 : i32
    scf.if %11 {
      %c0_10 = arith.constant 0 : index
      %c0_11 = arith.constant 0 : index
      %12 = vector.load %arg8[%c0_10, %c0_11] : memref<256x128xf32, #tpu.memory_space<vmem>>, vector<256x128xf32>
      %c0_12 = arith.constant 0 : index
      %c0_13 = arith.constant 0 : index
      %13 = vector.load %arg5[%c0_12, %c0_13] : memref<1x128xf32, #tpu.memory_space<vmem>>, vector<1x128xf32>
      %14 = vector.broadcast %13 : vector<1x128xf32> to vector<256x128xf32>
      %15 = arith.addf %12, %14 : vector<256x128xf32>
      %c0_14 = arith.constant 0 : index
      %c0_15 = arith.constant 0 : index
      %16 = vector.load %arg6[%c0_14, %c0_15] : memref<256x128xf32, #tpu.memory_space<vmem>>, vector<256x128xf32>
      %17 = arith.addf %15, %16 : vector<256x128xf32>
      %c0_16 = arith.constant 0 : index
      %c0_17 = arith.constant 0 : index
      %18 = vector.load %arg7[%c0_16, %c0_17] : memref<256x128xf32, #tpu.memory_space<vmem>>, vector<256x128xf32>
      tpu.vector_store %arg7[%c0_16, %c0_17], %17 {strides = array<i32>} : memref<256x128xf32, #tpu.memory_space<vmem>>, vector<256x128xf32>,
    } else {
    }
    return
  }
  func.func @transform_0(%arg0: i32, %arg1: i32, %arg2: i32) -> (i32, i32) {
    %c0_i32 = arith.constant 0 : i32
    return %arg0, %arg2 : i32, i32
  }
  func.func @transform_1(%arg0: i32, %arg1: i32, %arg2: i32) -> (i32, i32) {
    %c0_i32 = arith.constant 0 : i32
    return %arg2, %arg1 : i32, i32
  }
  func.func @transform_2(%arg0: i32, %arg1: i32, %arg2: i32) -> (i32, i32) {
    %c0_i32 = arith.constant 0 : i32
    %c0_i32_0 = arith.constant 0 : i32
    return %c0_i32, %arg1 : i32, i32
  }
  func.func @transform_3(%arg0: i32, %arg1: i32, %arg2: i32) -> (i32, i32) {
    %c0_i32 = arith.constant 0 : i32
    return %arg0, %arg1 : i32, i32
  }
  func.func @transform_4(%arg0: i32, %arg1: i32, %arg2: i32) -> (i32, i32) {
    %c0_i32 = arith.constant 0 : i32
    return %arg0, %arg1 : i32, i32
  }
}

</mosaic_0001>

<bundles_post_ra>
// kernel: unet_forward.66
= control target key start
LH: loop header
LB: loop body
LE: loop exit
PB: predicated region body
PF: predicated region fallthrough
CT: control target
= control target key end

     0   :  { %s1180_s12 = smov 0   ;;  %s1182_s13 = smov 0   ;;  %s1330_s0 = inlined_call_operand.vmem [shape: bf16[512,128], index: 0, kind: input, shape index: {}]   ;;  %s1331_s1 = inlined_call_operand.vmem [shape: bf16[128,128], index: 1, kind: input, shape index: {}]   ;;  %s1332_s2 = inlined_call_operand.vmem [shape: f32[1,128], index: 2, kind: input, shape index: {}]   ;;  %s1333_s3 = inlined_call_operand.vmem [shape: f32[512,128], index: 3, kind: output, shape index: {}]  }
   0x1   :  { %s1184_s14 = smov 0  }
   0x2 LB: > { %s32_s15 = sadd.s32 1, %s1154_s13  ;;  %p968_p0 = scmp.ge.s32.totalorder %s1158_s14, 1  ;;  %s1158_s14 = sphi %s1184_s14, %s13_s14   ;;  %s1154_s13 = sphi %s1182_s13, %s1335_s13   ;;  %s1150_s12 = sphi %s1180_s12, %s1334_s12  }
   0x3   : > { %p34_p1 = scmp.ge.s32.totalorder %s32_s15, 2  ;;  %p188_p2 = scmp.lt.s32.totalorder %s1158_s14, 3 }
   0x5   : > { %s1337_s15 = smov (%p34_p1, %s32_s15), 0  ;;  %p189_p3 = pnand %p968_p0, %p188_p2 }
   0x6   : > { %v1112_v0 = vld [vmem:[%s1331_s1] sm:$0xff] (!%p189_p3)   ;;  %s969_s18 = sshll.u32 (!%p189_p3), %s1150_s12, 5  ;;  %v1113_v1 = vld [vmem:[%s1331_s1 + $0x8] sm:$0xff] (!%p189_p3)   ;;  %v1114_v2 = vld [vmem:[%s1331_s1 + $0x10] sm:$0xff] (!%p189_p3)  }
   0x7   : > { %192 = sbr.rel (%p189_p3) target bundleno = 281 (0x119), region = 32  ;;  %p230_p4 = scmp.lt.s32.totalorder (!%p189_p3), %s969_s18, 63  ;;  %1024 = vmatprep.subr.bf16.mxu0 (!%p189_p3), %v1112_v0  ;;  %1072 = vmatprep.subr.bf16.mxu1 (!%p189_p3), %v1112_v0  ;;  %v1115_v3 = vld [vmem:[%s1331_s1 + $0x18] sm:$0xff] (!%p189_p3)   ;;  %v1116_v6 = vld [vmem:[%s1331_s1 + $0x20] sm:$0xff] (!%p189_p3)   ;;  %v1117_v7 = vld [vmem:[%s1331_s1 + $0x28] sm:$0xff] (!%p189_p3)  }
   0x8   : > { %1025 = vmatpush3.bf16.msra.mxu0 (!%p189_p3), %v1112_v0  ;;  %1080 = vmatpush3.bf16.msra.mxu1 (!%p189_p3), %v1112_v0  ;;  %v1118_v8 = vld [vmem:[%s1331_s1 + $0x30] sm:$0xff] (!%p189_p3)   ;;  %v1119_v9 = vld [vmem:[%s1331_s1 + $0x38] sm:$0xff] (!%p189_p3)   ;;  %v1250_v24 = vld [vmem:[%s1332_s2] ss:$0 sm:$0xff] (!%p189_p3) }
   0x9   : > { %1026 = vmatprep.subr.bf16.mxu0 (!%p189_p3), %v1113_v1  ;;  %1073 = vmatprep.subr.bf16.mxu1 (!%p189_p3), %v1113_v1 }
   0xc   : > { %1027 = vmatpush3.bf16.msra.mxu0 (!%p189_p3), %v1113_v1  ;;  %1081 = vmatpush3.bf16.msra.mxu1 (!%p189_p3), %v1113_v1 }
   0xd   : > { %1028 = vmatprep.subr.bf16.mxu0 (!%p189_p3), %v1114_v2  ;;  %1074 = vmatprep.subr.bf16.mxu1 (!%p189_p3), %v1114_v2 }
   0xe   : > { %s1339_s18 = smov (!%p230_p4, %s969_s18), 63 }
   0xf   : > { %s970_s23 = sshll.u32 %s1339_s18, 2  ;;  %s972_s10 = sshll.u32 %s1339_s18, 3 }
  0x10   : > { %s1213_s26 = scalar_lea.vmem %s1330_s0, %s970_s23  ;;  %1029 = vmatpush3.bf16.msra.mxu0 %v1114_v2  ;;  %1082 = vmatpush3.bf16.msra.mxu1 %v1114_v2  ;;  %s1255_s19 = scalar_lea.vmem %s1333_s3, %s972_s10 }
  0x11   : > { %v1120_v4 = vld [vmem:[%s1213_s26] sm:$0xff]   ;;  %1030 = vmatprep.subr.bf16.mxu0 %v1115_v3  ;;  %1075 = vmatprep.subr.bf16.mxu1 %v1115_v3  ;;  %v1122_v10 = vld [vmem:[%s1213_s26 + $0x8] sm:$0xff]   ;;  %v1124_v12 = vld [vmem:[%s1213_s26 + $0x10] sm:$0xff]  }
  0x12   : > { %v1121_v5 = vld [vmem:[%s1213_s26 + $0x40] sm:$0xff]   ;;  %1040 = vmatprep.mubr.bf16.mxu0 %v1120_v4  ;;  %v1123_v11 = vld [vmem:[%s1213_s26 + $0x48] sm:$0xff]   ;;  %v1125_v13 = vld [vmem:[%s1213_s26 + $0x50] sm:$0xff]  }
  0x13   : > { %1056 = vmatprep.mubr.bf16.mxu1 %v1121_v5  ;;  %v1126_v14 = vld [vmem:[%s1213_s26 + $0x18] sm:$0xff]   ;;  %v1128_v16 = vld [vmem:[%s1213_s26 + $0x20] sm:$0xff]   ;;  %v1130_v18 = vld [vmem:[%s1213_s26 + $0x28] sm:$0xff]  }
  0x14   : > { %1031 = vmatpush3.bf16.msra.mxu0 %v1115_v3  ;;  %1083 = vmatpush3.bf16.msra.mxu1 %v1115_v3  ;;  %v1127_v15 = vld [vmem:[%s1213_s26 + $0x58] sm:$0xff]   ;;  %v1129_v17 = vld [vmem:[%s1213_s26 + $0x60] sm:$0xff]   ;;  %v1131_v19 = vld [vmem:[%s1213_s26 + $0x68] sm:$0xff]  }
  0x15   : > { %1032 = vmatprep.subr.bf16.mxu0 %v1116_v6  ;;  %1076 = vmatprep.subr.bf16.mxu1 %v1116_v6  ;;  %v1132_v20 = vld [vmem:[%s1213_s26 + $0x30] sm:$0xff]   ;;  %v1134_v22 = vld [vmem:[%s1213_s26 + $0x38] sm:$0xff]  }
  0x16   : > { %v1133_v21 = vld [vmem:[%s1213_s26 + $0x70] sm:$0xff]   ;;  %v1135_v23 = vld [vmem:[%s1213_s26 + $0x78] sm:$0xff]  }
  0x18   : > { %1033 = vmatpush3.bf16.msra.mxu0 %v1116_v6  ;;  %1084 = vmatpush3.bf16.msra.mxu1 %v1116_v6 }
  0x19   : > { %1034 = vmatprep.subr.bf16.mxu0 %v1117_v7  ;;  %1077 = vmatprep.subr.bf16.mxu1 %v1117_v7 }
  0x1c   : > { %1035 = vmatpush3.bf16.msra.mxu0 %v1117_v7  ;;  %1085 = vmatpush3.bf16.msra.mxu1 %v1117_v7 }
  0x1d   : > { %1036 = vmatprep.subr.bf16.mxu0 %v1118_v8  ;;  %1078 = vmatprep.subr.bf16.mxu1 %v1118_v8 }
  0x20   : > { %1037 = vmatpush3.bf16.msra.mxu0 %v1118_v8  ;;  %1086 = vmatpush3.bf16.msra.mxu1 %v1118_v8 }
  0x21   : > { %1038 = vmatprep.subr.bf16.mxu0 %v1119_v9  ;;  %1079 = vmatprep.subr.bf16.mxu1 %v1119_v9 }
  0x24   : > { %1039 = vmatpush3.bf16.msra.mxu0 %v1119_v9  ;;  %1087 = vmatpush3.bf16.msra.mxu1 %v1119_v9 }
  0x27   : > { %1041 = vmatmul.mubr.bf16.vlgmr.msra.gmra.mrb[0].mxu0 %v1122_v10  ;;  %1057 = vmatmul.mubr.bf16.vlgmr.msra.gmra.mrb[0].mxu1 %v1123_v11 }
  0x28   : > { %1044 = vmatprep.mubr.bf16.mxu0 %v1124_v12  ;;  %1060 = vmatprep.mubr.bf16.mxu1 %v1125_v13 }
  0x2f   : > { %1045 = vmatmul.mubr.bf16.gmra.mrb[4].mxu0 %v1126_v14  ;;  %1061 = vmatmul.mubr.bf16.gmra.mrb[4].mxu1 %v1127_v15 }
  0x30   : > { %1048 = vmatprep.mubr.bf16.mxu0 %v1128_v16  ;;  %1064 = vmatprep.mubr.bf16.mxu1 %v1129_v17 }
  0x37   : > { %1049 = vmatmul.mubr.bf16.gmra.mrb[8].mxu0 %v1130_v18  ;;  %1065 = vmatmul.mubr.bf16.gmra.mrb[8].mxu1 %v1131_v19 }
  0x38   : > { %1052 = vmatprep.mubr.bf16.mxu0 %v1132_v20  ;;  %1068 = vmatprep.mubr.bf16.mxu1 %v1133_v21 }
  0x3f   : > { %1053 = vmatmul.mubr.bf16.gmra.mrb[12].mxu0 %v1134_v22  ;;  %1069 = vmatmul.mubr.bf16.gmra.mrb[12].mxu1 %v1135_v23 }
  0xfa   : > { %v1042_v25 = vpop.f32.mrb[0].mxu0  ;;  %v1058_v26 = vpop.f32.mrb[0].mxu1 }
  0xfb   : > { %v789_v27 = vadd.f32 %v1042_v25, %v1250_v24  ;;  %v805_v28 = vadd.f32 %v1058_v26, %v1250_v24  ;;  %v554_v29 = vpop.f32.mrb[1].mxu0  ;;  %v618_v30 = vpop.f32.mrb[1].mxu1 }
  0xfc   : > { %v787_v31 = vadd.f32 %v1250_v24, %v554_v29  ;;  %v803_v32 = vadd.f32 %v1250_v24, %v618_v30  ;;  %v1043_v33 = vpop.f32.mrb[2].mxu0  ;;  %v1059_v34 = vpop.f32.mrb[2].mxu1 }
  0xfd   : > { %821 = vst [vmem:[%s1255_s19 + $0x10] sm:$0xff] %v789_v27  ;;  %837 = vst [vmem:[%s1255_s19 + $0x90] sm:$0xff] %v805_v28  ;;  %v790_v35 = vadd.f32 %v1043_v33, %v1250_v24  ;;  %v806_v36 = vadd.f32 %v1059_v34, %v1250_v24  ;;  %v557_v37 = vpop.f32.mrb[3].mxu0  ;;  %v621_v38 = vpop.f32.mrb[3].mxu1 }
  0xfe   : > { %819 = vst [vmem:[%s1255_s19] sm:$0xff] %v787_v31  ;;  %835 = vst [vmem:[%s1255_s19 + $0x80] sm:$0xff] %v803_v32  ;;  %v788_v39 = vadd.f32 %v1250_v24, %v557_v37  ;;  %v804_v40 = vadd.f32 %v1250_v24, %v621_v38 }
  0xff   : > { %822 = vst [vmem:[%s1255_s19 + $0x18] sm:$0xff] %v790_v35  ;;  %838 = vst [vmem:[%s1255_s19 + $0x98] sm:$0xff] %v806_v36 }
 0x100   : > { %820 = vst [vmem:[%s1255_s19 + $0x8] sm:$0xff] %v788_v39  ;;  %836 = vst [vmem:[%s1255_s19 + $0x88] sm:$0xff] %v804_v40 }
 0x102   : > { %v1046_v41 = vpop.f32.mrb[4].mxu0  ;;  %v1062_v42 = vpop.f32.mrb[4].mxu1 }
 0x103   : > { %v793_v43 = vadd.f32 %v1046_v41, %v1250_v24  ;;  %v809_v44 = vadd.f32 %v1062_v42, %v1250_v24  ;;  %v570_v45 = vpop.f32.mrb[5].mxu0  ;;  %v634_v46 = vpop.f32.mrb[5].mxu1 }
 0x104   : > { %v791_v47 = vadd.f32 %v1250_v24, %v570_v45  ;;  %v807_v48 = vadd.f32 %v1250_v24, %v634_v46  ;;  %v1047_v49 = vpop.f32.mrb[6].mxu0  ;;  %v1063_v50 = vpop.f32.mrb[6].mxu1 }
 0x105   : > { %825 = vst [vmem:[%s1255_s19 + $0x30] sm:$0xff] %v793_v43  ;;  %841 = vst [vmem:[%s1255_s19 + $0xb0] sm:$0xff] %v809_v44  ;;  %v794_v51 = vadd.f32 %v1047_v49, %v1250_v24  ;;  %v810_v52 = vadd.f32 %v1063_v50, %v1250_v24  ;;  %v573_v53 = vpop.f32.mrb[7].mxu0  ;;  %v637_v54 = vpop.f32.mrb[7].mxu1 }
 0x106   : > { %823 = vst [vmem:[%s1255_s19 + $0x20] sm:$0xff] %v791_v47  ;;  %839 = vst [vmem:[%s1255_s19 + $0xa0] sm:$0xff] %v807_v48  ;;  %v792_v55 = vadd.f32 %v1250_v24, %v573_v53  ;;  %v808_v56 = vadd.f32 %v1250_v24, %v637_v54 }
 0x107   : > { %826 = vst [vmem:[%s1255_s19 + $0x38] sm:$0xff] %v794_v51  ;;  %842 = vst [vmem:[%s1255_s19 + $0xb8] sm:$0xff] %v810_v52 }
 0x108   : > { %824 = vst [vmem:[%s1255_s19 + $0x28] sm:$0xff] %v792_v55  ;;  %840 = vst [vmem:[%s1255_s19 + $0xa8] sm:$0xff] %v808_v56 }
 0x10a   : > { %v1050_v57 = vpop.f32.mrb[8].mxu0  ;;  %v1066_v58 = vpop.f32.mrb[8].mxu1 }
 0x10b   : > { %v797_v59 = vadd.f32 %v1050_v57, %v1250_v24  ;;  %v813_v60 = vadd.f32 %v1066_v58, %v1250_v24  ;;  %v586_v61 = vpop.f32.mrb[9].mxu0  ;;  %v650_v62 = vpop.f32.mrb[9].mxu1 }
 0x10c   : > { %v795_v63 = vadd.f32 %v1250_v24, %v586_v61  ;;  %v811_v0 = vadd.f32 %v1250_v24, %v650_v62  ;;  %v1051_v1 = vpop.f32.mrb[10].mxu0  ;;  %v1067_v2 = vpop.f32.mrb[10].mxu1 }
 0x10d   : > { %829 = vst [vmem:[%s1255_s19 + $0x50] sm:$0xff] %v797_v59  ;;  %845 = vst [vmem:[%s1255_s19 + $0xd0] sm:$0xff] %v813_v60  ;;  %v798_v3 = vadd.f32 %v1051_v1, %v1250_v24  ;;  %v814_v4 = vadd.f32 %v1067_v2, %v1250_v24  ;;  %v589_v5 = vpop.f32.mrb[11].mxu0  ;;  %v653_v6 = vpop.f32.mrb[11].mxu1 }
 0x10e   : > { %827 = vst [vmem:[%s1255_s19 + $0x40] sm:$0xff] %v795_v63  ;;  %843 = vst [vmem:[%s1255_s19 + $0xc0] sm:$0xff] %v811_v0  ;;  %v796_v7 = vadd.f32 %v1250_v24, %v589_v5  ;;  %v812_v8 = vadd.f32 %v1250_v24, %v653_v6 }
 0x10f   : > { %830 = vst [vmem:[%s1255_s19 + $0x58] sm:$0xff] %v798_v3  ;;  %846 = vst [vmem:[%s1255_s19 + $0xd8] sm:$0xff] %v814_v4 }
 0x110   : > { %828 = vst [vmem:[%s1255_s19 + $0x48] sm:$0xff] %v796_v7  ;;  %844 = vst [vmem:[%s1255_s19 + $0xc8] sm:$0xff] %v812_v8 }
 0x112   : > { %v1054_v9 = vpop.f32.mrb[12].mxu0  ;;  %v1070_v10 = vpop.f32.mrb[12].mxu1 }
 0x113   : > { %v801_v11 = vadd.f32 %v1054_v9, %v1250_v24  ;;  %v817_v12 = vadd.f32 %v1070_v10, %v1250_v24  ;;  %v602_v13 = vpop.f32.mrb[13].mxu0  ;;  %v666_v14 = vpop.f32.mrb[13].mxu1 }
 0x114   : > { %v799_v15 = vadd.f32 %v1250_v24, %v602_v13  ;;  %v815_v16 = vadd.f32 %v1250_v24, %v666_v14  ;;  %v1055_v17 = vpop.f32.mrb[14].mxu0  ;;  %v1071_v18 = vpop.f32.mrb[14].mxu1 }
 0x115   : > { %833 = vst [vmem:[%s1255_s19 + $0x70] sm:$0xff] %v801_v11  ;;  %849 = vst [vmem:[%s1255_s19 + $0xf0] sm:$0xff] %v817_v12  ;;  %v802_v19 = vadd.f32 %v1055_v17, %v1250_v24  ;;  %v818_v20 = vadd.f32 %v1071_v18, %v1250_v24  ;;  %v605_v21 = vpop.f32.mrb[15].mxu0  ;;  %v669_v22 = vpop.f32.mrb[15].mxu1 }
 0x116   : > { %831 = vst [vmem:[%s1255_s19 + $0x60] sm:$0xff] %v799_v15  ;;  %847 = vst [vmem:[%s1255_s19 + $0xe0] sm:$0xff] %v815_v16  ;;  %v800_v23 = vadd.f32 %v1250_v24, %v605_v21  ;;  %v816_v25 = vadd.f32 %v1250_v24, %v669_v22 }
 0x117   : > { %834 = vst [vmem:[%s1255_s19 + $0x78] sm:$0xff] %v802_v19  ;;  %850 = vst [vmem:[%s1255_s19 + $0xf8] sm:$0xff] %v818_v20 }
 0x118   : > { %832 = vst [vmem:[%s1255_s19 + $0x68] sm:$0xff] %v800_v23  ;;  %848 = vst [vmem:[%s1255_s19 + $0xe8] sm:$0xff] %v816_v25 }
 0x119 PF: > { %s13_s14 = sadd.s32 1, %s1158_s14   ;;  %s1334_s12 = smov %s1154_s13 }
 0x11a   : > { %p10_p5 = scmp.ge.s32.totalorder %s13_s14, 4   ;;  %s1335_s13 = smov %s1337_s15 }
 0x11c   :  { %12 = sbr.rel (!%p10_p5) target bundleno = 2 (0x2), region = 76 }

// kernel: unet_forward.67
= control target key start
LH: loop header
LB: loop body
LE: loop exit
PB: predicated region body
PF: predicated region fallthrough
CT: control target
= control target key end

     0   :  { %s950_s0 = inlined_call_operand.vmem [shape: f32[8,2048], index: 0, kind: input, shape index: {}]   ;;  %s951_s1 = inlined_call_operand.vmem [shape: f32[1,2048], index: 1, kind: input, shape index: {}]   ;;  %s952_s2 = inlined_call_operand.vmem [shape: f32[1,2048], index: 2, kind: input, shape index: {}]   ;;  %s953_s3 = inlined_call_operand.vmem [shape: f32[8,2048], index: 3, kind: output, shape index: {}]  }
   0x1   :  { %v523_v0 = vld [vmem:[%s950_s0] sm:$0xff]  ;;  %v528_v1 = vld [vmem:[%s950_s0 + $0x8] sm:$0xff]  ;;  %v533_v2 = vld [vmem:[%s950_s0 + $0x10] sm:$0xff] }
   0x2   :  { %v30_v3 = vadd.f32 %v528_v1, %v523_v0  ;;  %v48_v4 = vmul.f32 %v523_v0, %v523_v0  ;;  %v49_v5 = vmul.f32 %v528_v1, %v528_v1  ;;  %v544_v6 = vld [vmem:[%s950_s0 + $0x18] sm:$0xff]  ;;  %v50_v7 = vmul.f32 %v533_v2, %v533_v2  ;;  %v552_v9 = vld [vmem:[%s950_s0 + $0x20] sm:$0xff]  ;;  %v560_v13 = vld [vmem:[%s950_s0 + $0x28] sm:$0xff] }
   0x3   :  { %v51_v10 = vmul.f32 %v544_v6, %v544_v6  ;;  %v52_v14 = vmul.f32 %v552_v9, %v552_v9  ;;  %v568_v17 = vld [vmem:[%s950_s0 + $0x30] sm:$0xff]  ;;  %v53_v18 = vmul.f32 %v560_v13, %v560_v13  ;;  %v576_v21 = vld [vmem:[%s950_s0 + $0x38] sm:$0xff]  ;;  %v584_v25 = vld [vmem:[%s950_s0 + $0x40] sm:$0xff] }
   0x4   :  { %v31_v8 = vadd.f32 %v30_v3, %v533_v2  ;;  %v64_v11 = vadd.f32 %v49_v5, %v48_v4  ;;  %v54_v22 = vmul.f32 %v568_v17, %v568_v17  ;;  %v55_v26 = vmul.f32 %v576_v21, %v576_v21  ;;  %v592_v29 = vld [vmem:[%s950_s0 + $0x48] sm:$0xff]  ;;  %v600_v33 = vld [vmem:[%s950_s0 + $0x50] sm:$0xff]  ;;  %v608_v37 = vld [vmem:[%s950_s0 + $0x58] sm:$0xff] }
   0x5   :  { %v56_v30 = vmul.f32 %v584_v25, %v584_v25  ;;  %v57_v34 = vmul.f32 %v592_v29, %v592_v29  ;;  %v58_v38 = vmul.f32 %v600_v33, %v600_v33  ;;  %v616_v41 = vld [vmem:[%s950_s0 + $0x60] sm:$0xff]  ;;  %v59_v42 = vmul.f32 %v608_v37, %v608_v37  ;;  %v624_v45 = vld [vmem:[%s950_s0 + $0x68] sm:$0xff]  ;;  %v632_v49 = vld [vmem:[%s950_s0 + $0x70] sm:$0xff] }
   0x6   :  { %v32_v12 = vadd.f32 %v31_v8, %v544_v6  ;;  %v65_v15 = vadd.f32 %v64_v11, %v50_v7  ;;  %v60_v46 = vmul.f32 %v616_v41, %v616_v41  ;;  %v61_v50 = vmul.f32 %v624_v45, %v624_v45  ;;  %v640_v53 = vld [vmem:[%s950_s0 + $0x78] sm:$0xff] }
   0x7   :  { %v62_v54 = vmul.f32 %v632_v49, %v632_v49  ;;  %v63_v57 = vmul.f32 %v640_v53, %v640_v53  ;;  %v122_v3 = vlaneseq }
   0x8   :  { %v33_v16 = vadd.f32 %v32_v12, %v552_v9  ;;  %v66_v19 = vadd.f32 %v65_v15, %v51_v10 }
   0x9   :  { %v123_v8 = vshrl.u32 %v122_v3, 7 }
   0xa   :  { %v34_v20 = vadd.f32 %v33_v16, %v560_v13  ;;  %v67_v23 = vadd.f32 %v66_v19, %v52_v14  ;;  %v665_v19 = vld [vmem:[%s951_s1] sm:$0xff] }
   0xb   :  { %v652_v12 = vsub.s32 0, %v123_v8  ;;  %v654_v14 = vsub.s32 1, %v123_v8  ;;  %v656_v15 = vsub.s32 2, %v123_v8  ;;  %v658_v16 = vsub.s32 3, %v123_v8 }
   0xc   :  { %v35_v24 = vadd.f32 %v34_v20, %v568_v17  ;;  %v68_v27 = vadd.f32 %v67_v23, %v53_v18  ;;  %v660_v18 = vsub.s32 4, %v123_v8  ;;  %v667_v20 = vsub.s32 5, %v123_v8 }
   0xd   :  { %v671_v23 = vsub.s32 7, %v123_v8 }
   0xe   :  { %v36_v28 = vadd.f32 %v35_v24, %v576_v21  ;;  %v69_v31 = vadd.f32 %v68_v27, %v54_v22  ;;  %v669_v22 = vsub.s32 6, %v123_v8  ;;  %v676_v24 = vld [vmem:[%s951_s1 + $0x8] sm:$0xff]  ;;  %v129_v27 = vrot.slane %v665_v19, %v654_v14 }
  0x10   :  { %v37_v32 = vadd.f32 %v36_v28, %v584_v25  ;;  %v70_v35 = vadd.f32 %v69_v31, %v55_v26  ;;  %v125_v26 = vrot.slane %v665_v19, %v652_v12  ;;  %v133_v28 = vrot.slane %v665_v19, %v656_v15 }
  0x11   :  { %v141_v31 = vrot.slane %v665_v19, %v660_v18 }
  0x12   :  { %v38_v36 = vadd.f32 %v37_v32, %v592_v29  ;;  %v71_v39 = vadd.f32 %v70_v35, %v56_v30  ;;  %v137_v30 = vrot.slane %v665_v19, %v658_v16  ;;  %v145_v32 = vrot.slane %v665_v19, %v667_v20 }
  0x13   :  { %v153_v35 = vrot.slane %v665_v19, %v671_v23 }
  0x14   :  { %v39_v40 = vadd.f32 %v38_v36, %v600_v33  ;;  %v72_v43 = vadd.f32 %v71_v39, %v57_v34  ;;  %v149_v34 = vrot.slane %v665_v19, %v669_v22  ;;  %v697_v36 = vld [vmem:[%s952_s2] sm:$0xff]  ;;  %v161_v39 = vrot.slane %v676_v24, %v654_v14 }
  0x16   :  { %v40_v44 = vadd.f32 %v39_v40, %v608_v37  ;;  %v73_v47 = vadd.f32 %v72_v43, %v58_v38  ;;  %v157_v38 = vrot.slane %v676_v24, %v652_v12  ;;  %v165_v40 = vrot.slane %v676_v24, %v656_v15 }
  0x17   :  { %v173_v43 = vrot.slane %v676_v24, %v660_v18 }
  0x18   :  { %v41_v48 = vadd.f32 %v40_v44, %v616_v41  ;;  %v74_v51 = vadd.f32 %v73_v47, %v59_v42  ;;  %v169_v42 = vrot.slane %v676_v24, %v658_v16  ;;  %v177_v44 = vrot.slane %v676_v24, %v667_v20 }
  0x1a   :  { %v42_v52 = vadd.f32 %v41_v48, %v624_v45  ;;  %v75_v55 = vadd.f32 %v74_v51, %v60_v46  ;;  %v718_v48 = vld [vmem:[%s952_s2 + $0x8] sm:$0xff]  ;;  %v229_v51 = vrot.slane %v697_v36, %v654_v14 }
  0x1c   :  { %v43_v56 = vadd.f32 %v42_v52, %v632_v49  ;;  %v76_v58 = vadd.f32 %v75_v55, %v61_v50  ;;  %v225_v50 = vrot.slane %v697_v36, %v652_v12  ;;  %v233_v52 = vrot.slane %v697_v36, %v656_v15 }
  0x1d   :  { %v241_v55 = vrot.slane %v697_v36, %v660_v18 }
  0x1e   :  { %v44_v59 = vadd.f32 %v43_v56, %v640_v53  ;;  %v77_v60 = vadd.f32 %v76_v58, %v62_v54  ;;  %v237_v54 = vrot.slane %v697_v36, %v658_v16  ;;  %v245_v56 = vrot.slane %v697_v36, %v667_v20 }
  0x1f   :  { %v253_v58 = vrot.slane %v697_v36, %v671_v23 }
  0x20   :  { %45 = vadd.xlane.f32.xlu0 %v44_v59  ;;  %v78_v61 = vadd.f32 %v77_v60, %v63_v57  ;;  %v249_v57 = vrot.slane %v697_v36, %v669_v22  ;;  %v955_v36 = vrot.slane %v676_v24, %v669_v22 }
  0x24   :  { %79 = vadd.xlane.f32.xlu0 %v78_v61 }
  0xad   :  { %v46_v62 = vpop.xlane.xlu0 %45 }
  0xae   :  { %v648_v63 = vmul.f32 0.00048828125, %v46_v62 }
  0xb0   :  { %v82_v7 = vmul.f32 %v648_v63, %v648_v63  ;;  %v86_v59 = vsub.f32 %v523_v0, %v648_v63  ;;  %v87_v60 = vsub.f32 %v528_v1, %v648_v63  ;;  %v88_v61 = vsub.f32 %v533_v2, %v648_v63 }
  0xb1   :  { %v80_v4 = vpop.xlane.xlu0 %79  ;;  %v90_v1 = vsub.f32 %v552_v9, %v648_v63  ;;  %v96_v9 = vsub.f32 %v600_v33, %v648_v63 }
  0xb2   :  { %v81_v5 = vmul.f32 0.00048828125, %v80_v4  ;;  %v89_v4 = vsub.f32 %v544_v6, %v648_v63  ;;  %v92_v6 = vsub.f32 %v568_v17, %v648_v63  ;;  %v94_v17 = vsub.f32 %v584_v25, %v648_v63 }
  0xb3   :  { %v99_v25 = vsub.f32 %v624_v45, %v648_v63 }
  0xb4   :  { %v83_v10 = vsub.f32 %v81_v5, %v82_v7 }
  0xb6   :  { %v84_v11 = vadd.f32 1e-05, %v83_v10 }
  0xb8   :  { %434 = vrsqrt.f32 %v84_v11  ;;  %v91_v11 = vsub.f32 %v560_v13, %v648_v63  ;;  %v93_v13 = vsub.f32 %v576_v21, %v648_v63  ;;  %v98_v21 = vsub.f32 %v616_v41, %v648_v63 }
  0xb9   :  { %v101_v41 = vsub.f32 %v640_v53, %v648_v63 }
  0xc2   :  { %v435_v3 = vpop.eup %434 }
  0xc3   :  { %v102_v2 = vmul.f32 %v435_v3, %v86_v59  ;;  %v103_v8 = vmul.f32 %v435_v3, %v87_v60  ;;  %v104_v10 = vmul.f32 %v435_v3, %v88_v61  ;;  %v105_v47 = vmul.f32 %v435_v3, %v89_v4 }
  0xc4   :  { %v106_v7 = vmul.f32 %v435_v3, %v90_v1  ;;  %v107_v60 = vmul.f32 %v435_v3, %v91_v11  ;;  %v108_v61 = vmul.f32 %v435_v3, %v92_v6  ;;  %v95_v4 = vsub.f32 %v592_v29, %v648_v63 }
  0xc5   :  { %v202_v1 = vmul.f32 %v125_v26, %v102_v2  ;;  %v203_v5 = vmul.f32 %v129_v27, %v103_v8  ;;  %v204_v0 = vmul.f32 %v133_v28, %v104_v10  ;;  %v97_v59 = vsub.f32 %v608_v37, %v648_v63 }
  0xc6   :  { %v109_v46 = vmul.f32 %v435_v3, %v93_v13  ;;  %v205_v62 = vmul.f32 %v137_v30, %v105_v47  ;;  %v110_v11 = vmul.f32 %v435_v3, %v94_v17  ;;  %v206_v6 = vmul.f32 %v141_v31, %v106_v7 }
  0xc7   :  { %v100_v29 = vsub.f32 %v632_v49, %v648_v63  ;;  %v111_v26 = vmul.f32 %v435_v3, %v95_v4  ;;  %v207_v27 = vmul.f32 %v145_v32, %v107_v60  ;;  %v208_v28 = vmul.f32 %v149_v34, %v108_v61 }
  0xc8   :  { %v112_v33 = vmul.f32 %v435_v3, %v96_v9  ;;  %v782_v2 = vadd.f32 %v225_v50, %v202_v1  ;;  %v784_v37 = vadd.f32 %v229_v51, %v203_v5  ;;  %v786_v30 = vadd.f32 %v233_v52, %v204_v0 }
  0xc9   :  { %v113_v47 = vmul.f32 %v435_v3, %v97_v59  ;;  %v209_v45 = vmul.f32 %v153_v35, %v109_v46  ;;  %v793_v31 = vadd.f32 %v237_v54, %v205_v62  ;;  %v114_v49 = vmul.f32 %v435_v3, %v98_v21 }
  0xca   :  { %v115_v32 = vmul.f32 %v435_v3, %v99_v25  ;;  %v210_v34 = vmul.f32 %v157_v38, %v110_v11  ;;  %v798_v50 = vadd.f32 %v241_v55, %v206_v6  ;;  %v116_v51 = vmul.f32 %v435_v3, %v100_v29 }
  0xcb   :  { %v211_v53 = vmul.f32 %v161_v39, %v111_v26  ;;  %v803_v63 = vadd.f32 %v245_v56, %v207_v27  ;;  %v805_v52 = vadd.f32 %v249_v57, %v208_v28  ;;  %v212_v19 = vmul.f32 %v165_v40, %v112_v33 }
  0xcc   :  { %v318_v35 = vsub.f32 0.0, %v782_v2  ;;  %v319_v46 = vsub.f32 0.0, %v784_v37  ;;  %v320_v38 = vsub.f32 0.0, %v786_v30  ;;  %v117_v54 = vmul.f32 %v435_v3, %v101_v41 }
  0xcd   :  { %v213_v55 = vmul.f32 %v169_v42, %v113_v47  ;;  %v819_v39 = vadd.f32 %v253_v58, %v209_v45  ;;  %v321_v56 = vsub.f32 0.0, %v793_v31  ;;  %v214_v40 = vmul.f32 %v173_v43, %v114_v49 }
  0xce   :  { %v215_v57 = vmul.f32 %v177_v44, %v115_v32  ;;  %v954_v62 = vrot.slane %v718_v48, %v652_v12  ;;  %v322_v42 = vsub.f32 0.0, %v798_v50  ;;  %v216_v58 = vmul.f32 %v955_v36, %v116_v51 }
  0xcf   :  { %v956_v5 = vrot.slane %v718_v48, %v654_v14  ;;  %v323_v43 = vsub.f32 0.0, %v803_v63  ;;  %v324_v44 = vsub.f32 0.0, %v805_v52  ;;  %v957_v12 = vrot.slane %v718_v48, %v656_v15 }
  0xd0   :  { %v831_v3 = vadd.f32 %v954_v62, %v210_v34  ;;  %v334_v8 = vmul.f32 1.442695, %v318_v35  ;;  %v336_v10 = vmul.f32 1.442695, %v319_v46  ;;  %v338_v9 = vmul.f32 1.442695, %v320_v38 }
  0xd1   :  { %v840_v7 = vadd.f32 %v956_v5, %v211_v53  ;;  %v847_v0 = vadd.f32 %v957_v12, %v212_v19  ;;  %v958_v59 = vrot.slane %v676_v24, %v671_v23  ;;  %v959_v14 = vrot.slane %v718_v48, %v658_v16 }
  0xd2   :  { %v325_v60 = vsub.f32 0.0, %v819_v39  ;;  %v340_v61 = vmul.f32 1.442695, %v321_v56  ;;  %v960_v15 = vrot.slane %v718_v48, %v660_v18  ;;  %v326_v1 = vsub.f32 0.0, %v831_v3 }
  0xd3   :  { %v217_v13 = vmul.f32 %v958_v59, %v117_v54  ;;  %v855_v17 = vadd.f32 %v959_v14, %v213_v55  ;;  %436 = vpow2.f32 %v334_v8  ;;  %v342_v21 = vmul.f32 1.442695, %v322_v42 }
  0xd4   :  { %v861_v4 = vadd.f32 %v960_v15, %v214_v40  ;;  %v961_v24 = vrot.slane %v718_v48, %v667_v20  ;;  %v327_v16 = vsub.f32 0.0, %v840_v7  ;;  %438 = vpow2.f32 %v336_v10 }
  0xd5   :  { %v344_v11 = vmul.f32 1.442695, %v323_v43  ;;  %v962_v6 = vrot.slane %v718_v48, %v669_v22  ;;  %v328_v18 = vsub.f32 0.0, %v847_v0  ;;  %440 = vpow2.f32 %v338_v9 }
  0xd6   :  { %v867_v25 = vadd.f32 %v961_v24, %v215_v57  ;;  %v346_v26 = vmul.f32 1.442695, %v324_v44  ;;  %v963_v27 = vrot.slane %v718_v48, %v671_v23  ;;  %v329_v20 = vsub.f32 0.0, %v855_v17 }
  0xd7   :  { %v873_v29 = vadd.f32 %v962_v6, %v216_v58  ;;  %442 = vpow2.f32 %v340_v61  ;;  %v348_v33 = vmul.f32 1.442695, %v325_v60  ;;  %v330_v41 = vsub.f32 0.0, %v861_v4 }
  0xd8   :  { %v879_v28 = vadd.f32 %v963_v27, %v217_v13  ;;  %444 = vpow2.f32 %v342_v21  ;;  %v350_v47 = vmul.f32 1.442695, %v326_v1  ;;  %v331_v22 = vsub.f32 0.0, %v867_v25 }
  0xd9   :  { %446 = vpow2.f32 %v344_v11  ;;  %v352_v45 = vmul.f32 1.442695, %v327_v16  ;;  %v332_v49 = vsub.f32 0.0, %v873_v29  ;;  %v354_v32 = vmul.f32 1.442695, %v328_v18 }
  0xda   :  { %448 = vpow2.f32 %v346_v26  ;;  %v333_v23 = vsub.f32 0.0, %v879_v28  ;;  %v356_v48 = vmul.f32 1.442695, %v329_v20  ;;  %v358_v34 = vmul.f32 1.442695, %v330_v41 }
  0xdb   :  { %450 = vpow2.f32 %v348_v33  ;;  %v360_v51 = vmul.f32 1.442695, %v331_v22  ;;  %v362_v19 = vmul.f32 1.442695, %v332_v49 }
  0xdc   :  { %452 = vpow2.f32 %v350_v47  ;;  %v364_v46 = vmul.f32 1.442695, %v333_v23 }
  0xdd   :  { %454 = vpow2.f32 %v352_v45  ;;  %v437_v53 = vpop.eup %436 }
  0xde   :  { %456 = vpow2.f32 %v354_v32  ;;  %v439_v35 = vpop.eup %438  ;;  %v366_v54 = vadd.f32 1.0, %v437_v53 }
  0xdf   :  { %458 = vpow2.f32 %v356_v48  ;;  %v441_v38 = vpop.eup %440  ;;  %v367_v56 = vadd.f32 1.0, %v439_v35 }
  0xe0   :  { %460 = vpow2.f32 %v358_v34  ;;  %v368_v57 = vadd.f32 1.0, %v441_v38 }
  0xe1   :  { %v443_v55 = vpop.eup %442  ;;  %462 = vpow2.f32 %v360_v51 }
  0xe2   :  { %v445_v40 = vpop.eup %444  ;;  %464 = vpow2.f32 %v362_v19  ;;  %v369_v42 = vadd.f32 1.0, %v443_v55 }
  0xe3   :  { %v447_v62 = vpop.eup %446  ;;  %466 = vpow2.f32 %v364_v46  ;;  %v370_v58 = vadd.f32 1.0, %v445_v40 }
  0xe4   :  { %v449_v36 = vpop.eup %448  ;;  %468 = vrcp.f32 %v366_v54  ;;  %v371_v43 = vadd.f32 1.0, %v447_v62 }
  0xe5   :  { %v451_v5 = vpop.eup %450  ;;  %470 = vrcp.f32 %v367_v56  ;;  %v372_v12 = vadd.f32 1.0, %v449_v36 }
  0xe6   :  { %v453_v44 = vpop.eup %452  ;;  %472 = vrcp.f32 %v368_v57  ;;  %v373_v10 = vadd.f32 1.0, %v451_v5 }
  0xe7   :  { %v455_v8 = vpop.eup %454  ;;  %474 = vrcp.f32 %v369_v42  ;;  %v374_v59 = vadd.f32 1.0, %v453_v44 }
  0xe8   :  { %v457_v9 = vpop.eup %456  ;;  %476 = vrcp.f32 %v370_v58  ;;  %v375_v14 = vadd.f32 1.0, %v455_v8 }
  0xe9   :  { %v459_v13 = vpop.eup %458  ;;  %478 = vrcp.f32 %v371_v43  ;;  %v376_v61 = vadd.f32 1.0, %v457_v9 }
  0xea   :  { %v461_v60 = vpop.eup %460  ;;  %480 = vrcp.f32 %v372_v12  ;;  %v377_v1 = vadd.f32 1.0, %v459_v13 }
  0xeb   :  { %v463_v15 = vpop.eup %462  ;;  %482 = vrcp.f32 %v373_v10  ;;  %v378_v24 = vadd.f32 1.0, %v461_v60 }
  0xec   :  { %v465_v21 = vpop.eup %464  ;;  %484 = vrcp.f32 %v374_v59  ;;  %v379_v11 = vadd.f32 1.0, %v463_v15 }
  0xed   :  { %v467_v16 = vpop.eup %466  ;;  %486 = vrcp.f32 %v375_v14  ;;  %v380_v18 = vadd.f32 1.0, %v465_v21 }
  0xee   :  { %v469_v6 = vpop.eup %468  ;;  %488 = vrcp.f32 %v376_v61  ;;  %v381_v27 = vadd.f32 1.0, %v467_v16 }
  0xef   :  { %v471_v26 = vpop.eup %470  ;;  %490 = vrcp.f32 %v377_v1  ;;  %v398_v20 = vmul.f32 %v469_v6, %v782_v2 }
  0xf0   :  { %v473_v33 = vpop.eup %472  ;;  %492 = vrcp.f32 %v378_v24  ;;  %v399_v41 = vmul.f32 %v471_v26, %v784_v37 }
  0xf1   :  { %v475_v47 = vpop.eup %474  ;;  %494 = vrcp.f32 %v379_v11  ;;  %v400_v22 = vmul.f32 %v473_v33, %v786_v30  ;;  %414 = vst [vmem:[%s953_s3] sm:$0xff] %v398_v20 }
  0xf2   :  { %v477_v45 = vpop.eup %476  ;;  %496 = vrcp.f32 %v380_v18  ;;  %v401_v49 = vmul.f32 %v475_v47, %v793_v31  ;;  %415 = vst [vmem:[%s953_s3 + $0x8] sm:$0xff] %v399_v41 }
  0xf3   :  { %v479_v2 = vpop.eup %478  ;;  %498 = vrcp.f32 %v381_v27  ;;  %v402_v37 = vmul.f32 %v477_v45, %v798_v50  ;;  %416 = vst [vmem:[%s953_s3 + $0x10] sm:$0xff] %v400_v22 }
  0xf4   :  { %v481_v30 = vpop.eup %480  ;;  %v403_v32 = vmul.f32 %v479_v2, %v803_v63  ;;  %417 = vst [vmem:[%s953_s3 + $0x18] sm:$0xff] %v401_v49 }
  0xf5   :  { %v483_v31 = vpop.eup %482  ;;  %v404_v23 = vmul.f32 %v481_v30, %v805_v52  ;;  %418 = vst [vmem:[%s953_s3 + $0x20] sm:$0xff] %v402_v37 }
  0xf6   :  { %v485_v48 = vpop.eup %484  ;;  %v405_v50 = vmul.f32 %v483_v31, %v819_v39  ;;  %419 = vst [vmem:[%s953_s3 + $0x28] sm:$0xff] %v403_v32 }
  0xf7   :  { %v487_v34 = vpop.eup %486  ;;  %v406_v63 = vmul.f32 %v485_v48, %v831_v3  ;;  %420 = vst [vmem:[%s953_s3 + $0x30] sm:$0xff] %v404_v23 }
  0xf8   :  { %v489_v51 = vpop.eup %488  ;;  %v407_v52 = vmul.f32 %v487_v34, %v840_v7  ;;  %421 = vst [vmem:[%s953_s3 + $0x38] sm:$0xff] %v405_v50 }
  0xf9   :  { %v491_v53 = vpop.eup %490  ;;  %v408_v39 = vmul.f32 %v489_v51, %v847_v0  ;;  %422 = vst [vmem:[%s953_s3 + $0x40] sm:$0xff] %v406_v63 }
  0xfa   :  { %v493_v19 = vpop.eup %492  ;;  %v409_v3 = vmul.f32 %v491_v53, %v855_v17  ;;  %423 = vst [vmem:[%s953_s3 + $0x48] sm:$0xff] %v407_v52 }
  0xfb   :  { %v495_v35 = vpop.eup %494  ;;  %v410_v7 = vmul.f32 %v493_v19, %v861_v4  ;;  %424 = vst [vmem:[%s953_s3 + $0x50] sm:$0xff] %v408_v39 }
  0xfc   :  { %v497_v46 = vpop.eup %496  ;;  %v411_v0 = vmul.f32 %v495_v35, %v867_v25  ;;  %425 = vst [vmem:[%s953_s3 + $0x58] sm:$0xff] %v409_v3 }
  0xfd   :  { %v499_v38 = vpop.eup %498  ;;  %v412_v17 = vmul.f32 %v497_v46, %v873_v29  ;;  %426 = vst [vmem:[%s953_s3 + $0x60] sm:$0xff] %v410_v7 }
  0xfe   :  { %v413_v4 = vmul.f32 %v499_v38, %v879_v28  ;;  %427 = vst [vmem:[%s953_s3 + $0x68] sm:$0xff] %v411_v0 }
  0xff   :  { %428 = vst [vmem:[%s953_s3 + $0x70] sm:$0xff] %v412_v17 }
 0x100   :  { %429 = vst [vmem:[%s953_s3 + $0x78] sm:$0xff] %v413_v4 }

// kernel: unet_forward.64
= control target key start
LH: loop header
LB: loop body
LE: loop exit
PB: predicated region body
PF: predicated region fallthrough
CT: control target
= control target key end

     0   :  { %v230_v0 = vmov 0.0   ;;  %vm231_vm0 = vmmov 0   ;;  %s288_s1 = inlined_call_operand.vmem [shape: bf16[128,128], index: 1, kind: input, shape index: {}]   ;;  %s289_s0 = inlined_call_operand.vmem [shape: bf16[16,128], index: 0, kind: input, shape index: {}]   ;;  %s290_s2 = inlined_call_operand.vmem [shape: f32[1,128], index: 2, kind: input, shape index: {}]   ;;  %s291_s3 = inlined_call_operand.vmem [shape: f32[16,128], index: 3, kind: output, shape index: {}]  }
   0x1   :  { %191 = vmatprep.subr.bf16.mxu0 %v230_v0  ;;  %v213_v1 = vld [vmem:[%s288_s1] sm:$0xff]   ;;  %207 = vmatprep.mubr.msk.bf16.mxu0 %vm231_vm0, %v230_v0  ;;  %v214_v2 = vld [vmem:[%s288_s1 + $0x8] sm:$0xff]   ;;  %v215_v3 = vld [vmem:[%s288_s1 + $0x10] sm:$0xff]  }
   0x2   :  { %192 = vmatpush3.bf16.msra.mxu0 %v213_v1  ;;  %v216_v4 = vld [vmem:[%s288_s1 + $0x18] sm:$0xff]   ;;  %v217_v5 = vld [vmem:[%s288_s1 + $0x20] sm:$0xff]   ;;  %v218_v6 = vld [vmem:[%s288_s1 + $0x28] sm:$0xff]  }
   0x3   :  { %193 = vmatprep.subr.bf16.mxu0 %v230_v0  ;;  %v219_v7 = vld [vmem:[%s288_s1 + $0x30] sm:$0xff]   ;;  %v220_v8 = vld [vmem:[%s288_s1 + $0x38] sm:$0xff]   ;;  %v221_v9 = vld [vmem:[%s289_s0] sm:$0xff]  }
   0x4   :  { %v181_v10 = vld [vmem:[%s290_s2] ss:$0 sm:$0xff] }
   0x6   :  { %194 = vmatpush3.bf16.msra.mxu0 %v214_v2 }
   0x7   :  { %195 = vmatprep.subr.bf16.mxu0 %v230_v0 }
   0xa   :  { %196 = vmatpush3.bf16.msra.mxu0 %v215_v3 }
   0xb   :  { %197 = vmatprep.subr.bf16.mxu0 %v230_v0 }
   0xe   :  { %198 = vmatpush3.bf16.msra.mxu0 %v216_v4 }
   0xf   :  { %199 = vmatprep.subr.bf16.mxu0 %v230_v0 }
  0x12   :  { %200 = vmatpush3.bf16.msra.mxu0 %v217_v5 }
  0x13   :  { %201 = vmatprep.subr.bf16.mxu0 %v230_v0 }
  0x16   :  { %202 = vmatpush3.bf16.msra.mxu0 %v218_v6 }
  0x17   :  { %203 = vmatprep.subr.bf16.mxu0 %v230_v0 }
  0x1a   :  { %204 = vmatpush3.bf16.msra.mxu0 %v219_v7 }
  0x1b   :  { %205 = vmatprep.subr.bf16.mxu0 %v230_v0 }
  0x1e   :  { %206 = vmatpush3.bf16.msra.mxu0 %v220_v8 }
  0x21   :  { %208 = vmatmul.mubr.bf16.vlgmr.msra.gmra.mrb[0].mxu0 %v221_v9 }
  0xf4   :  { %v129_v11 = vpop.f32.mrb[0].mxu0 }
  0xf5   :  { %v152_v12 = vadd.f32 %v181_v10, %v129_v11  ;;  %v209_v13 = vpop.f32.mrb[1].mxu0 }
  0xf6   :  { %v132_v14 = vpop.f32.mrb[2].mxu0 }
  0xf7   :  { %v154_v15 = vsub.f32 0.0, %v152_v12  ;;  %v153_v16 = vadd.f32 %v181_v10, %v132_v14  ;;  %v210_v17 = vpop.f32.mrb[3].mxu0 }
  0xf9   :  { %v156_v18 = vmul.f32 1.442695, %v154_v15  ;;  %v155_v19 = vsub.f32 0.0, %v153_v16 }
  0xfb   :  { %222 = vpow2.f32 %v156_v18  ;;  %v158_v20 = vmul.f32 1.442695, %v155_v19 }
  0xfd   :  { %224 = vpow2.f32 %v158_v20 }
 0x105   :  { %v223_v21 = vpop.eup %222 }
 0x106   :  { %v160_v22 = vadd.f32 1.0, %v223_v21 }
 0x107   :  { %v225_v23 = vpop.eup %224 }
 0x108   :  { %226 = vrcp.f32 %v160_v22  ;;  %v161_v24 = vadd.f32 1.0, %v225_v23 }
 0x10a   :  { %228 = vrcp.f32 %v161_v24 }
 0x112   :  { %v227_v25 = vpop.eup %226 }
 0x113   :  { %v164_v26 = vmul.f32 %v227_v25, %v152_v12 }
 0x114   :  { %v229_v27 = vpop.eup %228 }
 0x115   :  { %166 = vst [vmem:[%s291_s3] sm:$0xff] %v164_v26  ;;  %v165_v28 = vmul.f32 %v229_v27, %v153_v16 }
 0x117   :  { %167 = vst [vmem:[%s291_s3 + $0x8] sm:$0xff] %v165_v28 }

// kernel: unet_forward.68
= control target key start
LH: loop header
LB: loop body
LE: loop exit
PB: predicated region body
PF: predicated region fallthrough
CT: control target
= control target key end

     0   :  { %v210_v0 = vmov 0.0   ;;  %vm211_vm0 = vmmov 0   ;;  %s268_s1 = inlined_call_operand.vmem [shape: bf16[128,128], index: 1, kind: input, shape index: {}]   ;;  %s269_s0 = inlined_call_operand.vmem [shape: bf16[16,128], index: 0, kind: input, shape index: {}]   ;;  %s270_s2 = inlined_call_operand.vmem [shape: f32[1,128], index: 2, kind: input, shape index: {}]   ;;  %s271_s3 = inlined_call_operand.vmem [shape: f32[16,128], index: 3, kind: output, shape index: {}]  }
   0x1   :  { %179 = vmatprep.subr.bf16.mxu0 %v210_v0  ;;  %v201_v1 = vld [vmem:[%s268_s1] sm:$0xff]   ;;  %195 = vmatprep.mubr.msk.bf16.mxu0 %vm211_vm0, %v210_v0  ;;  %v202_v2 = vld [vmem:[%s268_s1 + $0x8] sm:$0xff]   ;;  %v203_v3 = vld [vmem:[%s268_s1 + $0x10] sm:$0xff]  }
   0x2   :  { %180 = vmatpush3.bf16.msra.mxu0 %v201_v1  ;;  %v204_v4 = vld [vmem:[%s268_s1 + $0x18] sm:$0xff]   ;;  %v205_v5 = vld [vmem:[%s268_s1 + $0x20] sm:$0xff]   ;;  %v206_v6 = vld [vmem:[%s268_s1 + $0x28] sm:$0xff]  }
   0x3   :  { %181 = vmatprep.subr.bf16.mxu0 %v210_v0  ;;  %v207_v7 = vld [vmem:[%s268_s1 + $0x30] sm:$0xff]   ;;  %v208_v8 = vld [vmem:[%s268_s1 + $0x38] sm:$0xff]   ;;  %v209_v9 = vld [vmem:[%s269_s0] sm:$0xff]  }
   0x4   :  { %v169_v10 = vld [vmem:[%s270_s2] ss:$0 sm:$0xff] }
   0x6   :  { %182 = vmatpush3.bf16.msra.mxu0 %v202_v2 }
   0x7   :  { %183 = vmatprep.subr.bf16.mxu0 %v210_v0 }
   0xa   :  { %184 = vmatpush3.bf16.msra.mxu0 %v203_v3 }
   0xb   :  { %185 = vmatprep.subr.bf16.mxu0 %v210_v0 }
   0xe   :  { %186 = vmatpush3.bf16.msra.mxu0 %v204_v4 }
   0xf   :  { %187 = vmatprep.subr.bf16.mxu0 %v210_v0 }
  0x12   :  { %188 = vmatpush3.bf16.msra.mxu0 %v205_v5 }
  0x13   :  { %189 = vmatprep.subr.bf16.mxu0 %v210_v0 }
  0x16   :  { %190 = vmatpush3.bf16.msra.mxu0 %v206_v6 }
  0x17   :  { %191 = vmatprep.subr.bf16.mxu0 %v210_v0 }
  0x1a   :  { %192 = vmatpush3.bf16.msra.mxu0 %v207_v7 }
  0x1b   :  { %193 = vmatprep.subr.bf16.mxu0 %v210_v0 }
  0x1e   :  { %194 = vmatpush3.bf16.msra.mxu0 %v208_v8 }
  0x21   :  { %196 = vmatmul.mubr.bf16.vlgmr.msra.gmra.mrb[0].mxu0 %v209_v9 }
  0xf4   :  { %v129_v11 = vpop.f32.mrb[0].mxu0 }
  0xf5   :  { %v152_v12 = vadd.f32 %v169_v10, %v129_v11  ;;  %v197_v13 = vpop.f32.mrb[1].mxu0 }
  0xf6   :  { %v132_v14 = vpop.f32.mrb[2].mxu0 }
  0xf7   :  { %154 = vst [vmem:[%s271_s3] sm:$0xff] %v152_v12  ;;  %v153_v15 = vadd.f32 %v169_v10, %v132_v14  ;;  %v198_v16 = vpop.f32.mrb[3].mxu0 }
  0xf9   :  { %155 = vst [vmem:[%s271_s3 + $0x8] sm:$0xff] %v153_v15 }

// kernel: unet_forward.69
= control target key start
LH: loop header
LB: loop body
LE: loop exit
PB: predicated region body
PF: predicated region fallthrough
CT: control target
= control target key end

     0   :  { %s1326_s15 = smov 0   ;;  %s1328_s16 = smov 0   ;;  %s1513_s0 = inlined_call_operand.vmem [shape: bf16[512,128], index: 0, kind: input, shape index: {}]   ;;  %s1514_s1 = inlined_call_operand.vmem [shape: bf16[128,128], index: 1, kind: input, shape index: {}]   ;;  %s1515_s2 = inlined_call_operand.vmem [shape: f32[1,128], index: 2, kind: input, shape index: {}]   ;;  %s1516_s3 = inlined_call_operand.vmem [shape: f32[512,128], index: 3, kind: input, shape index: {}]   ;;  %s1517_s4 = inlined_call_operand.vmem [shape: f32[512,128], index: 4, kind: output, shape index: {}]  }
   0x1   :  { %s1330_s17 = smov 0  }
   0x2 LB: > { %s33_s18 = sadd.s32 1, %s1295_s16  ;;  %p1107_p0 = scmp.ge.s32.totalorder %s1299_s17, 1  ;;  %s1299_s17 = sphi %s1330_s17, %s14_s17   ;;  %s1295_s16 = sphi %s1328_s16, %s1519_s16   ;;  %s1291_s15 = sphi %s1326_s15, %s1518_s15  }
   0x3   : > { %p35_p1 = scmp.ge.s32.totalorder %s33_s18, 2  ;;  %p229_p2 = scmp.lt.s32.totalorder %s1299_s17, 3 }
   0x5   : > { %s1521_s18 = smov (%p35_p1, %s33_s18), 0  ;;  %p230_p3 = pnand %p1107_p0, %p229_p2 }
   0x6   : > { %v1253_v0 = vld [vmem:[%s1514_s1] sm:$0xff] (!%p230_p3)   ;;  %s1108_s21 = sshll.u32 (!%p230_p3), %s1291_s15, 5  ;;  %v1254_v1 = vld [vmem:[%s1514_s1 + $0x8] sm:$0xff] (!%p230_p3)   ;;  %v1255_v2 = vld [vmem:[%s1514_s1 + $0x10] sm:$0xff] (!%p230_p3)  }
   0x7   : > { %233 = sbr.rel (%p230_p3) target bundleno = 283 (0x11b), region = 36  ;;  %p281_p4 = scmp.lt.s32.totalorder (!%p230_p3), %s1108_s21, 63  ;;  %1165 = vmatprep.subr.bf16.mxu0 (!%p230_p3), %v1253_v0  ;;  %1213 = vmatprep.subr.bf16.mxu1 (!%p230_p3), %v1253_v0  ;;  %v1256_v3 = vld [vmem:[%s1514_s1 + $0x18] sm:$0xff] (!%p230_p3)   ;;  %v1257_v6 = vld [vmem:[%s1514_s1 + $0x20] sm:$0xff] (!%p230_p3)   ;;  %v1258_v7 = vld [vmem:[%s1514_s1 + $0x28] sm:$0xff] (!%p230_p3)  }
   0x8   : > { %1166 = vmatpush3.bf16.msra.mxu0 (!%p230_p3), %v1253_v0  ;;  %1221 = vmatpush3.bf16.msra.mxu1 (!%p230_p3), %v1253_v0  ;;  %v1259_v8 = vld [vmem:[%s1514_s1 + $0x30] sm:$0xff] (!%p230_p3)   ;;  %v1260_v9 = vld [vmem:[%s1514_s1 + $0x38] sm:$0xff] (!%p230_p3)   ;;  %v1401_v24 = vld [vmem:[%s1515_s2] ss:$0 sm:$0xff] (!%p230_p3) }
   0x9   : > { %1167 = vmatprep.subr.bf16.mxu0 (!%p230_p3), %v1254_v1  ;;  %1214 = vmatprep.subr.bf16.mxu1 (!%p230_p3), %v1254_v1 }
   0xc   : > { %1168 = vmatpush3.bf16.msra.mxu0 (!%p230_p3), %v1254_v1  ;;  %1222 = vmatpush3.bf16.msra.mxu1 (!%p230_p3), %v1254_v1 }
   0xd   : > { %1169 = vmatprep.subr.bf16.mxu0 (!%p230_p3), %v1255_v2  ;;  %1215 = vmatprep.subr.bf16.mxu1 (!%p230_p3), %v1255_v2 }
   0xe   : > { %s1523_s21 = smov (!%p281_p4, %s1108_s21), 63 }
   0xf   : > { %s1109_s26 = sshll.u32 %s1523_s21, 2  ;;  %s1111_s14 = sshll.u32 %s1523_s21, 3 }
  0x10   : > { %s1359_s29 = scalar_lea.vmem %s1513_s0, %s1109_s26  ;;  %1170 = vmatpush3.bf16.msra.mxu0 %v1255_v2  ;;  %1223 = vmatpush3.bf16.msra.mxu1 %v1255_v2  ;;  %s1396_s20 = scalar_lea.vmem %s1516_s3, %s1111_s14 }
  0x11   : > { %v1261_v4 = vld [vmem:[%s1359_s29] sm:$0xff]   ;;  %1171 = vmatprep.subr.bf16.mxu0 %v1256_v3  ;;  %1216 = vmatprep.subr.bf16.mxu1 %v1256_v3  ;;  %v1263_v10 = vld [vmem:[%s1359_s29 + $0x8] sm:$0xff]   ;;  %v1265_v12 = vld [vmem:[%s1359_s29 + $0x10] sm:$0xff]   ;;  %s1412_s25 = scalar_lea.vmem %s1517_s4, %s1111_s14 }
  0x12   : > { %v1262_v5 = vld [vmem:[%s1359_s29 + $0x40] sm:$0xff]   ;;  %1181 = vmatprep.mubr.bf16.mxu0 %v1261_v4  ;;  %v1264_v11 = vld [vmem:[%s1359_s29 + $0x48] sm:$0xff]   ;;  %v1266_v13 = vld [vmem:[%s1359_s29 + $0x50] sm:$0xff]  }
  0x13   : > { %1197 = vmatprep.mubr.bf16.mxu1 %v1262_v5  ;;  %v1267_v14 = vld [vmem:[%s1359_s29 + $0x18] sm:$0xff]   ;;  %v1269_v16 = vld [vmem:[%s1359_s29 + $0x20] sm:$0xff]   ;;  %v1271_v18 = vld [vmem:[%s1359_s29 + $0x28] sm:$0xff]  }
  0x14   : > { %1172 = vmatpush3.bf16.msra.mxu0 %v1256_v3  ;;  %1224 = vmatpush3.bf16.msra.mxu1 %v1256_v3  ;;  %v1268_v15 = vld [vmem:[%s1359_s29 + $0x58] sm:$0xff]   ;;  %v1270_v17 = vld [vmem:[%s1359_s29 + $0x60] sm:$0xff]   ;;  %v1272_v19 = vld [vmem:[%s1359_s29 + $0x68] sm:$0xff]  }
  0x15   : > { %1173 = vmatprep.subr.bf16.mxu0 %v1257_v6  ;;  %1217 = vmatprep.subr.bf16.mxu1 %v1257_v6  ;;  %v1273_v20 = vld [vmem:[%s1359_s29 + $0x30] sm:$0xff]   ;;  %v1275_v22 = vld [vmem:[%s1359_s29 + $0x38] sm:$0xff]   ;;  %v879_v32 = vld [vmem:[%s1396_s20] sm:$0xff] }
  0x16   : > { %v1274_v21 = vld [vmem:[%s1359_s29 + $0x70] sm:$0xff]   ;;  %v1276_v23 = vld [vmem:[%s1359_s29 + $0x78] sm:$0xff]   ;;  %v895_v34 = vld [vmem:[%s1396_s20 + $0x80] sm:$0xff] }
  0x17   : > { %v881_v26 = vld [vmem:[%s1396_s20 + $0x10] sm:$0xff]  ;;  %v882_v38 = vld [vmem:[%s1396_s20 + $0x18] sm:$0xff]  ;;  %v880_v46 = vld [vmem:[%s1396_s20 + $0x8] sm:$0xff] }
  0x18   : > { %1174 = vmatpush3.bf16.msra.mxu0 %v1257_v6  ;;  %1225 = vmatpush3.bf16.msra.mxu1 %v1257_v6  ;;  %v897_v28 = vld [vmem:[%s1396_s20 + $0x90] sm:$0xff]  ;;  %v898_v40 = vld [vmem:[%s1396_s20 + $0x98] sm:$0xff]  ;;  %v896_v48 = vld [vmem:[%s1396_s20 + $0x88] sm:$0xff] }
  0x19   : > { %1175 = vmatprep.subr.bf16.mxu0 %v1258_v7  ;;  %1218 = vmatprep.subr.bf16.mxu1 %v1258_v7  ;;  %v885_v58 = vld [vmem:[%s1396_s20 + $0x30] sm:$0xff]  ;;  %v883_v0 = vld [vmem:[%s1396_s20 + $0x20] sm:$0xff]  ;;  %v886_v6 = vld [vmem:[%s1396_s20 + $0x38] sm:$0xff] }
  0x1a   : > { %v901_v60 = vld [vmem:[%s1396_s20 + $0xb0] sm:$0xff]  ;;  %v899_v2 = vld [vmem:[%s1396_s20 + $0xa0] sm:$0xff] }
  0x1c   : > { %1176 = vmatpush3.bf16.msra.mxu0 %v1258_v7  ;;  %1226 = vmatpush3.bf16.msra.mxu1 %v1258_v7 }
  0x1d   : > { %1177 = vmatprep.subr.bf16.mxu0 %v1259_v8  ;;  %1219 = vmatprep.subr.bf16.mxu1 %v1259_v8 }
  0x20   : > { %1178 = vmatpush3.bf16.msra.mxu0 %v1259_v8  ;;  %1227 = vmatpush3.bf16.msra.mxu1 %v1259_v8  ;;  %v902_v8 = vld [vmem:[%s1396_s20 + $0xb8] sm:$0xff] }
  0x21   : > { %1179 = vmatprep.subr.bf16.mxu0 %v1260_v9  ;;  %1220 = vmatprep.subr.bf16.mxu1 %v1260_v9 }
  0x24   : > { %1180 = vmatpush3.bf16.msra.mxu0 %v1260_v9  ;;  %1228 = vmatpush3.bf16.msra.mxu1 %v1260_v9 }
  0x27   : > { %1182 = vmatmul.mubr.bf16.vlgmr.msra.gmra.mrb[0].mxu0 %v1263_v10  ;;  %1198 = vmatmul.mubr.bf16.vlgmr.msra.gmra.mrb[0].mxu1 %v1264_v11 }
  0x28   : > { %1185 = vmatprep.mubr.bf16.mxu0 %v1265_v12  ;;  %1201 = vmatprep.mubr.bf16.mxu1 %v1266_v13 }
  0x2f   : > { %1186 = vmatmul.mubr.bf16.gmra.mrb[4].mxu0 %v1267_v14  ;;  %1202 = vmatmul.mubr.bf16.gmra.mrb[4].mxu1 %v1268_v15  ;;  %v884_v14 = vld [vmem:[%s1396_s20 + $0x28] sm:$0xff] }
  0x30   : > { %1189 = vmatprep.mubr.bf16.mxu0 %v1269_v16  ;;  %1205 = vmatprep.mubr.bf16.mxu1 %v1270_v17  ;;  %v900_v16 = vld [vmem:[%s1396_s20 + $0xa8] sm:$0xff] }
  0x37   : > { %1190 = vmatmul.mubr.bf16.gmra.mrb[8].mxu0 %v1271_v18  ;;  %1206 = vmatmul.mubr.bf16.gmra.mrb[8].mxu1 %v1272_v19 }
  0x38   : > { %1193 = vmatprep.mubr.bf16.mxu0 %v1273_v20  ;;  %1209 = vmatprep.mubr.bf16.mxu1 %v1274_v21 }
  0x3f   : > { %1194 = vmatmul.mubr.bf16.gmra.mrb[12].mxu0 %v1275_v22  ;;  %1210 = vmatmul.mubr.bf16.gmra.mrb[12].mxu1 %v1276_v23 }
  0xfa   : > { %v1183_v25 = vpop.f32.mrb[0].mxu0  ;;  %v1199_v27 = vpop.f32.mrb[0].mxu1 }
  0xfb   : > { %v849_v29 = vadd.f32 %v1183_v25, %v1401_v24  ;;  %v865_v30 = vadd.f32 %v1199_v27, %v1401_v24  ;;  %v614_v31 = vpop.f32.mrb[1].mxu0  ;;  %v678_v33 = vpop.f32.mrb[1].mxu1  ;;  %v889_v27 = vld [vmem:[%s1396_s20 + $0x50] sm:$0xff] }
  0xfc   : > { %v847_v35 = vadd.f32 %v1401_v24, %v614_v31  ;;  %v863_v36 = vadd.f32 %v1401_v24, %v678_v33  ;;  %v1184_v37 = vpop.f32.mrb[2].mxu0  ;;  %v1200_v39 = vpop.f32.mrb[2].mxu1  ;;  %v887_v33 = vld [vmem:[%s1396_s20 + $0x40] sm:$0xff] }
  0xfd   : > { %v913_v41 = vadd.f32 %v881_v26, %v849_v29  ;;  %v929_v42 = vadd.f32 %v897_v28, %v865_v30  ;;  %v850_v43 = vadd.f32 %v1184_v37, %v1401_v24  ;;  %v866_v44 = vadd.f32 %v1200_v39, %v1401_v24  ;;  %v617_v45 = vpop.f32.mrb[3].mxu0  ;;  %v681_v47 = vpop.f32.mrb[3].mxu1  ;;  %v905_v29 = vld [vmem:[%s1396_s20 + $0xd0] sm:$0xff]  ;;  %v890_v39 = vld [vmem:[%s1396_s20 + $0x58] sm:$0xff] }
  0xfe   : > { %v911_v49 = vadd.f32 %v879_v32, %v847_v35  ;;  %v927_v50 = vadd.f32 %v895_v34, %v863_v36  ;;  %v848_v51 = vadd.f32 %v1401_v24, %v617_v45  ;;  %v864_v52 = vadd.f32 %v1401_v24, %v681_v47  ;;  %v903_v35 = vld [vmem:[%s1396_s20 + $0xc0] sm:$0xff]  ;;  %v888_v47 = vld [vmem:[%s1396_s20 + $0x48] sm:$0xff] }
  0xff   : > { %945 = vst [vmem:[%s1412_s25 + $0x10] sm:$0xff] %v913_v41  ;;  %961 = vst [vmem:[%s1412_s25 + $0x90] sm:$0xff] %v929_v42  ;;  %v914_v53 = vadd.f32 %v882_v38, %v850_v43  ;;  %v930_v54 = vadd.f32 %v898_v40, %v866_v44  ;;  %v906_v41 = vld [vmem:[%s1396_s20 + $0xd8] sm:$0xff] }
 0x100   : > { %943 = vst [vmem:[%s1412_s25] sm:$0xff] %v911_v49  ;;  %959 = vst [vmem:[%s1412_s25 + $0x80] sm:$0xff] %v927_v50  ;;  %v912_v55 = vadd.f32 %v880_v46, %v848_v51  ;;  %v928_v56 = vadd.f32 %v896_v48, %v864_v52  ;;  %v904_v49 = vld [vmem:[%s1396_s20 + $0xc8] sm:$0xff] }
 0x101   : > { %946 = vst [vmem:[%s1412_s25 + $0x18] sm:$0xff] %v914_v53  ;;  %962 = vst [vmem:[%s1412_s25 + $0x98] sm:$0xff] %v930_v54 }
 0x102   : > { %944 = vst [vmem:[%s1412_s25 + $0x8] sm:$0xff] %v912_v55  ;;  %960 = vst [vmem:[%s1412_s25 + $0x88] sm:$0xff] %v928_v56  ;;  %v1187_v57 = vpop.f32.mrb[4].mxu0  ;;  %v1203_v59 = vpop.f32.mrb[4].mxu1 }
 0x103   : > { %v853_v61 = vadd.f32 %v1187_v57, %v1401_v24  ;;  %v869_v62 = vadd.f32 %v1203_v59, %v1401_v24  ;;  %v630_v63 = vpop.f32.mrb[5].mxu0  ;;  %v694_v1 = vpop.f32.mrb[5].mxu1  ;;  %v893_v59 = vld [vmem:[%s1396_s20 + $0x70] sm:$0xff] }
 0x104   : > { %v851_v3 = vadd.f32 %v1401_v24, %v630_v63  ;;  %v867_v4 = vadd.f32 %v1401_v24, %v694_v1  ;;  %v1188_v5 = vpop.f32.mrb[6].mxu0  ;;  %v1204_v7 = vpop.f32.mrb[6].mxu1  ;;  %v891_v1 = vld [vmem:[%s1396_s20 + $0x60] sm:$0xff] }
 0x105   : > { %v917_v9 = vadd.f32 %v885_v58, %v853_v61  ;;  %v933_v10 = vadd.f32 %v901_v60, %v869_v62  ;;  %v854_v11 = vadd.f32 %v1188_v5, %v1401_v24  ;;  %v870_v12 = vadd.f32 %v1204_v7, %v1401_v24  ;;  %v633_v13 = vpop.f32.mrb[7].mxu0  ;;  %v697_v15 = vpop.f32.mrb[7].mxu1  ;;  %v909_v61 = vld [vmem:[%s1396_s20 + $0xf0] sm:$0xff]  ;;  %v894_v7 = vld [vmem:[%s1396_s20 + $0x78] sm:$0xff] }
 0x106   : > { %v915_v17 = vadd.f32 %v883_v0, %v851_v3  ;;  %v931_v18 = vadd.f32 %v899_v2, %v867_v4  ;;  %v852_v19 = vadd.f32 %v1401_v24, %v633_v13  ;;  %v868_v20 = vadd.f32 %v1401_v24, %v697_v15  ;;  %v907_v3 = vld [vmem:[%s1396_s20 + $0xe0] sm:$0xff]  ;;  %v892_v15 = vld [vmem:[%s1396_s20 + $0x68] sm:$0xff] }
 0x107   : > { %949 = vst [vmem:[%s1412_s25 + $0x30] sm:$0xff] %v917_v9  ;;  %965 = vst [vmem:[%s1412_s25 + $0xb0] sm:$0xff] %v933_v10  ;;  %v918_v21 = vadd.f32 %v886_v6, %v854_v11  ;;  %v934_v22 = vadd.f32 %v902_v8, %v870_v12  ;;  %v910_v9 = vld [vmem:[%s1396_s20 + $0xf8] sm:$0xff] }
 0x108   : > { %947 = vst [vmem:[%s1412_s25 + $0x20] sm:$0xff] %v915_v17  ;;  %963 = vst [vmem:[%s1412_s25 + $0xa0] sm:$0xff] %v931_v18  ;;  %v916_v23 = vadd.f32 %v884_v14, %v852_v19  ;;  %v932_v25 = vadd.f32 %v900_v16, %v868_v20  ;;  %v908_v17 = vld [vmem:[%s1396_s20 + $0xe8] sm:$0xff] }
 0x109   : > { %950 = vst [vmem:[%s1412_s25 + $0x38] sm:$0xff] %v918_v21  ;;  %966 = vst [vmem:[%s1412_s25 + $0xb8] sm:$0xff] %v934_v22 }
 0x10a   : > { %948 = vst [vmem:[%s1412_s25 + $0x28] sm:$0xff] %v916_v23  ;;  %964 = vst [vmem:[%s1412_s25 + $0xa8] sm:$0xff] %v932_v25  ;;  %v1191_v26 = vpop.f32.mrb[8].mxu0  ;;  %v1207_v28 = vpop.f32.mrb[8].mxu1 }
 0x10b   : > { %v857_v30 = vadd.f32 %v1191_v26, %v1401_v24  ;;  %v873_v31 = vadd.f32 %v1207_v28, %v1401_v24  ;;  %v646_v32 = vpop.f32.mrb[9].mxu0  ;;  %v710_v34 = vpop.f32.mrb[9].mxu1 }
 0x10c   : > { %v855_v36 = vadd.f32 %v1401_v24, %v646_v32  ;;  %v871_v37 = vadd.f32 %v1401_v24, %v710_v34  ;;  %v1192_v38 = vpop.f32.mrb[10].mxu0  ;;  %v1208_v40 = vpop.f32.mrb[10].mxu1 }
 0x10d   : > { %v921_v42 = vadd.f32 %v889_v27, %v857_v30  ;;  %v937_v43 = vadd.f32 %v905_v29, %v873_v31  ;;  %v858_v44 = vadd.f32 %v1192_v38, %v1401_v24  ;;  %v874_v45 = vadd.f32 %v1208_v40, %v1401_v24  ;;  %v649_v46 = vpop.f32.mrb[11].mxu0  ;;  %v713_v48 = vpop.f32.mrb[11].mxu1 }
 0x10e   : > { %v919_v50 = vadd.f32 %v887_v33, %v855_v36  ;;  %v935_v51 = vadd.f32 %v903_v35, %v871_v37  ;;  %v856_v52 = vadd.f32 %v1401_v24, %v649_v46  ;;  %v872_v53 = vadd.f32 %v1401_v24, %v713_v48 }
 0x10f   : > { %953 = vst [vmem:[%s1412_s25 + $0x50] sm:$0xff] %v921_v42  ;;  %969 = vst [vmem:[%s1412_s25 + $0xd0] sm:$0xff] %v937_v43  ;;  %v922_v54 = vadd.f32 %v890_v39, %v858_v44  ;;  %v938_v55 = vadd.f32 %v906_v41, %v874_v45 }
 0x110   : > { %951 = vst [vmem:[%s1412_s25 + $0x40] sm:$0xff] %v919_v50  ;;  %967 = vst [vmem:[%s1412_s25 + $0xc0] sm:$0xff] %v935_v51  ;;  %v920_v56 = vadd.f32 %v888_v47, %v856_v52  ;;  %v936_v57 = vadd.f32 %v904_v49, %v872_v53 }
 0x111   : > { %954 = vst [vmem:[%s1412_s25 + $0x58] sm:$0xff] %v922_v54  ;;  %970 = vst [vmem:[%s1412_s25 + $0xd8] sm:$0xff] %v938_v55 }
 0x112   : > { %952 = vst [vmem:[%s1412_s25 + $0x48] sm:$0xff] %v920_v56  ;;  %968 = vst [vmem:[%s1412_s25 + $0xc8] sm:$0xff] %v936_v57  ;;  %v1195_v58 = vpop.f32.mrb[12].mxu0  ;;  %v1211_v60 = vpop.f32.mrb[12].mxu1 }
 0x113   : > { %v861_v62 = vadd.f32 %v1195_v58, %v1401_v24  ;;  %v877_v63 = vadd.f32 %v1211_v60, %v1401_v24  ;;  %v662_v0 = vpop.f32.mrb[13].mxu0  ;;  %v726_v2 = vpop.f32.mrb[13].mxu1 }
 0x114   : > { %v859_v4 = vadd.f32 %v1401_v24, %v662_v0  ;;  %v875_v5 = vadd.f32 %v1401_v24, %v726_v2  ;;  %v1196_v6 = vpop.f32.mrb[14].mxu0  ;;  %v1212_v8 = vpop.f32.mrb[14].mxu1 }
 0x115   : > { %v925_v10 = vadd.f32 %v893_v59, %v861_v62  ;;  %v941_v11 = vadd.f32 %v909_v61, %v877_v63  ;;  %v862_v12 = vadd.f32 %v1196_v6, %v1401_v24  ;;  %v878_v13 = vadd.f32 %v1212_v8, %v1401_v24  ;;  %v665_v14 = vpop.f32.mrb[15].mxu0  ;;  %v729_v16 = vpop.f32.mrb[15].mxu1 }
 0x116   : > { %v923_v18 = vadd.f32 %v891_v1, %v859_v4  ;;  %v939_v19 = vadd.f32 %v907_v3, %v875_v5  ;;  %v860_v20 = vadd.f32 %v1401_v24, %v665_v14  ;;  %v876_v21 = vadd.f32 %v1401_v24, %v729_v16 }
 0x117   : > { %957 = vst [vmem:[%s1412_s25 + $0x70] sm:$0xff] %v925_v10  ;;  %973 = vst [vmem:[%s1412_s25 + $0xf0] sm:$0xff] %v941_v11  ;;  %v926_v22 = vadd.f32 %v894_v7, %v862_v12  ;;  %v942_v23 = vadd.f32 %v910_v9, %v878_v13 }
 0x118   : > { %955 = vst [vmem:[%s1412_s25 + $0x60] sm:$0xff] %v923_v18  ;;  %971 = vst [vmem:[%s1412_s25 + $0xe0] sm:$0xff] %v939_v19  ;;  %v924_v25 = vadd.f32 %v892_v15, %v860_v20  ;;  %v940_v26 = vadd.f32 %v908_v17, %v876_v21 }
 0x119   : > { %958 = vst [vmem:[%s1412_s25 + $0x78] sm:$0xff] %v926_v22  ;;  %974 = vst [vmem:[%s1412_s25 + $0xf8] sm:$0xff] %v942_v23 }
 0x11a   : > { %956 = vst [vmem:[%s1412_s25 + $0x68] sm:$0xff] %v924_v25  ;;  %972 = vst [vmem:[%s1412_s25 + $0xe8] sm:$0xff] %v940_v26 }
 0x11b PF: > { %s14_s17 = sadd.s32 1, %s1299_s17   ;;  %s1518_s15 = smov %s1295_s16 }
 0x11c   : > { %p11_p5 = scmp.ge.s32.totalorder %s14_s17, 4   ;;  %s1519_s16 = smov %s1521_s18 }
 0x11e   :  { %13 = sbr.rel (!%p11_p5) target bundleno = 2 (0x2), region = 83 }

// kernel: unet_forward.77
= control target key start
LH: loop header
LB: loop body
LE: loop exit
PB: predicated region body
PF: predicated region fallthrough
CT: control target
= control target key end

     0   :  { %s586_s1 = inlined_call_operand.vmem [shape: bf16[128,128], index: 1, kind: input, shape index: {}]   ;;  %s587_s0 = inlined_call_operand.vmem [shape: bf16[128,128], index: 0, kind: input, shape index: {}]   ;;  %s588_s2 = inlined_call_operand.vmem [shape: f32[1,128], index: 2, kind: input, shape index: {}]   ;;  %s589_s3 = inlined_call_operand.vmem [shape: f32[128,128], index: 3, kind: output, shape index: {}]  }
   0x1   :  { %v451_v0 = vld [vmem:[%s586_s1] sm:$0xff]   ;;  %v452_v1 = vld [vmem:[%s586_s1 + $0x8] sm:$0xff]   ;;  %v453_v2 = vld [vmem:[%s586_s1 + $0x10] sm:$0xff]  }
   0x2   :  { %403 = vmatprep.subr.bf16.mxu0 %v451_v0  ;;  %435 = vmatprep.subr.bf16.mxu1 %v451_v0  ;;  %v454_v3 = vld [vmem:[%s586_s1 + $0x18] sm:$0xff]   ;;  %v459_v4 = vld [vmem:[%s587_s0] sm:$0xff]   ;;  %v456_v7 = vld [vmem:[%s586_s1 + $0x28] sm:$0xff]  }
   0x3   :  { %404 = vmatpush3.bf16.msra.mxu0 %v451_v0  ;;  %443 = vmatpush3.bf16.msra.mxu1 %v451_v0  ;;  %v460_v5 = vld [vmem:[%s587_s0 + $0x20] sm:$0xff]   ;;  %v457_v8 = vld [vmem:[%s586_s1 + $0x30] sm:$0xff]   ;;  %v458_v9 = vld [vmem:[%s586_s1 + $0x38] sm:$0xff]  }
   0x4   :  { %405 = vmatprep.subr.bf16.mxu0 %v452_v1  ;;  %436 = vmatprep.subr.bf16.mxu1 %v452_v1  ;;  %v455_v6 = vld [vmem:[%s586_s1 + $0x20] sm:$0xff]   ;;  %v461_v10 = vld [vmem:[%s587_s0 + $0x8] sm:$0xff]   ;;  %v463_v12 = vld [vmem:[%s587_s0 + $0x10] sm:$0xff]  }
   0x5   :  { %419 = vmatprep.mubr.bf16.mxu0 %v459_v4  ;;  %427 = vmatprep.mubr.bf16.mxu1 %v460_v5  ;;  %v462_v11 = vld [vmem:[%s587_s0 + $0x28] sm:$0xff]   ;;  %v464_v13 = vld [vmem:[%s587_s0 + $0x30] sm:$0xff]   ;;  %v465_v14 = vld [vmem:[%s587_s0 + $0x18] sm:$0xff]  }
   0x6   :  { %v466_v15 = vld [vmem:[%s587_s0 + $0x38] sm:$0xff]   ;;  %v386_v16 = vld [vmem:[%s588_s2] ss:$0 sm:$0xff] }
   0x7   :  { %406 = vmatpush3.bf16.msra.mxu0 %v452_v1  ;;  %444 = vmatpush3.bf16.msra.mxu1 %v452_v1 }
   0x8   :  { %407 = vmatprep.subr.bf16.mxu0 %v453_v2  ;;  %437 = vmatprep.subr.bf16.mxu1 %v453_v2 }
   0xb   :  { %408 = vmatpush3.bf16.msra.mxu0 %v453_v2  ;;  %445 = vmatpush3.bf16.msra.mxu1 %v453_v2 }
   0xc   :  { %409 = vmatprep.subr.bf16.mxu0 %v454_v3  ;;  %438 = vmatprep.subr.bf16.mxu1 %v454_v3 }
   0xf   :  { %410 = vmatpush3.bf16.msra.mxu0 %v454_v3  ;;  %446 = vmatpush3.bf16.msra.mxu1 %v454_v3 }
  0x10   :  { %411 = vmatprep.subr.bf16.mxu0 %v455_v6  ;;  %439 = vmatprep.subr.bf16.mxu1 %v455_v6 }
  0x13   :  { %412 = vmatpush3.bf16.msra.mxu0 %v455_v6  ;;  %447 = vmatpush3.bf16.msra.mxu1 %v455_v6 }
  0x14   :  { %413 = vmatprep.subr.bf16.mxu0 %v456_v7  ;;  %440 = vmatprep.subr.bf16.mxu1 %v456_v7 }
  0x17   :  { %414 = vmatpush3.bf16.msra.mxu0 %v456_v7  ;;  %448 = vmatpush3.bf16.msra.mxu1 %v456_v7 }
  0x18   :  { %415 = vmatprep.subr.bf16.mxu0 %v457_v8  ;;  %441 = vmatprep.subr.bf16.mxu1 %v457_v8 }
  0x1b   :  { %416 = vmatpush3.bf16.msra.mxu0 %v457_v8  ;;  %449 = vmatpush3.bf16.msra.mxu1 %v457_v8 }
  0x1c   :  { %417 = vmatprep.subr.bf16.mxu0 %v458_v9  ;;  %442 = vmatprep.subr.bf16.mxu1 %v458_v9 }
  0x1f   :  { %418 = vmatpush3.bf16.msra.mxu0 %v458_v9  ;;  %450 = vmatpush3.bf16.msra.mxu1 %v458_v9 }
  0x22   :  { %420 = vmatmul.mubr.bf16.vlgmr.msra.gmra.mrb[0].mxu0 %v461_v10  ;;  %428 = vmatmul.mubr.bf16.vlgmr.msra.gmra.mrb[0].mxu1 %v462_v11 }
  0x23   :  { %423 = vmatprep.mubr.bf16.mxu0 %v463_v12  ;;  %431 = vmatprep.mubr.bf16.mxu1 %v464_v13 }
  0x2a   :  { %424 = vmatmul.mubr.bf16.gmra.mrb[4].mxu0 %v465_v14  ;;  %432 = vmatmul.mubr.bf16.gmra.mrb[4].mxu1 %v466_v15 }
  0xf5   :  { %v421_v17 = vpop.f32.mrb[0].mxu0  ;;  %v429_v18 = vpop.f32.mrb[0].mxu1 }
  0xf6   :  { %v336_v19 = vadd.f32 %v421_v17, %v386_v16  ;;  %v344_v20 = vadd.f32 %v429_v18, %v386_v16  ;;  %v213_v21 = vpop.f32.mrb[1].mxu0  ;;  %v245_v22 = vpop.f32.mrb[1].mxu1 }
  0xf7   :  { %v334_v23 = vadd.f32 %v386_v16, %v213_v21  ;;  %v342_v24 = vadd.f32 %v386_v16, %v245_v22  ;;  %v422_v25 = vpop.f32.mrb[2].mxu0  ;;  %v430_v26 = vpop.f32.mrb[2].mxu1 }
  0xf8   :  { %352 = vst [vmem:[%s589_s3 + $0x10] sm:$0xff] %v336_v19  ;;  %360 = vst [vmem:[%s589_s3 + $0x50] sm:$0xff] %v344_v20  ;;  %v337_v27 = vadd.f32 %v422_v25, %v386_v16  ;;  %v345_v28 = vadd.f32 %v430_v26, %v386_v16  ;;  %v216_v29 = vpop.f32.mrb[3].mxu0  ;;  %v248_v30 = vpop.f32.mrb[3].mxu1 }
  0xf9   :  { %350 = vst [vmem:[%s589_s3] sm:$0xff] %v334_v23  ;;  %358 = vst [vmem:[%s589_s3 + $0x40] sm:$0xff] %v342_v24  ;;  %v335_v31 = vadd.f32 %v386_v16, %v216_v29  ;;  %v343_v32 = vadd.f32 %v386_v16, %v248_v30 }
  0xfa   :  { %353 = vst [vmem:[%s589_s3 + $0x18] sm:$0xff] %v337_v27  ;;  %361 = vst [vmem:[%s589_s3 + $0x58] sm:$0xff] %v345_v28 }
  0xfb   :  { %351 = vst [vmem:[%s589_s3 + $0x8] sm:$0xff] %v335_v31  ;;  %359 = vst [vmem:[%s589_s3 + $0x48] sm:$0xff] %v343_v32 }
  0xfd   :  { %v425_v33 = vpop.f32.mrb[4].mxu0  ;;  %v433_v34 = vpop.f32.mrb[4].mxu1 }
  0xfe   :  { %v340_v35 = vadd.f32 %v425_v33, %v386_v16  ;;  %v348_v36 = vadd.f32 %v433_v34, %v386_v16  ;;  %v229_v37 = vpop.f32.mrb[5].mxu0  ;;  %v261_v38 = vpop.f32.mrb[5].mxu1 }
  0xff   :  { %v338_v39 = vadd.f32 %v386_v16, %v229_v37  ;;  %v346_v40 = vadd.f32 %v386_v16, %v261_v38  ;;  %v426_v41 = vpop.f32.mrb[6].mxu0  ;;  %v434_v42 = vpop.f32.mrb[6].mxu1 }
 0x100   :  { %356 = vst [vmem:[%s589_s3 + $0x30] sm:$0xff] %v340_v35  ;;  %364 = vst [vmem:[%s589_s3 + $0x70] sm:$0xff] %v348_v36  ;;  %v341_v43 = vadd.f32 %v426_v41, %v386_v16  ;;  %v349_v44 = vadd.f32 %v434_v42, %v386_v16  ;;  %v232_v45 = vpop.f32.mrb[7].mxu0  ;;  %v264_v46 = vpop.f32.mrb[7].mxu1 }
 0x101   :  { %354 = vst [vmem:[%s589_s3 + $0x20] sm:$0xff] %v338_v39  ;;  %362 = vst [vmem:[%s589_s3 + $0x60] sm:$0xff] %v346_v40  ;;  %v339_v47 = vadd.f32 %v386_v16, %v232_v45  ;;  %v347_v48 = vadd.f32 %v386_v16, %v264_v46 }
 0x102   :  { %357 = vst [vmem:[%s589_s3 + $0x38] sm:$0xff] %v341_v43  ;;  %365 = vst [vmem:[%s589_s3 + $0x78] sm:$0xff] %v349_v44 }
 0x103   :  { %355 = vst [vmem:[%s589_s3 + $0x28] sm:$0xff] %v339_v47  ;;  %363 = vst [vmem:[%s589_s3 + $0x68] sm:$0xff] %v347_v48 }

// kernel: unet_forward.78
= control target key start
LH: loop header
LB: loop body
LE: loop exit
PB: predicated region body
PF: predicated region fallthrough
CT: control target
= control target key end

     0   :  { %v48_v19 = vlaneseq  ;;  %s198_s0 = inlined_call_operand.vmem [shape: f32[8,512], index: 0, kind: input, shape index: {}]   ;;  %s199_s1 = inlined_call_operand.vmem [shape: f32[1,512], index: 1, kind: input, shape index: {}]   ;;  %s200_s2 = inlined_call_operand.vmem [shape: f32[1,512], index: 2, kind: input, shape index: {}]   ;;  %s201_s3 = inlined_call_operand.vmem [shape: f32[8,512], index: 3, kind: output, shape index: {}]  }
   0x1   :  { %v14_v0 = vld [vmem:[%s198_s0] sm:$0xff]  ;;  %v15_v1 = vld [vmem:[%s198_s0 + $0x8] sm:$0xff]  ;;  %v16_v2 = vld [vmem:[%s198_s0 + $0x10] sm:$0xff] }
   0x2   :  { %v18_v3 = vadd.f32 %v15_v1, %v14_v0  ;;  %v24_v4 = vmul.f32 %v14_v0, %v14_v0  ;;  %v25_v5 = vmul.f32 %v15_v1, %v15_v1  ;;  %v26_v6 = vmul.f32 %v16_v2, %v16_v2  ;;  %v17_v7 = vld [vmem:[%s198_s0 + $0x18] sm:$0xff]  ;;  %v46_v27 = vld [vmem:[%s199_s1] sm:$0xf] }
   0x3   :  { %v27_v9 = vmul.f32 %v17_v7, %v17_v7  ;;  %v49_v22 = vshrl.u32 %v48_v19, 7  ;;  %v72_v28 = vld [vmem:[%s200_s2] sm:$0xf] }
   0x4   :  { %v19_v8 = vadd.f32 %v18_v3, %v16_v2  ;;  %v28_v10 = vadd.f32 %v25_v5, %v24_v4 }
   0x5   :  { %v50_v23 = vsub.s32 0, %v49_v22  ;;  %v54_v24 = vsub.s32 1, %v49_v22  ;;  %v58_v25 = vsub.s32 2, %v49_v22  ;;  %v62_v26 = vsub.s32 3, %v49_v22 }
   0x6   :  { %v20_v11 = vadd.f32 %v19_v8, %v17_v7  ;;  %v29_v12 = vadd.f32 %v28_v10, %v26_v6 }
   0x7   :  { %v51_v29 = vrot.slane %v46_v27, %v50_v23  ;;  %v55_v30 = vrot.slane %v46_v27, %v54_v24  ;;  %v59_v31 = vrot.slane %v46_v27, %v58_v25  ;;  %v63_v32 = vrot.slane %v46_v27, %v62_v26 }
   0x8   :  { %21 = vadd.xlane.f32.xlu0 %v20_v11  ;;  %v30_v13 = vadd.f32 %v29_v12, %v27_v9  ;;  %v77_v38 = vrot.slane %v72_v28, %v50_v23  ;;  %v81_v39 = vrot.slane %v72_v28, %v54_v24  ;;  %v85_v40 = vrot.slane %v72_v28, %v58_v25 }
   0x9   :  { %v89_v41 = vrot.slane %v72_v28, %v62_v26 }
   0xc   :  { %31 = vadd.xlane.f32.xlu0 %v30_v13 }
  0x95   :  { %v22_v14 = vpop.xlane.xlu0 %21 }
  0x96   :  { %v23_v15 = vmul.f32 0.001953125, %v22_v14 }
  0x98   :  { %v34_v17 = vmul.f32 %v23_v15, %v23_v15  ;;  %v38_v33 = vsub.f32 %v14_v0, %v23_v15  ;;  %v39_v34 = vsub.f32 %v15_v1, %v23_v15  ;;  %v40_v35 = vsub.f32 %v16_v2, %v23_v15 }
  0x99   :  { %v32_v16 = vpop.xlane.xlu0 %31  ;;  %v41_v36 = vsub.f32 %v17_v7, %v23_v15 }
  0x9a   :  { %v33_v18 = vmul.f32 0.001953125, %v32_v16 }
  0x9c   :  { %v35_v20 = vsub.f32 %v33_v18, %v34_v17 }
  0x9e   :  { %v36_v21 = vadd.f32 1e-05, %v35_v20 }
  0xa0   :  { %130 = vrsqrt.f32 %v36_v21 }
  0xaa   :  { %v131_v37 = vpop.eup %130 }
  0xab   :  { %v42_v42 = vmul.f32 %v131_v37, %v38_v33  ;;  %v43_v43 = vmul.f32 %v131_v37, %v39_v34  ;;  %v44_v44 = vmul.f32 %v131_v37, %v40_v35  ;;  %v45_v45 = vmul.f32 %v131_v37, %v41_v36 }
  0xad   :  { %v68_v46 = vmul.f32 %v51_v29, %v42_v42  ;;  %v69_v47 = vmul.f32 %v55_v30, %v43_v43  ;;  %v70_v48 = vmul.f32 %v59_v31, %v44_v44  ;;  %v71_v49 = vmul.f32 %v63_v32, %v45_v45 }
  0xaf   :  { %v94_v50 = vadd.f32 %v77_v38, %v68_v46  ;;  %v95_v51 = vadd.f32 %v81_v39, %v69_v47  ;;  %v96_v52 = vadd.f32 %v85_v40, %v70_v48  ;;  %v97_v53 = vadd.f32 %v89_v41, %v71_v49 }
  0xb1   :  { %v98_v54 = vsub.f32 0.0, %v94_v50  ;;  %v99_v55 = vsub.f32 0.0, %v95_v51  ;;  %v100_v56 = vsub.f32 0.0, %v96_v52  ;;  %v101_v57 = vsub.f32 0.0, %v97_v53 }
  0xb3   :  { %v102_v58 = vmul.f32 1.442695, %v98_v54  ;;  %v104_v59 = vmul.f32 1.442695, %v99_v55  ;;  %v106_v60 = vmul.f32 1.442695, %v100_v56 }
  0xb4   :  { %v108_v61 = vmul.f32 1.442695, %v101_v57 }
  0xb5   :  { %132 = vpow2.f32 %v102_v58 }
  0xb6   :  { %134 = vpow2.f32 %v104_v59 }
  0xb7   :  { %136 = vpow2.f32 %v106_v60 }
  0xb8   :  { %138 = vpow2.f32 %v108_v61 }
  0xbf   :  { %v133_v62 = vpop.eup %132 }
  0xc0   :  { %v135_v63 = vpop.eup %134  ;;  %v110_v0 = vadd.f32 1.0, %v133_v62 }
  0xc1   :  { %v137_v1 = vpop.eup %136  ;;  %v111_v2 = vadd.f32 1.0, %v135_v63 }
  0xc2   :  { %v139_v3 = vpop.eup %138  ;;  %v112_v4 = vadd.f32 1.0, %v137_v1  ;;  %140 = vrcp.f32 %v110_v0 }
  0xc3   :  { %v113_v5 = vadd.f32 1.0, %v139_v3  ;;  %142 = vrcp.f32 %v111_v2 }
  0xc4   :  { %144 = vrcp.f32 %v112_v4 }
  0xc5   :  { %146 = vrcp.f32 %v113_v5 }
  0xcc   :  { %v141_v6 = vpop.eup %140 }
  0xcd   :  { %v143_v7 = vpop.eup %142  ;;  %v118_v8 = vmul.f32 %v141_v6, %v94_v50 }
  0xce   :  { %v145_v9 = vpop.eup %144  ;;  %v119_v10 = vmul.f32 %v143_v7, %v95_v51 }
  0xcf   :  { %v147_v11 = vpop.eup %146  ;;  %v120_v12 = vmul.f32 %v145_v9, %v96_v52  ;;  %122 = vst [vmem:[%s201_s3] sm:$0xff] %v118_v8 }
  0xd0   :  { %v121_v13 = vmul.f32 %v147_v11, %v97_v53  ;;  %123 = vst [vmem:[%s201_s3 + $0x8] sm:$0xff] %v119_v10 }
  0xd1   :  { %124 = vst [vmem:[%s201_s3 + $0x10] sm:$0xff] %v120_v12 }
  0xd2   :  { %125 = vst [vmem:[%s201_s3 + $0x18] sm:$0xff] %v121_v13 }

// kernel: unet_forward.80
= control target key start
LH: loop header
LB: loop body
LE: loop exit
PB: predicated region body
PF: predicated region fallthrough
CT: control target
= control target key end

     0   :  { %s692_s1 = inlined_call_operand.vmem [shape: bf16[128,128], index: 1, kind: input, shape index: {}]   ;;  %s693_s0 = inlined_call_operand.vmem [shape: bf16[128,128], index: 0, kind: input, shape index: {}]   ;;  %s694_s2 = inlined_call_operand.vmem [shape: f32[1,128], index: 2, kind: input, shape index: {}]   ;;  %s695_s3 = inlined_call_operand.vmem [shape: f32[128,128], index: 3, kind: input, shape index: {}]   ;;  %s696_s4 = inlined_call_operand.vmem [shape: f32[128,128], index: 4, kind: output, shape index: {}]  }
   0x1   :  { %v486_v0 = vld [vmem:[%s692_s1] sm:$0xff]   ;;  %v487_v1 = vld [vmem:[%s692_s1 + $0x8] sm:$0xff]   ;;  %v488_v2 = vld [vmem:[%s692_s1 + $0x10] sm:$0xff]  }
   0x2   :  { %438 = vmatprep.subr.bf16.mxu0 %v486_v0  ;;  %470 = vmatprep.subr.bf16.mxu1 %v486_v0  ;;  %v489_v3 = vld [vmem:[%s692_s1 + $0x18] sm:$0xff]   ;;  %v494_v4 = vld [vmem:[%s693_s0] sm:$0xff]   ;;  %v491_v7 = vld [vmem:[%s692_s1 + $0x28] sm:$0xff]  }
   0x3   :  { %439 = vmatpush3.bf16.msra.mxu0 %v486_v0  ;;  %478 = vmatpush3.bf16.msra.mxu1 %v486_v0  ;;  %v495_v5 = vld [vmem:[%s693_s0 + $0x20] sm:$0xff]   ;;  %v492_v8 = vld [vmem:[%s692_s1 + $0x30] sm:$0xff]   ;;  %v493_v9 = vld [vmem:[%s692_s1 + $0x38] sm:$0xff]  }
   0x4   :  { %440 = vmatprep.subr.bf16.mxu0 %v487_v1  ;;  %471 = vmatprep.subr.bf16.mxu1 %v487_v1  ;;  %v490_v6 = vld [vmem:[%s692_s1 + $0x20] sm:$0xff]   ;;  %v496_v10 = vld [vmem:[%s693_s0 + $0x8] sm:$0xff]   ;;  %v498_v12 = vld [vmem:[%s693_s0 + $0x10] sm:$0xff]  }
   0x5   :  { %454 = vmatprep.mubr.bf16.mxu0 %v494_v4  ;;  %462 = vmatprep.mubr.bf16.mxu1 %v495_v5  ;;  %v497_v11 = vld [vmem:[%s693_s0 + $0x28] sm:$0xff]   ;;  %v499_v13 = vld [vmem:[%s693_s0 + $0x30] sm:$0xff]   ;;  %v500_v14 = vld [vmem:[%s693_s0 + $0x18] sm:$0xff]  }
   0x6   :  { %v501_v15 = vld [vmem:[%s693_s0 + $0x38] sm:$0xff]   ;;  %v578_v16 = vld [vmem:[%s694_s2] ss:$0 sm:$0xff]  ;;  %v355_v18 = vld [vmem:[%s695_s3 + $0x10] sm:$0xff] }
   0x7   :  { %441 = vmatpush3.bf16.msra.mxu0 %v487_v1  ;;  %479 = vmatpush3.bf16.msra.mxu1 %v487_v1  ;;  %v363_v20 = vld [vmem:[%s695_s3 + $0x50] sm:$0xff]  ;;  %v353_v24 = vld [vmem:[%s695_s3] sm:$0xff]  ;;  %v356_v30 = vld [vmem:[%s695_s3 + $0x18] sm:$0xff] }
   0x8   :  { %442 = vmatprep.subr.bf16.mxu0 %v488_v2  ;;  %472 = vmatprep.subr.bf16.mxu1 %v488_v2  ;;  %v361_v26 = vld [vmem:[%s695_s3 + $0x40] sm:$0xff]  ;;  %v364_v32 = vld [vmem:[%s695_s3 + $0x58] sm:$0xff]  ;;  %v354_v38 = vld [vmem:[%s695_s3 + $0x8] sm:$0xff] }
   0x9   :  { %v362_v40 = vld [vmem:[%s695_s3 + $0x48] sm:$0xff]  ;;  %v359_v50 = vld [vmem:[%s695_s3 + $0x30] sm:$0xff]  ;;  %v357_v56 = vld [vmem:[%s695_s3 + $0x20] sm:$0xff] }
   0xa   :  { %v367_v52 = vld [vmem:[%s695_s3 + $0x70] sm:$0xff]  ;;  %v365_v58 = vld [vmem:[%s695_s3 + $0x60] sm:$0xff]  ;;  %v360_v62 = vld [vmem:[%s695_s3 + $0x38] sm:$0xff] }
   0xb   :  { %443 = vmatpush3.bf16.msra.mxu0 %v488_v2  ;;  %480 = vmatpush3.bf16.msra.mxu1 %v488_v2  ;;  %v368_v0 = vld [vmem:[%s695_s3 + $0x78] sm:$0xff] }
   0xc   :  { %444 = vmatprep.subr.bf16.mxu0 %v489_v3  ;;  %473 = vmatprep.subr.bf16.mxu1 %v489_v3 }
   0xf   :  { %445 = vmatpush3.bf16.msra.mxu0 %v489_v3  ;;  %481 = vmatpush3.bf16.msra.mxu1 %v489_v3 }
  0x10   :  { %446 = vmatprep.subr.bf16.mxu0 %v490_v6  ;;  %474 = vmatprep.subr.bf16.mxu1 %v490_v6 }
  0x13   :  { %447 = vmatpush3.bf16.msra.mxu0 %v490_v6  ;;  %482 = vmatpush3.bf16.msra.mxu1 %v490_v6  ;;  %v358_v6 = vld [vmem:[%s695_s3 + $0x28] sm:$0xff] }
  0x14   :  { %448 = vmatprep.subr.bf16.mxu0 %v491_v7  ;;  %475 = vmatprep.subr.bf16.mxu1 %v491_v7 }
  0x17   :  { %449 = vmatpush3.bf16.msra.mxu0 %v491_v7  ;;  %483 = vmatpush3.bf16.msra.mxu1 %v491_v7 }
  0x18   :  { %450 = vmatprep.subr.bf16.mxu0 %v492_v8  ;;  %476 = vmatprep.subr.bf16.mxu1 %v492_v8 }
  0x1b   :  { %451 = vmatpush3.bf16.msra.mxu0 %v492_v8  ;;  %484 = vmatpush3.bf16.msra.mxu1 %v492_v8  ;;  %v366_v8 = vld [vmem:[%s695_s3 + $0x68] sm:$0xff] }
  0x1c   :  { %452 = vmatprep.subr.bf16.mxu0 %v493_v9  ;;  %477 = vmatprep.subr.bf16.mxu1 %v493_v9 }
  0x1f   :  { %453 = vmatpush3.bf16.msra.mxu0 %v493_v9  ;;  %485 = vmatpush3.bf16.msra.mxu1 %v493_v9 }
  0x22   :  { %455 = vmatmul.mubr.bf16.vlgmr.msra.gmra.mrb[0].mxu0 %v496_v10  ;;  %463 = vmatmul.mubr.bf16.vlgmr.msra.gmra.mrb[0].mxu1 %v497_v11 }
  0x23   :  { %458 = vmatprep.mubr.bf16.mxu0 %v498_v12  ;;  %466 = vmatprep.mubr.bf16.mxu1 %v499_v13 }
  0x2a   :  { %459 = vmatmul.mubr.bf16.gmra.mrb[4].mxu0 %v500_v14  ;;  %467 = vmatmul.mubr.bf16.gmra.mrb[4].mxu1 %v501_v15 }
  0xf5   :  { %v456_v17 = vpop.f32.mrb[0].mxu0  ;;  %v464_v19 = vpop.f32.mrb[0].mxu1 }
  0xf6   :  { %v339_v21 = vadd.f32 %v456_v17, %v578_v16  ;;  %v347_v22 = vadd.f32 %v464_v19, %v578_v16  ;;  %v216_v23 = vpop.f32.mrb[1].mxu0  ;;  %v248_v25 = vpop.f32.mrb[1].mxu1 }
  0xf7   :  { %v337_v27 = vadd.f32 %v578_v16, %v216_v23  ;;  %v345_v28 = vadd.f32 %v578_v16, %v248_v25  ;;  %v457_v29 = vpop.f32.mrb[2].mxu0  ;;  %v465_v31 = vpop.f32.mrb[2].mxu1 }
  0xf8   :  { %v371_v33 = vadd.f32 %v355_v18, %v339_v21  ;;  %v379_v34 = vadd.f32 %v363_v20, %v347_v22  ;;  %v340_v35 = vadd.f32 %v457_v29, %v578_v16  ;;  %v348_v36 = vadd.f32 %v465_v31, %v578_v16  ;;  %v219_v37 = vpop.f32.mrb[3].mxu0  ;;  %v251_v39 = vpop.f32.mrb[3].mxu1 }
  0xf9   :  { %v369_v41 = vadd.f32 %v353_v24, %v337_v27  ;;  %v377_v42 = vadd.f32 %v361_v26, %v345_v28  ;;  %v338_v43 = vadd.f32 %v578_v16, %v219_v37  ;;  %v346_v44 = vadd.f32 %v578_v16, %v251_v39 }
  0xfa   :  { %387 = vst [vmem:[%s696_s4 + $0x10] sm:$0xff] %v371_v33  ;;  %395 = vst [vmem:[%s696_s4 + $0x50] sm:$0xff] %v379_v34  ;;  %v372_v45 = vadd.f32 %v356_v30, %v340_v35  ;;  %v380_v46 = vadd.f32 %v364_v32, %v348_v36 }
  0xfb   :  { %385 = vst [vmem:[%s696_s4] sm:$0xff] %v369_v41  ;;  %393 = vst [vmem:[%s696_s4 + $0x40] sm:$0xff] %v377_v42  ;;  %v370_v47 = vadd.f32 %v354_v38, %v338_v43  ;;  %v378_v48 = vadd.f32 %v362_v40, %v346_v44 }
  0xfc   :  { %388 = vst [vmem:[%s696_s4 + $0x18] sm:$0xff] %v372_v45  ;;  %396 = vst [vmem:[%s696_s4 + $0x58] sm:$0xff] %v380_v46 }
  0xfd   :  { %386 = vst [vmem:[%s696_s4 + $0x8] sm:$0xff] %v370_v47  ;;  %394 = vst [vmem:[%s696_s4 + $0x48] sm:$0xff] %v378_v48  ;;  %v460_v49 = vpop.f32.mrb[4].mxu0  ;;  %v468_v51 = vpop.f32.mrb[4].mxu1 }
  0xfe   :  { %v343_v53 = vadd.f32 %v460_v49, %v578_v16  ;;  %v351_v54 = vadd.f32 %v468_v51, %v578_v16  ;;  %v232_v55 = vpop.f32.mrb[5].mxu0  ;;  %v264_v57 = vpop.f32.mrb[5].mxu1 }
  0xff   :  { %v341_v59 = vadd.f32 %v578_v16, %v232_v55  ;;  %v349_v60 = vadd.f32 %v578_v16, %v264_v57  ;;  %v461_v61 = vpop.f32.mrb[6].mxu0  ;;  %v469_v63 = vpop.f32.mrb[6].mxu1 }
 0x100   :  { %v375_v1 = vadd.f32 %v359_v50, %v343_v53  ;;  %v383_v2 = vadd.f32 %v367_v52, %v351_v54  ;;  %v344_v3 = vadd.f32 %v461_v61, %v578_v16  ;;  %v352_v4 = vadd.f32 %v469_v63, %v578_v16  ;;  %v235_v5 = vpop.f32.mrb[7].mxu0  ;;  %v267_v7 = vpop.f32.mrb[7].mxu1 }
 0x101   :  { %v373_v9 = vadd.f32 %v357_v56, %v341_v59  ;;  %v381_v10 = vadd.f32 %v365_v58, %v349_v60  ;;  %v342_v11 = vadd.f32 %v578_v16, %v235_v5  ;;  %v350_v12 = vadd.f32 %v578_v16, %v267_v7 }
 0x102   :  { %391 = vst [vmem:[%s696_s4 + $0x30] sm:$0xff] %v375_v1  ;;  %399 = vst [vmem:[%s696_s4 + $0x70] sm:$0xff] %v383_v2  ;;  %v376_v13 = vadd.f32 %v360_v62, %v344_v3  ;;  %v384_v14 = vadd.f32 %v368_v0, %v352_v4 }
 0x103   :  { %389 = vst [vmem:[%s696_s4 + $0x20] sm:$0xff] %v373_v9  ;;  %397 = vst [vmem:[%s696_s4 + $0x60] sm:$0xff] %v381_v10  ;;  %v374_v15 = vadd.f32 %v358_v6, %v342_v11  ;;  %v382_v16 = vadd.f32 %v366_v8, %v350_v12 }
 0x104   :  { %392 = vst [vmem:[%s696_s4 + $0x38] sm:$0xff] %v376_v13  ;;  %400 = vst [vmem:[%s696_s4 + $0x78] sm:$0xff] %v384_v14 }
 0x105   :  { %390 = vst [vmem:[%s696_s4 + $0x28] sm:$0xff] %v374_v15  ;;  %398 = vst [vmem:[%s696_s4 + $0x68] sm:$0xff] %v382_v16 }

// kernel: unet_forward.81
= control target key start
LH: loop header
LB: loop body
LE: loop exit
PB: predicated region body
PF: predicated region fallthrough
CT: control target
= control target key end

     0   :  { %v72_v32 = vlaneseq  ;;  %s406_s0 = inlined_call_operand.vmem [shape: f32[8,1024], index: 0, kind: input, shape index: {}]   ;;  %s407_s1 = inlined_call_operand.vmem [shape: f32[1,1024], index: 1, kind: input, shape index: {}]   ;;  %s408_s2 = inlined_call_operand.vmem [shape: f32[1,1024], index: 2, kind: input, shape index: {}]   ;;  %s409_s3 = inlined_call_operand.vmem [shape: f32[8,1024], index: 3, kind: output, shape index: {}]  }
   0x1   :  { %v287_v0 = vld [vmem:[%s406_s0] sm:$0xff]  ;;  %v292_v1 = vld [vmem:[%s406_s0 + $0x8] sm:$0xff]  ;;  %v297_v2 = vld [vmem:[%s406_s0 + $0x10] sm:$0xff] }
   0x2   :  { %v22_v3 = vadd.f32 %v292_v1, %v287_v0  ;;  %v32_v4 = vmul.f32 %v287_v0, %v287_v0  ;;  %v33_v5 = vmul.f32 %v292_v1, %v292_v1  ;;  %v34_v6 = vmul.f32 %v297_v2, %v297_v2  ;;  %v310_v7 = vld [vmem:[%s406_s0 + $0x18] sm:$0xff]  ;;  %v318_v11 = vld [vmem:[%s406_s0 + $0x20] sm:$0xff]  ;;  %v326_v15 = vld [vmem:[%s406_s0 + $0x28] sm:$0xff] }
   0x3   :  { %v35_v9 = vmul.f32 %v310_v7, %v310_v7  ;;  %v36_v13 = vmul.f32 %v318_v11, %v318_v11  ;;  %v37_v17 = vmul.f32 %v326_v15, %v326_v15  ;;  %v334_v19 = vld [vmem:[%s406_s0 + $0x30] sm:$0xff]  ;;  %v342_v23 = vld [vmem:[%s406_s0 + $0x38] sm:$0xff]  ;;  %v73_v37 = vshrl.u32 %v72_v32, 7  ;;  %v70_v43 = vld [vmem:[%s407_s1] sm:$0xff] }
   0x4   :  { %v23_v8 = vadd.f32 %v22_v3, %v297_v2  ;;  %v40_v10 = vadd.f32 %v33_v5, %v32_v4  ;;  %v38_v21 = vmul.f32 %v334_v19, %v334_v19  ;;  %v39_v25 = vmul.f32 %v342_v23, %v342_v23  ;;  %v120_v48 = vld [vmem:[%s408_s2] sm:$0xff] }
   0x5   :  { %v74_v39 = vsub.s32 0, %v73_v37  ;;  %v78_v40 = vsub.s32 1, %v73_v37  ;;  %v82_v41 = vsub.s32 2, %v73_v37  ;;  %v86_v42 = vsub.s32 3, %v73_v37 }
   0x6   :  { %v24_v12 = vadd.f32 %v23_v8, %v310_v7  ;;  %v41_v14 = vadd.f32 %v40_v10, %v34_v6  ;;  %v90_v44 = vsub.s32 4, %v73_v37  ;;  %v94_v45 = vsub.s32 5, %v73_v37 }
   0x7   :  { %v98_v46 = vsub.s32 6, %v73_v37  ;;  %v102_v47 = vsub.s32 7, %v73_v37  ;;  %v75_v49 = vrot.slane %v70_v43, %v74_v39  ;;  %v79_v50 = vrot.slane %v70_v43, %v78_v40 }
   0x8   :  { %v25_v16 = vadd.f32 %v24_v12, %v318_v11  ;;  %v42_v18 = vadd.f32 %v41_v14, %v35_v9  ;;  %v83_v51 = vrot.slane %v70_v43, %v82_v41  ;;  %v87_v52 = vrot.slane %v70_v43, %v86_v42 }
   0x9   :  { %v91_v53 = vrot.slane %v70_v43, %v90_v44  ;;  %v95_v54 = vrot.slane %v70_v43, %v94_v45  ;;  %v99_v55 = vrot.slane %v70_v43, %v98_v46  ;;  %v103_v56 = vrot.slane %v70_v43, %v102_v47 }
   0xa   :  { %v26_v20 = vadd.f32 %v25_v16, %v326_v15  ;;  %v43_v22 = vadd.f32 %v42_v18, %v36_v13  ;;  %v125_v57 = vrot.slane %v120_v48, %v74_v39  ;;  %v129_v58 = vrot.slane %v120_v48, %v78_v40 }
   0xb   :  { %v133_v59 = vrot.slane %v120_v48, %v82_v41  ;;  %v137_v60 = vrot.slane %v120_v48, %v86_v42  ;;  %v141_v61 = vrot.slane %v120_v48, %v90_v44  ;;  %v145_v62 = vrot.slane %v120_v48, %v94_v45 }
   0xc   :  { %v27_v24 = vadd.f32 %v26_v20, %v334_v19  ;;  %v44_v26 = vadd.f32 %v43_v22, %v37_v17  ;;  %v149_v63 = vrot.slane %v120_v48, %v98_v46  ;;  %v153_v3 = vrot.slane %v120_v48, %v102_v47 }
   0xe   :  { %v28_v27 = vadd.f32 %v27_v24, %v342_v23  ;;  %v45_v28 = vadd.f32 %v44_v26, %v38_v21 }
  0x10   :  { %29 = vadd.xlane.f32.xlu0 %v28_v27  ;;  %v46_v29 = vadd.f32 %v45_v28, %v39_v25 }
  0x14   :  { %47 = vadd.xlane.f32.xlu0 %v46_v29 }
  0x9d   :  { %v30_v30 = vpop.xlane.xlu0 %29 }
  0x9e   :  { %v31_v31 = vmul.f32 0.0009765625, %v30_v30 }
  0xa0   :  { %v50_v34 = vmul.f32 %v31_v31, %v31_v31  ;;  %v54_v4 = vsub.f32 %v287_v0, %v31_v31  ;;  %v55_v5 = vsub.f32 %v292_v1, %v31_v31  ;;  %v56_v6 = vsub.f32 %v297_v2, %v31_v31 }
  0xa1   :  { %v48_v33 = vpop.xlane.xlu0 %47  ;;  %v57_v8 = vsub.f32 %v310_v7, %v31_v31  ;;  %v58_v10 = vsub.f32 %v318_v11, %v31_v31  ;;  %v59_v12 = vsub.f32 %v326_v15, %v31_v31  ;;  %v60_v13 = vsub.f32 %v334_v19, %v31_v31 }
  0xa2   :  { %v49_v35 = vmul.f32 0.0009765625, %v48_v33  ;;  %v61_v14 = vsub.f32 %v342_v23, %v31_v31 }
  0xa4   :  { %v51_v36 = vsub.f32 %v49_v35, %v50_v34 }
  0xa6   :  { %v52_v38 = vadd.f32 1e-05, %v51_v36 }
  0xa8   :  { %230 = vrsqrt.f32 %v52_v38 }
  0xb2   :  { %v231_v9 = vpop.eup %230 }
  0xb3   :  { %v62_v16 = vmul.f32 %v231_v9, %v54_v4  ;;  %v63_v17 = vmul.f32 %v231_v9, %v55_v5  ;;  %v64_v18 = vmul.f32 %v231_v9, %v56_v6  ;;  %v65_v20 = vmul.f32 %v231_v9, %v57_v8 }
  0xb4   :  { %v66_v0 = vmul.f32 %v231_v9, %v58_v10  ;;  %v67_v21 = vmul.f32 %v231_v9, %v59_v12  ;;  %v68_v1 = vmul.f32 %v231_v9, %v60_v13  ;;  %v69_v22 = vmul.f32 %v231_v9, %v61_v14 }
  0xb5   :  { %v112_v2 = vmul.f32 %v75_v49, %v62_v16  ;;  %v113_v24 = vmul.f32 %v79_v50, %v63_v17  ;;  %v114_v7 = vmul.f32 %v83_v51, %v64_v18  ;;  %v115_v25 = vmul.f32 %v87_v52, %v65_v20 }
  0xb6   :  { %v116_v26 = vmul.f32 %v91_v53, %v66_v0  ;;  %v117_v11 = vmul.f32 %v95_v54, %v67_v21  ;;  %v118_v27 = vmul.f32 %v99_v55, %v68_v1  ;;  %v119_v15 = vmul.f32 %v103_v56, %v69_v22 }
  0xb7   :  { %v162_v28 = vadd.f32 %v125_v57, %v112_v2  ;;  %v163_v19 = vadd.f32 %v129_v58, %v113_v24  ;;  %v164_v29 = vadd.f32 %v133_v59, %v114_v7  ;;  %v362_v23 = vadd.f32 %v137_v60, %v115_v25 }
  0xb8   :  { %v364_v30 = vadd.f32 %v141_v61, %v116_v26  ;;  %v366_v31 = vadd.f32 %v145_v62, %v117_v11  ;;  %v368_v32 = vadd.f32 %v149_v63, %v118_v27  ;;  %v370_v33 = vadd.f32 %v153_v3, %v119_v15 }
  0xb9   :  { %v170_v34 = vsub.f32 0.0, %v162_v28  ;;  %v171_v35 = vsub.f32 0.0, %v163_v19  ;;  %v172_v36 = vsub.f32 0.0, %v164_v29  ;;  %v173_v37 = vsub.f32 0.0, %v362_v23 }
  0xba   :  { %v174_v38 = vsub.f32 0.0, %v364_v30  ;;  %v175_v39 = vsub.f32 0.0, %v366_v31  ;;  %v176_v40 = vsub.f32 0.0, %v368_v32  ;;  %v177_v44 = vsub.f32 0.0, %v370_v33 }
  0xbb   :  { %v178_v41 = vmul.f32 1.442695, %v170_v34  ;;  %v180_v42 = vmul.f32 1.442695, %v171_v35  ;;  %v182_v43 = vmul.f32 1.442695, %v172_v36 }
  0xbc   :  { %v184_v45 = vmul.f32 1.442695, %v173_v37  ;;  %v186_v46 = vmul.f32 1.442695, %v174_v38  ;;  %v188_v47 = vmul.f32 1.442695, %v175_v39 }
  0xbd   :  { %232 = vpow2.f32 %v178_v41  ;;  %v190_v48 = vmul.f32 1.442695, %v176_v40  ;;  %v192_v49 = vmul.f32 1.442695, %v177_v44 }
  0xbe   :  { %234 = vpow2.f32 %v180_v42 }
  0xbf   :  { %236 = vpow2.f32 %v182_v43 }
  0xc0   :  { %238 = vpow2.f32 %v184_v45 }
  0xc1   :  { %240 = vpow2.f32 %v186_v46 }
  0xc2   :  { %242 = vpow2.f32 %v188_v47 }
  0xc3   :  { %244 = vpow2.f32 %v190_v48 }
  0xc4   :  { %246 = vpow2.f32 %v192_v49 }
  0xc7   :  { %v233_v50 = vpop.eup %232 }
  0xc8   :  { %v235_v51 = vpop.eup %234  ;;  %v194_v52 = vadd.f32 1.0, %v233_v50 }
  0xc9   :  { %v237_v53 = vpop.eup %236  ;;  %v195_v54 = vadd.f32 1.0, %v235_v51 }
  0xca   :  { %v239_v55 = vpop.eup %238  ;;  %v196_v56 = vadd.f32 1.0, %v237_v53  ;;  %248 = vrcp.f32 %v194_v52 }
  0xcb   :  { %v241_v57 = vpop.eup %240  ;;  %v197_v58 = vadd.f32 1.0, %v239_v55  ;;  %250 = vrcp.f32 %v195_v54 }
  0xcc   :  { %v243_v59 = vpop.eup %242  ;;  %v198_v60 = vadd.f32 1.0, %v241_v57  ;;  %252 = vrcp.f32 %v196_v56 }
  0xcd   :  { %v245_v61 = vpop.eup %244  ;;  %v199_v62 = vadd.f32 1.0, %v243_v59  ;;  %254 = vrcp.f32 %v197_v58 }
  0xce   :  { %v247_v63 = vpop.eup %246  ;;  %v200_v3 = vadd.f32 1.0, %v245_v61  ;;  %256 = vrcp.f32 %v198_v60 }
  0xcf   :  { %v201_v4 = vadd.f32 1.0, %v247_v63  ;;  %258 = vrcp.f32 %v199_v62 }
  0xd0   :  { %260 = vrcp.f32 %v200_v3 }
  0xd1   :  { %262 = vrcp.f32 %v201_v4 }
  0xd4   :  { %v249_v5 = vpop.eup %248 }
  0xd5   :  { %v251_v6 = vpop.eup %250  ;;  %v210_v8 = vmul.f32 %v249_v5, %v162_v28 }
  0xd6   :  { %v253_v9 = vpop.eup %252  ;;  %v211_v10 = vmul.f32 %v251_v6, %v163_v19 }
  0xd7   :  { %v255_v12 = vpop.eup %254  ;;  %v212_v13 = vmul.f32 %v253_v9, %v164_v29  ;;  %218 = vst [vmem:[%s409_s3] sm:$0xff] %v210_v8 }
  0xd8   :  { %v257_v14 = vpop.eup %256  ;;  %v213_v16 = vmul.f32 %v255_v12, %v362_v23  ;;  %219 = vst [vmem:[%s409_s3 + $0x8] sm:$0xff] %v211_v10 }
  0xd9   :  { %v259_v17 = vpop.eup %258  ;;  %v214_v18 = vmul.f32 %v257_v14, %v364_v30  ;;  %220 = vst [vmem:[%s409_s3 + $0x10] sm:$0xff] %v212_v13 }
  0xda   :  { %v261_v20 = vpop.eup %260  ;;  %v215_v0 = vmul.f32 %v259_v17, %v366_v31  ;;  %221 = vst [vmem:[%s409_s3 + $0x18] sm:$0xff] %v213_v16 }
  0xdb   :  { %v263_v21 = vpop.eup %262  ;;  %v216_v1 = vmul.f32 %v261_v20, %v368_v32  ;;  %222 = vst [vmem:[%s409_s3 + $0x20] sm:$0xff] %v214_v18 }
  0xdc   :  { %v217_v22 = vmul.f32 %v263_v21, %v370_v33  ;;  %223 = vst [vmem:[%s409_s3 + $0x28] sm:$0xff] %v215_v0 }
  0xdd   :  { %224 = vst [vmem:[%s409_s3 + $0x30] sm:$0xff] %v216_v1 }
  0xde   :  { %225 = vst [vmem:[%s409_s3 + $0x38] sm:$0xff] %v217_v22 }

// kernel: unet_forward.83
= control target key start
LH: loop header
LB: loop body
LE: loop exit
PB: predicated region body
PF: predicated region fallthrough
CT: control target
= control target key end

     0   :  { %s892_s1 = inlined_call_operand.vmem [shape: bf16[256,128], index: 1, kind: input, shape index: {}]   ;;  %s893_s0 = inlined_call_operand.vmem [shape: bf16[128,256], index: 0, kind: input, shape index: {}]   ;;  %s894_s2 = inlined_call_operand.vmem [shape: f32[1,128], index: 2, kind: input, shape index: {}]   ;;  %s895_s3 = inlined_call_operand.vmem [shape: f32[128,128], index: 3, kind: input, shape index: {}]   ;;  %s896_s4 = inlined_call_operand.vmem [shape: f32[128,128], index: 4, kind: output, shape index: {}]  }
   0x1   :  { %v614_v0 = vld [vmem:[%s892_s1 + $0x40] sm:$0xff]   ;;  %v616_v2 = vld [vmem:[%s892_s1 + $0x48] sm:$0xff]   ;;  %v618_v4 = vld [vmem:[%s892_s1 + $0x50] sm:$0xff]  }
   0x2   :  { %v615_v1 = vld [vmem:[%s892_s1] sm:$0xff]   ;;  %534 = vmatprep.subr.bf16.mxu0 %v614_v0  ;;  %598 = vmatprep.subr.bf16.mxu1 %v614_v0  ;;  %v617_v3 = vld [vmem:[%s892_s1 + $0x8] sm:$0xff]   ;;  %v619_v5 = vld [vmem:[%s892_s1 + $0x10] sm:$0xff]  }
   0x3   :  { %535 = vmatpush3.bf16.msra.mxu0 %v615_v1  ;;  %606 = vmatpush3.bf16.msra.mxu1 %v615_v1  ;;  %v620_v6 = vld [vmem:[%s892_s1 + $0x58] sm:$0xff]   ;;  %v622_v8 = vld [vmem:[%s892_s1 + $0x60] sm:$0xff]   ;;  %v624_v10 = vld [vmem:[%s892_s1 + $0x68] sm:$0xff]  }
   0x4   :  { %536 = vmatprep.subr.bf16.mxu0 %v616_v2  ;;  %599 = vmatprep.subr.bf16.mxu1 %v616_v2  ;;  %v621_v7 = vld [vmem:[%s892_s1 + $0x18] sm:$0xff]   ;;  %v623_v9 = vld [vmem:[%s892_s1 + $0x20] sm:$0xff]   ;;  %v625_v13 = vld [vmem:[%s892_s1 + $0x28] sm:$0xff]  }
   0x5   :  { %v632_v11 = vld [vmem:[%s893_s0 + $0x4] ss:$8 sps:$4 sm:$0xff]   ;;  %v626_v14 = vld [vmem:[%s892_s1 + $0x70] sm:$0xff]   ;;  %v628_v16 = vld [vmem:[%s892_s1 + $0x78] sm:$0xff]  }
   0x6   :  { %v635_v12 = vld [vmem:[%s893_s0 + $0x44] ss:$8 sps:$4 sm:$0xff]   ;;  %310 = vmatprep.mubr.bf16.mxu0 %v632_v11  ;;  %v627_v15 = vld [vmem:[%s892_s1 + $0x30] sm:$0xff]   ;;  %v629_v17 = vld [vmem:[%s892_s1 + $0x38] sm:$0xff]  }
   0x7   :  { %537 = vmatpush3.bf16.msra.mxu0 %v617_v3  ;;  %607 = vmatpush3.bf16.msra.mxu1 %v617_v3  ;;  %v630_v18 = vld [vmem:[%s893_s0] ss:$8 sps:$4 sm:$0xff]   ;;  %v636_v20 = vld [vmem:[%s893_s0 + $0x14] ss:$8 sps:$4 sm:$0xff]   ;;  %v640_v22 = vld [vmem:[%s893_s0 + $0x10] ss:$8 sps:$4 sm:$0xff]  }
   0x8   :  { %538 = vmatprep.subr.bf16.mxu0 %v618_v4  ;;  %600 = vmatprep.subr.bf16.mxu1 %v618_v4  ;;  %v633_v19 = vld [vmem:[%s893_s0 + $0x40] ss:$8 sps:$4 sm:$0xff]   ;;  %v638_v21 = vld [vmem:[%s893_s0 + $0x54] ss:$8 sps:$4 sm:$0xff]   ;;  %v641_v23 = vld [vmem:[%s893_s0 + $0x50] ss:$8 sps:$4 sm:$0xff]  }
   0x9   :  { %342 = vmatprep.mubr.bf16.mxu1 %v635_v12  ;;  %v642_v24 = vld [vmem:[%s893_s0 + $0x24] ss:$8 sps:$4 sm:$0xff]   ;;  %v646_v26 = vld [vmem:[%s893_s0 + $0x20] ss:$8 sps:$4 sm:$0xff]   ;;  %v648_v28 = vld [vmem:[%s893_s0 + $0x34] ss:$8 sps:$4 sm:$0xff]  }
   0xa   :  { %v644_v25 = vld [vmem:[%s893_s0 + $0x64] ss:$8 sps:$4 sm:$0xff]   ;;  %v647_v27 = vld [vmem:[%s893_s0 + $0x60] ss:$8 sps:$4 sm:$0xff]   ;;  %v650_v29 = vld [vmem:[%s893_s0 + $0x74] ss:$8 sps:$4 sm:$0xff]  }
   0xb   :  { %539 = vmatpush3.bf16.msra.mxu0 %v619_v5  ;;  %608 = vmatpush3.bf16.msra.mxu1 %v619_v5  ;;  %v652_v30 = vld [vmem:[%s893_s0 + $0x30] ss:$8 sps:$4 sm:$0xff]   ;;  %v778_v35 = vld [vmem:[%s894_s2] ss:$0 sm:$0xff]  ;;  %v450_v49 = vld [vmem:[%s895_s3 + $0x8] sm:$0xff] }
   0xc   :  { %540 = vmatprep.subr.bf16.mxu0 %v620_v6  ;;  %601 = vmatprep.subr.bf16.mxu1 %v620_v6  ;;  %v653_v31 = vld [vmem:[%s893_s0 + $0x70] ss:$8 sps:$4 sm:$0xff]   ;;  %v449_v41 = vld [vmem:[%s895_s3] sm:$0xff]  ;;  %v458_v50 = vld [vmem:[%s895_s3 + $0x48] sm:$0xff] }
   0xd   :  { %v457_v42 = vld [vmem:[%s895_s3 + $0x40] sm:$0xff]  ;;  %v451_v1 = vld [vmem:[%s895_s3 + $0x10] sm:$0xff] }
   0xe   :  { %v459_v2 = vld [vmem:[%s895_s3 + $0x50] sm:$0xff] }
   0xf   :  { %541 = vmatpush3.bf16.msra.mxu0 %v621_v7  ;;  %609 = vmatpush3.bf16.msra.mxu1 %v621_v7 }
  0x10   :  { %542 = vmatprep.subr.bf16.mxu0 %v622_v8  ;;  %602 = vmatprep.subr.bf16.mxu1 %v622_v8 }
  0x13   :  { %543 = vmatpush3.bf16.msra.mxu0 %v623_v9  ;;  %610 = vmatpush3.bf16.msra.mxu1 %v623_v9  ;;  %v452_v9 = vld [vmem:[%s895_s3 + $0x18] sm:$0xff] }
  0x14   :  { %544 = vmatprep.subr.bf16.mxu0 %v624_v10  ;;  %603 = vmatprep.subr.bf16.mxu1 %v624_v10  ;;  %v460_v10 = vld [vmem:[%s895_s3 + $0x58] sm:$0xff] }
  0x17   :  { %545 = vmatpush3.bf16.msra.mxu0 %v625_v13  ;;  %611 = vmatpush3.bf16.msra.mxu1 %v625_v13 }
  0x18   :  { %546 = vmatprep.subr.bf16.mxu0 %v626_v14  ;;  %604 = vmatprep.subr.bf16.mxu1 %v626_v14 }
  0x1b   :  { %547 = vmatpush3.bf16.msra.mxu0 %v627_v15  ;;  %612 = vmatpush3.bf16.msra.mxu1 %v627_v15 }
  0x1c   :  { %548 = vmatprep.subr.bf16.mxu0 %v628_v16  ;;  %605 = vmatprep.subr.bf16.mxu1 %v628_v16 }
  0x1f   :  { %549 = vmatpush3.bf16.msra.mxu0 %v629_v17  ;;  %613 = vmatpush3.bf16.msra.mxu1 %v629_v17 }
  0x22   :  { %311 = vmatmul.mubr.bf16.vlgmr.msra.gmra.mrb[0].mxu0 %v630_v18  ;;  %343 = vmatmul.mubr.bf16.vlgmr.msra.gmra.mrb[0].mxu1 %v633_v19 }
  0x23   :  { %318 = vmatprep.mubr.bf16.mxu0 %v636_v20  ;;  %350 = vmatprep.mubr.bf16.mxu1 %v638_v21 }
  0x2a   :  { %319 = vmatmul.mubr.bf16.gmra.mrb[4].mxu0 %v640_v22  ;;  %351 = vmatmul.mubr.bf16.gmra.mrb[4].mxu1 %v641_v23 }
  0x2b   :  { %326 = vmatprep.mubr.bf16.mxu0 %v642_v24  ;;  %358 = vmatprep.mubr.bf16.mxu1 %v644_v25  ;;  %v453_v25 = vld [vmem:[%s895_s3 + $0x20] sm:$0xff] }
  0x32   :  { %327 = vmatmul.mubr.bf16.gmra.mrb[8].mxu0 %v646_v26  ;;  %359 = vmatmul.mubr.bf16.gmra.mrb[8].mxu1 %v647_v27  ;;  %v461_v26 = vld [vmem:[%s895_s3 + $0x60] sm:$0xff] }
  0x33   :  { %334 = vmatprep.mubr.bf16.mxu0 %v648_v28  ;;  %366 = vmatprep.mubr.bf16.mxu1 %v650_v29 }
  0x3a   :  { %335 = vmatmul.mubr.bf16.gmra.mrb[12].mxu0 %v652_v30  ;;  %367 = vmatmul.mubr.bf16.gmra.mrb[12].mxu1 %v653_v31 }
  0xf5   :  { %v550_v32 = vpop.f32.mrb[0].mxu0  ;;  %v574_v33 = vpop.f32.mrb[0].mxu1 }
  0xf6   :  { %v551_v34 = vpop.f32.mrb[1].mxu0  ;;  %v575_v36 = vpop.f32.mrb[1].mxu1 }
  0xf7   :  { %v552_v37 = vadd.f32 %v551_v34, %v550_v32  ;;  %v576_v38 = vadd.f32 %v575_v36, %v574_v33  ;;  %v553_v39 = vpop.f32.mrb[2].mxu0  ;;  %v577_v40 = vpop.f32.mrb[2].mxu1  ;;  %v454_v33 = vld [vmem:[%s895_s3 + $0x28] sm:$0xff] }
  0xf8   :  { %v554_v43 = vpop.f32.mrb[3].mxu0  ;;  %v578_v44 = vpop.f32.mrb[3].mxu1  ;;  %v462_v34 = vld [vmem:[%s895_s3 + $0x68] sm:$0xff] }
  0xf9   :  { %v433_v45 = vadd.f32 %v552_v37, %v778_v35  ;;  %v441_v46 = vadd.f32 %v576_v38, %v778_v35  ;;  %v555_v47 = vadd.f32 %v554_v43, %v553_v39  ;;  %v579_v48 = vadd.f32 %v578_v44, %v577_v40 }
  0xfb   :  { %v465_v51 = vadd.f32 %v449_v41, %v433_v45  ;;  %v473_v52 = vadd.f32 %v457_v42, %v441_v46  ;;  %v434_v53 = vadd.f32 %v555_v47, %v778_v35  ;;  %v442_v54 = vadd.f32 %v579_v48, %v778_v35 }
  0xfd   :  { %481 = vst [vmem:[%s896_s4] sm:$0xff] %v465_v51  ;;  %489 = vst [vmem:[%s896_s4 + $0x40] sm:$0xff] %v473_v52  ;;  %v466_v55 = vadd.f32 %v450_v49, %v434_v53  ;;  %v474_v56 = vadd.f32 %v458_v50, %v442_v54  ;;  %v556_v57 = vpop.f32.mrb[4].mxu0  ;;  %v580_v58 = vpop.f32.mrb[4].mxu1  ;;  %v455_v50 = vld [vmem:[%s895_s3 + $0x30] sm:$0xff] }
  0xfe   :  { %v557_v59 = vpop.f32.mrb[5].mxu0  ;;  %v581_v60 = vpop.f32.mrb[5].mxu1  ;;  %v463_v51 = vld [vmem:[%s895_s3 + $0x70] sm:$0xff] }
  0xff   :  { %482 = vst [vmem:[%s896_s4 + $0x8] sm:$0xff] %v466_v55  ;;  %490 = vst [vmem:[%s896_s4 + $0x48] sm:$0xff] %v474_v56  ;;  %v558_v61 = vadd.f32 %v557_v59, %v556_v57  ;;  %v582_v62 = vadd.f32 %v581_v60, %v580_v58  ;;  %v559_v63 = vpop.f32.mrb[6].mxu0  ;;  %v583_v0 = vpop.f32.mrb[6].mxu1  ;;  %v456_v58 = vld [vmem:[%s895_s3 + $0x38] sm:$0xff] }
 0x100   :  { %v560_v3 = vpop.f32.mrb[7].mxu0  ;;  %v584_v4 = vpop.f32.mrb[7].mxu1  ;;  %v464_v59 = vld [vmem:[%s895_s3 + $0x78] sm:$0xff] }
 0x101   :  { %v435_v5 = vadd.f32 %v558_v61, %v778_v35  ;;  %v443_v6 = vadd.f32 %v582_v62, %v778_v35  ;;  %v561_v7 = vadd.f32 %v560_v3, %v559_v63  ;;  %v585_v8 = vadd.f32 %v584_v4, %v583_v0 }
 0x103   :  { %v467_v11 = vadd.f32 %v451_v1, %v435_v5  ;;  %v475_v12 = vadd.f32 %v459_v2, %v443_v6  ;;  %v436_v13 = vadd.f32 %v561_v7, %v778_v35  ;;  %v444_v14 = vadd.f32 %v585_v8, %v778_v35 }
 0x105   :  { %483 = vst [vmem:[%s896_s4 + $0x10] sm:$0xff] %v467_v11  ;;  %491 = vst [vmem:[%s896_s4 + $0x50] sm:$0xff] %v475_v12  ;;  %v468_v15 = vadd.f32 %v452_v9, %v436_v13  ;;  %v476_v16 = vadd.f32 %v460_v10, %v444_v14  ;;  %v562_v17 = vpop.f32.mrb[8].mxu0  ;;  %v586_v18 = vpop.f32.mrb[8].mxu1 }
 0x106   :  { %v563_v19 = vpop.f32.mrb[9].mxu0  ;;  %v587_v20 = vpop.f32.mrb[9].mxu1 }
 0x107   :  { %484 = vst [vmem:[%s896_s4 + $0x18] sm:$0xff] %v468_v15  ;;  %492 = vst [vmem:[%s896_s4 + $0x58] sm:$0xff] %v476_v16  ;;  %v564_v21 = vadd.f32 %v563_v19, %v562_v17  ;;  %v588_v22 = vadd.f32 %v587_v20, %v586_v18  ;;  %v565_v23 = vpop.f32.mrb[10].mxu0  ;;  %v589_v24 = vpop.f32.mrb[10].mxu1 }
 0x108   :  { %v566_v27 = vpop.f32.mrb[11].mxu0  ;;  %v590_v28 = vpop.f32.mrb[11].mxu1 }
 0x109   :  { %v437_v29 = vadd.f32 %v564_v21, %v778_v35  ;;  %v445_v30 = vadd.f32 %v588_v22, %v778_v35  ;;  %v567_v31 = vadd.f32 %v566_v27, %v565_v23  ;;  %v591_v32 = vadd.f32 %v590_v28, %v589_v24 }
 0x10b   :  { %v469_v36 = vadd.f32 %v453_v25, %v437_v29  ;;  %v477_v37 = vadd.f32 %v461_v26, %v445_v30  ;;  %v438_v38 = vadd.f32 %v567_v31, %v778_v35  ;;  %v446_v39 = vadd.f32 %v591_v32, %v778_v35 }
 0x10d   :  { %485 = vst [vmem:[%s896_s4 + $0x20] sm:$0xff] %v469_v36  ;;  %493 = vst [vmem:[%s896_s4 + $0x60] sm:$0xff] %v477_v37  ;;  %v470_v40 = vadd.f32 %v454_v33, %v438_v38  ;;  %v478_v41 = vadd.f32 %v462_v34, %v446_v39  ;;  %v568_v42 = vpop.f32.mrb[12].mxu0  ;;  %v592_v43 = vpop.f32.mrb[12].mxu1 }
 0x10e   :  { %v569_v44 = vpop.f32.mrb[13].mxu0  ;;  %v593_v45 = vpop.f32.mrb[13].mxu1 }
 0x10f   :  { %486 = vst [vmem:[%s896_s4 + $0x28] sm:$0xff] %v470_v40  ;;  %494 = vst [vmem:[%s896_s4 + $0x68] sm:$0xff] %v478_v41  ;;  %v570_v46 = vadd.f32 %v569_v44, %v568_v42  ;;  %v594_v47 = vadd.f32 %v593_v45, %v592_v43  ;;  %v571_v48 = vpop.f32.mrb[14].mxu0  ;;  %v595_v49 = vpop.f32.mrb[14].mxu1 }
 0x110   :  { %v572_v52 = vpop.f32.mrb[15].mxu0  ;;  %v596_v53 = vpop.f32.mrb[15].mxu1 }
 0x111   :  { %v439_v54 = vadd.f32 %v570_v46, %v778_v35  ;;  %v447_v55 = vadd.f32 %v594_v47, %v778_v35  ;;  %v573_v56 = vadd.f32 %v572_v52, %v571_v48  ;;  %v597_v57 = vadd.f32 %v596_v53, %v595_v49 }
 0x113   :  { %v471_v60 = vadd.f32 %v455_v50, %v439_v54  ;;  %v479_v61 = vadd.f32 %v463_v51, %v447_v55  ;;  %v440_v62 = vadd.f32 %v573_v56, %v778_v35  ;;  %v448_v63 = vadd.f32 %v597_v57, %v778_v35 }
 0x115   :  { %487 = vst [vmem:[%s896_s4 + $0x30] sm:$0xff] %v471_v60  ;;  %495 = vst [vmem:[%s896_s4 + $0x70] sm:$0xff] %v479_v61  ;;  %v472_v0 = vadd.f32 %v456_v58, %v440_v62  ;;  %v480_v1 = vadd.f32 %v464_v59, %v448_v63 }
 0x117   :  { %488 = vst [vmem:[%s896_s4 + $0x38] sm:$0xff] %v472_v0  ;;  %496 = vst [vmem:[%s896_s4 + $0x78] sm:$0xff] %v480_v1 }

// kernel: unet_forward.89
= control target key start
LH: loop header
LB: loop body
LE: loop exit
PB: predicated region body
PF: predicated region fallthrough
CT: control target
= control target key end

     0   :  { %s306_s1 = inlined_call_operand.vmem [shape: bf16[128,128], index: 1, kind: input, shape index: {}]   ;;  %s307_s0 = inlined_call_operand.vmem [shape: bf16[32,128], index: 0, kind: input, shape index: {}]   ;;  %s308_s2 = inlined_call_operand.vmem [shape: f32[1,128], index: 2, kind: input, shape index: {}]   ;;  %s309_s3 = inlined_call_operand.vmem [shape: f32[32,128], index: 3, kind: output, shape index: {}]  }
   0x1   :  { %v231_v0 = vld [vmem:[%s306_s1] sm:$0xff]   ;;  %v232_v1 = vld [vmem:[%s306_s1 + $0x8] sm:$0xff]   ;;  %v233_v2 = vld [vmem:[%s306_s1 + $0x10] sm:$0xff]  }
   0x2   :  { %211 = vmatprep.subr.bf16.mxu0 %v231_v0  ;;  %v234_v3 = vld [vmem:[%s306_s1 + $0x18] sm:$0xff]   ;;  %v239_v4 = vld [vmem:[%s307_s0] sm:$0xff]   ;;  %v236_v6 = vld [vmem:[%s306_s1 + $0x28] sm:$0xff]  }
   0x3   :  { %212 = vmatpush3.bf16.msra.mxu0 %v231_v0  ;;  %227 = vmatprep.mubr.bf16.mxu0 %v239_v4  ;;  %v235_v5 = vld [vmem:[%s306_s1 + $0x20] sm:$0xff]   ;;  %v237_v7 = vld [vmem:[%s306_s1 + $0x30] sm:$0xff]   ;;  %v238_v8 = vld [vmem:[%s306_s1 + $0x38] sm:$0xff]  }
   0x4   :  { %213 = vmatprep.subr.bf16.mxu0 %v232_v1  ;;  %v240_v9 = vld [vmem:[%s307_s0 + $0x8] sm:$0xff]   ;;  %v200_v10 = vld [vmem:[%s308_s2] ss:$0 sm:$0xff] }
   0x7   :  { %214 = vmatpush3.bf16.msra.mxu0 %v232_v1 }
   0x8   :  { %215 = vmatprep.subr.bf16.mxu0 %v233_v2 }
   0xb   :  { %216 = vmatpush3.bf16.msra.mxu0 %v233_v2 }
   0xc   :  { %217 = vmatprep.subr.bf16.mxu0 %v234_v3 }
   0xf   :  { %218 = vmatpush3.bf16.msra.mxu0 %v234_v3 }
  0x10   :  { %219 = vmatprep.subr.bf16.mxu0 %v235_v5 }
  0x13   :  { %220 = vmatpush3.bf16.msra.mxu0 %v235_v5 }
  0x14   :  { %221 = vmatprep.subr.bf16.mxu0 %v236_v6 }
  0x17   :  { %222 = vmatpush3.bf16.msra.mxu0 %v236_v6 }
  0x18   :  { %223 = vmatprep.subr.bf16.mxu0 %v237_v7 }
  0x1b   :  { %224 = vmatpush3.bf16.msra.mxu0 %v237_v7 }
  0x1c   :  { %225 = vmatprep.subr.bf16.mxu0 %v238_v8 }
  0x1f   :  { %226 = vmatpush3.bf16.msra.mxu0 %v238_v8 }
  0x22   :  { %228 = vmatmul.mubr.bf16.vlgmr.msra.gmra.mrb[0].mxu0 %v240_v9 }
  0xf5   :  { %v229_v11 = vpop.f32.mrb[0].mxu0 }
  0xf6   :  { %v180_v12 = vadd.f32 %v229_v11, %v200_v10  ;;  %v141_v13 = vpop.f32.mrb[1].mxu0 }
  0xf7   :  { %v178_v14 = vadd.f32 %v200_v10, %v141_v13  ;;  %v230_v15 = vpop.f32.mrb[2].mxu0 }
  0xf8   :  { %184 = vst [vmem:[%s309_s3 + $0x10] sm:$0xff] %v180_v12  ;;  %v181_v16 = vadd.f32 %v230_v15, %v200_v10  ;;  %v144_v17 = vpop.f32.mrb[3].mxu0 }
  0xf9   :  { %182 = vst [vmem:[%s309_s3] sm:$0xff] %v178_v14  ;;  %v179_v18 = vadd.f32 %v200_v10, %v144_v17 }
  0xfa   :  { %185 = vst [vmem:[%s309_s3 + $0x18] sm:$0xff] %v181_v16 }
  0xfb   :  { %183 = vst [vmem:[%s309_s3 + $0x8] sm:$0xff] %v179_v18 }

// kernel: unet_forward.90
= control target key start
LH: loop header
LB: loop body
LE: loop exit
PB: predicated region body
PF: predicated region fallthrough
CT: control target
= control target key end

     0   :  { %v36_v12 = vlaneseq  ;;  %s128_s0 = inlined_call_operand.vmem [shape: f32[8,256], index: 0, kind: input, shape index: {}]   ;;  %s129_s1 = inlined_call_operand.vmem [shape: f32[1,256], index: 1, kind: input, shape index: {}]   ;;  %s130_s2 = inlined_call_operand.vmem [shape: f32[1,256], index: 2, kind: input, shape index: {}]   ;;  %s131_s3 = inlined_call_operand.vmem [shape: f32[8,256], index: 3, kind: output, shape index: {}]  }
   0x1   :  { %v14_v0 = vld [vmem:[%s128_s0] sm:$0xff]  ;;  %v15_v1 = vld [vmem:[%s128_s0 + $0x8] sm:$0xff] }
   0x2   :  { %v16_v2 = vadd.f32 %v15_v1, %v14_v0  ;;  %v20_v3 = vmul.f32 %v14_v0, %v14_v0  ;;  %v21_v4 = vmul.f32 %v15_v1, %v15_v1  ;;  %v37_v14 = vshrl.u32 %v36_v12, 7  ;;  %v34_v17 = vld [vmem:[%s129_s1] sm:$0x3] }
   0x3   :  { %v48_v18 = vld [vmem:[%s130_s2] sm:$0x3] }
   0x4   :  { %17 = vadd.xlane.f32.xlu0 %v16_v2  ;;  %v22_v5 = vadd.f32 %v21_v4, %v20_v3  ;;  %v38_v15 = vsub.s32 0, %v37_v14  ;;  %v42_v16 = vsub.s32 1, %v37_v14 }
   0x6   :  { %v39_v21 = vrot.slane %v34_v17, %v38_v15  ;;  %v43_v22 = vrot.slane %v34_v17, %v42_v16  ;;  %v53_v24 = vrot.slane %v48_v18, %v38_v15  ;;  %v57_v25 = vrot.slane %v48_v18, %v42_v16 }
   0x8   :  { %23 = vadd.xlane.f32.xlu0 %v22_v5 }
  0x91   :  { %v18_v6 = vpop.xlane.xlu0 %17 }
  0x92   :  { %v19_v7 = vmul.f32 0.00390625, %v18_v6 }
  0x94   :  { %v26_v9 = vmul.f32 %v19_v7, %v19_v7  ;;  %v30_v19 = vsub.f32 %v14_v0, %v19_v7  ;;  %v31_v20 = vsub.f32 %v15_v1, %v19_v7 }
  0x95   :  { %v24_v8 = vpop.xlane.xlu0 %23 }
  0x96   :  { %v25_v10 = vmul.f32 0.00390625, %v24_v8 }
  0x98   :  { %v27_v11 = vsub.f32 %v25_v10, %v26_v9 }
  0x9a   :  { %v28_v13 = vadd.f32 1e-05, %v27_v11 }
  0x9c   :  { %80 = vrsqrt.f32 %v28_v13 }
  0xa6   :  { %v81_v23 = vpop.eup %80 }
  0xa7   :  { %v32_v26 = vmul.f32 %v81_v23, %v30_v19  ;;  %v33_v27 = vmul.f32 %v81_v23, %v31_v20 }
  0xa9   :  { %v46_v28 = vmul.f32 %v39_v21, %v32_v26  ;;  %v47_v29 = vmul.f32 %v43_v22, %v33_v27 }
  0xab   :  { %v60_v30 = vadd.f32 %v53_v24, %v46_v28  ;;  %v61_v31 = vadd.f32 %v57_v25, %v47_v29 }
  0xad   :  { %v62_v32 = vsub.f32 0.0, %v60_v30  ;;  %v63_v33 = vsub.f32 0.0, %v61_v31 }
  0xaf   :  { %v64_v34 = vmul.f32 1.442695, %v62_v32  ;;  %v66_v35 = vmul.f32 1.442695, %v63_v33 }
  0xb1   :  { %82 = vpow2.f32 %v64_v34 }
  0xb2   :  { %84 = vpow2.f32 %v66_v35 }
  0xbb   :  { %v83_v36 = vpop.eup %82 }
  0xbc   :  { %v85_v37 = vpop.eup %84  ;;  %v68_v38 = vadd.f32 1.0, %v83_v36 }
  0xbd   :  { %v69_v39 = vadd.f32 1.0, %v85_v37 }
  0xbe   :  { %86 = vrcp.f32 %v68_v38 }
  0xbf   :  { %88 = vrcp.f32 %v69_v39 }
  0xc8   :  { %v87_v40 = vpop.eup %86 }
  0xc9   :  { %v89_v41 = vpop.eup %88  ;;  %v72_v42 = vmul.f32 %v87_v40, %v60_v30 }
  0xca   :  { %v73_v43 = vmul.f32 %v89_v41, %v61_v31 }
  0xcb   :  { %74 = vst [vmem:[%s131_s3] sm:$0xff] %v72_v42 }
  0xcc   :  { %75 = vst [vmem:[%s131_s3 + $0x8] sm:$0xff] %v73_v43 }

// kernel: unet_forward.92
= control target key start
LH: loop header
LB: loop body
LE: loop exit
PB: predicated region body
PF: predicated region fallthrough
CT: control target
= control target key end

     0   :  { %s472_s1 = inlined_call_operand.vmem [shape: bf16[256,128], index: 1, kind: input, shape index: {}]   ;;  %s473_s0 = inlined_call_operand.vmem [shape: bf16[32,256], index: 0, kind: input, shape index: {}]   ;;  %s474_s2 = inlined_call_operand.vmem [shape: f32[1,128], index: 2, kind: input, shape index: {}]   ;;  %s475_s3 = inlined_call_operand.vmem [shape: f32[32,128], index: 3, kind: input, shape index: {}]   ;;  %s476_s4 = inlined_call_operand.vmem [shape: f32[32,128], index: 4, kind: output, shape index: {}]  }
   0x1   :  { %v338_v0 = vld [vmem:[%s472_s1 + $0x40] sm:$0xff]   ;;  %v340_v2 = vld [vmem:[%s472_s1 + $0x48] sm:$0xff]   ;;  %v342_v4 = vld [vmem:[%s472_s1 + $0x50] sm:$0xff]  }
   0x2   :  { %v339_v1 = vld [vmem:[%s472_s1] sm:$0xff]   ;;  %294 = vmatprep.subr.bf16.mxu0 %v338_v0  ;;  %322 = vmatprep.subr.bf16.mxu1 %v338_v0  ;;  %v341_v3 = vld [vmem:[%s472_s1 + $0x8] sm:$0xff]   ;;  %v343_v5 = vld [vmem:[%s472_s1 + $0x10] sm:$0xff]  }
   0x3   :  { %295 = vmatpush3.bf16.msra.mxu0 %v339_v1  ;;  %330 = vmatpush3.bf16.msra.mxu1 %v339_v1  ;;  %v344_v6 = vld [vmem:[%s472_s1 + $0x58] sm:$0xff]   ;;  %v346_v8 = vld [vmem:[%s472_s1 + $0x60] sm:$0xff]   ;;  %v348_v10 = vld [vmem:[%s472_s1 + $0x68] sm:$0xff]  }
   0x4   :  { %296 = vmatprep.subr.bf16.mxu0 %v340_v2  ;;  %323 = vmatprep.subr.bf16.mxu1 %v340_v2  ;;  %v345_v7 = vld [vmem:[%s472_s1 + $0x18] sm:$0xff]   ;;  %v347_v9 = vld [vmem:[%s472_s1 + $0x20] sm:$0xff]   ;;  %v349_v13 = vld [vmem:[%s472_s1 + $0x28] sm:$0xff]  }
   0x5   :  { %v356_v11 = vld [vmem:[%s473_s0 + $0x4] ss:$8 sps:$4 sm:$0xff]   ;;  %v359_v12 = vld [vmem:[%s473_s0 + $0x14] ss:$8 sps:$4 sm:$0xff]   ;;  %v354_v18 = vld [vmem:[%s473_s0] ss:$8 sps:$4 sm:$0xff]  }
   0x6   :  { %v350_v14 = vld [vmem:[%s472_s1 + $0x70] sm:$0xff]   ;;  %214 = vmatprep.mubr.bf16.mxu0 %v356_v11  ;;  %222 = vmatprep.mubr.bf16.mxu1 %v359_v12  ;;  %v352_v16 = vld [vmem:[%s472_s1 + $0x78] sm:$0xff]   ;;  %v293_v23 = vld [vmem:[%s474_s2] ss:$0 sm:$0xff] }
   0x7   :  { %297 = vmatpush3.bf16.msra.mxu0 %v341_v3  ;;  %331 = vmatpush3.bf16.msra.mxu1 %v341_v3  ;;  %v351_v15 = vld [vmem:[%s472_s1 + $0x30] sm:$0xff]   ;;  %v353_v17 = vld [vmem:[%s472_s1 + $0x38] sm:$0xff]   ;;  %v257_v29 = vld [vmem:[%s475_s3] sm:$0xff] }
   0x8   :  { %298 = vmatprep.subr.bf16.mxu0 %v342_v4  ;;  %324 = vmatprep.subr.bf16.mxu1 %v342_v4  ;;  %v357_v19 = vld [vmem:[%s473_s0 + $0x10] ss:$8 sps:$4 sm:$0xff]   ;;  %v258_v37 = vld [vmem:[%s475_s3 + $0x8] sm:$0xff] }
   0x9   :  { %v259_v30 = vld [vmem:[%s475_s3 + $0x10] sm:$0xff]  ;;  %v260_v38 = vld [vmem:[%s475_s3 + $0x18] sm:$0xff] }
   0xb   :  { %299 = vmatpush3.bf16.msra.mxu0 %v343_v5  ;;  %332 = vmatpush3.bf16.msra.mxu1 %v343_v5 }
   0xc   :  { %300 = vmatprep.subr.bf16.mxu0 %v344_v6  ;;  %325 = vmatprep.subr.bf16.mxu1 %v344_v6 }
   0xf   :  { %301 = vmatpush3.bf16.msra.mxu0 %v345_v7  ;;  %333 = vmatpush3.bf16.msra.mxu1 %v345_v7 }
  0x10   :  { %302 = vmatprep.subr.bf16.mxu0 %v346_v8  ;;  %326 = vmatprep.subr.bf16.mxu1 %v346_v8 }
  0x13   :  { %303 = vmatpush3.bf16.msra.mxu0 %v347_v9  ;;  %334 = vmatpush3.bf16.msra.mxu1 %v347_v9 }
  0x14   :  { %304 = vmatprep.subr.bf16.mxu0 %v348_v10  ;;  %327 = vmatprep.subr.bf16.mxu1 %v348_v10 }
  0x17   :  { %305 = vmatpush3.bf16.msra.mxu0 %v349_v13  ;;  %335 = vmatpush3.bf16.msra.mxu1 %v349_v13 }
  0x18   :  { %306 = vmatprep.subr.bf16.mxu0 %v350_v14  ;;  %328 = vmatprep.subr.bf16.mxu1 %v350_v14 }
  0x1b   :  { %307 = vmatpush3.bf16.msra.mxu0 %v351_v15  ;;  %336 = vmatpush3.bf16.msra.mxu1 %v351_v15 }
  0x1c   :  { %308 = vmatprep.subr.bf16.mxu0 %v352_v16  ;;  %329 = vmatprep.subr.bf16.mxu1 %v352_v16 }
  0x1f   :  { %309 = vmatpush3.bf16.msra.mxu0 %v353_v17  ;;  %337 = vmatpush3.bf16.msra.mxu1 %v353_v17 }
  0x22   :  { %215 = vmatmul.mubr.bf16.vlgmr.msra.gmra.mrb[0].mxu0 %v354_v18  ;;  %223 = vmatmul.mubr.bf16.vlgmr.msra.gmra.mrb[0].mxu1 %v357_v19 }
  0xf5   :  { %v310_v20 = vpop.f32.mrb[0].mxu0  ;;  %v316_v21 = vpop.f32.mrb[0].mxu1 }
  0xf6   :  { %v311_v22 = vpop.f32.mrb[1].mxu0  ;;  %v317_v24 = vpop.f32.mrb[1].mxu1 }
  0xf7   :  { %v312_v25 = vadd.f32 %v311_v22, %v310_v20  ;;  %v318_v26 = vadd.f32 %v317_v24, %v316_v21  ;;  %v313_v27 = vpop.f32.mrb[2].mxu0  ;;  %v319_v28 = vpop.f32.mrb[2].mxu1 }
  0xf8   :  { %v314_v31 = vpop.f32.mrb[3].mxu0  ;;  %v320_v32 = vpop.f32.mrb[3].mxu1 }
  0xf9   :  { %v253_v33 = vadd.f32 %v312_v25, %v293_v23  ;;  %v255_v34 = vadd.f32 %v318_v26, %v293_v23  ;;  %v315_v35 = vadd.f32 %v314_v31, %v313_v27  ;;  %v321_v36 = vadd.f32 %v320_v32, %v319_v28 }
  0xfb   :  { %v261_v39 = vadd.f32 %v257_v29, %v253_v33  ;;  %v263_v40 = vadd.f32 %v259_v30, %v255_v34  ;;  %v254_v41 = vadd.f32 %v315_v35, %v293_v23  ;;  %v256_v42 = vadd.f32 %v321_v36, %v293_v23 }
  0xfd   :  { %265 = vst [vmem:[%s476_s4] sm:$0xff] %v261_v39  ;;  %267 = vst [vmem:[%s476_s4 + $0x10] sm:$0xff] %v263_v40  ;;  %v262_v43 = vadd.f32 %v258_v37, %v254_v41  ;;  %v264_v44 = vadd.f32 %v260_v38, %v256_v42 }
  0xff   :  { %266 = vst [vmem:[%s476_s4 + $0x8] sm:$0xff] %v262_v43  ;;  %268 = vst [vmem:[%s476_s4 + $0x18] sm:$0xff] %v264_v44 }

// kernel: unet_forward.95
= control target key start
LH: loop header
LB: loop body
LE: loop exit
PB: predicated region body
PF: predicated region fallthrough
CT: control target
= control target key end

     0   :  { %s955_s15 = smov 0   ;;  %s957_s16 = smov 0   ;;  %s1073_s0 = inlined_call_operand.vmem [shape: bf16[32,512], index: 0, kind: input, shape index: {}]   ;;  %s1074_s1 = inlined_call_operand.vmem [shape: bf16[512,128], index: 1, kind: input, shape index: {}]   ;;  %s1075_s2 = inlined_call_operand.vmem [shape: f32[1,128], index: 2, kind: input, shape index: {}]   ;;  %s1076_s3 = inlined_call_operand.vmem [shape: f32[32,128], index: 3, kind: input, shape index: {}]   ;;  %s1077_s4 = inlined_call_operand.vmem [shape: f32[32,128], index: 4, kind: output, shape index: {}]  }
   0x1   :  { %s959_s17 = smov 0   ;;  %s961_s18 = smov 0  }
   0x2   :  { %s963_s19 = smov 0  }
   0x3 LB: > { %s26_s20 = sadd.s32 1, %s923_s18  ;;  %p49_p1 = scmp.ne.s32.totalorder %s915_s16, %s911_s15  ;;  %s927_s19 = sphi %s963_s19, %s14_s19   ;;  %s923_s18 = sphi %s961_s18, %s1081_s18   ;;  %s919_s17 = sphi %s959_s17, %s1080_s17   ;;  %s915_s16 = sphi %s957_s16, %s1079_s16   ;;  %s911_s15 = sphi %s955_s15, %s1078_s15  }
   0x4   : > { %p27_p0 = scmp.ge.s32.totalorder %s26_s20, 2  ;;  %p50_p2 = scmp.eq.s32.totalorder %s927_s19, 0 }
   0x5   : > { %s42_s22 = sadd.s32 1, %s915_s16  ;;  %p746_p5 = scmp.ge.s32.totalorder %s927_s19, 2 }
   0x6   : > { %s1083_s20 = smov (%p27_p0, %s26_s20), 0  ;;  %p51_p3 = por %p50_p2, %p49_p1 }
   0x7   : > { %s38_s21 = ssub.s32 %s923_s18, %s1083_s20  ;;  %203 = sbr.rel (%p746_p5) target bundleno = 21 (0x15), region = 24 }
   0x8   : > { %p40_p4 = scmp.eq.s32.totalorder %s38_s21, 0 }
   0xa   : > { %s990_s23 = scalar_select %p40_p4, %s915_s16, %s42_s22  }
   0xe   : > { %206 = sbr.rel (!%p51_p3) target bundleno = 21 (0x15), region = 28  ;;  %s208_s24 = sand.u32 (%p51_p3), 1, %s915_s16  }
   0xf   : > { %s781_s25 = sshll.u32 (%p51_p3), %s923_s18, 3  ;;  %s747_s26 = sshll.u32 (%p51_p3), %s208_s24, 5 }
  0x10   : > { %s216_s29 = scalar_lea.vmem (%p51_p3), %s1073_s0, %s781_s25  ;;  %s210_s30 = scalar_lea.vmem (%p51_p3), [#allocation3], %s747_s26 }
  0x11   : > { %v250_v0 = vld [vmem:[%s216_s29] sm:$0xff] (%p51_p3)  ;;  %v252_v1 = vld [vmem:[%s216_s29 + $0x10] sm:$0xff] (%p51_p3) }
  0x12   : > { %v254_v2 = vld [vmem:[%s216_s29 + $0x20] sm:$0xff] (%p51_p3)  ;;  %251 = vst [vmem:[%s210_s30] sm:$0xff] (%p51_p3), %v250_v0  ;;  %253 = vst [vmem:[%s210_s30 + $0x8] sm:$0xff] (%p51_p3), %v252_v1  ;;  %v256_v3 = vld [vmem:[%s216_s29 + $0x30] sm:$0xff] (%p51_p3) }
  0x13   : > { %255 = vst [vmem:[%s210_s30 + $0x10] sm:$0xff] (%p51_p3), %v254_v2  ;;  %257 = vst [vmem:[%s210_s30 + $0x18] sm:$0xff] (%p51_p3), %v256_v3 }
  0x15 PF: > { %p750_p6 = scmp.ge.s32.totalorder %s927_s19, 1  ;;  %p274_p7 = scmp.lt.s32.totalorder %s927_s19, 3 }
  0x17   : > { %p275_p8 = pnand %p750_p6, %p274_p7 }
  0x18   : > { %s281_s5 = sand.u32 (!%p275_p8), 1, %s911_s15   ;;  %s752_s6 = sshll.u32 (!%p275_p8), %s919_s17, 5 }
  0x19   : > { %278 = sbr.rel (%p275_p8) target bundleno = 304 (0x130), region = 70  ;;  %s751_s7 = sshll.u32 (!%p275_p8), %s281_s5, 5 }
  0x1a   : > { %p331_p9 = scmp.lt.s32.totalorder (!%p275_p8), %s752_s6, 63  ;;  %s1007_s12 = scalar_lea.vmem (!%p275_p8), [#allocation3], %s751_s7 }
  0x1b   : > { %p754_p10 = scmp.ne.s32.totalorder (!%p275_p8), %s919_s17, 0 }
  0x20   : > { %s1085_s6 = smov (!%p331_p9, %s752_s6), 63  ;;  %364 = sbr.rel (%p754_p10) target bundleno = 39 (0x27), region = 78 }
  0x21   : > { %s753_s8 = sshll.u32 %s1085_s6, 2  ;;  %v929_v4 = vmov (!%p754_p10), 0.0  }
  0x22   : > { %s1005_s11 = scalar_lea.vmem %s1074_s1, %s753_s8  ;;  %365 = vst [vmem:[#allocation2] sm:$0xff] (!%p754_p10), %v929_v4  ;;  %366 = vst [vmem:[#allocation2 + $0x8] sm:$0xff] (!%p754_p10), %v929_v4 }
  0x23   : > { %367 = vst [vmem:[#allocation2 + $0x10] sm:$0xff] (!%p754_p10), %v929_v4  ;;  %368 = vst [vmem:[#allocation2 + $0x18] sm:$0xff] (!%p754_p10), %v929_v4 }
  0x27 PF: > { %v867_v5 = vld [vmem:[%s1005_s11 + $0x40] sm:$0xff]   ;;  %v869_v7 = vld [vmem:[%s1005_s11 + $0x48] sm:$0xff]   ;;  %v871_v9 = vld [vmem:[%s1005_s11 + $0x50] sm:$0xff]   ;;  %p775_p11 = scmp.ne.s32.totalorder %s919_s17, 1 }
  0x28   : > { %v868_v6 = vld [vmem:[%s1005_s11] sm:$0xff]   ;;  %782 = vmatprep.subr.bf16.mxu0 %v867_v5  ;;  %810 = vmatprep.subr.bf16.mxu1 %v867_v5  ;;  %v870_v8 = vld [vmem:[%s1005_s11 + $0x8] sm:$0xff]   ;;  %v872_v10 = vld [vmem:[%s1005_s11 + $0x10] sm:$0xff]  }
  0x29   : > { %783 = vmatpush3.bf16.msra.mxu0 %v868_v6  ;;  %818 = vmatpush3.bf16.msra.mxu1 %v868_v6  ;;  %v873_v11 = vld [vmem:[%s1005_s11 + $0x58] sm:$0xff]   ;;  %v875_v13 = vld [vmem:[%s1005_s11 + $0x60] sm:$0xff]   ;;  %v877_v15 = vld [vmem:[%s1005_s11 + $0x68] sm:$0xff]  }
  0x2a   : > { %784 = vmatprep.subr.bf16.mxu0 %v869_v7  ;;  %811 = vmatprep.subr.bf16.mxu1 %v869_v7  ;;  %v874_v12 = vld [vmem:[%s1005_s11 + $0x18] sm:$0xff]   ;;  %v876_v14 = vld [vmem:[%s1005_s11 + $0x20] sm:$0xff]   ;;  %v878_v18 = vld [vmem:[%s1005_s11 + $0x28] sm:$0xff]  }
  0x2b   : > { %v885_v16 = vld [vmem:[%s1007_s12 + $0x4] ss:$8 sps:$4 sm:$0xff]   ;;  %v888_v17 = vld [vmem:[%s1007_s12 + $0x14] ss:$8 sps:$4 sm:$0xff]   ;;  %v883_v23 = vld [vmem:[%s1007_s12] ss:$8 sps:$4 sm:$0xff]  }
  0x2c   : > { %v879_v19 = vld [vmem:[%s1005_s11 + $0x70] sm:$0xff]   ;;  %557 = vmatprep.mubr.bf16.mxu0 %v885_v16  ;;  %565 = vmatprep.mubr.bf16.mxu1 %v888_v17  ;;  %v881_v21 = vld [vmem:[%s1005_s11 + $0x78] sm:$0xff]   ;;  %v369_v27 = vld [vmem:[#allocation2] sm:$0xff] }
  0x2d   : > { %785 = vmatpush3.bf16.msra.mxu0 %v870_v8  ;;  %819 = vmatpush3.bf16.msra.mxu1 %v870_v8  ;;  %v880_v20 = vld [vmem:[%s1005_s11 + $0x30] sm:$0xff]   ;;  %v882_v22 = vld [vmem:[%s1005_s11 + $0x38] sm:$0xff]   ;;  %v370_v35 = vld [vmem:[#allocation2 + $0x8] sm:$0xff] }
  0x2e   : > { %786 = vmatprep.subr.bf16.mxu0 %v871_v9  ;;  %812 = vmatprep.subr.bf16.mxu1 %v871_v9  ;;  %v886_v24 = vld [vmem:[%s1007_s12 + $0x10] ss:$8 sps:$4 sm:$0xff]   ;;  %v776_v46 = vld [vmem:[%s1075_s2] ss:$0 sm:$0xff] (!%p775_p11)  ;;  %v602_v50 = vld [vmem:[%s1076_s3 + $0x8] sm:$0xff] (!%p775_p11) }
  0x2f   : > { %v371_v29 = vld [vmem:[#allocation2 + $0x10] sm:$0xff]  ;;  %v372_v37 = vld [vmem:[#allocation2 + $0x18] sm:$0xff]  ;;  %v601_v47 = vld [vmem:[%s1076_s3] sm:$0xff] (!%p775_p11) }
  0x30   : > { %v603_v54 = vld [vmem:[%s1076_s3 + $0x10] sm:$0xff] (!%p775_p11)  ;;  %v604_v56 = vld [vmem:[%s1076_s3 + $0x18] sm:$0xff] (!%p775_p11) }
  0x31   : > { %787 = vmatpush3.bf16.msra.mxu0 %v872_v10  ;;  %820 = vmatpush3.bf16.msra.mxu1 %v872_v10 }
  0x32   : > { %788 = vmatprep.subr.bf16.mxu0 %v873_v11  ;;  %813 = vmatprep.subr.bf16.mxu1 %v873_v11 }
  0x35   : > { %789 = vmatpush3.bf16.msra.mxu0 %v874_v12  ;;  %821 = vmatpush3.bf16.msra.mxu1 %v874_v12 }
  0x36   : > { %790 = vmatprep.subr.bf16.mxu0 %v875_v13  ;;  %814 = vmatprep.subr.bf16.mxu1 %v875_v13 }
  0x39   : > { %791 = vmatpush3.bf16.msra.mxu0 %v876_v14  ;;  %822 = vmatpush3.bf16.msra.mxu1 %v876_v14 }
  0x3a   : > { %792 = vmatprep.subr.bf16.mxu0 %v877_v15  ;;  %815 = vmatprep.subr.bf16.mxu1 %v877_v15 }
  0x3d   : > { %793 = vmatpush3.bf16.msra.mxu0 %v878_v18  ;;  %823 = vmatpush3.bf16.msra.mxu1 %v878_v18 }
  0x3e   : > { %794 = vmatprep.subr.bf16.mxu0 %v879_v19  ;;  %816 = vmatprep.subr.bf16.mxu1 %v879_v19 }
  0x41   : > { %795 = vmatpush3.bf16.msra.mxu0 %v880_v20  ;;  %824 = vmatpush3.bf16.msra.mxu1 %v880_v20 }
  0x42   : > { %796 = vmatprep.subr.bf16.mxu0 %v881_v21  ;;  %817 = vmatprep.subr.bf16.mxu1 %v881_v21 }
  0x45   : > { %797 = vmatpush3.bf16.msra.mxu0 %v882_v22  ;;  %825 = vmatpush3.bf16.msra.mxu1 %v882_v22 }
  0x48   : > { %558 = vmatmul.mubr.bf16.vlgmr.msra.gmra.mrb[0].mxu0 %v883_v23  ;;  %566 = vmatmul.mubr.bf16.vlgmr.msra.gmra.mrb[0].mxu1 %v886_v24 }
 0x11b   : > { %v798_v25 = vpop.f32.mrb[0].mxu0  ;;  %v804_v26 = vpop.f32.mrb[0].mxu1 }
 0x11c   : > { %v799_v28 = vpop.f32.mrb[1].mxu0  ;;  %v805_v30 = vpop.f32.mrb[1].mxu1 }
 0x11d   : > { %v800_v31 = vadd.f32 %v799_v28, %v798_v25  ;;  %v806_v32 = vadd.f32 %v805_v30, %v804_v26  ;;  %v801_v33 = vpop.f32.mrb[2].mxu0  ;;  %v807_v34 = vpop.f32.mrb[2].mxu1  ;;  %585 = sbr.rel (%p775_p11) target bundleno = 304 (0x130), region = 82 }
 0x11e   : > { %v802_v36 = vpop.f32.mrb[3].mxu0  ;;  %v808_v38 = vpop.f32.mrb[3].mxu1 }
 0x11f   : > { %v574_v39 = vadd.f32 %v800_v31, %v369_v27  ;;  %v576_v40 = vadd.f32 %v806_v32, %v371_v29  ;;  %v803_v41 = vadd.f32 %v802_v36, %v801_v33  ;;  %v809_v42 = vadd.f32 %v808_v38, %v807_v34 }
 0x121   : > { %578 = vst [vmem:[#allocation2] sm:$0xff] %v574_v39  ;;  %580 = vst [vmem:[#allocation2 + $0x10] sm:$0xff] %v576_v40  ;;  %v575_v43 = vadd.f32 %v803_v41, %v370_v35  ;;  %v577_v44 = vadd.f32 %v809_v42, %v372_v37 }
 0x123   : > { %579 = vst [vmem:[#allocation2 + $0x8] sm:$0xff] %v575_v43  ;;  %581 = vst [vmem:[#allocation2 + $0x18] sm:$0xff] %v577_v44 }
 0x128   : > { %v586_v45 = vld [vmem:[#allocation2] sm:$0xff]  ;;  %v588_v51 = vld [vmem:[#allocation2 + $0x10] sm:$0xff] }
 0x129   : > { %v597_v48 = vadd.f32 %v776_v46, %v586_v45  ;;  %v599_v53 = vadd.f32 %v776_v46, %v588_v51 }
 0x12a   : > { %v587_v49 = vld [vmem:[#allocation2 + $0x8] sm:$0xff]  ;;  %v589_v55 = vld [vmem:[#allocation2 + $0x18] sm:$0xff] }
 0x12b   : > { %v598_v52 = vadd.f32 %v776_v46, %v587_v49  ;;  %v605_v57 = vadd.f32 %v601_v47, %v597_v48  ;;  %v600_v58 = vadd.f32 %v776_v46, %v589_v55  ;;  %v607_v60 = vadd.f32 %v603_v54, %v599_v53 }
 0x12d   : > { %v606_v59 = vadd.f32 %v602_v50, %v598_v52  ;;  %609 = vst [vmem:[%s1077_s4] sm:$0xff] %v605_v57  ;;  %v608_v61 = vadd.f32 %v604_v56, %v600_v58  ;;  %611 = vst [vmem:[%s1077_s4 + $0x10] sm:$0xff] %v607_v60 }
 0x12f   : > { %610 = vst [vmem:[%s1077_s4 + $0x8] sm:$0xff] %v606_v59  ;;  %612 = vst [vmem:[%s1077_s4 + $0x18] sm:$0xff] %v608_v61 }
 0x130 PF: > { %s14_s19 = sadd.s32 1, %s927_s19   ;;  %s1078_s15 = smov %s915_s16 }
 0x131   : > { %p11_p12 = scmp.ge.s32.totalorder %s14_s19, 4   ;;  %s1079_s16 = smov %s990_s23 }
 0x132   : > { %s1080_s17 = smov %s923_s18  ;;  %s1081_s18 = smov %s1083_s20 }
 0x133   :  { %13 = sbr.rel (!%p11_p12) target bundleno = 3 (0x3), region = 126 }

// kernel: unet_forward.104
= control target key start
LH: loop header
LB: loop body
LE: loop exit
PB: predicated region body
PF: predicated region fallthrough
CT: control target
= control target key end

     0   :  { %s1297_s15 = smov 0   ;;  %s1299_s16 = smov 0   ;;  %s1535_s0 = inlined_call_operand.vmem [shape: bf16[128,512], index: 0, kind: input, shape index: {}]   ;;  %s1536_s1 = inlined_call_operand.vmem [shape: bf16[512,128], index: 1, kind: input, shape index: {}]   ;;  %s1537_s2 = inlined_call_operand.vmem [shape: f32[1,128], index: 2, kind: input, shape index: {}]   ;;  %s1538_s3 = inlined_call_operand.vmem [shape: f32[128,128], index: 3, kind: input, shape index: {}]   ;;  %s1539_s4 = inlined_call_operand.vmem [shape: f32[128,128], index: 4, kind: output, shape index: {}]  }
   0x1   :  { %s1301_s17 = smov 0   ;;  %s1303_s18 = smov 0  }
   0x2   :  { %s1305_s19 = smov 0  }
   0x3 LB: > { %s26_s20 = sadd.s32 1, %s1265_s18  ;;  %p49_p1 = scmp.ne.s32.totalorder %s1257_s16, %s1253_s15  ;;  %s1269_s19 = sphi %s1305_s19, %s14_s19   ;;  %s1265_s18 = sphi %s1303_s18, %s1543_s18   ;;  %s1261_s17 = sphi %s1301_s17, %s1542_s17   ;;  %s1257_s16 = sphi %s1299_s16, %s1541_s16   ;;  %s1253_s15 = sphi %s1297_s15, %s1540_s15  }
   0x4   : > { %p27_p0 = scmp.ge.s32.totalorder %s26_s20, 2  ;;  %p50_p2 = scmp.eq.s32.totalorder %s1269_s19, 0 }
   0x5   : > { %s42_s22 = sadd.s32 1, %s1257_s16  ;;  %p1022_p5 = scmp.ge.s32.totalorder %s1269_s19, 2 }
   0x6   : > { %s1545_s20 = smov (%p27_p0, %s26_s20), 0  ;;  %p51_p3 = por %p50_p2, %p49_p1 }
   0x7   : > { %s38_s21 = ssub.s32 %s1265_s18, %s1545_s20  ;;  %203 = sbr.rel (%p1022_p5) target bundleno = 26 (0x1a), region = 24 }
   0x8   : > { %p40_p4 = scmp.eq.s32.totalorder %s38_s21, 0 }
   0xa   : > { %s1332_s23 = scalar_select %p40_p4, %s1257_s16, %s42_s22  }
   0xe   : > { %206 = sbr.rel (!%p51_p3) target bundleno = 26 (0x1a), region = 28  ;;  %s208_s24 = sand.u32 (%p51_p3), 1, %s1257_s16  }
   0xf   : > { %s1069_s25 = sshll.u32 (%p51_p3), %s1265_s18, 3  ;;  %s1023_s26 = sshll.u32 (%p51_p3), %s208_s24, 7 }
  0x10   : > { %s1340_s29 = scalar_lea.vmem (%p51_p3), %s1535_s0, %s1069_s25  ;;  %s210_s30 = scalar_lea.vmem (%p51_p3), [#allocation3], %s1023_s26 }
  0x11   : > { %v274_v0 = vld [vmem:[%s1340_s29] sm:$0xff] (%p51_p3)  ;;  %v276_v1 = vld [vmem:[%s1340_s29 + $0x10] sm:$0xff] (%p51_p3) }
  0x12   : > { %v278_v2 = vld [vmem:[%s1340_s29 + $0x20] sm:$0xff] (%p51_p3)  ;;  %275 = vst [vmem:[%s210_s30] sm:$0xff] (%p51_p3), %v274_v0  ;;  %277 = vst [vmem:[%s210_s30 + $0x8] sm:$0xff] (%p51_p3), %v276_v1  ;;  %v280_v3 = vld [vmem:[%s1340_s29 + $0x30] sm:$0xff] (%p51_p3) }
  0x13   : > { %279 = vst [vmem:[%s210_s30 + $0x10] sm:$0xff] (%p51_p3), %v278_v2  ;;  %v282_v4 = vld [vmem:[%s1340_s29 + $0x40] sm:$0xff] (%p51_p3)  ;;  %v284_v5 = vld [vmem:[%s1340_s29 + $0x50] sm:$0xff] (%p51_p3)  ;;  %281 = vst [vmem:[%s210_s30 + $0x18] sm:$0xff] (%p51_p3), %v280_v3 }
  0x14   : > { %283 = vst [vmem:[%s210_s30 + $0x20] sm:$0xff] (%p51_p3), %v282_v4  ;;  %285 = vst [vmem:[%s210_s30 + $0x28] sm:$0xff] (%p51_p3), %v284_v5  ;;  %v286_v6 = vld [vmem:[%s1340_s29 + $0x60] sm:$0xff] (%p51_p3)  ;;  %v288_v7 = vld [vmem:[%s1340_s29 + $0x70] sm:$0xff] (%p51_p3) }
  0x15   : > { %v290_v8 = vld [vmem:[%s1340_s29 + $0x80] sm:$0xff]  ;;  %287 = vst [vmem:[%s210_s30 + $0x30] sm:$0xff] %v286_v6  ;;  %289 = vst [vmem:[%s210_s30 + $0x38] sm:$0xff] %v288_v7  ;;  %v292_v9 = vld [vmem:[%s1340_s29 + $0x90] sm:$0xff] }
  0x16   : > { %291 = vst [vmem:[%s210_s30 + $0x40] sm:$0xff] %v290_v8  ;;  %v294_v10 = vld [vmem:[%s1340_s29 + $0xa0] sm:$0xff]  ;;  %v296_v11 = vld [vmem:[%s1340_s29 + $0xb0] sm:$0xff]  ;;  %293 = vst [vmem:[%s210_s30 + $0x48] sm:$0xff] %v292_v9 }
  0x17   : > { %295 = vst [vmem:[%s210_s30 + $0x50] sm:$0xff] %v294_v10  ;;  %297 = vst [vmem:[%s210_s30 + $0x58] sm:$0xff] %v296_v11  ;;  %v298_v12 = vld [vmem:[%s1340_s29 + $0xc0] sm:$0xff]  ;;  %v300_v13 = vld [vmem:[%s1340_s29 + $0xd0] sm:$0xff] }
  0x18   : > { %v302_v14 = vld [vmem:[%s1340_s29 + $0xe0] sm:$0xff]  ;;  %299 = vst [vmem:[%s210_s30 + $0x60] sm:$0xff] %v298_v12  ;;  %301 = vst [vmem:[%s210_s30 + $0x68] sm:$0xff] %v300_v13  ;;  %v304_v15 = vld [vmem:[%s1340_s29 + $0xf0] sm:$0xff] }
  0x19   : > { %303 = vst [vmem:[%s210_s30 + $0x70] sm:$0xff] %v302_v14  ;;  %305 = vst [vmem:[%s210_s30 + $0x78] sm:$0xff] %v304_v15 }
  0x1a PF: > { %p1026_p6 = scmp.ge.s32.totalorder %s1269_s19, 1  ;;  %p322_p7 = scmp.lt.s32.totalorder %s1269_s19, 3 }
  0x1c   : > { %p323_p8 = pnand %p1026_p6, %p322_p7 }
  0x1d   : > { %s329_s5 = sand.u32 (!%p323_p8), 1, %s1253_s15   ;;  %s1028_s6 = sshll.u32 (!%p323_p8), %s1261_s17, 5 }
  0x1e   : > { %326 = sbr.rel (%p323_p8) target bundleno = 337 (0x151), region = 70  ;;  %s1027_s7 = sshll.u32 (!%p323_p8), %s329_s5, 7 }
  0x1f   : > { %p379_p9 = scmp.lt.s32.totalorder (!%p323_p8), %s1028_s6, 63  ;;  %s1367_s12 = scalar_lea.vmem (!%p323_p8), [#allocation3], %s1027_s7 }
  0x20   : > { %p1030_p10 = scmp.ne.s32.totalorder (!%p323_p8), %s1261_s17, 0 }
  0x25   : > { %s1547_s6 = smov (!%p379_p9, %s1028_s6), 63  ;;  %412 = sbr.rel (%p1030_p10) target bundleno = 47 (0x2f), region = 78 }
  0x26   : > { %s1029_s8 = sshll.u32 %s1547_s6, 2  ;;  %v1271_v16 = vmov (!%p1030_p10), 0.0  }
  0x27   : > { %s1365_s11 = scalar_lea.vmem %s1536_s1, %s1029_s8  ;;  %413 = vst [vmem:[#allocation2] sm:$0xff] (!%p1030_p10), %v1271_v16  ;;  %414 = vst [vmem:[#allocation2 + $0x8] sm:$0xff] (!%p1030_p10), %v1271_v16 }
  0x28   : > { %415 = vst [vmem:[#allocation2 + $0x10] sm:$0xff] (!%p1030_p10), %v1271_v16  ;;  %416 = vst [vmem:[#allocation2 + $0x18] sm:$0xff] (!%p1030_p10), %v1271_v16 }
  0x29   : > { %417 = vst [vmem:[#allocation2 + $0x20] sm:$0xff] (!%p1030_p10), %v1271_v16  ;;  %418 = vst [vmem:[#allocation2 + $0x28] sm:$0xff] (!%p1030_p10), %v1271_v16 }
  0x2a   : > { %419 = vst [vmem:[#allocation2 + $0x30] sm:$0xff] (!%p1030_p10), %v1271_v16  ;;  %420 = vst [vmem:[#allocation2 + $0x38] sm:$0xff] (!%p1030_p10), %v1271_v16 }
  0x2b   : > { %421 = vst [vmem:[#allocation2 + $0x40] sm:$0xff] (!%p1030_p10), %v1271_v16  ;;  %422 = vst [vmem:[#allocation2 + $0x48] sm:$0xff] (!%p1030_p10), %v1271_v16 }
  0x2c   : > { %423 = vst [vmem:[#allocation2 + $0x50] sm:$0xff] %v1271_v16  ;;  %424 = vst [vmem:[#allocation2 + $0x58] sm:$0xff] %v1271_v16 }
  0x2d   : > { %425 = vst [vmem:[#allocation2 + $0x60] sm:$0xff] %v1271_v16  ;;  %426 = vst [vmem:[#allocation2 + $0x68] sm:$0xff] %v1271_v16 }
  0x2e   : > { %427 = vst [vmem:[#allocation2 + $0x70] sm:$0xff] %v1271_v16  ;;  %428 = vst [vmem:[#allocation2 + $0x78] sm:$0xff] %v1271_v16 }
  0x2f PF: > { %v1191_v17 = vld [vmem:[%s1365_s11 + $0x40] sm:$0xff]   ;;  %v1193_v19 = vld [vmem:[%s1365_s11 + $0x48] sm:$0xff]   ;;  %v1195_v21 = vld [vmem:[%s1365_s11 + $0x50] sm:$0xff]   ;;  %p1063_p11 = scmp.ne.s32.totalorder %s1261_s17, 1 }
  0x30   : > { %v1192_v18 = vld [vmem:[%s1365_s11] sm:$0xff]   ;;  %1070 = vmatprep.subr.bf16.mxu0 %v1191_v17  ;;  %1134 = vmatprep.subr.bf16.mxu1 %v1191_v17  ;;  %v1194_v20 = vld [vmem:[%s1365_s11 + $0x8] sm:$0xff]   ;;  %v1196_v22 = vld [vmem:[%s1365_s11 + $0x10] sm:$0xff]  }
  0x31   : > { %1071 = vmatpush3.bf16.msra.mxu0 %v1192_v18  ;;  %1142 = vmatpush3.bf16.msra.mxu1 %v1192_v18  ;;  %v1197_v23 = vld [vmem:[%s1365_s11 + $0x58] sm:$0xff]   ;;  %v1199_v25 = vld [vmem:[%s1365_s11 + $0x60] sm:$0xff]   ;;  %v1201_v27 = vld [vmem:[%s1365_s11 + $0x68] sm:$0xff]  }
  0x32   : > { %1072 = vmatprep.subr.bf16.mxu0 %v1193_v19  ;;  %1135 = vmatprep.subr.bf16.mxu1 %v1193_v19  ;;  %v1198_v24 = vld [vmem:[%s1365_s11 + $0x18] sm:$0xff]   ;;  %v1200_v26 = vld [vmem:[%s1365_s11 + $0x20] sm:$0xff]   ;;  %v1202_v30 = vld [vmem:[%s1365_s11 + $0x28] sm:$0xff]  }
  0x33   : > { %v1209_v28 = vld [vmem:[%s1367_s12 + $0x4] ss:$8 sps:$4 sm:$0xff]   ;;  %v1203_v31 = vld [vmem:[%s1365_s11 + $0x70] sm:$0xff]   ;;  %v1205_v33 = vld [vmem:[%s1365_s11 + $0x78] sm:$0xff]  }
  0x34   : > { %v1212_v29 = vld [vmem:[%s1367_s12 + $0x44] ss:$8 sps:$4 sm:$0xff]   ;;  %701 = vmatprep.mubr.bf16.mxu0 %v1209_v28  ;;  %v1204_v32 = vld [vmem:[%s1365_s11 + $0x30] sm:$0xff]   ;;  %v1206_v34 = vld [vmem:[%s1365_s11 + $0x38] sm:$0xff]  }
  0x35   : > { %1073 = vmatpush3.bf16.msra.mxu0 %v1194_v20  ;;  %1143 = vmatpush3.bf16.msra.mxu1 %v1194_v20  ;;  %v1207_v35 = vld [vmem:[%s1367_s12] ss:$8 sps:$4 sm:$0xff]   ;;  %v1213_v37 = vld [vmem:[%s1367_s12 + $0x14] ss:$8 sps:$4 sm:$0xff]   ;;  %v1217_v39 = vld [vmem:[%s1367_s12 + $0x10] ss:$8 sps:$4 sm:$0xff]  }
  0x36   : > { %1074 = vmatprep.subr.bf16.mxu0 %v1195_v21  ;;  %1136 = vmatprep.subr.bf16.mxu1 %v1195_v21  ;;  %v1210_v36 = vld [vmem:[%s1367_s12 + $0x40] ss:$8 sps:$4 sm:$0xff]   ;;  %v1215_v38 = vld [vmem:[%s1367_s12 + $0x54] ss:$8 sps:$4 sm:$0xff]   ;;  %v1218_v40 = vld [vmem:[%s1367_s12 + $0x50] ss:$8 sps:$4 sm:$0xff]  }
  0x37   : > { %733 = vmatprep.mubr.bf16.mxu1 %v1212_v29  ;;  %v1219_v41 = vld [vmem:[%s1367_s12 + $0x24] ss:$8 sps:$4 sm:$0xff]   ;;  %v1223_v43 = vld [vmem:[%s1367_s12 + $0x20] ss:$8 sps:$4 sm:$0xff]   ;;  %v1225_v45 = vld [vmem:[%s1367_s12 + $0x34] ss:$8 sps:$4 sm:$0xff]  }
  0x38   : > { %v1221_v42 = vld [vmem:[%s1367_s12 + $0x64] ss:$8 sps:$4 sm:$0xff]   ;;  %v1224_v44 = vld [vmem:[%s1367_s12 + $0x60] ss:$8 sps:$4 sm:$0xff]   ;;  %v1227_v46 = vld [vmem:[%s1367_s12 + $0x74] ss:$8 sps:$4 sm:$0xff]  }
  0x39   : > { %1075 = vmatpush3.bf16.msra.mxu0 %v1196_v22  ;;  %1144 = vmatpush3.bf16.msra.mxu1 %v1196_v22  ;;  %v1229_v47 = vld [vmem:[%s1367_s12 + $0x30] ss:$8 sps:$4 sm:$0xff]   ;;  %v429_v51 = vld [vmem:[#allocation2] sm:$0xff]  ;;  %v430_v59 = vld [vmem:[#allocation2 + $0x8] sm:$0xff] }
  0x3a   : > { %1076 = vmatprep.subr.bf16.mxu0 %v1197_v23  ;;  %1137 = vmatprep.subr.bf16.mxu1 %v1197_v23  ;;  %v1230_v48 = vld [vmem:[%s1367_s12 + $0x70] ss:$8 sps:$4 sm:$0xff]   ;;  %v437_v53 = vld [vmem:[#allocation2 + $0x40] sm:$0xff]  ;;  %v438_v61 = vld [vmem:[#allocation2 + $0x48] sm:$0xff] }
  0x3b   : > { %v431_v7 = vld [vmem:[#allocation2 + $0x10] sm:$0xff]  ;;  %v432_v15 = vld [vmem:[#allocation2 + $0x18] sm:$0xff]  ;;  %v441_v29 = vld [vmem:[#allocation2 + $0x60] sm:$0xff] }
  0x3c   : > { %v439_v9 = vld [vmem:[#allocation2 + $0x50] sm:$0xff]  ;;  %v440_v17 = vld [vmem:[#allocation2 + $0x58] sm:$0xff] }
  0x3d   : > { %1077 = vmatpush3.bf16.msra.mxu0 %v1198_v24  ;;  %1145 = vmatpush3.bf16.msra.mxu1 %v1198_v24 }
  0x3e   : > { %1078 = vmatprep.subr.bf16.mxu0 %v1199_v25  ;;  %1138 = vmatprep.subr.bf16.mxu1 %v1199_v25 }
  0x41   : > { %1079 = vmatpush3.bf16.msra.mxu0 %v1200_v26  ;;  %1146 = vmatpush3.bf16.msra.mxu1 %v1200_v26 }
  0x42   : > { %1080 = vmatprep.subr.bf16.mxu0 %v1201_v27  ;;  %1139 = vmatprep.subr.bf16.mxu1 %v1201_v27  ;;  %v433_v27 = vld [vmem:[#allocation2 + $0x20] sm:$0xff] }
  0x45   : > { %1081 = vmatpush3.bf16.msra.mxu0 %v1202_v30  ;;  %1147 = vmatpush3.bf16.msra.mxu1 %v1202_v30 }
  0x46   : > { %1082 = vmatprep.subr.bf16.mxu0 %v1203_v31  ;;  %1140 = vmatprep.subr.bf16.mxu1 %v1203_v31 }
  0x49   : > { %1083 = vmatpush3.bf16.msra.mxu0 %v1204_v32  ;;  %1148 = vmatpush3.bf16.msra.mxu1 %v1204_v32 }
  0x4a   : > { %1084 = vmatprep.subr.bf16.mxu0 %v1205_v33  ;;  %1141 = vmatprep.subr.bf16.mxu1 %v1205_v33 }
  0x4d   : > { %1085 = vmatpush3.bf16.msra.mxu0 %v1206_v34  ;;  %1149 = vmatpush3.bf16.msra.mxu1 %v1206_v34 }
  0x50   : > { %702 = vmatmul.mubr.bf16.vlgmr.msra.gmra.mrb[0].mxu0 %v1207_v35  ;;  %734 = vmatmul.mubr.bf16.vlgmr.msra.gmra.mrb[0].mxu1 %v1210_v36  ;;  %v434_v35 = vld [vmem:[#allocation2 + $0x28] sm:$0xff] }
  0x51   : > { %709 = vmatprep.mubr.bf16.mxu0 %v1213_v37  ;;  %741 = vmatprep.mubr.bf16.mxu1 %v1215_v38  ;;  %v442_v37 = vld [vmem:[#allocation2 + $0x68] sm:$0xff] }
  0x58   : > { %710 = vmatmul.mubr.bf16.gmra.mrb[4].mxu0 %v1217_v39  ;;  %742 = vmatmul.mubr.bf16.gmra.mrb[4].mxu1 %v1218_v40 }
  0x59   : > { %717 = vmatprep.mubr.bf16.mxu0 %v1219_v41  ;;  %749 = vmatprep.mubr.bf16.mxu1 %v1221_v42 }
  0x60   : > { %718 = vmatmul.mubr.bf16.gmra.mrb[8].mxu0 %v1223_v43  ;;  %750 = vmatmul.mubr.bf16.gmra.mrb[8].mxu1 %v1224_v44 }
  0x61   : > { %725 = vmatprep.mubr.bf16.mxu0 %v1225_v45  ;;  %757 = vmatprep.mubr.bf16.mxu1 %v1227_v46 }
  0x68   : > { %726 = vmatmul.mubr.bf16.gmra.mrb[12].mxu0 %v1229_v47  ;;  %758 = vmatmul.mubr.bf16.gmra.mrb[12].mxu1 %v1230_v48  ;;  %v435_v47 = vld [vmem:[#allocation2 + $0x30] sm:$0xff] }
 0x123   : > { %v1086_v49 = vpop.f32.mrb[0].mxu0  ;;  %v1110_v50 = vpop.f32.mrb[0].mxu1 }
 0x124   : > { %v1087_v52 = vpop.f32.mrb[1].mxu0  ;;  %v1111_v54 = vpop.f32.mrb[1].mxu1 }
 0x125   : > { %v1088_v55 = vadd.f32 %v1087_v52, %v1086_v49  ;;  %v1112_v56 = vadd.f32 %v1111_v54, %v1110_v50  ;;  %v1089_v57 = vpop.f32.mrb[2].mxu0  ;;  %v1113_v58 = vpop.f32.mrb[2].mxu1  ;;  %v443_v49 = vld [vmem:[#allocation2 + $0x70] sm:$0xff] }
 0x126   : > { %v1090_v60 = vpop.f32.mrb[3].mxu0  ;;  %v1114_v62 = vpop.f32.mrb[3].mxu1 }
 0x127   : > { %v766_v63 = vadd.f32 %v1088_v55, %v429_v51  ;;  %v774_v0 = vadd.f32 %v1112_v56, %v437_v53  ;;  %v1091_v1 = vadd.f32 %v1090_v60, %v1089_v57  ;;  %v1115_v2 = vadd.f32 %v1114_v62, %v1113_v58  ;;  %v436_v55 = vld [vmem:[#allocation2 + $0x38] sm:$0xff] }
 0x128   : > { %v444_v57 = vld [vmem:[#allocation2 + $0x78] sm:$0xff] }
 0x129   : > { %782 = vst [vmem:[#allocation2] sm:$0xff] %v766_v63  ;;  %790 = vst [vmem:[#allocation2 + $0x40] sm:$0xff] %v774_v0  ;;  %v767_v3 = vadd.f32 %v1091_v1, %v430_v59  ;;  %v775_v4 = vadd.f32 %v1115_v2, %v438_v61  ;;  %v1406_v2 = vld [vmem:[%s1537_s2] ss:$0 sm:$0xff] (!%p1063_p11) }
 0x12b   : > { %783 = vst [vmem:[#allocation2 + $0x8] sm:$0xff] %v767_v3  ;;  %791 = vst [vmem:[#allocation2 + $0x48] sm:$0xff] %v775_v4  ;;  %v1092_v5 = vpop.f32.mrb[4].mxu0  ;;  %v1116_v6 = vpop.f32.mrb[4].mxu1  ;;  %v841_v3 = vld [vmem:[%s1538_s3] sm:$0xff] (!%p1063_p11) }
 0x12c   : > { %v1093_v8 = vpop.f32.mrb[5].mxu0  ;;  %v1117_v10 = vpop.f32.mrb[5].mxu1 }
 0x12d   : > { %v1094_v11 = vadd.f32 %v1093_v8, %v1092_v5  ;;  %v1118_v12 = vadd.f32 %v1117_v10, %v1116_v6  ;;  %v1095_v13 = vpop.f32.mrb[6].mxu0  ;;  %v1119_v14 = vpop.f32.mrb[6].mxu1  ;;  %v842_v6 = vld [vmem:[%s1538_s3 + $0x8] sm:$0xff] (!%p1063_p11)  ;;  %v843_v10 = vld [vmem:[%s1538_s3 + $0x10] sm:$0xff] (!%p1063_p11) }
 0x12e   : > { %v1096_v16 = vpop.f32.mrb[7].mxu0  ;;  %v1120_v18 = vpop.f32.mrb[7].mxu1 }
 0x12f   : > { %v768_v19 = vadd.f32 %v1094_v11, %v431_v7  ;;  %v776_v20 = vadd.f32 %v1118_v12, %v439_v9  ;;  %v1097_v21 = vadd.f32 %v1096_v16, %v1095_v13  ;;  %v1121_v22 = vadd.f32 %v1120_v18, %v1119_v14  ;;  %v844_v12 = vld [vmem:[%s1538_s3 + $0x18] sm:$0xff] (!%p1063_p11)  ;;  %v845_v16 = vld [vmem:[%s1538_s3 + $0x20] sm:$0xff] (!%p1063_p11) }
 0x130   : > { %v802_v1 = vld [vmem:[#allocation2] sm:$0xff] (!%p1063_p11) }
 0x131   : > { %784 = vst [vmem:[#allocation2 + $0x10] sm:$0xff] %v768_v19  ;;  %792 = vst [vmem:[#allocation2 + $0x50] sm:$0xff] %v776_v20  ;;  %v769_v23 = vadd.f32 %v1097_v21, %v432_v15  ;;  %v777_v24 = vadd.f32 %v1121_v22, %v440_v17  ;;  %v825_v4 = vadd.f32 (!%p1063_p11), %v1406_v2, %v802_v1  ;;  %v846_v22 = vld [vmem:[%s1538_s3 + $0x28] sm:$0xff] (!%p1063_p11) }
 0x132   : > { %v803_v5 = vld [vmem:[#allocation2 + $0x8] sm:$0xff] (!%p1063_p11) }
 0x133   : > { %785 = vst [vmem:[#allocation2 + $0x18] sm:$0xff] %v769_v23  ;;  %793 = vst [vmem:[#allocation2 + $0x58] sm:$0xff] %v777_v24  ;;  %v1098_v25 = vpop.f32.mrb[8].mxu0  ;;  %v1122_v26 = vpop.f32.mrb[8].mxu1  ;;  %v826_v8 = vadd.f32 (!%p1063_p11), %v1406_v2, %v803_v5  ;;  %v857_v13 = vadd.f32 (!%p1063_p11), %v841_v3, %v825_v4  ;;  %v847_v24 = vld [vmem:[%s1538_s3 + $0x30] sm:$0xff] (!%p1063_p11) }
 0x134   : > { %v1099_v28 = vpop.f32.mrb[9].mxu0  ;;  %v1123_v30 = vpop.f32.mrb[9].mxu1 }
 0x135   : > { %v1100_v31 = vadd.f32 %v1099_v28, %v1098_v25  ;;  %v1124_v32 = vadd.f32 %v1123_v30, %v1122_v26  ;;  %v1101_v33 = vpop.f32.mrb[10].mxu0  ;;  %v1125_v34 = vpop.f32.mrb[10].mxu1  ;;  %v858_v18 = vadd.f32 (!%p1063_p11), %v842_v6, %v826_v8  ;;  %873 = vst [vmem:[%s1539_s4] sm:$0xff] (!%p1063_p11), %v857_v13  ;;  %v848_v28 = vld [vmem:[%s1538_s3 + $0x38] sm:$0xff] (!%p1063_p11) }
 0x136   : > { %v1102_v36 = vpop.f32.mrb[11].mxu0  ;;  %v1126_v38 = vpop.f32.mrb[11].mxu1 }
 0x137   : > { %v770_v39 = vadd.f32 %v1100_v31, %v433_v27  ;;  %v778_v40 = vadd.f32 %v1124_v32, %v441_v29  ;;  %v1103_v41 = vadd.f32 %v1102_v36, %v1101_v33  ;;  %v1127_v42 = vadd.f32 %v1126_v38, %v1125_v34  ;;  %v810_v29 = vld [vmem:[#allocation2 + $0x40] sm:$0xff] (!%p1063_p11)  ;;  %874 = vst [vmem:[%s1539_s4 + $0x8] sm:$0xff] (!%p1063_p11), %v858_v18  ;;  %v850_v36 = vld [vmem:[%s1538_s3 + $0x48] sm:$0xff] (!%p1063_p11) }
 0x138   : > { %v804_v7 = vld [vmem:[#allocation2 + $0x10] sm:$0xff] (!%p1063_p11)  ;;  %v833_v33 = vadd.f32 (!%p1063_p11), %v1406_v2, %v810_v29  ;;  %v849_v34 = vld [vmem:[%s1538_s3 + $0x40] sm:$0xff] (!%p1063_p11) }
 0x139   : > { %786 = vst [vmem:[#allocation2 + $0x20] sm:$0xff] %v770_v39  ;;  %794 = vst [vmem:[#allocation2 + $0x60] sm:$0xff] %v778_v40  ;;  %v771_v43 = vadd.f32 %v1103_v41, %v434_v35  ;;  %v779_v44 = vadd.f32 %v1127_v42, %v442_v37  ;;  %v827_v9 = vadd.f32 (!%p1063_p11), %v1406_v2, %v804_v7  ;;  %v811_v35 = vld [vmem:[#allocation2 + $0x48] sm:$0xff] (!%p1063_p11)  ;;  %v812_v39 = vld [vmem:[#allocation2 + $0x50] sm:$0xff] (!%p1063_p11) }
 0x13a   : > { %v805_v11 = vld [vmem:[#allocation2 + $0x18] sm:$0xff] (!%p1063_p11)  ;;  %v834_v38 = vadd.f32 (!%p1063_p11), %v1406_v2, %v811_v35  ;;  %v851_v40 = vld [vmem:[%s1538_s3 + $0x50] sm:$0xff] (!%p1063_p11) }
 0x13b   : > { %787 = vst [vmem:[#allocation2 + $0x28] sm:$0xff] %v771_v43  ;;  %795 = vst [vmem:[#allocation2 + $0x68] sm:$0xff] %v779_v44  ;;  %v1104_v45 = vpop.f32.mrb[12].mxu0  ;;  %v1128_v46 = vpop.f32.mrb[12].mxu1  ;;  %v828_v14 = vadd.f32 (!%p1063_p11), %v1406_v2, %v805_v11  ;;  %v859_v19 = vadd.f32 (!%p1063_p11), %v843_v10, %v827_v9  ;;  %v813_v41 = vld [vmem:[#allocation2 + $0x58] sm:$0xff] (!%p1063_p11)  ;;  %v865_v43 = vadd.f32 (!%p1063_p11), %v849_v34, %v833_v33 }
 0x13c   : > { %v1105_v48 = vpop.f32.mrb[13].mxu0  ;;  %v1129_v50 = vpop.f32.mrb[13].mxu1  ;;  %v835_v44 = vadd.f32 (!%p1063_p11), %v1406_v2, %v812_v39 }
 0x13d   : > { %v1106_v51 = vadd.f32 %v1105_v48, %v1104_v45  ;;  %v1130_v52 = vadd.f32 %v1129_v50, %v1128_v46  ;;  %v1107_v53 = vpop.f32.mrb[14].mxu0  ;;  %v1131_v54 = vpop.f32.mrb[14].mxu1  ;;  %801 = sbr.rel (%p1063_p11) target bundleno = 337 (0x151), region = 82  ;;  %v860_v25 = vadd.f32 (!%p1063_p11), %v844_v12, %v828_v14  ;;  %875 = vst [vmem:[%s1539_s4 + $0x10] sm:$0xff] (!%p1063_p11), %v859_v19  ;;  %v836_v45 = vadd.f32 (!%p1063_p11), %v1406_v2, %v813_v41  ;;  %v852_v46 = vld [vmem:[%s1538_s3 + $0x58] sm:$0xff] (!%p1063_p11)  ;;  %v853_v48 = vld [vmem:[%s1538_s3 + $0x60] sm:$0xff] (!%p1063_p11) }
 0x13e   : > { %v1108_v56 = vpop.f32.mrb[15].mxu0  ;;  %v1132_v58 = vpop.f32.mrb[15].mxu1  ;;  %881 = vst [vmem:[%s1539_s4 + $0x40] sm:$0xff] (!%p1063_p11), %v865_v43 }
 0x13f   : > { %v772_v59 = vadd.f32 %v1106_v51, %v435_v47  ;;  %v780_v60 = vadd.f32 %v1130_v52, %v443_v49  ;;  %v1109_v61 = vadd.f32 %v1108_v56, %v1107_v53  ;;  %v1133_v62 = vadd.f32 %v1132_v58, %v1131_v54  ;;  %876 = vst [vmem:[%s1539_s4 + $0x18] sm:$0xff] (!%p1063_p11), %v860_v25  ;;  %v854_v52 = vld [vmem:[%s1538_s3 + $0x68] sm:$0xff] (!%p1063_p11)  ;;  %v855_v58 = vld [vmem:[%s1538_s3 + $0x70] sm:$0xff] (!%p1063_p11) }
 0x140   : > { %v806_v15 = vld [vmem:[#allocation2 + $0x20] sm:$0xff] (!%p1063_p11)  ;;  %v866_v49 = vadd.f32 (!%p1063_p11), %v850_v36, %v834_v38  ;;  %v867_v54 = vadd.f32 (!%p1063_p11), %v851_v40, %v835_v44 }
 0x141   : > { %788 = vst [vmem:[#allocation2 + $0x30] sm:$0xff] %v772_v59  ;;  %796 = vst [vmem:[#allocation2 + $0x70] sm:$0xff] %v780_v60  ;;  %v773_v63 = vadd.f32 %v1109_v61, %v436_v55  ;;  %v781_v0 = vadd.f32 %v1133_v62, %v444_v57  ;;  %v829_v20 = vadd.f32 (!%p1063_p11), %v1406_v2, %v806_v15  ;;  %v814_v47 = vld [vmem:[#allocation2 + $0x60] sm:$0xff] (!%p1063_p11)  ;;  %v856_v60 = vld [vmem:[%s1538_s3 + $0x78] sm:$0xff] (!%p1063_p11) }
 0x142   : > { %v807_v17 = vld [vmem:[#allocation2 + $0x28] sm:$0xff] (!%p1063_p11)  ;;  %v837_v50 = vadd.f32 (!%p1063_p11), %v1406_v2, %v814_v47  ;;  %v868_v55 = vadd.f32 (!%p1063_p11), %v852_v46, %v836_v45  ;;  %882 = vst [vmem:[%s1539_s4 + $0x48] sm:$0xff] (!%p1063_p11), %v866_v49  ;;  %883 = vst [vmem:[%s1539_s4 + $0x50] sm:$0xff] (!%p1063_p11), %v867_v54 }
 0x143   : > { %789 = vst [vmem:[#allocation2 + $0x38] sm:$0xff] %v773_v63  ;;  %797 = vst [vmem:[#allocation2 + $0x78] sm:$0xff] %v781_v0  ;;  %v830_v21 = vadd.f32 (!%p1063_p11), %v1406_v2, %v807_v17  ;;  %v861_v30 = vadd.f32 (!%p1063_p11), %v845_v16, %v829_v20  ;;  %v815_v51 = vld [vmem:[#allocation2 + $0x68] sm:$0xff] (!%p1063_p11) }
 0x144   : > { %v838_v56 = vadd.f32 %v1406_v2, %v815_v51  ;;  %v869_v61 = vadd.f32 %v853_v48, %v837_v50  ;;  %884 = vst [vmem:[%s1539_s4 + $0x58] sm:$0xff] %v868_v55 }
 0x145   : > { %v862_v31 = vadd.f32 %v846_v22, %v830_v21  ;;  %877 = vst [vmem:[%s1539_s4 + $0x20] sm:$0xff] %v861_v30 }
 0x146   : > { %v870_v63 = vadd.f32 %v854_v52, %v838_v56  ;;  %885 = vst [vmem:[%s1539_s4 + $0x60] sm:$0xff] %v869_v61 }
 0x147   : > { %878 = vst [vmem:[%s1539_s4 + $0x28] sm:$0xff] %v862_v31 }
 0x148   : > { %v808_v23 = vld [vmem:[#allocation2 + $0x30] sm:$0xff]  ;;  %886 = vst [vmem:[%s1539_s4 + $0x68] sm:$0xff] %v870_v63 }
 0x149   : > { %v831_v26 = vadd.f32 %v1406_v2, %v808_v23  ;;  %v816_v53 = vld [vmem:[#allocation2 + $0x70] sm:$0xff] }
 0x14a   : > { %v809_v27 = vld [vmem:[#allocation2 + $0x38] sm:$0xff]  ;;  %v839_v57 = vadd.f32 %v1406_v2, %v816_v53 }
 0x14b   : > { %v832_v32 = vadd.f32 %v1406_v2, %v809_v27  ;;  %v863_v37 = vadd.f32 %v847_v24, %v831_v26  ;;  %v817_v59 = vld [vmem:[#allocation2 + $0x78] sm:$0xff] }
 0x14c   : > { %v840_v62 = vadd.f32 %v1406_v2, %v817_v59  ;;  %v871_v0 = vadd.f32 %v855_v58, %v839_v57 }
 0x14d   : > { %v864_v42 = vadd.f32 %v848_v28, %v832_v32  ;;  %879 = vst [vmem:[%s1539_s4 + $0x30] sm:$0xff] %v863_v37 }
 0x14e   : > { %v872_v1 = vadd.f32 %v856_v60, %v840_v62  ;;  %887 = vst [vmem:[%s1539_s4 + $0x70] sm:$0xff] %v871_v0 }
 0x14f   : > { %880 = vst [vmem:[%s1539_s4 + $0x38] sm:$0xff] %v864_v42 }
 0x150   : > { %888 = vst [vmem:[%s1539_s4 + $0x78] sm:$0xff] %v872_v1 }
 0x151 PF: > { %s14_s19 = sadd.s32 1, %s1269_s19   ;;  %s1540_s15 = smov %s1257_s16 }
 0x152   : > { %p11_p12 = scmp.ge.s32.totalorder %s14_s19, 4   ;;  %s1541_s16 = smov %s1332_s23 }
 0x153   : > { %s1542_s17 = smov %s1265_s18  ;;  %s1543_s18 = smov %s1545_s20 }
 0x154   :  { %13 = sbr.rel (!%p11_p12) target bundleno = 3 (0x3), region = 126 }

// kernel: unet_forward.115
= control target key start
LH: loop header
LB: loop body
LE: loop exit
PB: predicated region body
PF: predicated region fallthrough
CT: control target
= control target key end

     0   :  { %s2012_s0 = inlined_call_operand.vmem [shape: f32[8,4096], index: 0, kind: input, shape index: {}]   ;;  %s2013_s1 = inlined_call_operand.vmem [shape: f32[1,4096], index: 1, kind: input, shape index: {}]   ;;  %s2014_s2 = inlined_call_operand.vmem [shape: f32[1,4096], index: 2, kind: input, shape index: {}]   ;;  %s2015_s3 = inlined_call_operand.vmem [shape: f32[8,4096], index: 3, kind: output, shape index: {}]  }
   0x1   :  { %v995_v0 = vld [vmem:[%s2012_s0] sm:$0xff]  ;;  %v1000_v1 = vld [vmem:[%s2012_s0 + $0x8] sm:$0xff]  ;;  %v1005_v2 = vld [vmem:[%s2012_s0 + $0x10] sm:$0xff] }
   0x2   :  { %v46_v3 = vadd.f32 %v1000_v1, %v995_v0  ;;  %v80_v4 = vmul.f32 %v995_v0, %v995_v0  ;;  %v81_v5 = vmul.f32 %v1000_v1, %v1000_v1  ;;  %v1016_v6 = vld [vmem:[%s2012_s0 + $0x18] sm:$0xff]  ;;  %v82_v7 = vmul.f32 %v1005_v2, %v1005_v2  ;;  %v1024_v9 = vld [vmem:[%s2012_s0 + $0x20] sm:$0xff]  ;;  %v1032_v13 = vld [vmem:[%s2012_s0 + $0x28] sm:$0xff] }
   0x3   :  { %v83_v10 = vmul.f32 %v1016_v6, %v1016_v6  ;;  %v84_v14 = vmul.f32 %v1024_v9, %v1024_v9  ;;  %v1040_v17 = vld [vmem:[%s2012_s0 + $0x30] sm:$0xff]  ;;  %v85_v18 = vmul.f32 %v1032_v13, %v1032_v13  ;;  %v1048_v21 = vld [vmem:[%s2012_s0 + $0x38] sm:$0xff]  ;;  %v1056_v25 = vld [vmem:[%s2012_s0 + $0x40] sm:$0xff] }
   0x4   :  { %v47_v8 = vadd.f32 %v46_v3, %v1005_v2  ;;  %v112_v11 = vadd.f32 %v81_v5, %v80_v4  ;;  %v86_v22 = vmul.f32 %v1040_v17, %v1040_v17  ;;  %v87_v26 = vmul.f32 %v1048_v21, %v1048_v21  ;;  %v1064_v29 = vld [vmem:[%s2012_s0 + $0x48] sm:$0xff]  ;;  %v1072_v33 = vld [vmem:[%s2012_s0 + $0x50] sm:$0xff]  ;;  %v1080_v37 = vld [vmem:[%s2012_s0 + $0x58] sm:$0xff] }
   0x5   :  { %v88_v30 = vmul.f32 %v1056_v25, %v1056_v25  ;;  %v89_v34 = vmul.f32 %v1064_v29, %v1064_v29  ;;  %v90_v38 = vmul.f32 %v1072_v33, %v1072_v33  ;;  %v1088_v41 = vld [vmem:[%s2012_s0 + $0x60] sm:$0xff]  ;;  %v91_v42 = vmul.f32 %v1080_v37, %v1080_v37  ;;  %v1096_v45 = vld [vmem:[%s2012_s0 + $0x68] sm:$0xff]  ;;  %v1104_v49 = vld [vmem:[%s2012_s0 + $0x70] sm:$0xff] }
   0x6   :  { %v48_v12 = vadd.f32 %v47_v8, %v1016_v6  ;;  %v113_v15 = vadd.f32 %v112_v11, %v82_v7  ;;  %v92_v46 = vmul.f32 %v1088_v41, %v1088_v41  ;;  %v93_v50 = vmul.f32 %v1096_v45, %v1096_v45  ;;  %v1112_v53 = vld [vmem:[%s2012_s0 + $0x78] sm:$0xff]  ;;  %v1120_v57 = vld [vmem:[%s2012_s0 + $0x80] sm:$0xff]  ;;  %v1128_v61 = vld [vmem:[%s2012_s0 + $0x88] sm:$0xff] }
   0x7   :  { %v94_v54 = vmul.f32 %v1104_v49, %v1104_v49  ;;  %v95_v58 = vmul.f32 %v1112_v53, %v1112_v53  ;;  %v96_v62 = vmul.f32 %v1120_v57, %v1120_v57  ;;  %v1136_v4 = vld [vmem:[%s2012_s0 + $0x90] sm:$0xff]  ;;  %v97_v5 = vmul.f32 %v1128_v61, %v1128_v61 }
   0x8   :  { %v49_v16 = vadd.f32 %v48_v12, %v1024_v9  ;;  %v114_v19 = vadd.f32 %v113_v15, %v83_v10  ;;  %v1144_v10 = vld [vmem:[%s2012_s0 + $0x98] sm:$0xff]  ;;  %v98_v11 = vmul.f32 %v1136_v4, %v1136_v4  ;;  %v1152_v15 = vld [vmem:[%s2012_s0 + $0xa0] sm:$0xff] }
   0xa   :  { %v50_v20 = vadd.f32 %v49_v16, %v1032_v13  ;;  %v115_v23 = vadd.f32 %v114_v19, %v84_v14  ;;  %v99_v16 = vmul.f32 %v1144_v10, %v1144_v10 }
   0xc   :  { %v51_v24 = vadd.f32 %v50_v20, %v1040_v17  ;;  %v116_v27 = vadd.f32 %v115_v23, %v85_v18  ;;  %v1160_v20 = vld [vmem:[%s2012_s0 + $0xa8] sm:$0xff] }
   0xe   :  { %v52_v28 = vadd.f32 %v51_v24, %v1048_v21  ;;  %v117_v31 = vadd.f32 %v116_v27, %v86_v22  ;;  %v100_v22 = vmul.f32 %v1152_v15, %v1152_v15  ;;  %v101_v27 = vmul.f32 %v1160_v20, %v1160_v20 }
  0x10   :  { %v53_v32 = vadd.f32 %v52_v28, %v1056_v25  ;;  %v118_v35 = vadd.f32 %v117_v31, %v87_v26  ;;  %v1168_v26 = vld [vmem:[%s2012_s0 + $0xb0] sm:$0xff]  ;;  %v1176_v31 = vld [vmem:[%s2012_s0 + $0xb8] sm:$0xff] }
  0x12   :  { %v54_v36 = vadd.f32 %v53_v32, %v1064_v29  ;;  %v119_v39 = vadd.f32 %v118_v35, %v88_v30  ;;  %v102_v32 = vmul.f32 %v1168_v26, %v1168_v26 }
  0x14   :  { %v55_v40 = vadd.f32 %v54_v36, %v1072_v33  ;;  %v120_v43 = vadd.f32 %v119_v39, %v89_v34  ;;  %v1184_v36 = vld [vmem:[%s2012_s0 + $0xc0] sm:$0xff] }
  0x16   :  { %v56_v44 = vadd.f32 %v55_v40, %v1080_v37  ;;  %v121_v47 = vadd.f32 %v120_v43, %v90_v38  ;;  %v103_v38 = vmul.f32 %v1176_v31, %v1176_v31  ;;  %v104_v43 = vmul.f32 %v1184_v36, %v1184_v36 }
  0x18   :  { %v57_v48 = vadd.f32 %v56_v44, %v1088_v41  ;;  %v122_v51 = vadd.f32 %v121_v47, %v91_v42  ;;  %v1192_v42 = vld [vmem:[%s2012_s0 + $0xc8] sm:$0xff]  ;;  %v1200_v47 = vld [vmem:[%s2012_s0 + $0xd0] sm:$0xff] }
  0x1a   :  { %v58_v52 = vadd.f32 %v57_v48, %v1096_v45  ;;  %v123_v55 = vadd.f32 %v122_v51, %v92_v46  ;;  %v105_v48 = vmul.f32 %v1192_v42, %v1192_v42 }
  0x1c   :  { %v59_v56 = vadd.f32 %v58_v52, %v1104_v49  ;;  %v124_v59 = vadd.f32 %v123_v55, %v93_v50  ;;  %v1208_v52 = vld [vmem:[%s2012_s0 + $0xd8] sm:$0xff] }
  0x1e   :  { %v60_v60 = vadd.f32 %v59_v56, %v1112_v53  ;;  %v125_v63 = vadd.f32 %v124_v59, %v94_v54  ;;  %v106_v54 = vmul.f32 %v1200_v47, %v1200_v47  ;;  %v107_v59 = vmul.f32 %v1208_v52, %v1208_v52 }
  0x20   :  { %v61_v3 = vadd.f32 %v60_v60, %v1120_v57  ;;  %v126_v7 = vadd.f32 %v125_v63, %v95_v58  ;;  %v1216_v58 = vld [vmem:[%s2012_s0 + $0xe0] sm:$0xff]  ;;  %v1224_v63 = vld [vmem:[%s2012_s0 + $0xe8] sm:$0xff] }
  0x22   :  { %v62_v8 = vadd.f32 %v61_v3, %v1128_v61  ;;  %v127_v12 = vadd.f32 %v126_v7, %v96_v62  ;;  %v108_v3 = vmul.f32 %v1216_v58, %v1216_v58 }
  0x24   :  { %v63_v14 = vadd.f32 %v62_v8, %v1136_v4  ;;  %v128_v18 = vadd.f32 %v127_v12, %v97_v5  ;;  %v1232_v8 = vld [vmem:[%s2012_s0 + $0xf0] sm:$0xff] }
  0x26   :  { %v64_v19 = vadd.f32 %v63_v14, %v1144_v10  ;;  %v129_v23 = vadd.f32 %v128_v18, %v98_v11  ;;  %v109_v11 = vmul.f32 %v1224_v63, %v1224_v63  ;;  %v110_v18 = vmul.f32 %v1232_v8, %v1232_v8 }
  0x28   :  { %v65_v24 = vadd.f32 %v64_v19, %v1152_v15  ;;  %v130_v28 = vadd.f32 %v129_v23, %v99_v16  ;;  %v1240_v16 = vld [vmem:[%s2012_s0 + $0xf8] sm:$0xff] }
  0x29   :  { %v111_v23 = vmul.f32 %v1240_v16, %v1240_v16 }
  0x2a   :  { %v66_v30 = vadd.f32 %v65_v24, %v1160_v20  ;;  %v131_v34 = vadd.f32 %v130_v28, %v100_v22 }
  0x2c   :  { %v67_v35 = vadd.f32 %v66_v30, %v1168_v26  ;;  %v132_v39 = vadd.f32 %v131_v34, %v101_v27 }
  0x2e   :  { %v68_v40 = vadd.f32 %v67_v35, %v1176_v31  ;;  %v133_v44 = vadd.f32 %v132_v39, %v102_v32  ;;  %v222_v32 = vlaneseq  ;;  %v1253_v39 = vld [vmem:[%s2013_s1] sm:$0xff] }
  0x30   :  { %v69_v46 = vadd.f32 %v68_v40, %v1184_v36  ;;  %v134_v50 = vadd.f32 %v133_v44, %v103_v38  ;;  %v223_v35 = vshrl.u32 %v222_v32, 7  ;;  %v1375_v32 = vld [vmem:[%s2014_s2 + $0x10] sm:$0xff] }
  0x31   :  { %2035 = vst [vmem:[#allocation6_spill] sm:$0xff] %v1375_v32 }
  0x32   :  { %v70_v51 = vadd.f32 %v69_v46, %v1192_v42  ;;  %v135_v55 = vadd.f32 %v134_v50, %v104_v43  ;;  %v1248_v38 = vsub.s32 0, %v223_v35  ;;  %v1255_v40 = vsub.s32 1, %v223_v35 }
  0x33   :  { %v1257_v43 = vsub.s32 2, %v223_v35  ;;  %v1259_v44 = vsub.s32 3, %v223_v35  ;;  %v1263_v50 = vsub.s32 5, %v223_v35 }
  0x34   :  { %v71_v56 = vadd.f32 %v70_v51, %v1200_v47  ;;  %v136_v60 = vadd.f32 %v135_v55, %v105_v48  ;;  %v1261_v48 = vsub.s32 4, %v223_v35  ;;  %v1265_v51 = vsub.s32 6, %v223_v35 }
  0x36   :  { %v72_v62 = vadd.f32 %v71_v56, %v1208_v52  ;;  %v137_v5 = vadd.f32 %v136_v60, %v106_v54  ;;  %v1267_v54 = vsub.s32 7, %v223_v35  ;;  %v1274_v56 = vld [vmem:[%s2013_s1 + $0x8] sm:$0xff] }
  0x38   :  { %v73_v7 = vadd.f32 %v72_v62, %v1216_v58  ;;  %v138_v12 = vadd.f32 %v137_v5, %v107_v59 }
  0x3a   :  { %v74_v14 = vadd.f32 %v73_v7, %v1224_v63  ;;  %v139_v19 = vadd.f32 %v138_v12, %v108_v3  ;;  %v1287_v7 = vld [vmem:[%s2013_s1 + $0x10] sm:$0xff] }
  0x3b   :  { %2031 = vst [vmem:[#allocation2_spill] sm:$0xff] %v1287_v7 }
  0x3c   :  { %v75_v22 = vadd.f32 %v74_v14, %v1232_v8  ;;  %v140_v24 = vadd.f32 %v139_v19, %v109_v11 }
  0x3e   :  { %v76_v27 = vadd.f32 %v75_v22, %v1240_v16  ;;  %v141_v28 = vadd.f32 %v140_v24, %v110_v18 }
  0x40   :  { %77 = vadd.xlane.f32.xlu0 %v76_v27  ;;  %v142_v30 = vadd.f32 %v141_v28, %v111_v23  ;;  %v1308_v27 = vld [vmem:[%s2013_s1 + $0x18] sm:$0xff]  ;;  %v1356_v28 = vld [vmem:[%s2014_s2 + $0x8] sm:$0xff] }
  0x41   :  { %2032 = vst [vmem:[#allocation3_spill] sm:$0xff] %v1308_v27  ;;  %2034 = vst [vmem:[#allocation5_spill] sm:$0xff] %v1356_v28  ;;  %v1396_v23 = vld [vmem:[%s2014_s2 + $0x18] sm:$0xff] }
  0x42   :  { %2036 = vst [vmem:[#allocation7_spill] sm:$0xff] %v1396_v23 }
  0x44   :  { %143 = vadd.xlane.f32.xlu0 %v142_v30 }
  0xcd   :  { %v78_v34 = vpop.xlane.xlu0 %77 }
  0xce   :  { %v1269_v55 = vmul.f32 0.00024414063, %v78_v34 }
  0xd0   :  { %v146_v19 = vmul.f32 %v1269_v55, %v1269_v55  ;;  %v152_v34 = vsub.f32 %v1005_v2, %v1269_v55  ;;  %v154_v24 = vsub.f32 %v1024_v9, %v1269_v55  ;;  %v155_v22 = vsub.f32 %v1032_v13, %v1269_v55 }
  0xd1   :  { %v144_v46 = vpop.xlane.xlu0 %143  ;;  %v159_v2 = vsub.f32 %v1064_v29, %v1269_v55  ;;  %v161_v9 = vsub.f32 %v1080_v37, %v1269_v55  ;;  %v162_v13 = vsub.f32 %v1088_v41, %v1269_v55  ;;  %v166_v29 = vsub.f32 %v1120_v57, %v1269_v55 }
  0xd2   :  { %v145_v60 = vmul.f32 0.00024414063, %v144_v46  ;;  %v151_v46 = vsub.f32 %v1000_v1, %v1269_v55  ;;  %v158_v1 = vsub.f32 %v1056_v25, %v1269_v55  ;;  %v165_v25 = vsub.f32 %v1112_v53, %v1269_v55 }
  0xd3   :  { %v168_v37 = vsub.f32 %v1136_v4, %v1269_v55  ;;  %v169_v41 = vsub.f32 %v1144_v10, %v1269_v55  ;;  %v172_v53 = vsub.f32 %v1168_v26, %v1269_v55  ;;  %v173_v57 = vsub.f32 %v1176_v31, %v1269_v55 }
  0xd4   :  { %v147_v35 = vsub.f32 %v145_v60, %v146_v19  ;;  %v1335_v19 = vld [vmem:[%s2014_s2] sm:$0xff]  ;;  %v150_v60 = vsub.f32 %v995_v0, %v1269_v55  ;;  %v157_v0 = vsub.f32 %v1048_v21, %v1269_v55  ;;  %v164_v21 = vsub.f32 %v1104_v49, %v1269_v55 }
  0xd5   :  { %2033 = vst [vmem:[#allocation4_spill] sm:$0xff] %v1335_v19  ;;  %v171_v49 = vsub.f32 %v1160_v20, %v1269_v55  ;;  %v175_v4 = vsub.f32 %v1192_v42, %v1269_v55  ;;  %v176_v10 = vsub.f32 %v1200_v47, %v1269_v55  ;;  %v178_v20 = vsub.f32 %v1216_v58, %v1269_v55 }
  0xd6   :  { %v148_v30 = vadd.f32 1e-05, %v147_v35  ;;  %v153_v35 = vsub.f32 %v1016_v6, %v1269_v55  ;;  %v160_v6 = vsub.f32 %v1072_v33, %v1269_v55  ;;  %v167_v33 = vsub.f32 %v1128_v61, %v1269_v55 }
  0xd7   :  { %v174_v61 = vsub.f32 %v1184_v36, %v1269_v55  ;;  %v179_v26 = vsub.f32 %v1224_v63, %v1269_v55  ;;  %v180_v31 = vsub.f32 %v1232_v8, %v1269_v55  ;;  %v181_v36 = vsub.f32 %v1240_v16, %v1269_v55 }
  0xd8   :  { %842 = vrsqrt.f32 %v148_v30  ;;  %v156_v30 = vsub.f32 %v1040_v17, %v1269_v55  ;;  %v163_v17 = vsub.f32 %v1096_v45, %v1269_v55  ;;  %v170_v45 = vsub.f32 %v1152_v15, %v1269_v55 }
  0xd9   :  { %v177_v15 = vsub.f32 %v1208_v52, %v1269_v55 }
  0xe2   :  { %v843_v18 = vpop.eup %842 }
  0xe3   :  { %v182_v14 = vmul.f32 %v843_v18, %v150_v60  ;;  %v183_v42 = vmul.f32 %v843_v18, %v151_v46  ;;  %v184_v12 = vmul.f32 %v843_v18, %v152_v34  ;;  %v185_v11 = vmul.f32 %v843_v18, %v153_v35 }
  0xe4   :  { %v186_v47 = vmul.f32 %v843_v18, %v154_v24  ;;  %v187_v5 = vmul.f32 %v843_v18, %v155_v22  ;;  %v188_v3 = vmul.f32 %v843_v18, %v156_v30  ;;  %v189_v52 = vmul.f32 %v843_v18, %v157_v0 }
  0xe5   :  { %v190_v62 = vmul.f32 %v843_v18, %v158_v1  ;;  %v191_v59 = vmul.f32 %v843_v18, %v159_v2  ;;  %v192_v58 = vmul.f32 %v843_v18, %v160_v6  ;;  %v193_v23 = vmul.f32 %v843_v18, %v161_v9 }
  0xe6   :  { %v194_v32 = vmul.f32 %v843_v18, %v162_v13  ;;  %v195_v63 = vmul.f32 %v843_v18, %v163_v17  ;;  %v196_v28 = vmul.f32 %v843_v18, %v164_v21  ;;  %v197_v27 = vmul.f32 %v843_v18, %v165_v25 }
  0xe7   :  { %v198_v8 = vmul.f32 %v843_v18, %v166_v29  ;;  %v199_v19 = vmul.f32 %v843_v18, %v167_v33  ;;  %v200_v7 = vmul.f32 %v843_v18, %v168_v37  ;;  %v201_v16 = vmul.f32 %v843_v18, %v169_v41 }
  0xe8   :  { %v202_v55 = vmul.f32 %v843_v18, %v170_v45  ;;  %v203_v46 = vmul.f32 %v843_v18, %v171_v49  ;;  %v204_v34 = vmul.f32 %v843_v18, %v172_v53  ;;  %v205_v60 = vmul.f32 %v843_v18, %v173_v57 }
  0xe9   :  { %v206_v24 = vmul.f32 %v843_v18, %v174_v61  ;;  %v207_v22 = vmul.f32 %v843_v18, %v175_v4  ;;  %v208_v35 = vmul.f32 %v843_v18, %v176_v10  ;;  %v209_v30 = vmul.f32 %v843_v18, %v177_v15 }
  0xea   :  { %v210_v0 = vmul.f32 %v843_v18, %v178_v20  ;;  %v211_v1 = vmul.f32 %v843_v18, %v179_v26  ;;  %v212_v2 = vmul.f32 %v843_v18, %v180_v31  ;;  %v213_v6 = vmul.f32 %v843_v18, %v181_v36 }
  0xeb   :  { %v2037_v9 = vrot.slane %v1253_v39, %v1248_v38  ;;  %v2038_v17 = vrot.slane %v1253_v39, %v1255_v40  ;;  %v2039_v25 = vrot.slane %v1253_v39, %v1257_v43  ;;  %v2040_v33 = vrot.slane %v1253_v39, %v1259_v44 }
  0xec   :  { %v2041_v41 = vrot.slane %v1253_v39, %v1261_v48  ;;  %v2042_v45 = vrot.slane %v1253_v39, %v1263_v50  ;;  %v2043_v49 = vrot.slane %v1253_v39, %v1265_v51  ;;  %v2044_v57 = vrot.slane %v1253_v39, %v1267_v54 }
  0xed   :  { %v382_v13 = vmul.f32 %v2037_v9, %v182_v14  ;;  %v383_v21 = vmul.f32 %v2038_v17, %v183_v42  ;;  %v384_v29 = vmul.f32 %v2039_v25, %v184_v12  ;;  %v385_v37 = vmul.f32 %v2040_v33, %v185_v11  ;;  %v2055_v9 = vld [vmem:[#allocation4_spill] sm:$0xff] }
  0xee   :  { %v386_v18 = vmul.f32 %v2041_v41, %v186_v47  ;;  %v387_v14 = vmul.f32 %v2042_v45, %v187_v5  ;;  %v388_v53 = vmul.f32 %v2043_v49, %v188_v3  ;;  %v389_v12 = vmul.f32 %v2044_v57, %v189_v52  ;;  %v2053_v52 = vld [vmem:[#allocation2_spill] sm:$0xff] }
  0xef   :  { %v2045_v61 = vrot.slane %v1274_v56, %v1248_v38  ;;  %v2046_v4 = vrot.slane %v1274_v56, %v1255_v40  ;;  %v2047_v15 = vrot.slane %v1274_v56, %v1257_v43  ;;  %v2048_v20 = vrot.slane %v1274_v56, %v1259_v44 }
  0xf0   :  { %v2049_v39 = vrot.slane %v1274_v56, %v1261_v48  ;;  %v2050_v31 = vrot.slane %v1274_v56, %v1263_v50  ;;  %v2051_v36 = vrot.slane %v1274_v56, %v1265_v51  ;;  %v2052_v42 = vrot.slane %v1274_v56, %v1267_v54 }
  0xf1   :  { %v390_v11 = vmul.f32 %v2045_v61, %v190_v62  ;;  %v391_v10 = vmul.f32 %v2046_v4, %v191_v59  ;;  %v392_v5 = vmul.f32 %v2047_v15, %v192_v58  ;;  %v393_v3 = vmul.f32 %v2048_v20, %v193_v23  ;;  %v2068_v20 = vld [vmem:[#allocation3_spill] sm:$0xff] }
  0xf2   :  { %v394_v26 = vmul.f32 %v2049_v39, %v194_v32  ;;  %v395_v62 = vmul.f32 %v2050_v31, %v195_v63  ;;  %v396_v59 = vmul.f32 %v2051_v36, %v196_v28  ;;  %v397_v47 = vmul.f32 %v2052_v42, %v197_v27 }
  0xf3   :  { %v2054_v58 = vrot.slane %v2053_v52, %v1248_v38  ;;  %v2056_v17 = vrot.slane %v2055_v9, %v1248_v38  ;;  %v2057_v63 = vrot.slane %v2055_v9, %v1255_v40  ;;  %v2058_v28 = vrot.slane %v2055_v9, %v1257_v43 }
  0xf4   :  { %v2059_v56 = vrot.slane %v2053_v52, %v1255_v40  ;;  %v2067_v15 = vrot.slane %v2053_v52, %v1267_v54  ;;  %v2069_v39 = vrot.slane %v2068_v20, %v1248_v38  ;;  %v2070_v31 = vrot.slane %v2055_v9, %v1263_v50 }
  0xf5   :  { %v398_v23 = vmul.f32 %v2054_v58, %v198_v8  ;;  %v1554_v32 = vadd.f32 %v2056_v17, %v382_v13  ;;  %v1559_v25 = vadd.f32 %v2057_v63, %v383_v21  ;;  %v1564_v33 = vadd.f32 %v2058_v28, %v384_v29 }
  0xf6   :  { %v399_v27 = vmul.f32 %v2059_v56, %v199_v19  ;;  %v2060_v8 = vrot.slane %v2053_v52, %v1257_v43  ;;  %v2061_v13 = vrot.slane %v2053_v52, %v1259_v44  ;;  %v2062_v21 = vrot.slane %v2055_v9, %v1259_v44 }
  0xf7   :  { %v2063_v29 = vrot.slane %v2053_v52, %v1261_v48  ;;  %v2064_v19 = vrot.slane %v2053_v52, %v1263_v50  ;;  %v2071_v36 = vrot.slane %v2055_v9, %v1265_v51  ;;  %v2072_v42 = vrot.slane %v2068_v20, %v1255_v40 }
  0xf8   :  { %v400_v41 = vmul.f32 %v2060_v8, %v200_v7  ;;  %v401_v45 = vmul.f32 %v2061_v13, %v201_v16  ;;  %v1578_v49 = vadd.f32 %v2062_v21, %v385_v37  ;;  %v2065_v7 = vrot.slane %v2053_v52, %v1265_v51 }
  0xf9   :  { %v1583_v57 = vmul.f32 %v2063_v29, %v202_v55  ;;  %v1588_v61 = vmul.f32 %v2064_v19, %v203_v46  ;;  %v2066_v16 = vrot.slane %v2055_v9, %v1261_v48  ;;  %v1603_v55 = vmul.f32 %v2067_v15, %v205_v60  ;;  %v2078_v29 = vld [vmem:[#allocation5_spill] sm:$0xff] }
  0xfa   :  { %v1593_v4 = vmul.f32 %v2065_v7, %v204_v34  ;;  %v1608_v46 = vmul.f32 %v2069_v39, %v206_v24  ;;  %v1613_v34 = vadd.f32 %v2070_v31, %v387_v14  ;;  %v1623_v60 = vmul.f32 %v2072_v42, %v207_v22 }
  0xfb   :  { %v1598_v37 = vadd.f32 %v2066_v16, %v386_v18  ;;  %v1618_v18 = vadd.f32 %v2071_v36, %v388_v53  ;;  %v614_v52 = vsub.f32 0.0, %v1554_v32  ;;  %v615_v24 = vsub.f32 0.0, %v1559_v25 }
  0xfc   :  { %v616_v58 = vsub.f32 0.0, %v1564_v33  ;;  %v2073_v14 = vrot.slane %v2068_v20, %v1257_v43  ;;  %v2074_v53 = vrot.slane %v2068_v20, %v1259_v44  ;;  %v2075_v22 = vrot.slane %v2055_v9, %v1267_v54 }
  0xfd   :  { %v617_v56 = vsub.f32 0.0, %v1578_v49  ;;  %v2076_v8 = vrot.slane %v2068_v20, %v1261_v48  ;;  %v2080_v9 = vrot.slane %v2068_v20, %v1265_v51  ;;  %v620_v15 = vsub.f32 0.0, %v1618_v18 }
  0xfe   :  { %v1631_v17 = vmul.f32 %v2073_v14, %v208_v35  ;;  %v1636_v63 = vmul.f32 %v2074_v53, %v209_v30  ;;  %v1641_v28 = vadd.f32 %v2075_v22, %v389_v12  ;;  %v2077_v35 = vrot.slane %v2068_v20, %v1263_v50 }
  0xff   :  { %v1647_v13 = vmul.f32 %v2076_v8, %v210_v0  ;;  %v2079_v30 = vrot.slane %v2078_v29, %v1248_v38  ;;  %v618_v12 = vsub.f32 0.0, %v1598_v37  ;;  %v1663_v7 = vmul.f32 %v2080_v9, %v212_v2 }
 0x100   :  { %v1652_v21 = vmul.f32 %v2077_v35, %v211_v1  ;;  %v2081_v0 = vrot.slane %v2078_v29, %v1255_v40  ;;  %v619_v1 = vsub.f32 0.0, %v1613_v34  ;;  %v646_v31 = vmul.f32 1.442695, %v614_v52 }
 0x101   :  { %v1657_v19 = vadd.f32 %v2079_v30, %v390_v11  ;;  %v2082_v11 = vrot.slane %v2078_v29, %v1257_v43  ;;  %v648_v36 = vmul.f32 1.442695, %v615_v24  ;;  %v650_v42 = vmul.f32 1.442695, %v616_v58 }
 0x102   :  { %v1668_v16 = vadd.f32 %v2081_v0, %v391_v10  ;;  %v2083_v2 = vrot.slane %v2068_v20, %v1267_v54  ;;  %v2084_v10 = vrot.slane %v2078_v29, %v1259_v44  ;;  %v621_v22 = vsub.f32 0.0, %v1641_v28 }
 0x103   :  { %v1675_v39 = vadd.f32 %v2082_v11, %v392_v5  ;;  %v652_v8 = vmul.f32 1.442695, %v617_v56  ;;  %v2085_v5 = vrot.slane %v2078_v29, %v1261_v48  ;;  %v622_v52 = vsub.f32 0.0, %v1657_v19 }
 0x104   :  { %v1680_v14 = vmul.f32 %v2083_v2, %v213_v6  ;;  %v1685_v53 = vadd.f32 %v2084_v10, %v393_v3  ;;  %844 = vpow2.f32 %v646_v31  ;;  %v654_v24 = vmul.f32 1.442695, %v618_v12  ;;  %v2089_v31 = vld [vmem:[#allocation6_spill] sm:$0xff] }
 0x105   :  { %v1691_v35 = vadd.f32 %v2085_v5, %v394_v26  ;;  %v2086_v6 = vrot.slane %v2078_v29, %v1263_v50  ;;  %v623_v3 = vsub.f32 0.0, %v1668_v16  ;;  %846 = vpow2.f32 %v648_v36 }
 0x106   :  { %v656_v58 = vmul.f32 1.442695, %v619_v1  ;;  %v2087_v56 = vrot.slane %v2078_v29, %v1265_v51  ;;  %v624_v26 = vsub.f32 0.0, %v1675_v39  ;;  %848 = vpow2.f32 %v650_v42 }
 0x107   :  { %v1697_v20 = vadd.f32 %v2086_v6, %v395_v62  ;;  %v658_v9 = vmul.f32 1.442695, %v620_v15  ;;  %v2088_v12 = vrot.slane %v2078_v29, %v1267_v54  ;;  %v625_v62 = vsub.f32 0.0, %v1685_v53 }
 0x108   :  { %v1703_v30 = vadd.f32 %v2087_v56, %v396_v59  ;;  %850 = vpow2.f32 %v652_v8  ;;  %v660_v11 = vmul.f32 1.442695, %v621_v22  ;;  %v2090_v1 = vrot.slane %v2089_v31, %v1248_v38 }
 0x109   :  { %v1709_v0 = vadd.f32 %v2088_v12, %v397_v47  ;;  %v626_v59 = vsub.f32 0.0, %v1691_v35  ;;  %852 = vpow2.f32 %v654_v24  ;;  %v662_v2 = vmul.f32 1.442695, %v622_v52 }
 0x10a   :  { %v1715_v36 = vadd.f32 %v2090_v1, %v398_v23  ;;  %v2091_v15 = vrot.slane %v2089_v31, %v1255_v40  ;;  %v627_v47 = vsub.f32 0.0, %v1697_v20  ;;  %854 = vpow2.f32 %v656_v58 }
 0x10b   :  { %v664_v29 = vmul.f32 1.442695, %v623_v3  ;;  %v2092_v10 = vrot.slane %v2089_v31, %v1257_v43  ;;  %v628_v23 = vsub.f32 0.0, %v1703_v30  ;;  %856 = vpow2.f32 %v658_v9 }
 0x10c   :  { %v1721_v42 = vadd.f32 %v2091_v15, %v399_v27  ;;  %v666_v8 = vmul.f32 1.442695, %v624_v26  ;;  %v2093_v5 = vrot.slane %v2089_v31, %v1259_v44  ;;  %v629_v27 = vsub.f32 0.0, %v1709_v0 }
 0x10d   :  { %v1727_v22 = vadd.f32 %v2092_v10, %v400_v41  ;;  %858 = vpow2.f32 %v660_v11  ;;  %v668_v24 = vmul.f32 1.442695, %v625_v62  ;;  %v2094_v6 = vrot.slane %v2089_v31, %v1261_v48 }
 0x10e   :  { %v1733_v52 = vadd.f32 %v2093_v5, %v401_v45  ;;  %v630_v41 = vsub.f32 0.0, %v1715_v36  ;;  %860 = vpow2.f32 %v662_v2  ;;  %v670_v58 = vmul.f32 1.442695, %v626_v59  ;;  %v1750_v12 = vpop.eup %844 }
 0x10f   :  { %v1740_v3 = vadd.f32 %v2094_v6, %v1583_v57  ;;  %v2095_v56 = vrot.slane %v2089_v31, %v1263_v50  ;;  %v631_v26 = vsub.f32 0.0, %v1721_v42  ;;  %862 = vpow2.f32 %v664_v29  ;;  %v1759_v59 = vpop.eup %846 }
 0x110   :  { %v672_v9 = vmul.f32 1.442695, %v627_v47  ;;  %v2096_v57 = vrot.slane %v2089_v31, %v1265_v51  ;;  %v632_v11 = vsub.f32 0.0, %v1727_v22  ;;  %864 = vpow2.f32 %v666_v8  ;;  %v1768_v29 = vpop.eup %848 }
 0x111   :  { %v1747_v45 = vadd.f32 %v2095_v56, %v1588_v61  ;;  %v674_v1 = vmul.f32 1.442695, %v628_v23  ;;  %v2097_v61 = vrot.slane %v2089_v31, %v1267_v54  ;;  %v633_v15 = vsub.f32 0.0, %v1733_v52 }
 0x112   :  { %v1756_v62 = vadd.f32 %v2096_v57, %v1593_v4  ;;  %866 = vpow2.f32 %v668_v24  ;;  %v676_v47 = vmul.f32 1.442695, %v629_v27  ;;  %v2098_v4 = vld [vmem:[#allocation7_spill] sm:$0xff]  ;;  %v634_v23 = vsub.f32 0.0, %v1740_v3  ;;  %v1777_v6 = vpop.eup %850 }
 0x113   :  { %v1765_v2 = vadd.f32 %v2097_v61, %v1603_v55  ;;  %v2099_v10 = vrot.slane %v2098_v4, %v1248_v38  ;;  %868 = vpow2.f32 %v670_v58  ;;  %v678_v5 = vmul.f32 1.442695, %v630_v41  ;;  %v1786_v56 = vpop.eup %852 }
 0x114   :  { %v2100_v55 = vrot.slane %v2098_v4, %v1255_v40  ;;  %v635_v27 = vsub.f32 0.0, %v1747_v45  ;;  %870 = vpow2.f32 %v672_v9  ;;  %v680_v24 = vmul.f32 1.442695, %v631_v26  ;;  %v1795_v57 = vpop.eup %854 }
 0x115   :  { %v1774_v8 = vadd.f32 %v2099_v10, %v1608_v46  ;;  %v2101_v38 = vrot.slane %v2098_v4, %v1257_v43  ;;  %v636_v41 = vsub.f32 0.0, %v1756_v62  ;;  %872 = vpow2.f32 %v674_v1  ;;  %v1804_v61 = vpop.eup %856 }
 0x116   :  { %v1783_v31 = vadd.f32 %v2100_v55, %v1623_v60  ;;  %v682_v58 = vmul.f32 1.442695, %v632_v11  ;;  %v2102_v40 = vrot.slane %v2098_v4, %v1259_v44  ;;  %v637_v26 = vsub.f32 0.0, %v1765_v2 }
 0x117   :  { %v1792_v46 = vadd.f32 %v2101_v38, %v1631_v17  ;;  %874 = vpow2.f32 %v676_v47  ;;  %v684_v9 = vmul.f32 1.442695, %v633_v15  ;;  %v2103_v43 = vrot.slane %v2098_v4, %v1261_v48  ;;  %v1813_v10 = vpop.eup %858 }
 0x118   :  { %v1801_v60 = vadd.f32 %v2102_v40, %v1636_v63  ;;  %v638_v11 = vsub.f32 0.0, %v1774_v8  ;;  %876 = vpow2.f32 %v678_v5  ;;  %v686_v1 = vmul.f32 1.442695, %v634_v23  ;;  %v861_v55 = vpop.eup %860 }
 0x119   :  { %v1810_v17 = vadd.f32 %v2103_v43, %v1647_v13  ;;  %v2105_v44 = vrot.slane %v2098_v4, %v1263_v50  ;;  %v639_v15 = vsub.f32 0.0, %v1783_v31  ;;  %878 = vpow2.f32 %v680_v24  ;;  %v863_v38 = vpop.eup %862 }
 0x11a   :  { %v688_v47 = vmul.f32 1.442695, %v635_v27  ;;  %v2107_v48 = vrot.slane %v2098_v4, %v1265_v51  ;;  %v640_v23 = vsub.f32 0.0, %v1792_v46  ;;  %880 = vpow2.f32 %v682_v58  ;;  %v865_v40 = vpop.eup %864 }
 0x11b   :  { %2104 = vst [vmem:[#allocation2_spill] sm:$0xff] %v1810_v17  ;;  %v1819_v63 = vadd.f32 %v2105_v44, %v1652_v21  ;;  %v690_v5 = vmul.f32 1.442695, %v636_v41  ;;  %v2109_v50 = vrot.slane %v2098_v4, %v1267_v54  ;;  %v641_v27 = vsub.f32 0.0, %v1801_v60 }
 0x11c   :  { %v1826_v13 = vadd.f32 %v2107_v48, %v1663_v7  ;;  %882 = vpow2.f32 %v684_v9  ;;  %v692_v24 = vmul.f32 1.442695, %v637_v26  ;;  %v642_v51 = vsub.f32 0.0, %v1810_v17  ;;  %v867_v43 = vpop.eup %866 }
 0x11d   :  { %2106 = vst [vmem:[#allocation4_spill] sm:$0xff] %v1819_v63  ;;  %v1833_v21 = vadd.f32 %v2109_v50, %v1680_v14  ;;  %884 = vpow2.f32 %v686_v1  ;;  %v694_v7 = vmul.f32 1.442695, %v638_v11  ;;  %v643_v58 = vsub.f32 0.0, %v1819_v63  ;;  %v869_v44 = vpop.eup %868 }
 0x11e   :  { %2108 = vst [vmem:[#allocation3_spill] sm:$0xff] %v1826_v13  ;;  %886 = vpow2.f32 %v688_v47  ;;  %v696_v41 = vmul.f32 1.442695, %v639_v15  ;;  %v644_v48 = vsub.f32 0.0, %v1826_v13  ;;  %v698_v54 = vmul.f32 1.442695, %v640_v23  ;;  %v871_v14 = vpop.eup %870 }
 0x11f   :  { %888 = vpow2.f32 %v690_v5  ;;  %v645_v4 = vsub.f32 0.0, %v1833_v21  ;;  %v700_v26 = vmul.f32 1.442695, %v641_v27  ;;  %v873_v9 = vpop.eup %872  ;;  %v702_v50 = vmul.f32 1.442695, %v642_v51 }
 0x120   :  { %890 = vpow2.f32 %v692_v24  ;;  %v704_v11 = vmul.f32 1.442695, %v643_v58  ;;  %v706_v47 = vmul.f32 1.442695, %v644_v48  ;;  %v710_v23 = vadd.f32 1.0, %v1750_v12 }
 0x121   :  { %892 = vpow2.f32 %v694_v7  ;;  %v875_v1 = vpop.eup %874  ;;  %v708_v63 = vmul.f32 1.442695, %v645_v4  ;;  %v711_v27 = vadd.f32 1.0, %v1759_v59  ;;  %v712_v51 = vadd.f32 1.0, %v1768_v29 }
 0x122   :  { %894 = vpow2.f32 %v696_v41  ;;  %v877_v17 = vpop.eup %876  ;;  %v713_v58 = vadd.f32 1.0, %v1777_v6  ;;  %v714_v48 = vadd.f32 1.0, %v1786_v56  ;;  %v716_v4 = vadd.f32 1.0, %v1804_v61 }
 0x123   :  { %896 = vpow2.f32 %v698_v54  ;;  %v879_v15 = vpop.eup %878  ;;  %v715_v54 = vadd.f32 1.0, %v1795_v57  ;;  %v721_v61 = vadd.f32 1.0, %v867_v43 }
 0x124   :  { %898 = vpow2.f32 %v700_v26  ;;  %v881_v13 = vpop.eup %880  ;;  %v718_v26 = vadd.f32 1.0, %v861_v55  ;;  %v723_v55 = vadd.f32 1.0, %v871_v14 }
 0x125   :  { %900 = vpow2.f32 %v702_v50  ;;  %v719_v50 = vadd.f32 1.0, %v863_v38 }
 0x126   :  { %v883_v5 = vpop.eup %882  ;;  %902 = vpow2.f32 %v704_v11  ;;  %v720_v11 = vadd.f32 1.0, %v865_v40 }
 0x127   :  { %v1842_v24 = vpop.eup %884  ;;  %904 = vpow2.f32 %v706_v47 }
 0x128   :  { %v1845_v7 = vpop.eup %886  ;;  %906 = vpow2.f32 %v708_v63  ;;  %v717_v63 = vadd.f32 1.0, %v1813_v10  ;;  %v722_v10 = vadd.f32 1.0, %v869_v44  ;;  %v727_v44 = vadd.f32 1.0, %v879_v15 }
 0x129   :  { %v1848_v41 = vpop.eup %888  ;;  %908 = vrcp.f32 %v710_v23  ;;  %v730_v15 = vadd.f32 1.0, %v1842_v24 }
 0x12a   :  { %v1851_v12 = vpop.eup %890  ;;  %910 = vrcp.f32 %v711_v27  ;;  %v732_v24 = vadd.f32 1.0, %v1848_v41 }
 0x12b   :  { %v1854_v59 = vpop.eup %892  ;;  %912 = vrcp.f32 %v712_v51 }
 0x12c   :  { %v1857_v29 = vpop.eup %894  ;;  %914 = vrcp.f32 %v713_v58  ;;  %v724_v58 = vadd.f32 1.0, %v873_v9  ;;  %v728_v9 = vadd.f32 1.0, %v881_v13  ;;  %v734_v41 = vadd.f32 1.0, %v1854_v59 }
 0x12d   :  { %v1860_v6 = vpop.eup %896  ;;  %916 = vrcp.f32 %v714_v48  ;;  %v725_v48 = vadd.f32 1.0, %v875_v1 }
 0x12e   :  { %v1862_v56 = vpop.eup %898  ;;  %918 = vrcp.f32 %v715_v54  ;;  %v736_v59 = vadd.f32 1.0, %v1860_v6 }
 0x12f   :  { %v1864_v57 = vpop.eup %900  ;;  %920 = vrcp.f32 %v716_v4  ;;  %v726_v4 = vadd.f32 1.0, %v877_v17 }
 0x130   :  { %v1866_v47 = vpop.eup %902  ;;  %922 = vrcp.f32 %v717_v63  ;;  %v738_v6 = vadd.f32 1.0, %v1864_v57 }
 0x131   :  { %v1868_v23 = vpop.eup %904  ;;  %924 = vrcp.f32 %v718_v26 }
 0x132   :  { %v1870_v27 = vpop.eup %906  ;;  %926 = vrcp.f32 %v719_v50  ;;  %v740_v57 = vadd.f32 1.0, %v1868_v23 }
 0x133   :  { %v909_v51 = vpop.eup %908  ;;  %928 = vrcp.f32 %v720_v11 }
 0x134   :  { %v911_v38 = vpop.eup %910  ;;  %930 = vrcp.f32 %v721_v61  ;;  %v774_v40 = vmul.f32 %v909_v51, %v1554_v32 }
 0x135   :  { %v913_v54 = vpop.eup %912  ;;  %932 = vrcp.f32 %v722_v10  ;;  %v775_v43 = vmul.f32 %v911_v38, %v1559_v25  ;;  %v729_v25 = vadd.f32 1.0, %v883_v5  ;;  %v731_v5 = vadd.f32 1.0, %v1845_v7 }
 0x136   :  { %v915_v63 = vpop.eup %914  ;;  %934 = vrcp.f32 %v723_v55  ;;  %v776_v26 = vmul.f32 %v913_v54, %v1564_v33  ;;  %806 = vst [vmem:[%s2015_s3] sm:$0xff] %v774_v40  ;;  %v733_v7 = vadd.f32 1.0, %v1851_v12  ;;  %v735_v12 = vadd.f32 1.0, %v1857_v29 }
 0x137   :  { %v917_v14 = vpop.eup %916  ;;  %936 = vrcp.f32 %v724_v58  ;;  %v777_v1 = vmul.f32 %v915_v63, %v1578_v49  ;;  %807 = vst [vmem:[%s2015_s3 + $0x8] sm:$0xff] %v775_v43  ;;  %v737_v29 = vadd.f32 1.0, %v1862_v56  ;;  %v739_v56 = vadd.f32 1.0, %v1866_v47 }
 0x138   :  { %v919_v32 = vpop.eup %918  ;;  %938 = vrcp.f32 %v725_v48  ;;  %v778_v17 = vmul.f32 %v917_v14, %v1598_v37  ;;  %808 = vst [vmem:[%s2015_s3 + $0x10] sm:$0xff] %v776_v26  ;;  %v741_v47 = vadd.f32 1.0, %v1870_v27 }
 0x139   :  { %v921_v33 = vpop.eup %920  ;;  %940 = vrcp.f32 %v726_v4  ;;  %v779_v13 = vmul.f32 %v919_v32, %v1613_v34  ;;  %809 = vst [vmem:[%s2015_s3 + $0x18] sm:$0xff] %v777_v1 }
 0x13a   :  { %v923_v49 = vpop.eup %922  ;;  %942 = vrcp.f32 %v727_v44  ;;  %v780_v37 = vmul.f32 %v921_v33, %v1618_v18  ;;  %810 = vst [vmem:[%s2015_s3 + $0x20] sm:$0xff] %v778_v17 }
 0x13b   :  { %v925_v50 = vpop.eup %924  ;;  %944 = vrcp.f32 %v728_v9  ;;  %v781_v34 = vmul.f32 %v923_v49, %v1641_v28  ;;  %811 = vst [vmem:[%s2015_s3 + $0x28] sm:$0xff] %v779_v13 }
 0x13c   :  { %v927_v11 = vpop.eup %926  ;;  %946 = vrcp.f32 %v729_v25  ;;  %v782_v18 = vmul.f32 %v925_v50, %v1657_v19  ;;  %812 = vst [vmem:[%s2015_s3 + $0x30] sm:$0xff] %v780_v37 }
 0x13d   :  { %v929_v61 = vpop.eup %928  ;;  %948 = vrcp.f32 %v730_v15  ;;  %v783_v28 = vmul.f32 %v927_v11, %v1668_v16  ;;  %813 = vst [vmem:[%s2015_s3 + $0x38] sm:$0xff] %v781_v34 }
 0x13e   :  { %v931_v10 = vpop.eup %930  ;;  %950 = vrcp.f32 %v731_v5  ;;  %v784_v19 = vmul.f32 %v929_v61, %v1675_v39  ;;  %814 = vst [vmem:[%s2015_s3 + $0x40] sm:$0xff] %v782_v18 }
 0x13f   :  { %v933_v55 = vpop.eup %932  ;;  %952 = vrcp.f32 %v732_v24  ;;  %v785_v16 = vmul.f32 %v931_v10, %v1685_v53  ;;  %815 = vst [vmem:[%s2015_s3 + $0x48] sm:$0xff] %v783_v28 }
 0x140   :  { %v935_v51 = vpop.eup %934  ;;  %954 = vrcp.f32 %v733_v7  ;;  %v786_v39 = vmul.f32 %v933_v55, %v1691_v35  ;;  %816 = vst [vmem:[%s2015_s3 + $0x50] sm:$0xff] %v784_v19 }
 0x141   :  { %v937_v58 = vpop.eup %936  ;;  %956 = vrcp.f32 %v734_v41  ;;  %v787_v53 = vmul.f32 %v935_v51, %v1697_v20  ;;  %817 = vst [vmem:[%s2015_s3 + $0x58] sm:$0xff] %v785_v16 }
 0x142   :  { %v939_v38 = vpop.eup %938  ;;  %958 = vrcp.f32 %v735_v12  ;;  %v788_v35 = vmul.f32 %v937_v58, %v1703_v30  ;;  %818 = vst [vmem:[%s2015_s3 + $0x60] sm:$0xff] %v786_v39 }
 0x143   :  { %v941_v48 = vpop.eup %940  ;;  %960 = vrcp.f32 %v736_v59  ;;  %v789_v20 = vmul.f32 %v939_v38, %v1709_v0  ;;  %819 = vst [vmem:[%s2015_s3 + $0x68] sm:$0xff] %v787_v53 }
 0x144   :  { %v943_v40 = vpop.eup %942  ;;  %962 = vrcp.f32 %v737_v29  ;;  %v790_v30 = vmul.f32 %v941_v48, %v1715_v36  ;;  %820 = vst [vmem:[%s2015_s3 + $0x70] sm:$0xff] %v788_v35 }
 0x145   :  { %v945_v54 = vpop.eup %944  ;;  %964 = vrcp.f32 %v738_v6  ;;  %v791_v23 = vmul.f32 %v943_v40, %v1721_v42  ;;  %821 = vst [vmem:[%s2015_s3 + $0x78] sm:$0xff] %v789_v20 }
 0x146   :  { %v947_v0 = vpop.eup %946  ;;  %966 = vrcp.f32 %v739_v56  ;;  %v792_v4 = vmul.f32 %v945_v54, %v1727_v22  ;;  %822 = vst [vmem:[%s2015_s3 + $0x80] sm:$0xff] %v790_v30 }
 0x147   :  { %v949_v36 = vpop.eup %948  ;;  %968 = vrcp.f32 %v740_v57  ;;  %v793_v27 = vmul.f32 %v947_v0, %v1733_v52  ;;  %823 = vst [vmem:[%s2015_s3 + $0x88] sm:$0xff] %v791_v23 }
 0x148   :  { %v951_v42 = vpop.eup %950  ;;  %970 = vrcp.f32 %v741_v47  ;;  %v794_v43 = vmul.f32 %v949_v36, %v1740_v3  ;;  %824 = vst [vmem:[%s2015_s3 + $0x90] sm:$0xff] %v792_v4 }
 0x149   :  { %v953_v22 = vpop.eup %952  ;;  %v795_v63 = vmul.f32 %v951_v42, %v1747_v45  ;;  %825 = vst [vmem:[%s2015_s3 + $0x98] sm:$0xff] %v793_v27 }
 0x14a   :  { %v955_v52 = vpop.eup %954  ;;  %v796_v44 = vmul.f32 %v953_v22, %v1756_v62  ;;  %826 = vst [vmem:[%s2015_s3 + $0xa0] sm:$0xff] %v794_v43 }
 0x14b   :  { %v957_v26 = vpop.eup %956  ;;  %v797_v3 = vmul.f32 %v955_v52, %v1765_v2  ;;  %827 = vst [vmem:[%s2015_s3 + $0xa8] sm:$0xff] %v795_v63 }
 0x14c   :  { %v959_v14 = vpop.eup %958  ;;  %v798_v45 = vmul.f32 %v957_v26, %v1774_v8  ;;  %828 = vst [vmem:[%s2015_s3 + $0xb0] sm:$0xff] %v796_v44 }
 0x14d   :  { %v961_v9 = vpop.eup %960  ;;  %v799_v62 = vmul.f32 %v959_v14, %v1783_v31  ;;  %829 = vst [vmem:[%s2015_s3 + $0xb8] sm:$0xff] %v797_v3  ;;  %v2110_v31 = vld [vmem:[#allocation2_spill] sm:$0xff] }
 0x14e   :  { %v963_v1 = vpop.eup %962  ;;  %v800_v2 = vmul.f32 %v961_v9, %v1792_v46  ;;  %830 = vst [vmem:[%s2015_s3 + $0xc0] sm:$0xff] %v798_v45  ;;  %v2111_v46 = vld [vmem:[#allocation4_spill] sm:$0xff] }
 0x14f   :  { %v965_v32 = vpop.eup %964  ;;  %v801_v8 = vmul.f32 %v963_v1, %v1801_v60  ;;  %831 = vst [vmem:[%s2015_s3 + $0xc8] sm:$0xff] %v799_v62  ;;  %v2112_v60 = vld [vmem:[#allocation3_spill] sm:$0xff] }
 0x150   :  { %v967_v25 = vpop.eup %966  ;;  %v802_v17 = vmul.f32 %v965_v32, %v2110_v31  ;;  %832 = vst [vmem:[%s2015_s3 + $0xd0] sm:$0xff] %v800_v2 }
 0x151   :  { %v969_v33 = vpop.eup %968  ;;  %v803_v15 = vmul.f32 %v967_v25, %v2111_v46  ;;  %833 = vst [vmem:[%s2015_s3 + $0xd8] sm:$0xff] %v801_v8 }
 0x152   :  { %v971_v13 = vpop.eup %970  ;;  %v804_v49 = vmul.f32 %v969_v33, %v2112_v60  ;;  %834 = vst [vmem:[%s2015_s3 + $0xe0] sm:$0xff] %v802_v17 }
 0x153   :  { %v805_v5 = vmul.f32 %v971_v13, %v1833_v21  ;;  %835 = vst [vmem:[%s2015_s3 + $0xe8] sm:$0xff] %v803_v15 }
 0x154   :  { %836 = vst [vmem:[%s2015_s3 + $0xf0] sm:$0xff] %v804_v49 }
 0x155   :  { %837 = vst [vmem:[%s2015_s3 + $0xf8] sm:$0xff] %v805_v5 }

// kernel: unet_forward.126
= control target key start
LH: loop header
LB: loop body
LE: loop exit
PB: predicated region body
PF: predicated region fallthrough
CT: control target
= control target key end

     0   :  { %s1646_s15 = smov 0   ;;  %s1648_s16 = smov 0   ;;  %s2001_s0 = inlined_call_operand.vmem [shape: bf16[512,128], index: 0, kind: input, shape index: {}]   ;;  %s2002_s1 = inlined_call_operand.vmem [shape: bf16[128,128], index: 1, kind: input, shape index: {}]   ;;  %s2003_s2 = inlined_call_operand.vmem [shape: f32[1,128], index: 2, kind: input, shape index: {}]   ;;  %s2004_s3 = inlined_call_operand.vmem [shape: f32[512,128], index: 3, kind: input, shape index: {}]   ;;  %s2005_s4 = inlined_call_operand.vmem [shape: f32[512,128], index: 4, kind: output, shape index: {}]  }
   0x1   :  { %s1650_s17 = smov 0  }
   0x2 LB: > { %s33_s18 = sadd.s32 1, %s1615_s16  ;;  %p1299_p0 = scmp.ge.s32.totalorder %s1619_s17, 1  ;;  %s1619_s17 = sphi %s1650_s17, %s14_s17   ;;  %s1615_s16 = sphi %s1648_s16, %s2007_s16   ;;  %s1611_s15 = sphi %s1646_s15, %s2006_s15  }
   0x3   : > { %p35_p1 = scmp.ge.s32.totalorder %s33_s18, 2  ;;  %p229_p2 = scmp.lt.s32.totalorder %s1619_s17, 3 }
   0x5   : > { %s2009_s18 = smov (%p35_p1, %s33_s18), 0  ;;  %p230_p3 = pnand %p1299_p0, %p229_p2 }
   0x6   : > { %v1445_v0 = vld [vmem:[%s2002_s1] sm:$0xff] (!%p230_p3)   ;;  %s1300_s21 = sshll.u32 (!%p230_p3), %s1611_s15, 5  ;;  %v1446_v1 = vld [vmem:[%s2002_s1 + $0x8] sm:$0xff] (!%p230_p3)   ;;  %v1447_v2 = vld [vmem:[%s2002_s1 + $0x10] sm:$0xff] (!%p230_p3)  }
   0x7   : > { %233 = sbr.rel (%p230_p3) target bundleno = 345 (0x159), region = 36  ;;  %p281_p4 = scmp.lt.s32.totalorder (!%p230_p3), %s1300_s21, 63  ;;  %1357 = vmatprep.subr.bf16.mxu0 (!%p230_p3), %v1445_v0  ;;  %1405 = vmatprep.subr.bf16.mxu1 (!%p230_p3), %v1445_v0  ;;  %v1448_v3 = vld [vmem:[%s2002_s1 + $0x18] sm:$0xff] (!%p230_p3)   ;;  %v1449_v6 = vld [vmem:[%s2002_s1 + $0x20] sm:$0xff] (!%p230_p3)   ;;  %v1450_v7 = vld [vmem:[%s2002_s1 + $0x28] sm:$0xff] (!%p230_p3)  }
   0x8   : > { %1358 = vmatpush3.bf16.msra.mxu0 (!%p230_p3), %v1445_v0  ;;  %1413 = vmatpush3.bf16.msra.mxu1 (!%p230_p3), %v1445_v0  ;;  %v1451_v8 = vld [vmem:[%s2002_s1 + $0x30] sm:$0xff] (!%p230_p3)   ;;  %v1452_v9 = vld [vmem:[%s2002_s1 + $0x38] sm:$0xff] (!%p230_p3)   ;;  %v1723_v24 = vld [vmem:[%s2003_s2] ss:$0 sm:$0xff] (!%p230_p3) }
   0x9   : > { %1359 = vmatprep.subr.bf16.mxu0 (!%p230_p3), %v1446_v1  ;;  %1406 = vmatprep.subr.bf16.mxu1 (!%p230_p3), %v1446_v1 }
   0xc   : > { %1360 = vmatpush3.bf16.msra.mxu0 (!%p230_p3), %v1446_v1  ;;  %1414 = vmatpush3.bf16.msra.mxu1 (!%p230_p3), %v1446_v1 }
   0xd   : > { %1361 = vmatprep.subr.bf16.mxu0 (!%p230_p3), %v1447_v2  ;;  %1407 = vmatprep.subr.bf16.mxu1 (!%p230_p3), %v1447_v2 }
   0xe   : > { %s2011_s21 = smov (!%p281_p4, %s1300_s21), 63 }
   0xf   : > { %s1301_s26 = sshll.u32 %s2011_s21, 2  ;;  %s1303_s14 = sshll.u32 %s2011_s21, 3 }
  0x10   : > { %s1679_s29 = scalar_lea.vmem %s2001_s0, %s1301_s26  ;;  %1362 = vmatpush3.bf16.msra.mxu0 %v1447_v2  ;;  %1415 = vmatpush3.bf16.msra.mxu1 %v1447_v2  ;;  %s1718_s20 = scalar_lea.vmem %s2004_s3, %s1303_s14 }
  0x11   : > { %v1453_v4 = vld [vmem:[%s1679_s29] sm:$0xff]   ;;  %1363 = vmatprep.subr.bf16.mxu0 %v1448_v3  ;;  %1408 = vmatprep.subr.bf16.mxu1 %v1448_v3  ;;  %v1455_v10 = vld [vmem:[%s1679_s29 + $0x8] sm:$0xff]   ;;  %v1457_v12 = vld [vmem:[%s1679_s29 + $0x10] sm:$0xff]   ;;  %s1867_s26 = scalar_lea.vmem %s2005_s4, %s1303_s14 }
  0x12   : > { %v1454_v5 = vld [vmem:[%s1679_s29 + $0x40] sm:$0xff]   ;;  %1373 = vmatprep.mubr.bf16.mxu0 %v1453_v4  ;;  %v1456_v11 = vld [vmem:[%s1679_s29 + $0x48] sm:$0xff]   ;;  %v1458_v13 = vld [vmem:[%s1679_s29 + $0x50] sm:$0xff]  }
  0x13   : > { %1389 = vmatprep.mubr.bf16.mxu1 %v1454_v5  ;;  %v1459_v14 = vld [vmem:[%s1679_s29 + $0x18] sm:$0xff]   ;;  %v1461_v16 = vld [vmem:[%s1679_s29 + $0x20] sm:$0xff]   ;;  %v1463_v18 = vld [vmem:[%s1679_s29 + $0x28] sm:$0xff]  }
  0x14   : > { %1364 = vmatpush3.bf16.msra.mxu0 %v1448_v3  ;;  %1416 = vmatpush3.bf16.msra.mxu1 %v1448_v3  ;;  %v1460_v15 = vld [vmem:[%s1679_s29 + $0x58] sm:$0xff]   ;;  %v1462_v17 = vld [vmem:[%s1679_s29 + $0x60] sm:$0xff]   ;;  %v1464_v19 = vld [vmem:[%s1679_s29 + $0x68] sm:$0xff]  }
  0x15   : > { %1365 = vmatprep.subr.bf16.mxu0 %v1449_v6  ;;  %1409 = vmatprep.subr.bf16.mxu1 %v1449_v6  ;;  %v1465_v20 = vld [vmem:[%s1679_s29 + $0x30] sm:$0xff]   ;;  %v1467_v22 = vld [vmem:[%s1679_s29 + $0x38] sm:$0xff]   ;;  %v879_v32 = vld [vmem:[%s1718_s20] sm:$0xff] }
  0x16   : > { %v1466_v21 = vld [vmem:[%s1679_s29 + $0x70] sm:$0xff]   ;;  %v1468_v23 = vld [vmem:[%s1679_s29 + $0x78] sm:$0xff]   ;;  %v895_v34 = vld [vmem:[%s1718_s20 + $0x80] sm:$0xff] }
  0x17   : > { %v881_v26 = vld [vmem:[%s1718_s20 + $0x10] sm:$0xff]  ;;  %v882_v38 = vld [vmem:[%s1718_s20 + $0x18] sm:$0xff]  ;;  %v880_v46 = vld [vmem:[%s1718_s20 + $0x8] sm:$0xff] }
  0x18   : > { %1366 = vmatpush3.bf16.msra.mxu0 %v1449_v6  ;;  %1417 = vmatpush3.bf16.msra.mxu1 %v1449_v6  ;;  %v897_v28 = vld [vmem:[%s1718_s20 + $0x90] sm:$0xff]  ;;  %v898_v40 = vld [vmem:[%s1718_s20 + $0x98] sm:$0xff]  ;;  %v896_v48 = vld [vmem:[%s1718_s20 + $0x88] sm:$0xff] }
  0x19   : > { %1367 = vmatprep.subr.bf16.mxu0 %v1450_v7  ;;  %1410 = vmatprep.subr.bf16.mxu1 %v1450_v7  ;;  %v885_v1 = vld [vmem:[%s1718_s20 + $0x30] sm:$0xff] }
  0x1a   : > { %v901_v6 = vld [vmem:[%s1718_s20 + $0xb0] sm:$0xff] }
  0x1c   : > { %1368 = vmatpush3.bf16.msra.mxu0 %v1450_v7  ;;  %1418 = vmatpush3.bf16.msra.mxu1 %v1450_v7  ;;  %v883_v7 = vld [vmem:[%s1718_s20 + $0x20] sm:$0xff] }
  0x1d   : > { %1369 = vmatprep.subr.bf16.mxu0 %v1451_v8  ;;  %1411 = vmatprep.subr.bf16.mxu1 %v1451_v8 }
  0x20   : > { %1370 = vmatpush3.bf16.msra.mxu0 %v1451_v8  ;;  %1419 = vmatpush3.bf16.msra.mxu1 %v1451_v8  ;;  %v899_v8 = vld [vmem:[%s1718_s20 + $0xa0] sm:$0xff] }
  0x21   : > { %1371 = vmatprep.subr.bf16.mxu0 %v1452_v9  ;;  %1412 = vmatprep.subr.bf16.mxu1 %v1452_v9 }
  0x24   : > { %1372 = vmatpush3.bf16.msra.mxu0 %v1452_v9  ;;  %1420 = vmatpush3.bf16.msra.mxu1 %v1452_v9 }
  0x27   : > { %1374 = vmatmul.mubr.bf16.vlgmr.msra.gmra.mrb[0].mxu0 %v1455_v10  ;;  %1390 = vmatmul.mubr.bf16.vlgmr.msra.gmra.mrb[0].mxu1 %v1456_v11 }
  0x28   : > { %1377 = vmatprep.mubr.bf16.mxu0 %v1457_v12  ;;  %1393 = vmatprep.mubr.bf16.mxu1 %v1458_v13 }
  0x2f   : > { %1378 = vmatmul.mubr.bf16.gmra.mrb[4].mxu0 %v1459_v14  ;;  %1394 = vmatmul.mubr.bf16.gmra.mrb[4].mxu1 %v1460_v15 }
  0x30   : > { %1381 = vmatprep.mubr.bf16.mxu0 %v1461_v16  ;;  %1397 = vmatprep.mubr.bf16.mxu1 %v1462_v17 }
  0x37   : > { %1382 = vmatmul.mubr.bf16.gmra.mrb[8].mxu0 %v1463_v18  ;;  %1398 = vmatmul.mubr.bf16.gmra.mrb[8].mxu1 %v1464_v19 }
  0x38   : > { %1385 = vmatprep.mubr.bf16.mxu0 %v1465_v20  ;;  %1401 = vmatprep.mubr.bf16.mxu1 %v1466_v21 }
  0x3f   : > { %1386 = vmatmul.mubr.bf16.gmra.mrb[12].mxu0 %v1467_v22  ;;  %1402 = vmatmul.mubr.bf16.gmra.mrb[12].mxu1 %v1468_v23  ;;  %v886_v22 = vld [vmem:[%s1718_s20 + $0x38] sm:$0xff] }
  0xfa   : > { %v1375_v25 = vpop.f32.mrb[0].mxu0  ;;  %v1391_v27 = vpop.f32.mrb[0].mxu1 }
  0xfb   : > { %v849_v29 = vadd.f32 %v1375_v25, %v1723_v24  ;;  %v865_v30 = vadd.f32 %v1391_v27, %v1723_v24  ;;  %v614_v31 = vpop.f32.mrb[1].mxu0  ;;  %v678_v33 = vpop.f32.mrb[1].mxu1  ;;  %v902_v25 = vld [vmem:[%s1718_s20 + $0xb8] sm:$0xff] }
  0xfc   : > { %v847_v35 = vadd.f32 %v1723_v24, %v614_v31  ;;  %v863_v36 = vadd.f32 %v1723_v24, %v678_v33  ;;  %v1376_v37 = vpop.f32.mrb[2].mxu0  ;;  %v1392_v39 = vpop.f32.mrb[2].mxu1 }
  0xfd   : > { %v1735_v41 = vadd.f32 %v881_v26, %v849_v29  ;;  %v1737_v42 = vadd.f32 %v897_v28, %v865_v30  ;;  %v850_v43 = vadd.f32 %v1376_v37, %v1723_v24  ;;  %v866_v44 = vadd.f32 %v1392_v39, %v1723_v24  ;;  %v617_v45 = vpop.f32.mrb[3].mxu0  ;;  %v681_v47 = vpop.f32.mrb[3].mxu1 }
  0xfe   : > { %v1743_v49 = vadd.f32 %v879_v32, %v847_v35  ;;  %v1745_v50 = vadd.f32 %v895_v34, %v863_v36  ;;  %v848_v51 = vadd.f32 %v1723_v24, %v617_v45  ;;  %v864_v52 = vadd.f32 %v1723_v24, %v681_v47 }
  0xff   : > { %v945_v53 = vsub.f32 0.0, %v1735_v41  ;;  %v961_v54 = vsub.f32 0.0, %v1737_v42  ;;  %v1751_v55 = vadd.f32 %v882_v38, %v850_v43  ;;  %v1753_v56 = vadd.f32 %v898_v40, %v866_v44  ;;  %v884_v43 = vld [vmem:[%s1718_s20 + $0x28] sm:$0xff] }
 0x100   : > { %v943_v57 = vsub.f32 0.0, %v1743_v49  ;;  %v959_v58 = vsub.f32 0.0, %v1745_v50  ;;  %v1757_v59 = vadd.f32 %v880_v46, %v848_v51  ;;  %v1759_v60 = vadd.f32 %v896_v48, %v864_v52  ;;  %v900_v44 = vld [vmem:[%s1718_s20 + $0xa8] sm:$0xff] }
 0x101   : > { %v979_v61 = vmul.f32 1.442695, %v945_v53  ;;  %v1011_v62 = vmul.f32 1.442695, %v961_v54  ;;  %v946_v63 = vsub.f32 0.0, %v1751_v55  ;;  %v962_v0 = vsub.f32 0.0, %v1753_v56 }
 0x102   : > { %v975_v2 = vmul.f32 1.442695, %v943_v57  ;;  %v1007_v3 = vmul.f32 1.442695, %v959_v58  ;;  %v944_v4 = vsub.f32 0.0, %v1757_v59  ;;  %v960_v5 = vsub.f32 0.0, %v1759_v60 }
 0x103   : > { %1469 = vpow2.f32 %v979_v61  ;;  %v981_v9 = vmul.f32 1.442695, %v946_v63  ;;  %v1013_v10 = vmul.f32 1.442695, %v962_v0  ;;  %v1379_v11 = vpop.f32.mrb[4].mxu0  ;;  %v1395_v12 = vpop.f32.mrb[4].mxu1 }
 0x104   : > { %1471 = vpow2.f32 %v1011_v62  ;;  %v977_v13 = vmul.f32 1.442695, %v944_v4  ;;  %v1009_v14 = vmul.f32 1.442695, %v960_v5  ;;  %v853_v15 = vadd.f32 %v1379_v11, %v1723_v24  ;;  %v630_v16 = vpop.f32.mrb[5].mxu0  ;;  %v694_v17 = vpop.f32.mrb[5].mxu1 }
 0x105   : > { %1473 = vpow2.f32 %v975_v2  ;;  %v869_v18 = vadd.f32 %v1395_v12, %v1723_v24  ;;  %v851_v19 = vadd.f32 %v1723_v24, %v630_v16  ;;  %v867_v20 = vadd.f32 %v1723_v24, %v694_v17  ;;  %v1380_v21 = vpop.f32.mrb[6].mxu0  ;;  %v1396_v23 = vpop.f32.mrb[6].mxu1  ;;  %v889_v58 = vld [vmem:[%s1718_s20 + $0x50] sm:$0xff] }
 0x106   : > { %1475 = vpow2.f32 %v1007_v3  ;;  %v1775_v26 = vadd.f32 %v885_v1, %v853_v15  ;;  %v854_v27 = vadd.f32 %v1380_v21, %v1723_v24  ;;  %v870_v28 = vadd.f32 %v1396_v23, %v1723_v24  ;;  %v633_v29 = vpop.f32.mrb[7].mxu0  ;;  %v697_v30 = vpop.f32.mrb[7].mxu1  ;;  %v905_v3 = vld [vmem:[%s1718_s20 + $0xd0] sm:$0xff] }
 0x107   : > { %1477 = vpow2.f32 %v981_v9  ;;  %v1779_v31 = vadd.f32 %v901_v6, %v869_v18  ;;  %v1781_v32 = vadd.f32 %v883_v7, %v851_v19  ;;  %v1783_v33 = vadd.f32 %v899_v8, %v867_v20  ;;  %v887_v20 = vld [vmem:[%s1718_s20 + $0x40] sm:$0xff] }
 0x108   : > { %1479 = vpow2.f32 %v1013_v10  ;;  %v949_v34 = vsub.f32 0.0, %v1775_v26  ;;  %v1786_v35 = vadd.f32 %v886_v22, %v854_v27  ;;  %v1788_v36 = vadd.f32 %v902_v25, %v870_v28 }
 0x109   : > { %1481 = vpow2.f32 %v977_v13  ;;  %v965_v37 = vsub.f32 0.0, %v1779_v31  ;;  %v947_v38 = vsub.f32 0.0, %v1781_v32  ;;  %v963_v39 = vsub.f32 0.0, %v1783_v33 }
 0x10a   : > { %1483 = vpow2.f32 %v1009_v14  ;;  %v987_v40 = vmul.f32 1.442695, %v949_v34  ;;  %v1383_v45 = vpop.f32.mrb[8].mxu0  ;;  %v1399_v46 = vpop.f32.mrb[8].mxu1  ;;  %v852_v52 = vadd.f32 %v1723_v24, %v633_v29  ;;  %v950_v53 = vsub.f32 0.0, %v1786_v35 }
 0x10b   : > { %v1019_v47 = vmul.f32 1.442695, %v965_v37  ;;  %v983_v48 = vmul.f32 1.442695, %v947_v38  ;;  %v1015_v51 = vmul.f32 1.442695, %v963_v39  ;;  %v868_v57 = vadd.f32 %v1723_v24, %v697_v30 }
 0x10c   : > { %1485 = vpow2.f32 %v987_v40  ;;  %v966_v54 = vsub.f32 0.0, %v1788_v36  ;;  %v646_v61 = vpop.f32.mrb[9].mxu0  ;;  %v710_v62 = vpop.f32.mrb[9].mxu1  ;;  %v1800_v0 = vadd.f32 %v884_v43, %v852_v52  ;;  %v857_v1 = vadd.f32 %v1383_v45, %v1723_v24 }
 0x10d   : > { %v1470_v63 = vpop.eup %1469  ;;  %1487 = vpow2.f32 %v1019_v47  ;;  %v873_v2 = vadd.f32 %v1399_v46, %v1723_v24  ;;  %v1384_v4 = vpop.f32.mrb[10].mxu0  ;;  %v1805_v8 = vadd.f32 %v900_v44, %v868_v57  ;;  %v855_v9 = vadd.f32 %v1723_v24, %v646_v61  ;;  %v903_v44 = vld [vmem:[%s1718_s20 + $0xc0] sm:$0xff] }
 0x10e   : > { %v1400_v5 = vpop.f32.mrb[10].mxu1  ;;  %v1472_v6 = vpop.eup %1471  ;;  %v1041_v7 = vadd.f32 1.0, %v1470_v63  ;;  %1489 = vpow2.f32 %v983_v48  ;;  %v948_v14 = vsub.f32 0.0, %v1800_v0  ;;  %v1811_v15 = vadd.f32 %v889_v58, %v857_v1  ;;  %v906_v1 = vld [vmem:[%s1718_s20 + $0xd8] sm:$0xff] }
 0x10f   : > { %v649_v10 = vpop.f32.mrb[11].mxu0  ;;  %v1808_v11 = vpop.f32.mrb[11].mxu1  ;;  %v1057_v13 = vadd.f32 1.0, %v1472_v6  ;;  %1491 = vpow2.f32 %v1015_v51  ;;  %v964_v18 = vsub.f32 0.0, %v1805_v8  ;;  %v1814_v19 = vadd.f32 %v905_v3, %v873_v2 }
 0x110   : > { %v1474_v12 = vpop.eup %1473  ;;  %1493 = vrcp.f32 %v1041_v7  ;;  %v989_v23 = vmul.f32 1.442695, %v950_v53  ;;  %v1817_v25 = vmul.f32 1.442695, %v966_v54  ;;  %v1819_v29 = vmul.f32 1.442695, %v948_v14 }
 0x111   : > { %v1476_v16 = vpop.eup %1475  ;;  %v1039_v17 = vadd.f32 1.0, %v1474_v12  ;;  %1495 = vrcp.f32 %v1057_v13  ;;  %v953_v30 = vsub.f32 0.0, %v1811_v15  ;;  %v1826_v40 = vmul.f32 1.442695, %v964_v18  ;;  %v890_v53 = vld [vmem:[%s1718_s20 + $0x58] sm:$0xff]  ;;  %v888_v12 = vld [vmem:[%s1718_s20 + $0x48] sm:$0xff] }
 0x112   : > { %v1478_v21 = vpop.eup %1477  ;;  %v1055_v22 = vadd.f32 1.0, %v1476_v16  ;;  %v1822_v34 = vpop.f32.mrb[12].mxu0  ;;  %v1828_v43 = vadd.f32 %v887_v20, %v855_v9  ;;  %v969_v51 = vsub.f32 0.0, %v1814_v19  ;;  %v871_v52 = vadd.f32 %v1723_v24, %v710_v62 }
 0x113   : > { %v1480_v27 = vpop.eup %1479  ;;  %1497 = vrcp.f32 %v1039_v17  ;;  %v1042_v28 = vadd.f32 1.0, %v1478_v21  ;;  %v1824_v37 = vpop.f32.mrb[12].mxu1  ;;  %v858_v63 = vadd.f32 %v1384_v4, %v1723_v24  ;;  %v874_v7 = vadd.f32 %v1400_v5, %v1723_v24 }
 0x114   : > { %v1482_v38 = vpop.eup %1481  ;;  %1499 = vrcp.f32 %v1055_v22  ;;  %v1058_v39 = vadd.f32 1.0, %v1480_v27  ;;  %v1831_v45 = vpop.f32.mrb[13].mxu0  ;;  %v951_v61 = vsub.f32 0.0, %v1828_v43  ;;  %v1849_v62 = vadd.f32 %v903_v44, %v871_v52  ;;  %v904_v52 = vld [vmem:[%s1718_s20 + $0xc8] sm:$0xff] }
 0x115   : > { %v1833_v46 = vpop.f32.mrb[13].mxu1  ;;  %v1484_v47 = vpop.eup %1483  ;;  %1501 = vrcp.f32 %v1042_v28  ;;  %v1040_v48 = vadd.f32 1.0, %v1482_v38  ;;  %v856_v9 = vadd.f32 %v1723_v24, %v649_v10  ;;  %v995_v16 = vmul.f32 1.442695, %v953_v30 }
 0x116   : > { %v1838_v54 = vpop.f32.mrb[14].mxu0  ;;  %v1840_v57 = vpop.f32.mrb[14].mxu1  ;;  %1503 = vrcp.f32 %v1058_v39  ;;  %v1056_v58 = vadd.f32 1.0, %v1484_v47  ;;  %v1854_v4 = vadd.f32 %v890_v53, %v858_v63  ;;  %v967_v20 = vsub.f32 0.0, %v1849_v62 }
 0x117   : > { %v1845_v2 = vpop.f32.mrb[15].mxu0  ;;  %v1847_v3 = vpop.f32.mrb[15].mxu1  ;;  %1505 = vrcp.f32 %v1040_v48  ;;  %v1857_v21 = vadd.f32 %v906_v1, %v874_v7  ;;  %v1860_v27 = vadd.f32 %v888_v12, %v856_v9  ;;  %v1027_v30 = vmul.f32 1.442695, %v969_v51 }
 0x118   : > { %v1486_v6 = vpop.eup %1485  ;;  %1507 = vrcp.f32 %v1056_v58  ;;  %v954_v10 = vsub.f32 0.0, %v1854_v4  ;;  %v991_v38 = vmul.f32 1.442695, %v951_v61  ;;  %v1023_v47 = vmul.f32 1.442695, %v967_v20  ;;  %v893_v61 = vld [vmem:[%s1718_s20 + $0x70] sm:$0xff] }
 0x119   : > { %v1488_v13 = vpop.eup %1487  ;;  %v1045_v14 = vadd.f32 1.0, %v1486_v6  ;;  %1509 = vpow2.f32 %v989_v23  ;;  %v970_v48 = vsub.f32 0.0, %v1857_v21  ;;  %v872_v51 = vadd.f32 %v1723_v24, %v1808_v11 }
 0x11a   : > { %v1490_v17 = vpop.eup %1489  ;;  %v1061_v18 = vadd.f32 1.0, %v1488_v13  ;;  %v997_v63 = vmul.f32 1.442695, %v954_v10  ;;  %v952_v6 = vsub.f32 0.0, %v1860_v27  ;;  %v861_v7 = vadd.f32 %v1822_v34, %v1723_v24 }
 0x11b   : > { %v1492_v22 = vpop.eup %1491  ;;  %1511 = vrcp.f32 %v1045_v14  ;;  %v1043_v5 = vadd.f32 1.0, %v1490_v17  ;;  %v1886_v11 = vadd.f32 %v904_v52, %v872_v51  ;;  %v862_v52 = vadd.f32 %v1838_v54, %v1723_v24  ;;  %v892_v51 = vld [vmem:[%s1718_s20 + $0x68] sm:$0xff] }
 0x11c   : > { %v1494_v28 = vpop.eup %1493  ;;  %1513 = vrcp.f32 %v1061_v18  ;;  %v1059_v23 = vadd.f32 1.0, %v1492_v22  ;;  %v1894_v34 = vadd.f32 %v893_v61, %v861_v7 }
 0x11d   : > { %v1496_v39 = vpop.eup %1495  ;;  %v1105_v44 = vmul.f32 %v1494_v28, %v1735_v41  ;;  %1515 = vrcp.f32 %v1043_v5  ;;  %v993_v28 = vmul.f32 1.442695, %v952_v6 }
 0x11e   : > { %v1498_v53 = vpop.eup %1497  ;;  %v1121_v58 = vmul.f32 %v1496_v39, %v1737_v42  ;;  %1517 = vrcp.f32 %v1059_v23  ;;  %v909_v42 = vld [vmem:[%s1718_s20 + $0xf0] sm:$0xff] }
 0x11f   : > { %v1500_v1 = vpop.eup %1499  ;;  %1137 = vst [vmem:[%s1867_s26 + $0x10] sm:$0xff] %v1105_v44  ;;  %v1103_v41 = vmul.f32 %v1498_v53, %v1743_v49  ;;  %1519 = vpow2.f32 %v1817_v25  ;;  %v877_v49 = vadd.f32 %v1824_v37, %v1723_v24  ;;  %v891_v25 = vld [vmem:[%s1718_s20 + $0x60] sm:$0xff]  ;;  %v968_v37 = vsub.f32 0.0, %v1886_v11  ;;  %v910_v53 = vld [vmem:[%s1718_s20 + $0xf8] sm:$0xff] }
 0x120   : > { %v1502_v9 = vpop.eup %1501  ;;  %1153 = vst [vmem:[%s1867_s26 + $0x90] sm:$0xff] %v1121_v58  ;;  %v1119_v12 = vmul.f32 %v1500_v1, %v1745_v50  ;;  %1521 = vpow2.f32 %v1819_v29  ;;  %v859_v50 = vadd.f32 %v1723_v24, %v1831_v45  ;;  %v860_v1 = vadd.f32 %v1723_v24, %v1845_v2 }
 0x121   : > { %v1504_v13 = vpop.eup %1503  ;;  %1135 = vst [vmem:[%s1867_s26] sm:$0xff] %v1103_v41  ;;  %v1106_v14 = vmul.f32 %v1502_v9, %v1751_v55  ;;  %1523 = vpow2.f32 %v1826_v40  ;;  %v1901_v18 = vadd.f32 %v909_v42, %v877_v49  ;;  %v957_v40 = vsub.f32 0.0, %v1894_v34 }
 0x122   : > { %v1506_v29 = vpop.eup %1505  ;;  %1151 = vst [vmem:[%s1867_s26 + $0x80] sm:$0xff] %v1119_v12  ;;  %v1122_v17 = vmul.f32 %v1504_v13, %v1753_v56  ;;  %1525 = vpow2.f32 %v995_v16  ;;  %v1906_v45 = vadd.f32 %v891_v25, %v859_v50  ;;  %v1029_v16 = vmul.f32 1.442695, %v970_v48  ;;  %v908_v25 = vld [vmem:[%s1718_s20 + $0xe8] sm:$0xff] }
 0x123   : > { %v1508_v20 = vpop.eup %1507  ;;  %1138 = vst [vmem:[%s1867_s26 + $0x18] sm:$0xff] %v1106_v14  ;;  %v1104_v55 = vmul.f32 %v1506_v29, %v1757_v59  ;;  %1527 = vpow2.f32 %v1027_v30  ;;  %v907_v59 = vld [vmem:[%s1718_s20 + $0xe0] sm:$0xff]  ;;  %v1025_v39 = vmul.f32 1.442695, %v968_v37  ;;  %v1938_v42 = vadd.f32 %v892_v51, %v860_v1 }
 0x124   : > { %v1510_v22 = vpop.eup %1509  ;;  %1154 = vst [vmem:[%s1867_s26 + $0x98] sm:$0xff] %v1122_v17  ;;  %v1120_v56 = vmul.f32 %v1508_v20, %v1759_v60  ;;  %1529 = vpow2.f32 %v991_v38  ;;  %v875_v60 = vadd.f32 %v1723_v24, %v1833_v46  ;;  %v894_v38 = vld [vmem:[%s1718_s20 + $0x78] sm:$0xff]  ;;  %v878_v46 = vadd.f32 %v1840_v57, %v1723_v24 }
 0x125   : > { %v1512_v5 = vpop.eup %1511  ;;  %1136 = vst [vmem:[%s1867_s26 + $0x8] sm:$0xff] %v1104_v55  ;;  %v1046_v10 = vadd.f32 1.0, %v1510_v22  ;;  %1531 = vpow2.f32 %v1023_v47  ;;  %v1003_v47 = vmul.f32 1.442695, %v957_v40  ;;  %v1930_v54 = vadd.f32 %v894_v38, %v862_v52 }
 0x126   : > { %v1514_v23 = vpop.eup %1513  ;;  %1152 = vst [vmem:[%s1867_s26 + $0x88] sm:$0xff] %v1120_v56  ;;  %v1109_v30 = vmul.f32 %v1512_v5, %v1775_v26  ;;  %1533 = vpow2.f32 %v997_v63  ;;  %v1923_v63 = vadd.f32 %v907_v59, %v875_v60  ;;  %v1935_v6 = vadd.f32 %v910_v53, %v878_v46 }
 0x127   : > { %v1516_v44 = vpop.eup %1515  ;;  %v1125_v48 = vmul.f32 %v1514_v23, %v1779_v31  ;;  %1535 = vrcp.f32 %v1046_v10  ;;  %v973_v12 = vsub.f32 0.0, %v1901_v18  ;;  %v876_v50 = vadd.f32 %v1723_v24, %v1847_v3 }
 0x128   : > { %v1518_v58 = vpop.eup %1517  ;;  %1141 = vst [vmem:[%s1867_s26 + $0x30] sm:$0xff] %v1109_v30  ;;  %v1107_v26 = vmul.f32 %v1516_v44, %v1781_v32  ;;  %1537 = vpow2.f32 %v1029_v16  ;;  %v955_v16 = vsub.f32 0.0, %v1906_v45  ;;  %v971_v24 = vsub.f32 0.0, %v1923_v63 }
 0x129   : > { %v1520_v31 = vpop.eup %1519  ;;  %1157 = vst [vmem:[%s1867_s26 + $0xb0] sm:$0xff] %v1125_v48  ;;  %v1123_v61 = vmul.f32 %v1518_v58, %v1783_v33  ;;  %1539 = vpow2.f32 %v993_v28  ;;  %v1035_v55 = vmul.f32 1.442695, %v973_v12  ;;  %v1944_v40 = vadd.f32 %v908_v25, %v876_v50 }
 0x12a   : > { %v1522_v41 = vpop.eup %1521  ;;  %1139 = vst [vmem:[%s1867_s26 + $0x20] sm:$0xff] %v1107_v26  ;;  %v1062_v32 = vadd.f32 1.0, %v1520_v31  ;;  %1541 = vpow2.f32 %v1025_v39  ;;  %v958_v59 = vsub.f32 0.0, %v1930_v54  ;;  %v974_v39 = vsub.f32 0.0, %v1935_v6 }
 0x12b   : > { %v1524_v7 = vpop.eup %1523  ;;  %1155 = vst [vmem:[%s1867_s26 + $0xa0] sm:$0xff] %v1123_v61  ;;  %v1044_v57 = vadd.f32 1.0, %v1522_v41  ;;  %1543 = vpow2.f32 %v1003_v47  ;;  %v999_v44 = vmul.f32 1.442695, %v955_v16  ;;  %v1031_v52 = vmul.f32 1.442695, %v971_v24 }
 0x12c   : > { %v1526_v33 = vpop.eup %1525  ;;  %1545 = vrcp.f32 %v1062_v32  ;;  %v1060_v9 = vadd.f32 1.0, %v1524_v7  ;;  %v972_v53 = vsub.f32 0.0, %v1944_v40  ;;  %v1005_v46 = vmul.f32 1.442695, %v958_v59 }
 0x12d   : > { %v1528_v49 = vpop.eup %1527  ;;  %1547 = vrcp.f32 %v1044_v57  ;;  %v1049_v2 = vadd.f32 1.0, %v1526_v33  ;;  %v1037_v61 = vmul.f32 1.442695, %v974_v39 }
 0x12e   : > { %v1530_v13 = vpop.eup %1529  ;;  %1549 = vrcp.f32 %v1060_v9  ;;  %v1065_v14 = vadd.f32 1.0, %v1528_v49  ;;  %v1033_v57 = vmul.f32 1.442695, %v972_v53 }
 0x12f   : > { %v1532_v29 = vpop.eup %1531  ;;  %1551 = vrcp.f32 %v1049_v2  ;;  %v1047_v17 = vadd.f32 1.0, %v1530_v13 }
 0x130   : > { %v1534_v37 = vpop.eup %1533  ;;  %1553 = vrcp.f32 %v1065_v14  ;;  %v1063_v20 = vadd.f32 1.0, %v1532_v29 }
 0x131   : > { %v1536_v22 = vpop.eup %1535  ;;  %1555 = vrcp.f32 %v1047_v17  ;;  %v1050_v56 = vadd.f32 1.0, %v1534_v37 }
 0x132   : > { %v1538_v5 = vpop.eup %1537  ;;  %v1110_v10 = vmul.f32 %v1536_v22, %v1786_v35  ;;  %1557 = vrcp.f32 %v1063_v20  ;;  %v956_v35 = vsub.f32 0.0, %v1938_v42 }
 0x133   : > { %v1540_v3 = vpop.eup %1539  ;;  %1559 = vrcp.f32 %v1050_v56  ;;  %v1066_v28 = vadd.f32 1.0, %v1538_v5 }
 0x134   : > { %v1542_v23 = vpop.eup %1541  ;;  %1142 = vst [vmem:[%s1867_s26 + $0x38] sm:$0xff] %v1110_v10  ;;  %v1048_v30 = vadd.f32 1.0, %v1540_v3  ;;  %1561 = vpow2.f32 %v1035_v55  ;;  %v1001_v32 = vmul.f32 1.442695, %v956_v35 }
 0x135   : > { %v1544_v60 = vpop.eup %1543  ;;  %1563 = vrcp.f32 %v1066_v28  ;;  %v1064_v38 = vadd.f32 1.0, %v1542_v23 }
 0x136   : > { %v1546_v48 = vpop.eup %1545  ;;  %1565 = vrcp.f32 %v1048_v30  ;;  %v1053_v47 = vadd.f32 1.0, %v1544_v60 }
 0x137   : > { %v1548_v58 = vpop.eup %1547  ;;  %v1126_v26 = vmul.f32 %v1546_v48, %v1788_v36  ;;  %1567 = vrcp.f32 %v1064_v38 }
 0x138   : > { %v1550_v51 = vpop.eup %1549  ;;  %v1108_v31 = vmul.f32 %v1548_v58, %v1800_v0  ;;  %1569 = vrcp.f32 %v1053_v47 }
 0x139   : > { %v1552_v1 = vpop.eup %1551  ;;  %1158 = vst [vmem:[%s1867_s26 + $0xb8] sm:$0xff] %v1126_v26  ;;  %v1124_v41 = vmul.f32 %v1550_v51, %v1805_v8  ;;  %1571 = vpow2.f32 %v999_v44 }
 0x13a   : > { %v1554_v7 = vpop.eup %1553  ;;  %1140 = vst [vmem:[%s1867_s26 + $0x28] sm:$0xff] %v1108_v31  ;;  %v1113_v36 = vmul.f32 %v1552_v1, %v1811_v15  ;;  %1573 = vpow2.f32 %v1031_v52 }
 0x13b   : > { %v1556_v33 = vpop.eup %1555  ;;  %1156 = vst [vmem:[%s1867_s26 + $0xa8] sm:$0xff] %v1124_v41  ;;  %v1129_v0 = vmul.f32 %v1554_v7, %v1814_v19  ;;  %1575 = vpow2.f32 %v1005_v46 }
 0x13c   : > { %v1558_v9 = vpop.eup %1557  ;;  %1145 = vst [vmem:[%s1867_s26 + $0x50] sm:$0xff] %v1113_v36  ;;  %v1111_v8 = vmul.f32 %v1556_v33, %v1828_v43  ;;  %1577 = vpow2.f32 %v1037_v61 }
 0x13d   : > { %v1560_v12 = vpop.eup %1559  ;;  %1161 = vst [vmem:[%s1867_s26 + $0xd0] sm:$0xff] %v1129_v0  ;;  %v1127_v49 = vmul.f32 %v1558_v9, %v1849_v62  ;;  %1579 = vpow2.f32 %v1001_v32 }
 0x13e   : > { %v1562_v15 = vpop.eup %1561  ;;  %1143 = vst [vmem:[%s1867_s26 + $0x40] sm:$0xff] %v1111_v8  ;;  %v1114_v2 = vmul.f32 %v1560_v12, %v1854_v4  ;;  %1581 = vpow2.f32 %v1033_v57 }
 0x13f   : > { %v1564_v19 = vpop.eup %1563  ;;  %1159 = vst [vmem:[%s1867_s26 + $0xc0] sm:$0xff] %v1127_v49  ;;  %v1069_v25 = vadd.f32 1.0, %v1562_v15 }
 0x140   : > { %v1566_v13 = vpop.eup %1565  ;;  %1146 = vst [vmem:[%s1867_s26 + $0x58] sm:$0xff] %v1114_v2  ;;  %v1130_v43 = vmul.f32 %v1564_v19, %v1857_v21 }
 0x141   : > { %v1568_v14 = vpop.eup %1567  ;;  %v1112_v62 = vmul.f32 %v1566_v13, %v1860_v27  ;;  %1583 = vrcp.f32 %v1069_v25 }
 0x142   : > { %v1570_v50 = vpop.eup %1569  ;;  %1162 = vst [vmem:[%s1867_s26 + $0xd8] sm:$0xff] %v1130_v43  ;;  %v1128_v29 = vmul.f32 %v1568_v14, %v1886_v11 }
 0x143   : > { %v1572_v17 = vpop.eup %1571  ;;  %1144 = vst [vmem:[%s1867_s26 + $0x48] sm:$0xff] %v1112_v62  ;;  %v1117_v4 = vmul.f32 %v1570_v50, %v1894_v34 }
 0x144   : > { %v1574_v37 = vpop.eup %1573  ;;  %1160 = vst [vmem:[%s1867_s26 + $0xc8] sm:$0xff] %v1128_v29  ;;  %v1051_v20 = vadd.f32 1.0, %v1572_v17 }
 0x145   : > { %v1576_v55 = vpop.eup %1575  ;;  %1149 = vst [vmem:[%s1867_s26 + $0x70] sm:$0xff] %v1117_v4  ;;  %v1067_v22 = vadd.f32 1.0, %v1574_v37 }
 0x146   : > { %v1578_v21 = vpop.eup %1577  ;;  %1585 = vrcp.f32 %v1051_v20  ;;  %v1054_v56 = vadd.f32 1.0, %v1576_v55 }
 0x147   : > { %v1580_v27 = vpop.eup %1579  ;;  %1587 = vrcp.f32 %v1067_v22  ;;  %v1070_v16 = vadd.f32 1.0, %v1578_v21 }
 0x148   : > { %v1582_v5 = vpop.eup %1581  ;;  %1589 = vrcp.f32 %v1054_v56  ;;  %v1052_v11 = vadd.f32 1.0, %v1580_v27 }
 0x149   : > { %1591 = vrcp.f32 %v1070_v16  ;;  %v1068_v34 = vadd.f32 1.0, %v1582_v5 }
 0x14a   : > { %1593 = vrcp.f32 %v1052_v11 }
 0x14b   : > { %v1584_v10 = vpop.eup %1583  ;;  %1595 = vrcp.f32 %v1068_v34 }
 0x14c   : > { %v1133_v24 = vmul.f32 %v1584_v10, %v1901_v18 }
 0x14e   : > { %1165 = vst [vmem:[%s1867_s26 + $0xf0] sm:$0xff] %v1133_v24 }
 0x150   : > { %v1586_v3 = vpop.eup %1585 }
 0x151   : > { %v1588_v28 = vpop.eup %1587  ;;  %v1115_v59 = vmul.f32 %v1586_v3, %v1906_v45 }
 0x152   : > { %v1590_v23 = vpop.eup %1589  ;;  %v1131_v30 = vmul.f32 %v1588_v28, %v1923_v63 }
 0x153   : > { %v1592_v39 = vpop.eup %1591  ;;  %1147 = vst [vmem:[%s1867_s26 + $0x60] sm:$0xff] %v1115_v59  ;;  %v1118_v60 = vmul.f32 %v1590_v23, %v1930_v54 }
 0x154   : > { %v1594_v38 = vpop.eup %1593  ;;  %1163 = vst [vmem:[%s1867_s26 + $0xe0] sm:$0xff] %v1131_v30  ;;  %v1134_v44 = vmul.f32 %v1592_v39, %v1935_v6 }
 0x155   : > { %v1596_v18 = vpop.eup %1595  ;;  %1150 = vst [vmem:[%s1867_s26 + $0x78] sm:$0xff] %v1118_v60  ;;  %v1116_v35 = vmul.f32 %v1594_v38, %v1938_v42 }
 0x156   : > { %1166 = vst [vmem:[%s1867_s26 + $0xf8] sm:$0xff] %v1134_v44  ;;  %v1132_v48 = vmul.f32 %v1596_v18, %v1944_v40 }
 0x157   : > { %1148 = vst [vmem:[%s1867_s26 + $0x68] sm:$0xff] %v1116_v35 }
 0x158   : > { %1164 = vst [vmem:[%s1867_s26 + $0xe8] sm:$0xff] %v1132_v48 }
 0x159 PF: > { %s14_s17 = sadd.s32 1, %s1619_s17   ;;  %s2006_s15 = smov %s1615_s16 }
 0x15a   : > { %p11_p5 = scmp.ge.s32.totalorder %s14_s17, 4   ;;  %s2007_s16 = smov %s2009_s18 }
 0x15c   :  { %13 = sbr.rel (!%p11_p5) target bundleno = 2 (0x2), region = 83 }

// kernel: unet_forward.117
= control target key start
LH: loop header
LB: loop body
LE: loop exit
PB: predicated region body
PF: predicated region fallthrough
CT: control target
= control target key end

     0   :  { %s1571_s15 = smov 0   ;;  %s1573_s16 = smov 0   ;;  %s1799_s0 = inlined_call_operand.vmem [shape: bf16[512,256], index: 0, kind: input, shape index: {}]   ;;  %s1800_s1 = inlined_call_operand.vmem [shape: bf16[256,128], index: 1, kind: input, shape index: {}]   ;;  %s1801_s2 = inlined_call_operand.vmem [shape: f32[1,128], index: 2, kind: input, shape index: {}]   ;;  %s1802_s3 = inlined_call_operand.vmem [shape: f32[512,128], index: 3, kind: input, shape index: {}]   ;;  %s1803_s4 = inlined_call_operand.vmem [shape: f32[512,128], index: 4, kind: output, shape index: {}]  }
   0x1   :  { %s1575_s17 = smov 0  }
   0x2 LB: > { %s33_s18 = sadd.s32 1, %s1540_s16  ;;  %p1246_p0 = scmp.ge.s32.totalorder %s1544_s17, 1  ;;  %s1544_s17 = sphi %s1575_s17, %s14_s17   ;;  %s1540_s16 = sphi %s1573_s16, %s1805_s16   ;;  %s1536_s15 = sphi %s1571_s15, %s1804_s15  }
   0x3   : > { %p35_p1 = scmp.ge.s32.totalorder %s33_s18, 2  ;;  %p232_p2 = scmp.lt.s32.totalorder %s1544_s17, 3 }
   0x5   : > { %s1807_s18 = smov (%p35_p1, %s33_s18), 0  ;;  %p233_p3 = pnand %p1246_p0, %p232_p2 }
   0x6   : > { %v1458_v0 = vld [vmem:[%s1800_s1 + $0x40] sm:$0xff] (!%p233_p3)   ;;  %s1247_s21 = sshll.u32 (!%p233_p3), %s1536_s15, 5  ;;  %v1460_v2 = vld [vmem:[%s1800_s1 + $0x48] sm:$0xff] (!%p233_p3)   ;;  %v1462_v4 = vld [vmem:[%s1800_s1 + $0x50] sm:$0xff] (!%p233_p3)  }
   0x7   : > { %236 = sbr.rel (%p233_p3) target bundleno = 317 (0x13d), region = 36  ;;  %v1459_v1 = vld [vmem:[%s1800_s1] sm:$0xff] (!%p233_p3)   ;;  %1306 = vmatprep.subr.bf16.mxu0 (!%p233_p3), %v1458_v0  ;;  %1418 = vmatprep.subr.bf16.mxu1 (!%p233_p3), %v1458_v0  ;;  %v1461_v3 = vld [vmem:[%s1800_s1 + $0x8] sm:$0xff] (!%p233_p3)   ;;  %p287_p4 = scmp.lt.s32.totalorder (!%p233_p3), %s1247_s21, 63  ;;  %v1463_v5 = vld [vmem:[%s1800_s1 + $0x10] sm:$0xff] (!%p233_p3)  }
   0x8   : > { %1307 = vmatpush3.bf16.msra.mxu0 (!%p233_p3), %v1459_v1  ;;  %1426 = vmatpush3.bf16.msra.mxu1 (!%p233_p3), %v1459_v1  ;;  %v1464_v6 = vld [vmem:[%s1800_s1 + $0x58] sm:$0xff] (!%p233_p3)   ;;  %v1466_v8 = vld [vmem:[%s1800_s1 + $0x60] sm:$0xff] (!%p233_p3)   ;;  %v1468_v10 = vld [vmem:[%s1800_s1 + $0x68] sm:$0xff] (!%p233_p3)  }
   0x9   : > { %1308 = vmatprep.subr.bf16.mxu0 (!%p233_p3), %v1460_v2  ;;  %1419 = vmatprep.subr.bf16.mxu1 (!%p233_p3), %v1460_v2  ;;  %v1465_v7 = vld [vmem:[%s1800_s1 + $0x18] sm:$0xff] (!%p233_p3)   ;;  %v1467_v9 = vld [vmem:[%s1800_s1 + $0x20] sm:$0xff] (!%p233_p3)   ;;  %v1469_v13 = vld [vmem:[%s1800_s1 + $0x28] sm:$0xff] (!%p233_p3)  }
   0xa   : > { %v1470_v14 = vld [vmem:[%s1800_s1 + $0x70] sm:$0xff] (!%p233_p3)   ;;  %v1472_v16 = vld [vmem:[%s1800_s1 + $0x78] sm:$0xff] (!%p233_p3)   ;;  %v1686_v51 = vld [vmem:[%s1801_s2] ss:$0 sm:$0xff] (!%p233_p3) }
   0xb   : > { %v1471_v15 = vld [vmem:[%s1800_s1 + $0x30] sm:$0xff] (!%p233_p3)   ;;  %v1473_v17 = vld [vmem:[%s1800_s1 + $0x38] sm:$0xff] (!%p233_p3)  }
   0xc   : > { %1309 = vmatpush3.bf16.msra.mxu0 (!%p233_p3), %v1461_v3  ;;  %1427 = vmatpush3.bf16.msra.mxu1 (!%p233_p3), %v1461_v3 }
   0xd   : > { %1310 = vmatprep.subr.bf16.mxu0 (!%p233_p3), %v1462_v4  ;;  %1420 = vmatprep.subr.bf16.mxu1 (!%p233_p3), %v1462_v4 }
   0xe   : > { %s1809_s21 = smov (!%p287_p4, %s1247_s21), 63 }
   0xf   : > { %s1613_s10 = sshll.u32 %s1809_s21, 3 }
  0x10   : > { %1311 = vmatpush3.bf16.msra.mxu0 %v1463_v5  ;;  %1428 = vmatpush3.bf16.msra.mxu1 %v1463_v5  ;;  %s1622_s15 = scalar_lea.vmem %s1799_s0, %s1613_s10  ;;  %s1681_s9 = scalar_lea.vmem %s1802_s3, %s1613_s10 }
  0x11   : > { %1312 = vmatprep.subr.bf16.mxu0 %v1464_v6  ;;  %1421 = vmatprep.subr.bf16.mxu1 %v1464_v6  ;;  %v1476_v11 = vld [vmem:[%s1622_s15 + $0x4] ss:$8 sps:$4 sm:$0xff]   ;;  %v1474_v18 = vld [vmem:[%s1622_s15] ss:$8 sps:$4 sm:$0xff]   ;;  %v1480_v20 = vld [vmem:[%s1622_s15 + $0x14] ss:$8 sps:$4 sm:$0xff]  }
  0x12   : > { %v1479_v12 = vld [vmem:[%s1622_s15 + $0x84] ss:$8 sps:$4 sm:$0xff]   ;;  %748 = vmatprep.mubr.bf16.mxu0 %v1476_v11  ;;  %v1477_v19 = vld [vmem:[%s1622_s15 + $0x80] ss:$8 sps:$4 sm:$0xff]   ;;  %v1482_v21 = vld [vmem:[%s1622_s15 + $0x94] ss:$8 sps:$4 sm:$0xff]  }
  0x13   : > { %812 = vmatprep.mubr.bf16.mxu1 %v1479_v12  ;;  %v1484_v22 = vld [vmem:[%s1622_s15 + $0x10] ss:$8 sps:$4 sm:$0xff]   ;;  %v1486_v24 = vld [vmem:[%s1622_s15 + $0x24] ss:$8 sps:$4 sm:$0xff]   ;;  %v1490_v26 = vld [vmem:[%s1622_s15 + $0x20] ss:$8 sps:$4 sm:$0xff]  }
  0x14   : > { %1313 = vmatpush3.bf16.msra.mxu0 %v1465_v7  ;;  %1429 = vmatpush3.bf16.msra.mxu1 %v1465_v7  ;;  %v1485_v23 = vld [vmem:[%s1622_s15 + $0x90] ss:$8 sps:$4 sm:$0xff]   ;;  %v1488_v25 = vld [vmem:[%s1622_s15 + $0xa4] ss:$8 sps:$4 sm:$0xff]   ;;  %v1491_v27 = vld [vmem:[%s1622_s15 + $0xa0] ss:$8 sps:$4 sm:$0xff]  }
  0x15   : > { %1314 = vmatprep.subr.bf16.mxu0 %v1466_v8  ;;  %1422 = vmatprep.subr.bf16.mxu1 %v1466_v8  ;;  %v1492_v28 = vld [vmem:[%s1622_s15 + $0x34] ss:$8 sps:$4 sm:$0xff]   ;;  %v1496_v30 = vld [vmem:[%s1622_s15 + $0x30] ss:$8 sps:$4 sm:$0xff]   ;;  %v1498_v32 = vld [vmem:[%s1622_s15 + $0x44] ss:$8 sps:$4 sm:$0xff]  }
  0x16   : > { %v1494_v29 = vld [vmem:[%s1622_s15 + $0xb4] ss:$8 sps:$4 sm:$0xff]   ;;  %v1497_v31 = vld [vmem:[%s1622_s15 + $0xb0] ss:$8 sps:$4 sm:$0xff]   ;;  %v1500_v33 = vld [vmem:[%s1622_s15 + $0xc4] ss:$8 sps:$4 sm:$0xff]  }
  0x17   : > { %v1502_v34 = vld [vmem:[%s1622_s15 + $0x40] ss:$8 sps:$4 sm:$0xff]   ;;  %v1504_v36 = vld [vmem:[%s1622_s15 + $0x54] ss:$8 sps:$4 sm:$0xff]   ;;  %v1508_v38 = vld [vmem:[%s1622_s15 + $0x50] ss:$8 sps:$4 sm:$0xff]  }
  0x18   : > { %1315 = vmatpush3.bf16.msra.mxu0 %v1467_v9  ;;  %1430 = vmatpush3.bf16.msra.mxu1 %v1467_v9  ;;  %v1503_v35 = vld [vmem:[%s1622_s15 + $0xc0] ss:$8 sps:$4 sm:$0xff]   ;;  %v1506_v37 = vld [vmem:[%s1622_s15 + $0xd4] ss:$8 sps:$4 sm:$0xff]   ;;  %v1509_v39 = vld [vmem:[%s1622_s15 + $0xd0] ss:$8 sps:$4 sm:$0xff]  }
  0x19   : > { %1316 = vmatprep.subr.bf16.mxu0 %v1468_v10  ;;  %1423 = vmatprep.subr.bf16.mxu1 %v1468_v10  ;;  %v1510_v40 = vld [vmem:[%s1622_s15 + $0x64] ss:$8 sps:$4 sm:$0xff]   ;;  %v1514_v42 = vld [vmem:[%s1622_s15 + $0x60] ss:$8 sps:$4 sm:$0xff]   ;;  %v1516_v44 = vld [vmem:[%s1622_s15 + $0x74] ss:$8 sps:$4 sm:$0xff]  }
  0x1a   : > { %v1512_v41 = vld [vmem:[%s1622_s15 + $0xe4] ss:$8 sps:$4 sm:$0xff]   ;;  %v1515_v43 = vld [vmem:[%s1622_s15 + $0xe0] ss:$8 sps:$4 sm:$0xff]   ;;  %v1518_v45 = vld [vmem:[%s1622_s15 + $0xf4] ss:$8 sps:$4 sm:$0xff]  }
  0x1b   : > { %v1520_v46 = vld [vmem:[%s1622_s15 + $0x70] ss:$8 sps:$4 sm:$0xff]   ;;  %v1015_v57 = vld [vmem:[%s1681_s9] sm:$0xff]  ;;  %v1016_v1 = vld [vmem:[%s1681_s9 + $0x8] sm:$0xff] }
  0x1c   : > { %1317 = vmatpush3.bf16.msra.mxu0 %v1469_v13  ;;  %1431 = vmatpush3.bf16.msra.mxu1 %v1469_v13  ;;  %v1521_v47 = vld [vmem:[%s1622_s15 + $0xf0] ss:$8 sps:$4 sm:$0xff]   ;;  %v1031_v58 = vld [vmem:[%s1681_s9 + $0x80] sm:$0xff]  ;;  %s1696_s15 = scalar_lea.vmem %s1803_s4, %s1613_s10  ;;  %v1032_v2 = vld [vmem:[%s1681_s9 + $0x88] sm:$0xff] }
  0x1d   : > { %1318 = vmatprep.subr.bf16.mxu0 %v1470_v14  ;;  %1424 = vmatprep.subr.bf16.mxu1 %v1470_v14 }
  0x20   : > { %1319 = vmatpush3.bf16.msra.mxu0 %v1471_v15  ;;  %1432 = vmatpush3.bf16.msra.mxu1 %v1471_v15 }
  0x21   : > { %1320 = vmatprep.subr.bf16.mxu0 %v1472_v16  ;;  %1425 = vmatprep.subr.bf16.mxu1 %v1472_v16 }
  0x24   : > { %1321 = vmatpush3.bf16.msra.mxu0 %v1473_v17  ;;  %1433 = vmatpush3.bf16.msra.mxu1 %v1473_v17  ;;  %v1017_v17 = vld [vmem:[%s1681_s9 + $0x10] sm:$0xff] }
  0x27   : > { %749 = vmatmul.mubr.bf16.vlgmr.msra.gmra.mrb[0].mxu0 %v1474_v18  ;;  %813 = vmatmul.mubr.bf16.vlgmr.msra.gmra.mrb[0].mxu1 %v1477_v19  ;;  %v1033_v18 = vld [vmem:[%s1681_s9 + $0x90] sm:$0xff] }
  0x28   : > { %756 = vmatprep.mubr.bf16.mxu0 %v1480_v20  ;;  %820 = vmatprep.mubr.bf16.mxu1 %v1482_v21 }
  0x2f   : > { %757 = vmatmul.mubr.bf16.gmra.mrb[4].mxu0 %v1484_v22  ;;  %821 = vmatmul.mubr.bf16.gmra.mrb[4].mxu1 %v1485_v23 }
  0x30   : > { %764 = vmatprep.mubr.bf16.mxu0 %v1486_v24  ;;  %828 = vmatprep.mubr.bf16.mxu1 %v1488_v25  ;;  %v1018_v25 = vld [vmem:[%s1681_s9 + $0x18] sm:$0xff] }
  0x37   : > { %765 = vmatmul.mubr.bf16.gmra.mrb[8].mxu0 %v1490_v26  ;;  %829 = vmatmul.mubr.bf16.gmra.mrb[8].mxu1 %v1491_v27  ;;  %v1034_v26 = vld [vmem:[%s1681_s9 + $0x98] sm:$0xff] }
  0x38   : > { %772 = vmatprep.mubr.bf16.mxu0 %v1492_v28  ;;  %836 = vmatprep.mubr.bf16.mxu1 %v1494_v29 }
  0x3f   : > { %773 = vmatmul.mubr.bf16.gmra.mrb[12].mxu0 %v1496_v30  ;;  %837 = vmatmul.mubr.bf16.gmra.mrb[12].mxu1 %v1497_v31 }
  0x40   : > { %780 = vmatprep.mubr.bf16.mxu0 %v1498_v32  ;;  %844 = vmatprep.mubr.bf16.mxu1 %v1500_v33 }
  0x47   : > { %781 = vmatmul.mubr.bf16.gmra.mrb[16].mxu0 %v1502_v34  ;;  %845 = vmatmul.mubr.bf16.gmra.mrb[16].mxu1 %v1503_v35 }
  0x48   : > { %788 = vmatprep.mubr.bf16.mxu0 %v1504_v36  ;;  %852 = vmatprep.mubr.bf16.mxu1 %v1506_v37 }
  0x4f   : > { %789 = vmatmul.mubr.bf16.gmra.mrb[20].mxu0 %v1508_v38  ;;  %853 = vmatmul.mubr.bf16.gmra.mrb[20].mxu1 %v1509_v39 }
  0x50   : > { %796 = vmatprep.mubr.bf16.mxu0 %v1510_v40  ;;  %860 = vmatprep.mubr.bf16.mxu1 %v1512_v41  ;;  %v1019_v41 = vld [vmem:[%s1681_s9 + $0x20] sm:$0xff] }
  0x57   : > { %797 = vmatmul.mubr.bf16.gmra.mrb[24].mxu0 %v1514_v42  ;;  %861 = vmatmul.mubr.bf16.gmra.mrb[24].mxu1 %v1515_v43  ;;  %v1035_v42 = vld [vmem:[%s1681_s9 + $0xa0] sm:$0xff] }
  0x58   : > { %804 = vmatprep.mubr.bf16.mxu0 %v1516_v44  ;;  %868 = vmatprep.mubr.bf16.mxu1 %v1518_v45 }
  0x5f   : > { %805 = vmatmul.mubr.bf16.gmra.mrb[28].mxu0 %v1520_v46  ;;  %869 = vmatmul.mubr.bf16.gmra.mrb[28].mxu1 %v1521_v47 }
  0xfa   : > { %v1322_v48 = vpop.f32.mrb[0].mxu0  ;;  %v1370_v49 = vpop.f32.mrb[0].mxu1 }
  0xfb   : > { %v1323_v50 = vpop.f32.mrb[1].mxu0  ;;  %v1371_v52 = vpop.f32.mrb[1].mxu1 }
  0xfc   : > { %v1324_v53 = vadd.f32 %v1323_v50, %v1322_v48  ;;  %v1372_v54 = vadd.f32 %v1371_v52, %v1370_v49  ;;  %v1325_v55 = vpop.f32.mrb[2].mxu0  ;;  %v1373_v56 = vpop.f32.mrb[2].mxu1  ;;  %v1020_v49 = vld [vmem:[%s1681_s9 + $0x28] sm:$0xff] }
  0xfd   : > { %v1326_v59 = vpop.f32.mrb[3].mxu0  ;;  %v1374_v60 = vpop.f32.mrb[3].mxu1  ;;  %v1036_v50 = vld [vmem:[%s1681_s9 + $0xa8] sm:$0xff] }
  0xfe   : > { %v983_v61 = vadd.f32 %v1324_v53, %v1686_v51  ;;  %v999_v62 = vadd.f32 %v1372_v54, %v1686_v51  ;;  %v1327_v63 = vadd.f32 %v1326_v59, %v1325_v55  ;;  %v1375_v0 = vadd.f32 %v1374_v60, %v1373_v56 }
 0x100   : > { %v1047_v3 = vadd.f32 %v1015_v57, %v983_v61  ;;  %v1063_v4 = vadd.f32 %v1031_v58, %v999_v62  ;;  %v984_v5 = vadd.f32 %v1327_v63, %v1686_v51  ;;  %v1000_v6 = vadd.f32 %v1375_v0, %v1686_v51 }
 0x102   : > { %1079 = vst [vmem:[%s1696_s15] sm:$0xff] %v1047_v3  ;;  %1095 = vst [vmem:[%s1696_s15 + $0x80] sm:$0xff] %v1063_v4  ;;  %v1048_v7 = vadd.f32 %v1016_v1, %v984_v5  ;;  %v1064_v8 = vadd.f32 %v1032_v2, %v1000_v6  ;;  %v1328_v9 = vpop.f32.mrb[4].mxu0  ;;  %v1376_v10 = vpop.f32.mrb[4].mxu1  ;;  %v1021_v2 = vld [vmem:[%s1681_s9 + $0x30] sm:$0xff] }
 0x103   : > { %v1329_v11 = vpop.f32.mrb[5].mxu0  ;;  %v1377_v12 = vpop.f32.mrb[5].mxu1  ;;  %v1037_v3 = vld [vmem:[%s1681_s9 + $0xb0] sm:$0xff] }
 0x104   : > { %1080 = vst [vmem:[%s1696_s15 + $0x8] sm:$0xff] %v1048_v7  ;;  %1096 = vst [vmem:[%s1696_s15 + $0x88] sm:$0xff] %v1064_v8  ;;  %v1330_v13 = vadd.f32 %v1329_v11, %v1328_v9  ;;  %v1378_v14 = vadd.f32 %v1377_v12, %v1376_v10  ;;  %v1331_v15 = vpop.f32.mrb[6].mxu0  ;;  %v1379_v16 = vpop.f32.mrb[6].mxu1  ;;  %v1022_v10 = vld [vmem:[%s1681_s9 + $0x38] sm:$0xff] }
 0x105   : > { %v1332_v19 = vpop.f32.mrb[7].mxu0  ;;  %v1380_v20 = vpop.f32.mrb[7].mxu1  ;;  %v1038_v11 = vld [vmem:[%s1681_s9 + $0xb8] sm:$0xff] }
 0x106   : > { %v985_v21 = vadd.f32 %v1330_v13, %v1686_v51  ;;  %v1001_v22 = vadd.f32 %v1378_v14, %v1686_v51  ;;  %v1333_v23 = vadd.f32 %v1332_v19, %v1331_v15  ;;  %v1381_v24 = vadd.f32 %v1380_v20, %v1379_v16 }
 0x108   : > { %v1049_v27 = vadd.f32 %v1017_v17, %v985_v21  ;;  %v1065_v28 = vadd.f32 %v1033_v18, %v1001_v22  ;;  %v986_v29 = vadd.f32 %v1333_v23, %v1686_v51  ;;  %v1002_v30 = vadd.f32 %v1381_v24, %v1686_v51 }
 0x10a   : > { %1081 = vst [vmem:[%s1696_s15 + $0x10] sm:$0xff] %v1049_v27  ;;  %1097 = vst [vmem:[%s1696_s15 + $0x90] sm:$0xff] %v1065_v28  ;;  %v1050_v31 = vadd.f32 %v1018_v25, %v986_v29  ;;  %v1066_v32 = vadd.f32 %v1034_v26, %v1002_v30  ;;  %v1334_v33 = vpop.f32.mrb[8].mxu0  ;;  %v1382_v34 = vpop.f32.mrb[8].mxu1  ;;  %v1023_v26 = vld [vmem:[%s1681_s9 + $0x40] sm:$0xff] }
 0x10b   : > { %v1335_v35 = vpop.f32.mrb[9].mxu0  ;;  %v1383_v36 = vpop.f32.mrb[9].mxu1  ;;  %v1039_v27 = vld [vmem:[%s1681_s9 + $0xc0] sm:$0xff] }
 0x10c   : > { %1082 = vst [vmem:[%s1696_s15 + $0x18] sm:$0xff] %v1050_v31  ;;  %1098 = vst [vmem:[%s1696_s15 + $0x98] sm:$0xff] %v1066_v32  ;;  %v1336_v37 = vadd.f32 %v1335_v35, %v1334_v33  ;;  %v1384_v38 = vadd.f32 %v1383_v36, %v1382_v34  ;;  %v1337_v39 = vpop.f32.mrb[10].mxu0  ;;  %v1385_v40 = vpop.f32.mrb[10].mxu1  ;;  %v1024_v34 = vld [vmem:[%s1681_s9 + $0x48] sm:$0xff] }
 0x10d   : > { %v1338_v43 = vpop.f32.mrb[11].mxu0  ;;  %v1386_v44 = vpop.f32.mrb[11].mxu1  ;;  %v1040_v35 = vld [vmem:[%s1681_s9 + $0xc8] sm:$0xff] }
 0x10e   : > { %v987_v45 = vadd.f32 %v1336_v37, %v1686_v51  ;;  %v1003_v46 = vadd.f32 %v1384_v38, %v1686_v51  ;;  %v1339_v47 = vadd.f32 %v1338_v43, %v1337_v39  ;;  %v1387_v48 = vadd.f32 %v1386_v44, %v1385_v40 }
 0x110   : > { %v1051_v52 = vadd.f32 %v1019_v41, %v987_v45  ;;  %v1067_v53 = vadd.f32 %v1035_v42, %v1003_v46  ;;  %v988_v54 = vadd.f32 %v1339_v47, %v1686_v51  ;;  %v1004_v55 = vadd.f32 %v1387_v48, %v1686_v51 }
 0x112   : > { %1083 = vst [vmem:[%s1696_s15 + $0x20] sm:$0xff] %v1051_v52  ;;  %1099 = vst [vmem:[%s1696_s15 + $0xa0] sm:$0xff] %v1067_v53  ;;  %v1052_v56 = vadd.f32 %v1020_v49, %v988_v54  ;;  %v1068_v57 = vadd.f32 %v1036_v50, %v1004_v55  ;;  %v1340_v58 = vpop.f32.mrb[12].mxu0  ;;  %v1388_v59 = vpop.f32.mrb[12].mxu1  ;;  %v1025_v50 = vld [vmem:[%s1681_s9 + $0x50] sm:$0xff] }
 0x113   : > { %v1341_v60 = vpop.f32.mrb[13].mxu0  ;;  %v1389_v61 = vpop.f32.mrb[13].mxu1  ;;  %v1041_v52 = vld [vmem:[%s1681_s9 + $0xd0] sm:$0xff] }
 0x114   : > { %1084 = vst [vmem:[%s1696_s15 + $0x28] sm:$0xff] %v1052_v56  ;;  %1100 = vst [vmem:[%s1696_s15 + $0xa8] sm:$0xff] %v1068_v57  ;;  %v1342_v62 = vadd.f32 %v1341_v60, %v1340_v58  ;;  %v1390_v63 = vadd.f32 %v1389_v61, %v1388_v59  ;;  %v1343_v0 = vpop.f32.mrb[14].mxu0  ;;  %v1391_v1 = vpop.f32.mrb[14].mxu1  ;;  %v1026_v59 = vld [vmem:[%s1681_s9 + $0x58] sm:$0xff] }
 0x115   : > { %v1344_v4 = vpop.f32.mrb[15].mxu0  ;;  %v1392_v5 = vpop.f32.mrb[15].mxu1  ;;  %v1042_v60 = vld [vmem:[%s1681_s9 + $0xd8] sm:$0xff] }
 0x116   : > { %v989_v6 = vadd.f32 %v1342_v62, %v1686_v51  ;;  %v1005_v7 = vadd.f32 %v1390_v63, %v1686_v51  ;;  %v1345_v8 = vadd.f32 %v1344_v4, %v1343_v0  ;;  %v1393_v9 = vadd.f32 %v1392_v5, %v1391_v1 }
 0x118   : > { %v1053_v12 = vadd.f32 %v1021_v2, %v989_v6  ;;  %v1069_v13 = vadd.f32 %v1037_v3, %v1005_v7  ;;  %v990_v14 = vadd.f32 %v1345_v8, %v1686_v51  ;;  %v1006_v15 = vadd.f32 %v1393_v9, %v1686_v51 }
 0x11a   : > { %1085 = vst [vmem:[%s1696_s15 + $0x30] sm:$0xff] %v1053_v12  ;;  %1101 = vst [vmem:[%s1696_s15 + $0xb0] sm:$0xff] %v1069_v13  ;;  %v1054_v16 = vadd.f32 %v1022_v10, %v990_v14  ;;  %v1070_v17 = vadd.f32 %v1038_v11, %v1006_v15  ;;  %v1346_v18 = vpop.f32.mrb[16].mxu0  ;;  %v1394_v19 = vpop.f32.mrb[16].mxu1  ;;  %v1027_v11 = vld [vmem:[%s1681_s9 + $0x60] sm:$0xff] }
 0x11b   : > { %v1347_v20 = vpop.f32.mrb[17].mxu0  ;;  %v1395_v21 = vpop.f32.mrb[17].mxu1  ;;  %v1043_v12 = vld [vmem:[%s1681_s9 + $0xe0] sm:$0xff] }
 0x11c   : > { %1086 = vst [vmem:[%s1696_s15 + $0x38] sm:$0xff] %v1054_v16  ;;  %1102 = vst [vmem:[%s1696_s15 + $0xb8] sm:$0xff] %v1070_v17  ;;  %v1348_v22 = vadd.f32 %v1347_v20, %v1346_v18  ;;  %v1396_v23 = vadd.f32 %v1395_v21, %v1394_v19  ;;  %v1349_v24 = vpop.f32.mrb[18].mxu0  ;;  %v1397_v25 = vpop.f32.mrb[18].mxu1  ;;  %v1028_v19 = vld [vmem:[%s1681_s9 + $0x68] sm:$0xff] }
 0x11d   : > { %v1350_v28 = vpop.f32.mrb[19].mxu0  ;;  %v1398_v29 = vpop.f32.mrb[19].mxu1  ;;  %v1044_v20 = vld [vmem:[%s1681_s9 + $0xe8] sm:$0xff] }
 0x11e   : > { %v991_v30 = vadd.f32 %v1348_v22, %v1686_v51  ;;  %v1007_v31 = vadd.f32 %v1396_v23, %v1686_v51  ;;  %v1351_v32 = vadd.f32 %v1350_v28, %v1349_v24  ;;  %v1399_v33 = vadd.f32 %v1398_v29, %v1397_v25 }
 0x120   : > { %v1055_v36 = vadd.f32 %v1023_v26, %v991_v30  ;;  %v1071_v37 = vadd.f32 %v1039_v27, %v1007_v31  ;;  %v992_v38 = vadd.f32 %v1351_v32, %v1686_v51  ;;  %v1008_v39 = vadd.f32 %v1399_v33, %v1686_v51 }
 0x122   : > { %1087 = vst [vmem:[%s1696_s15 + $0x40] sm:$0xff] %v1055_v36  ;;  %1103 = vst [vmem:[%s1696_s15 + $0xc0] sm:$0xff] %v1071_v37  ;;  %v1056_v40 = vadd.f32 %v1024_v34, %v992_v38  ;;  %v1072_v41 = vadd.f32 %v1040_v35, %v1008_v39  ;;  %v1352_v42 = vpop.f32.mrb[20].mxu0  ;;  %v1400_v43 = vpop.f32.mrb[20].mxu1  ;;  %v1029_v35 = vld [vmem:[%s1681_s9 + $0x70] sm:$0xff] }
 0x123   : > { %v1353_v44 = vpop.f32.mrb[21].mxu0  ;;  %v1401_v45 = vpop.f32.mrb[21].mxu1  ;;  %v1045_v36 = vld [vmem:[%s1681_s9 + $0xf0] sm:$0xff] }
 0x124   : > { %1088 = vst [vmem:[%s1696_s15 + $0x48] sm:$0xff] %v1056_v40  ;;  %1104 = vst [vmem:[%s1696_s15 + $0xc8] sm:$0xff] %v1072_v41  ;;  %v1354_v46 = vadd.f32 %v1353_v44, %v1352_v42  ;;  %v1402_v47 = vadd.f32 %v1401_v45, %v1400_v43  ;;  %v1355_v48 = vpop.f32.mrb[22].mxu0  ;;  %v1403_v49 = vpop.f32.mrb[22].mxu1  ;;  %v1030_v43 = vld [vmem:[%s1681_s9 + $0x78] sm:$0xff] }
 0x125   : > { %v1356_v53 = vpop.f32.mrb[23].mxu0  ;;  %v1404_v54 = vpop.f32.mrb[23].mxu1  ;;  %v1046_v44 = vld [vmem:[%s1681_s9 + $0xf8] sm:$0xff] }
 0x126   : > { %v993_v55 = vadd.f32 %v1354_v46, %v1686_v51  ;;  %v1009_v56 = vadd.f32 %v1402_v47, %v1686_v51  ;;  %v1357_v57 = vadd.f32 %v1356_v53, %v1355_v48  ;;  %v1405_v58 = vadd.f32 %v1404_v54, %v1403_v49 }
 0x128   : > { %v1057_v61 = vadd.f32 %v1025_v50, %v993_v55  ;;  %v1073_v62 = vadd.f32 %v1041_v52, %v1009_v56  ;;  %v994_v63 = vadd.f32 %v1357_v57, %v1686_v51  ;;  %v1010_v0 = vadd.f32 %v1405_v58, %v1686_v51 }
 0x12a   : > { %1089 = vst [vmem:[%s1696_s15 + $0x50] sm:$0xff] %v1057_v61  ;;  %1105 = vst [vmem:[%s1696_s15 + $0xd0] sm:$0xff] %v1073_v62  ;;  %v1058_v1 = vadd.f32 %v1026_v59, %v994_v63  ;;  %v1074_v2 = vadd.f32 %v1042_v60, %v1010_v0  ;;  %v1358_v3 = vpop.f32.mrb[24].mxu0  ;;  %v1406_v4 = vpop.f32.mrb[24].mxu1 }
 0x12b   : > { %v1359_v5 = vpop.f32.mrb[25].mxu0  ;;  %v1407_v6 = vpop.f32.mrb[25].mxu1 }
 0x12c   : > { %1090 = vst [vmem:[%s1696_s15 + $0x58] sm:$0xff] %v1058_v1  ;;  %1106 = vst [vmem:[%s1696_s15 + $0xd8] sm:$0xff] %v1074_v2  ;;  %v1360_v7 = vadd.f32 %v1359_v5, %v1358_v3  ;;  %v1408_v8 = vadd.f32 %v1407_v6, %v1406_v4  ;;  %v1361_v9 = vpop.f32.mrb[26].mxu0  ;;  %v1409_v10 = vpop.f32.mrb[26].mxu1 }
 0x12d   : > { %v1362_v13 = vpop.f32.mrb[27].mxu0  ;;  %v1410_v14 = vpop.f32.mrb[27].mxu1 }
 0x12e   : > { %v995_v15 = vadd.f32 %v1360_v7, %v1686_v51  ;;  %v1011_v16 = vadd.f32 %v1408_v8, %v1686_v51  ;;  %v1363_v17 = vadd.f32 %v1362_v13, %v1361_v9  ;;  %v1411_v18 = vadd.f32 %v1410_v14, %v1409_v10 }
 0x130   : > { %v1059_v21 = vadd.f32 %v1027_v11, %v995_v15  ;;  %v1075_v22 = vadd.f32 %v1043_v12, %v1011_v16  ;;  %v996_v23 = vadd.f32 %v1363_v17, %v1686_v51  ;;  %v1012_v24 = vadd.f32 %v1411_v18, %v1686_v51 }
 0x132   : > { %1091 = vst [vmem:[%s1696_s15 + $0x60] sm:$0xff] %v1059_v21  ;;  %1107 = vst [vmem:[%s1696_s15 + $0xe0] sm:$0xff] %v1075_v22  ;;  %v1060_v25 = vadd.f32 %v1028_v19, %v996_v23  ;;  %v1076_v26 = vadd.f32 %v1044_v20, %v1012_v24  ;;  %v1364_v27 = vpop.f32.mrb[28].mxu0  ;;  %v1412_v28 = vpop.f32.mrb[28].mxu1 }
 0x133   : > { %v1365_v29 = vpop.f32.mrb[29].mxu0  ;;  %v1413_v30 = vpop.f32.mrb[29].mxu1 }
 0x134   : > { %1092 = vst [vmem:[%s1696_s15 + $0x68] sm:$0xff] %v1060_v25  ;;  %1108 = vst [vmem:[%s1696_s15 + $0xe8] sm:$0xff] %v1076_v26  ;;  %v1366_v31 = vadd.f32 %v1365_v29, %v1364_v27  ;;  %v1414_v32 = vadd.f32 %v1413_v30, %v1412_v28  ;;  %v1367_v33 = vpop.f32.mrb[30].mxu0  ;;  %v1415_v34 = vpop.f32.mrb[30].mxu1 }
 0x135   : > { %v1368_v37 = vpop.f32.mrb[31].mxu0  ;;  %v1416_v38 = vpop.f32.mrb[31].mxu1 }
 0x136   : > { %v997_v39 = vadd.f32 %v1366_v31, %v1686_v51  ;;  %v1013_v40 = vadd.f32 %v1414_v32, %v1686_v51  ;;  %v1369_v41 = vadd.f32 %v1368_v37, %v1367_v33  ;;  %v1417_v42 = vadd.f32 %v1416_v38, %v1415_v34 }
 0x138   : > { %v1061_v45 = vadd.f32 %v1029_v35, %v997_v39  ;;  %v1077_v46 = vadd.f32 %v1045_v36, %v1013_v40  ;;  %v998_v47 = vadd.f32 %v1369_v41, %v1686_v51  ;;  %v1014_v48 = vadd.f32 %v1417_v42, %v1686_v51 }
 0x13a   : > { %1093 = vst [vmem:[%s1696_s15 + $0x70] sm:$0xff] %v1061_v45  ;;  %1109 = vst [vmem:[%s1696_s15 + $0xf0] sm:$0xff] %v1077_v46  ;;  %v1062_v49 = vadd.f32 %v1030_v43, %v998_v47  ;;  %v1078_v50 = vadd.f32 %v1046_v44, %v1014_v48 }
 0x13c   : > { %1094 = vst [vmem:[%s1696_s15 + $0x78] sm:$0xff] %v1062_v49  ;;  %1110 = vst [vmem:[%s1696_s15 + $0xf8] sm:$0xff] %v1078_v50 }
 0x13d PF: > { %s14_s17 = sadd.s32 1, %s1544_s17   ;;  %s1804_s15 = smov %s1540_s16 }
 0x13e   : > { %p11_p5 = scmp.ge.s32.totalorder %s14_s17, 4   ;;  %s1805_s16 = smov %s1807_s18 }
 0x140   :  { %13 = sbr.rel (!%p11_p5) target bundleno = 2 (0x2), region = 83 }

</bundles_post_ra>
